<compile_context>
chip_gen: v6e
topology: v6e:2x2x1
jax: 0.10.0
libtpu: 0.0.40
codegen_flags: <defaults>
</compile_context>

<pallas_src>
import functools

import jax
import jax.numpy as jnp
from jax import lax
from jax.experimental import pallas as pl
from jax.experimental.pallas import tpu as pltpu


# ------------------------------ Pallas kernel ------------------------------ #

def fused_kernel(xt_ref, w_ref, gb_ref, pre_ref, tail_ref, o_ref,
                 *, eps, inv_n, c_split):
    """xt_ref:  (9*Cin, HW) im2col slab        w_ref: (Cout, 9*Cin)
       gb_ref:  (c_split, 2) gamma/beta rows for THIS grid step's channel block
       pre_ref: (C_pre, HW) all concat operands before the conv slot (grouped)
       tail_ref:(C_tail, HW) concat operands after the conv slot
       o_ref:   (c_split, HW) this step's half of the fused output
    """
    hw = o_ref.shape[1]
    ones = jnp.ones((hw, 1), jnp.float32)   # MXU reduction vector

    def normalize(x, off, size):
        # x: (size, hw) f32.  Per-channel batch stats via MXU matmuls
        # (keeps the 2-unit XLU free); single write of the normalized rows.
        s = jnp.dot(x, ones, preferred_element_type=jnp.float32)        # (size,1)
        ss = jnp.dot(x * x, ones, preferred_element_type=jnp.float32)   # (size,1)
        mean = s * inv_n
        var = jnp.maximum(ss * inv_n - mean * mean, 0.0)                # clamp
        scale = lax.rsqrt(var + eps) * gb_ref[off:off + size, 0:1]
        shift = gb_ref[off:off + size, 1:2] - mean * scale
        return x * scale + shift

    pid = pl.program_id(0)

    @pl.when(pid == 0)
    def _():
        # global channels [0, c_split): first half of the pre-concat slab
        x = pre_ref[0:c_split, :]
        o_ref[...] = normalize(x, 0, c_split).astype(o_ref.dtype)

    @pl.when(pid == 1)
    def _():
        # global channels [c_split, 2*c_split): rest of pre + conv + tail
        n_pre = pre_ref.shape[0] - c_split
        c_out = w_ref.shape[0]
        n_tail = tail_ref.shape[0]

        # Conv section: one K=9*Cin MXU matmul, f32 accumulation.
        conv = jnp.dot(w_ref[...], xt_ref[...],
                       preferred_element_type=jnp.float32)

        o_ref[0:n_pre, :] = normalize(
            pre_ref[c_split:, :], 0, n_pre).astype(o_ref.dtype)
        o_ref[n_pre:n_pre + c_out, :] = normalize(
            conv, n_pre, c_out).astype(o_ref.dtype)
        o_ref[n_pre + c_out:, :] = normalize(
            tail_ref[...], n_pre + c_out, n_tail).astype(o_ref.dtype)


# ------------------------------- JAX wrapper -------------------------------- #

def prepare_params(conv_w, bn_gamma, bn_beta):
    """Parameter-prep (outside jit): repack conv weight, stack gamma/beta."""
    cout, cin, kh, kw = conv_w.shape
    w_flat = jnp.transpose(conv_w, (0, 2, 3, 1)).reshape(cout, kh * kw * cin)
    gb = jnp.stack([bn_gamma, bn_beta], axis=1)   # (C_total, 2)
    return w_flat, gb


def forward(x634, x_others, w_flat, gb, eps=1e-5):
    """x_others: the 23 other concat operands in PyTorch concat order, with a
    None placeholder where the conv output (x635) goes (index 22)."""
    n, cin, H, W = x634.shape
    assert n == 1
    cout = w_flat.shape[0]
    kh = kw = 3
    hw = H * W

    # glue: im2col in (C, HW) orientation -> single (9*Cin, HW) slab
    x_pad = jnp.pad(x634[0], ((0, 0), (1, 1), (1, 1)))           # (Cin, H+2, W+2)
    taps = [x_pad[:, dy:dy + H, dx:dx + W].reshape(cin, hw)
            for dy in range(kh) for dx in range(kw)]
    x_taps = jnp.concatenate(taps, axis=0)                       # (9*Cin, HW)

    # glue: group the non-conv concat operands around the conv slot (free NCHW
    # -> (Ci, HW) reshapes; one small XLA concat copy replaces 20+ tiny DMAs)
    conv_idx = next(i for i, t in enumerate(x_others) if t is None)
    pre = jnp.concatenate(
        [t.reshape(t.shape[1], hw) for t in x_others[:conv_idx]], axis=0)
    tail = jnp.concatenate(
        [t.reshape(t.shape[1], hw) for t in x_others[conv_idx + 1:]], axis=0)

    c_total = pre.shape[0] + cout + tail.shape[0]
    assert c_total % 2 == 0
    c_split = c_total // 2                       # 816: per-step channel block
    assert c_split % 8 == 0 and c_split <= pre.shape[0]
    assert gb.shape == (c_total, 2)

    kernel = functools.partial(fused_kernel, eps=eps,
                               inv_n=1.0 / float(n * hw), c_split=c_split)

    out = pl.pallas_call(
        kernel,
        out_shape=jax.ShapeDtypeStruct((c_total, hw), jnp.float32),
        grid=(2,),
        in_specs=[
            pl.BlockSpec(x_taps.shape, lambda i: (0, 0)),
            pl.BlockSpec(w_flat.shape, lambda i: (0, 0)),
            pl.BlockSpec((c_split, 2), lambda i: (i, 0)),
            pl.BlockSpec(pre.shape, lambda i: (0, 0)),
            pl.BlockSpec(tail.shape, lambda i: (0, 0)),
        ],
        out_specs=pl.BlockSpec((c_split, hw), lambda i: (i, 0)),
        compiler_params=pltpu.CompilerParams(
            dimension_semantics=("parallel",),
            vmem_limit_bytes=16 * 1024 * 1024),
    )(x_taps, w_flat, gb, pre, tail)

    # free reshape: (C_total, HW) row-major == NCHW (1, C_total, H, W)
    return out.reshape(1, c_total, H, W)


# ----------------------------- reference (JAX) ------------------------------ #

def forward_ref(x634, x_others, conv_w, bn_gamma, bn_beta):
    x635 = lax.conv_general_dilated(
        x634, conv_w, window_strides=(1, 1), padding=((1, 1), (1, 1)),
        dimension_numbers=("NCHW", "OIHW", "NCHW"))
    cat_list = [t if t is not None else x635 for t in x_others]
    x = jnp.concatenate(cat_list, axis=1)
    mean = jnp.mean(x, axis=(0, 2, 3), keepdims=True)
    var = jnp.mean((x - mean) ** 2, axis=(0, 2, 3), keepdims=True)
    g = bn_gamma.reshape(1, -1, 1, 1)
    b = bn_beta.reshape(1, -1, 1, 1)
    return (x - mean) * lax.rsqrt(var + 1e-5) * g + b


# ---------------------------------- main ------------------------------------ #

if __name__ == "__main__":
    key = jax.random.PRNGKey(0)
    keys = jax.random.split(key, 32)

    H = W = 7
    # inputs (match PyTorch module shapes)
    x634 = jax.random.normal(keys[0], (1, 128, H, W), jnp.float32)
    x481 = jax.random.normal(keys[1], (1, 896, H, W), jnp.float32)
    small = [jax.random.normal(keys[2 + i], (1, 32, H, W), jnp.float32)
             for i in range(22)]  # x488..x628 (21 tensors) and x642 (1 tensor)

    # concat order: x481, 21 x (32ch), x635 (conv out, placeholder None), x642
    x_others = [x481] + small[:21] + [None] + [small[21]]

    # parameters (deterministic, in-script)
    conv_w = jax.random.normal(keys[30], (32, 128, 3, 3), jnp.float32) * 0.05
    bn_gamma = 1.0 + 0.1 * jax.random.normal(keys[31], (1632,), jnp.float32)
    bn_beta = 0.1 * jax.random.normal(keys[29], (1632,), jnp.float32)

    # parameter repack happens once, outside the jitted forward
    w_flat, gb = prepare_params(conv_w, bn_gamma, bn_beta)

    fwd = jax.jit(forward)
    out = jax.block_until_ready(fwd(x634, x_others, w_flat, gb))

    ref = jax.block_until_ready(
        forward_ref(x634, x_others, conv_w, bn_gamma, bn_beta))
    assert out.shape == (1, 1632, 7, 7), out.shape
    assert jnp.allclose(out, ref, atol=2e-3, rtol=2e-3), float(jnp.abs(out - ref).max())

    print("KERNEL_OK")
</pallas_src>

<mosaic_0001>
module attributes {stable_mosaic.version = 11 : i64} {
  func.func @fused_kernel(%arg0: i32, %arg1: memref<1152x49xf32, #tpu.memory_space<vmem>>, %arg2: memref<32x1152xf32, #tpu.memory_space<vmem>>, %arg3: memref<816x2xf32, #tpu.memory_space<vmem>>, %arg4: memref<1568x49xf32, #tpu.memory_space<vmem>>, %arg5: memref<32x49xf32, #tpu.memory_space<vmem>>, %arg6: memref<816x49xf32, #tpu.memory_space<vmem>>) attributes {dimension_semantics = [#tpu.dimension_semantics<parallel>], iteration_bounds = array<i64: 2>, scalar_prefetch = 0 : i64, scratch_operands = 0 : i64, tpu.core_type = #tpu.core_type<tc>, window_params = [{pipeline_mode = #tpu.pipeline_mode<synchronous>, transform_indices = @transform_0, window_bounds = array<i64: 1152, 49>}, {pipeline_mode = #tpu.pipeline_mode<synchronous>, transform_indices = @transform_1, window_bounds = array<i64: 32, 1152>}, {transform_indices = @transform_2, window_bounds = array<i64: 816, 2>}, {pipeline_mode = #tpu.pipeline_mode<synchronous>, transform_indices = @transform_3, window_bounds = array<i64: 1568, 49>}, {pipeline_mode = #tpu.pipeline_mode<synchronous>, transform_indices = @transform_4, window_bounds = array<i64: 32, 49>}, {transform_indices = @transform_5, window_bounds = array<i64: 816, 49>}]} {
    %cst = arith.constant 1.000000e+00 : f32
    %0 = vector.broadcast %cst : f32 to vector<49x1xf32>
    %c0_i32 = arith.constant 0 : i32
    %1 = arith.cmpi eq, %arg0, %c0_i32 : i32
    %2 = arith.extui %1 : i1 to i32
    %c0_i32_0 = arith.constant 0 : i32
    %3 = arith.cmpi ne, %2, %c0_i32_0 : i32
    scf.if %3 {
      %c0 = arith.constant 0 : index
      %c0_2 = arith.constant 0 : index
      %7 = vector.load %arg4[%c0, %c0_2] : memref<1568x49xf32, #tpu.memory_space<vmem>>, vector<816x49xf32>
      %cst_3 = arith.constant dense<0.000000e+00> : vector<816x1xf32>
      %8 = tpu.matmul %7, %0, %cst_3 {dimension_numbers = #tpu.dot_dimension_numbers<[1], [0], [0], [1], [0, 0, 1, 1], [], []>} : vector<816x49xf32>, vector<49x1xf32>, vector<816x1xf32> -> vector<816x1xf32>
      %9 = arith.mulf %7, %7 : vector<816x49xf32>
      %cst_4 = arith.constant dense<0.000000e+00> : vector<816x1xf32>
      %10 = tpu.matmul %9, %0, %cst_4 {dimension_numbers = #tpu.dot_dimension_numbers<[1], [0], [0], [1], [0, 0, 1, 1], [], []>} : vector<816x49xf32>, vector<49x1xf32>, vector<816x1xf32> -> vector<816x1xf32>
      %cst_5 = arith.constant 0.0204081628 : f32
      %11 = vector.broadcast %cst_5 : f32 to vector<816x1xf32>
      %12 = arith.mulf %8, %11 : vector<816x1xf32>
      %cst_6 = arith.constant 0.0204081628 : f32
      %13 = vector.broadcast %cst_6 : f32 to vector<816x1xf32>
      %14 = arith.mulf %10, %13 : vector<816x1xf32>
      %15 = arith.mulf %12, %12 : vector<816x1xf32>
      %16 = arith.subf %14, %15 : vector<816x1xf32>
      %cst_7 = arith.constant 0.000000e+00 : f32
      %17 = vector.broadcast %cst_7 : f32 to vector<816x1xf32>
      %18 = arith.maximumf %16, %17 : vector<816x1xf32>
      %cst_8 = arith.constant 9.99999974E-6 : f32
      %19 = vector.broadcast %cst_8 : f32 to vector<816x1xf32>
      %20 = arith.addf %18, %19 : vector<816x1xf32>
      %21 = math.rsqrt %20 : vector<816x1xf32>
      %c0_9 = arith.constant 0 : index
      %c0_10 = arith.constant 0 : index
      %22 = vector.load %arg3[%c0_9, %c0_10] : memref<816x2xf32, #tpu.memory_space<vmem>>, vector<816x1xf32>
      %23 = arith.mulf %21, %22 : vector<816x1xf32>
      %c0_11 = arith.constant 0 : index
      %c1 = arith.constant 1 : index
      %24 = vector.load %arg3[%c0_11, %c1] : memref<816x2xf32, #tpu.memory_space<vmem>>, vector<816x1xf32>
      %25 = arith.mulf %12, %23 : vector<816x1xf32>
      %26 = arith.subf %24, %25 : vector<816x1xf32>
      %27 = vector.broadcast %23 : vector<816x1xf32> to vector<816x49xf32>
      %28 = arith.mulf %7, %27 : vector<816x49xf32>
      %29 = vector.broadcast %26 : vector<816x1xf32> to vector<816x49xf32>
      %30 = arith.addf %28, %29 : vector<816x49xf32>
      %c0_12 = arith.constant 0 : index
      %c0_13 = arith.constant 0 : index
      %31 = vector.load %arg6[%c0_12, %c0_13] : memref<816x49xf32, #tpu.memory_space<vmem>>, vector<816x49xf32>
      tpu.vector_store %arg6[%c0_12, %c0_13], %30 {strides = array<i32>} : memref<816x49xf32, #tpu.memory_space<vmem>>, vector<816x49xf32>,
    } else {
    }
    %c1_i32 = arith.constant 1 : i32
    %4 = arith.cmpi eq, %arg0, %c1_i32 : i32
    %5 = arith.extui %4 : i1 to i32
    %c0_i32_1 = arith.constant 0 : i32
    %6 = arith.cmpi ne, %5, %c0_i32_1 : i32
    scf.if %6 {
      %c0 = arith.constant 0 : index
      %c0_2 = arith.constant 0 : index
      %7 = vector.load %arg2[%c0, %c0_2] : memref<32x1152xf32, #tpu.memory_space<vmem>>, vector<32x1152xf32>
      %c0_3 = arith.constant 0 : index
      %c0_4 = arith.constant 0 : index
      %8 = vector.load %arg1[%c0_3, %c0_4] : memref<1152x49xf32, #tpu.memory_space<vmem>>, vector<1152x49xf32>
      %cst_5 = arith.constant dense<0.000000e+00> : vector<32x49xf32>
      %9 = tpu.matmul %7, %8, %cst_5 {dimension_numbers = #tpu.dot_dimension_numbers<[1], [0], [0], [1], [0, 0, 1, 1], [], []>} : vector<32x1152xf32>, vector<1152x49xf32>, vector<32x49xf32> -> vector<32x49xf32>
      %c816 = arith.constant 816 : index
      %c0_6 = arith.constant 0 : index
      %10 = vector.load %arg4[%c816, %c0_6] : memref<1568x49xf32, #tpu.memory_space<vmem>>, vector<752x49xf32>
      %cst_7 = arith.constant dense<0.000000e+00> : vector<752x1xf32>
      %11 = tpu.matmul %10, %0, %cst_7 {dimension_numbers = #tpu.dot_dimension_numbers<[1], [0], [0], [1], [0, 0, 1, 1], [], []>} : vector<752x49xf32>, vector<49x1xf32>, vector<752x1xf32> -> vector<752x1xf32>
      %12 = arith.mulf %10, %10 : vector<752x49xf32>
      %cst_8 = arith.constant dense<0.000000e+00> : vector<752x1xf32>
      %13 = tpu.matmul %12, %0, %cst_8 {dimension_numbers = #tpu.dot_dimension_numbers<[1], [0], [0], [1], [0, 0, 1, 1], [], []>} : vector<752x49xf32>, vector<49x1xf32>, vector<752x1xf32> -> vector<752x1xf32>
      %cst_9 = arith.constant 0.0204081628 : f32
      %14 = vector.broadcast %cst_9 : f32 to vector<752x1xf32>
      %15 = arith.mulf %11, %14 : vector<752x1xf32>
      %cst_10 = arith.constant 0.0204081628 : f32
      %16 = vector.broadcast %cst_10 : f32 to vector<752x1xf32>
      %17 = arith.mulf %13, %16 : vector<752x1xf32>
      %18 = arith.mulf %15, %15 : vector<752x1xf32>
      %19 = arith.subf %17, %18 : vector<752x1xf32>
      %cst_11 = arith.constant 0.000000e+00 : f32
      %20 = vector.broadcast %cst_11 : f32 to vector<752x1xf32>
      %21 = arith.maximumf %19, %20 : vector<752x1xf32>
      %cst_12 = arith.constant 9.99999974E-6 : f32
      %22 = vector.broadcast %cst_12 : f32 to vector<752x1xf32>
      %23 = arith.addf %21, %22 : vector<752x1xf32>
      %24 = math.rsqrt %23 : vector<752x1xf32>
      %c0_13 = arith.constant 0 : index
      %c0_14 = arith.constant 0 : index
      %25 = vector.load %arg3[%c0_13, %c0_14] : memref<816x2xf32, #tpu.memory_space<vmem>>, vector<752x1xf32>
      %26 = arith.mulf %24, %25 : vector<752x1xf32>
      %c0_15 = arith.constant 0 : index
      %c1 = arith.constant 1 : index
      %27 = vector.load %arg3[%c0_15, %c1] : memref<816x2xf32, #tpu.memory_space<vmem>>, vector<752x1xf32>
      %28 = arith.mulf %15, %26 : vector<752x1xf32>
      %29 = arith.subf %27, %28 : vector<752x1xf32>
      %30 = vector.broadcast %26 : vector<752x1xf32> to vector<752x49xf32>
      %31 = arith.mulf %10, %30 : vector<752x49xf32>
      %32 = vector.broadcast %29 : vector<752x1xf32> to vector<752x49xf32>
      %33 = arith.addf %31, %32 : vector<752x49xf32>
      %c0_16 = arith.constant 0 : index
      %c0_17 = arith.constant 0 : index
      %34 = vector.load %arg6[%c0_16, %c0_17] : memref<816x49xf32, #tpu.memory_space<vmem>>, vector<752x49xf32>
      tpu.vector_store %arg6[%c0_16, %c0_17], %33 {strides = array<i32>} : memref<816x49xf32, #tpu.memory_space<vmem>>, vector<752x49xf32>,
      %cst_18 = arith.constant dense<0.000000e+00> : vector<32x1xf32>
      %35 = tpu.matmul %9, %0, %cst_18 {dimension_numbers = #tpu.dot_dimension_numbers<[1], [0], [0], [1], [0, 0, 1, 1], [], []>} : vector<32x49xf32>, vector<49x1xf32>, vector<32x1xf32> -> vector<32x1xf32>
      %36 = arith.mulf %9, %9 : vector<32x49xf32>
      %cst_19 = arith.constant dense<0.000000e+00> : vector<32x1xf32>
      %37 = tpu.matmul %36, %0, %cst_19 {dimension_numbers = #tpu.dot_dimension_numbers<[1], [0], [0], [1], [0, 0, 1, 1], [], []>} : vector<32x49xf32>, vector<49x1xf32>, vector<32x1xf32> -> vector<32x1xf32>
      %cst_20 = arith.constant 0.0204081628 : f32
      %38 = vector.broadcast %cst_20 : f32 to vector<32x1xf32>
      %39 = arith.mulf %35, %38 : vector<32x1xf32>
      %cst_21 = arith.constant 0.0204081628 : f32
      %40 = vector.broadcast %cst_21 : f32 to vector<32x1xf32>
      %41 = arith.mulf %37, %40 : vector<32x1xf32>
      %42 = arith.mulf %39, %39 : vector<32x1xf32>
      %43 = arith.subf %41, %42 : vector<32x1xf32>
      %cst_22 = arith.constant 0.000000e+00 : f32
      %44 = vector.broadcast %cst_22 : f32 to vector<32x1xf32>
      %45 = arith.maximumf %43, %44 : vector<32x1xf32>
      %cst_23 = arith.constant 9.99999974E-6 : f32
      %46 = vector.broadcast %cst_23 : f32 to vector<32x1xf32>
      %47 = arith.addf %45, %46 : vector<32x1xf32>
      %48 = math.rsqrt %47 : vector<32x1xf32>
      %c752 = arith.constant 752 : index
      %c0_24 = arith.constant 0 : index
      %49 = vector.load %arg3[%c752, %c0_24] : memref<816x2xf32, #tpu.memory_space<vmem>>, vector<32x1xf32>
      %50 = arith.mulf %48, %49 : vector<32x1xf32>
      %c752_25 = arith.constant 752 : index
      %c1_26 = arith.constant 1 : index
      %51 = vector.load %arg3[%c752_25, %c1_26] : memref<816x2xf32, #tpu.memory_space<vmem>>, vector<32x1xf32>
      %52 = arith.mulf %39, %50 : vector<32x1xf32>
      %53 = arith.subf %51, %52 : vector<32x1xf32>
      %54 = vector.broadcast %50 : vector<32x1xf32> to vector<32x49xf32>
      %55 = arith.mulf %9, %54 : vector<32x49xf32>
      %56 = vector.broadcast %53 : vector<32x1xf32> to vector<32x49xf32>
      %57 = arith.addf %55, %56 : vector<32x49xf32>
      %c752_27 = arith.constant 752 : index
      %c0_28 = arith.constant 0 : index
      %58 = vector.load %arg6[%c752_27, %c0_28] : memref<816x49xf32, #tpu.memory_space<vmem>>, vector<32x49xf32>
      tpu.vector_store %arg6[%c752_27, %c0_28], %57 {strides = array<i32>} : memref<816x49xf32, #tpu.memory_space<vmem>>, vector<32x49xf32>,
      %c0_29 = arith.constant 0 : index
      %c0_30 = arith.constant 0 : index
      %59 = vector.load %arg5[%c0_29, %c0_30] : memref<32x49xf32, #tpu.memory_space<vmem>>, vector<32x49xf32>
      %cst_31 = arith.constant dense<0.000000e+00> : vector<32x1xf32>
      %60 = tpu.matmul %59, %0, %cst_31 {dimension_numbers = #tpu.dot_dimension_numbers<[1], [0], [0], [1], [0, 0, 1, 1], [], []>} : vector<32x49xf32>, vector<49x1xf32>, vector<32x1xf32> -> vector<32x1xf32>
      %61 = arith.mulf %59, %59 : vector<32x49xf32>
      %cst_32 = arith.constant dense<0.000000e+00> : vector<32x1xf32>
      %62 = tpu.matmul %61, %0, %cst_32 {dimension_numbers = #tpu.dot_dimension_numbers<[1], [0], [0], [1], [0, 0, 1, 1], [], []>} : vector<32x49xf32>, vector<49x1xf32>, vector<32x1xf32> -> vector<32x1xf32>
      %cst_33 = arith.constant 0.0204081628 : f32
      %63 = vector.broadcast %cst_33 : f32 to vector<32x1xf32>
      %64 = arith.mulf %60, %63 : vector<32x1xf32>
      %cst_34 = arith.constant 0.0204081628 : f32
      %65 = vector.broadcast %cst_34 : f32 to vector<32x1xf32>
      %66 = arith.mulf %62, %65 : vector<32x1xf32>
      %67 = arith.mulf %64, %64 : vector<32x1xf32>
      %68 = arith.subf %66, %67 : vector<32x1xf32>
      %cst_35 = arith.constant 0.000000e+00 : f32
      %69 = vector.broadcast %cst_35 : f32 to vector<32x1xf32>
      %70 = arith.maximumf %68, %69 : vector<32x1xf32>
      %cst_36 = arith.constant 9.99999974E-6 : f32
      %71 = vector.broadcast %cst_36 : f32 to vector<32x1xf32>
      %72 = arith.addf %70, %71 : vector<32x1xf32>
      %73 = math.rsqrt %72 : vector<32x1xf32>
      %c784 = arith.constant 784 : index
      %c0_37 = arith.constant 0 : index
      %74 = vector.load %arg3[%c784, %c0_37] : memref<816x2xf32, #tpu.memory_space<vmem>>, vector<32x1xf32>
      %75 = arith.mulf %73, %74 : vector<32x1xf32>
      %c784_38 = arith.constant 784 : index
      %c1_39 = arith.constant 1 : index
      %76 = vector.load %arg3[%c784_38, %c1_39] : memref<816x2xf32, #tpu.memory_space<vmem>>, vector<32x1xf32>
      %77 = arith.mulf %64, %75 : vector<32x1xf32>
      %78 = arith.subf %76, %77 : vector<32x1xf32>
      %79 = vector.broadcast %75 : vector<32x1xf32> to vector<32x49xf32>
      %80 = arith.mulf %59, %79 : vector<32x49xf32>
      %81 = vector.broadcast %78 : vector<32x1xf32> to vector<32x49xf32>
      %82 = arith.addf %80, %81 : vector<32x49xf32>
      %c784_40 = arith.constant 784 : index
      %c0_41 = arith.constant 0 : index
      %83 = vector.load %arg6[%c784_40, %c0_41] : memref<816x49xf32, #tpu.memory_space<vmem>>, vector<32x49xf32>
      tpu.vector_store %arg6[%c784_40, %c0_41], %82 {strides = array<i32>} : memref<816x49xf32, #tpu.memory_space<vmem>>, vector<32x49xf32>,
    } else {
    }
    return
  }
  func.func @transform_0(%arg0: i32) -> (i32, i32) {
    %c0_i32 = arith.constant 0 : i32
    %c0_i32_0 = arith.constant 0 : i32
    %c0_i32_1 = arith.constant 0 : i32
    return %c0_i32, %c0_i32_0 : i32, i32
  }
  func.func @transform_1(%arg0: i32) -> (i32, i32) {
    %c0_i32 = arith.constant 0 : i32
    %c0_i32_0 = arith.constant 0 : i32
    %c0_i32_1 = arith.constant 0 : i32
    return %c0_i32, %c0_i32_0 : i32, i32
  }
  func.func @transform_2(%arg0: i32) -> (i32, i32) {
    %c0_i32 = arith.constant 0 : i32
    %c0_i32_0 = arith.constant 0 : i32
    return %arg0, %c0_i32 : i32, i32
  }
  func.func @transform_3(%arg0: i32) -> (i32, i32) {
    %c0_i32 = arith.constant 0 : i32
    %c0_i32_0 = arith.constant 0 : i32
    %c0_i32_1 = arith.constant 0 : i32
    return %c0_i32, %c0_i32_0 : i32, i32
  }
  func.func @transform_4(%arg0: i32) -> (i32, i32) {
    %c0_i32 = arith.constant 0 : i32
    %c0_i32_0 = arith.constant 0 : i32
    %c0_i32_1 = arith.constant 0 : i32
    return %c0_i32, %c0_i32_0 : i32, i32
  }
  func.func @transform_5(%arg0: i32) -> (i32, i32) {
    %c0_i32 = arith.constant 0 : i32
    %c0_i32_0 = arith.constant 0 : i32
    return %arg0, %c0_i32 : i32, i32
  }
}

</mosaic_0001>

<bundles_post_ra>
// kernel: forward.1
= control target key start
LH: loop header
LB: loop body
LE: loop exit
PB: predicated region body
PF: predicated region fallthrough
CT: control target
= control target key end

     0   :  { %s13614_s18 = smov 0   ;;  %s19572_s0 = inlined_call_operand.vmem [shape: f32[1152,49], index: 0, kind: input, shape index: {}]   ;;  %s19573_s1 = inlined_call_operand.vmem [shape: f32[32,1152], index: 1, kind: input, shape index: {}]   ;;  %s19574_s2 = inlined_call_operand.vmem [shape: f32[1632,2], index: 2, kind: input, shape index: {}]   ;;  %s19575_s3 = inlined_call_operand.vmem [shape: f32[1568,49], index: 3, kind: input, shape index: {}]   ;;  %s19576_s4 = inlined_call_operand.vmem [shape: f32[32,49], index: 4, kind: input, shape index: {}]   ;;  %s19577_s5 = inlined_call_operand.vmem [shape: f32[1632,49], index: 5, kind: output, shape index: {}]  }
   0x1 LB: > { %s13620_s19 = sadd.s32 4294967295, %s13574_s18   ;;  %p10811_p0 = scmp.ge.s32.totalorder %s13574_s18, 1  ;;  %s13574_s18 = sphi %s13614_s18, %s15_s18  }
   0x2   : > { %p188_p1 = scmp.lt.s32.totalorder %s13574_s18, 3 }
   0x4   : > { %p189_p2 = pnand %p10811_p0, %p188_p1 }
   0x5   : > { %s216_s20 = smul.u32 (!%p189_p2), 102, %s13620_s19  ;;  %p10814_p4 = scmp.ne.s32.totalorder (!%p189_p2), %s13620_s19, 0 }
   0x6   : > { %192 = sbr.rel (%p189_p2) target bundleno = 2136 (0x858), region = 40 }
   0x7   : > { %p217_p3 = scmp.lt.s32.totalorder (!%p189_p2), %s216_s20, 203 }
   0xb   : > { %s20007_s20 = smov (!%p217_p3, %s216_s20), 203  ;;  %231 = sbr.rel (%p10814_p4) target bundleno = 1000 (0x3e8), region = 44 }
   0xc   : > { %s10812_s21 = sshll.u32 %s20007_s20, 3 }
   0xd   : > { %s13628_s24 = scalar_lea.vmem %s19574_s2, %s10812_s21  ;;  %s13633_s27 = scalar_lea.vmem %s19577_s5, %s10812_s21 }
  0x10   : > { %vm641_vm0 = vcmask 1040384   ;;  %v13576_v0 = vmov 1.0   ;;  %v232_v1 = vld [vmem:[%s19575_s3] sm:$0xff]  ;;  %v233_v2 = vld [vmem:[%s19575_s3 + $0x8] sm:$0xff]  ;;  %v234_v3 = vld [vmem:[%s19575_s3 + $0x10] sm:$0xff]  ;;  %vm334_vm1 = vcmask 400384  }
  0x11   : > { %11894 = vmatprep.subr.msk.mxu0 %vm641_vm0, %v13576_v0  ;;  %12061 = vmatprep.subr.msk.mxu1 %vm641_vm0, %v13576_v0  ;;  %v1220_v4 = vmul.f32 %v232_v1, %v232_v1  ;;  %v1221_v5 = vmul.f32 %v233_v2, %v233_v2  ;;  %v1222_v6 = vmul.f32 %v234_v3, %v234_v3  ;;  %v235_v7 = vld [vmem:[%s19575_s3 + $0x18] sm:$0xff]  ;;  %v236_v8 = vld [vmem:[%s19575_s3 + $0x20] sm:$0xff]  ;;  %v237_v11 = vld [vmem:[%s19575_s3 + $0x28] sm:$0xff]  ;;  %s13578_s30 = smov 1  }
  0x12   : > { %11895 = vmatpush3.msk.msra.mxu0 %vm641_vm0, %v13576_v0  ;;  %12062 = vmatpush3.msk.msra.mxu1 %vm641_vm0, %v13576_v0  ;;  %v1223_v9 = vmul.f32 %v235_v7, %v235_v7  ;;  %v1224_v10 = vmul.f32 %v236_v8, %v236_v8  ;;  %v238_v12 = vld [vmem:[%s19575_s3 + $0x30] sm:$0xff]  ;;  %v1225_v13 = vmul.f32 %v237_v11, %v237_v11  ;;  %v239_v15 = vld [vmem:[%s19575_s3 + $0x38] sm:$0xff]  ;;  %v240_v16 = vld [vmem:[%s19575_s3 + $0x40] sm:$0xff] }
  0x13   : > { %11896 = vmatprep.subr.mxu0 %v13576_v0  ;;  %12063 = vmatprep.subr.mxu1 %v13576_v0  ;;  %v1226_v14 = vmul.f32 %v238_v12, %v238_v12  ;;  %v1227_v17 = vmul.f32 %v239_v15, %v239_v15  ;;  %v1228_v18 = vmul.f32 %v240_v16, %v240_v16  ;;  %v241_v19 = vld [vmem:[%s19575_s3 + $0x48] sm:$0xff]  ;;  %v242_v20 = vld [vmem:[%s19575_s3 + $0x50] sm:$0xff]  ;;  %v243_v23 = vld [vmem:[%s19575_s3 + $0x58] sm:$0xff] }
  0x14   : > { %11897 = vmatpush3.msra.mxu0 %v13576_v0  ;;  %12064 = vmatpush3.msra.mxu1 %v13576_v0  ;;  %v1229_v21 = vmul.f32 %v241_v19, %v241_v19  ;;  %v1230_v22 = vmul.f32 %v242_v20, %v242_v20  ;;  %v244_v24 = vld [vmem:[%s19575_s3 + $0x60] sm:$0xff]  ;;  %v1231_v25 = vmul.f32 %v243_v23, %v243_v23  ;;  %v245_v27 = vld [vmem:[%s19575_s3 + $0x68] sm:$0xff]  ;;  %v246_v28 = vld [vmem:[%s19575_s3 + $0x70] sm:$0xff] }
  0x15   : > { %11898 = vmatprep.subr.mxu0 %v13576_v0  ;;  %12065 = vmatprep.subr.mxu1 %v13576_v0  ;;  %v1232_v26 = vmul.f32 %v244_v24, %v244_v24  ;;  %v1233_v29 = vmul.f32 %v245_v27, %v245_v27  ;;  %v1234_v30 = vmul.f32 %v246_v28, %v246_v28  ;;  %v247_v31 = vld [vmem:[%s19575_s3 + $0x78] sm:$0xff]  ;;  %v248_v32 = vld [vmem:[%s19575_s3 + $0x80] sm:$0xff]  ;;  %v249_v35 = vld [vmem:[%s19575_s3 + $0x88] sm:$0xff] }
  0x16   : > { %11899 = vmatpush3.msra.mxu0 %v13576_v0  ;;  %12066 = vmatpush3.msra.mxu1 %v13576_v0  ;;  %v1235_v33 = vmul.f32 %v247_v31, %v247_v31  ;;  %v1236_v34 = vmul.f32 %v248_v32, %v248_v32  ;;  %v250_v36 = vld [vmem:[%s19575_s3 + $0x90] sm:$0xff]  ;;  %v1237_v37 = vmul.f32 %v249_v35, %v249_v35  ;;  %v251_v39 = vld [vmem:[%s19575_s3 + $0x98] sm:$0xff]  ;;  %v252_v40 = vld [vmem:[%s19575_s3 + $0xa0] sm:$0xff] }
  0x17   : > { %11900 = vmatprep.subr.mxu0 %v13576_v0  ;;  %12067 = vmatprep.subr.mxu1 %v13576_v0  ;;  %v1238_v38 = vmul.f32 %v250_v36, %v250_v36  ;;  %v1239_v41 = vmul.f32 %v251_v39, %v251_v39  ;;  %v1240_v42 = vmul.f32 %v252_v40, %v252_v40  ;;  %v253_v43 = vld [vmem:[%s19575_s3 + $0xa8] sm:$0xff]  ;;  %v254_v44 = vld [vmem:[%s19575_s3 + $0xb0] sm:$0xff]  ;;  %v255_v47 = vld [vmem:[%s19575_s3 + $0xb8] sm:$0xff] }
  0x18   : > { %11901 = vmatpush3.msra.mxu0 %v13576_v0  ;;  %12068 = vmatpush3.msra.mxu1 %v13576_v0  ;;  %v1241_v45 = vmul.f32 %v253_v43, %v253_v43  ;;  %v1242_v46 = vmul.f32 %v254_v44, %v254_v44  ;;  %v256_v48 = vld [vmem:[%s19575_s3 + $0xc0] sm:$0xff]  ;;  %v1243_v49 = vmul.f32 %v255_v47, %v255_v47  ;;  %v257_v51 = vld [vmem:[%s19575_s3 + $0xc8] sm:$0xff]  ;;  %v258_v52 = vld [vmem:[%s19575_s3 + $0xd0] sm:$0xff] }
  0x19   : > { %11902 = vmatprep.subr.mxu0 %v13576_v0  ;;  %12069 = vmatprep.subr.mxu1 %v13576_v0  ;;  %v1244_v50 = vmul.f32 %v256_v48, %v256_v48  ;;  %v1245_v53 = vmul.f32 %v257_v51, %v257_v51  ;;  %v1246_v54 = vmul.f32 %v258_v52, %v258_v52  ;;  %v259_v55 = vld [vmem:[%s19575_s3 + $0xd8] sm:$0xff]  ;;  %v260_v56 = vld [vmem:[%s19575_s3 + $0xe0] sm:$0xff]  ;;  %v261_v59 = vld [vmem:[%s19575_s3 + $0xe8] sm:$0xff] }
  0x1a   : > { %11903 = vmatpush3.msra.mxu0 %v13576_v0  ;;  %12070 = vmatpush3.msra.mxu1 %v13576_v0  ;;  %v1247_v57 = vmul.f32 %v259_v55, %v259_v55  ;;  %v1248_v58 = vmul.f32 %v260_v56, %v260_v56  ;;  %v262_v60 = vld [vmem:[%s19575_s3 + $0xf0] sm:$0xff]  ;;  %v1249_v61 = vmul.f32 %v261_v59, %v261_v59  ;;  %v263_v63 = vld [vmem:[%s19575_s3 + $0xf8] sm:$0xff] }
  0x1b   : > { %11904 = vmatprep.subr.mxu0 %v13576_v0  ;;  %12071 = vmatprep.subr.mxu1 %v13576_v0  ;;  %v1250_v62 = vmul.f32 %v262_v60, %v262_v60 }
  0x1c   : > { %11905 = vmatpush3.msra.mxu0 %v13576_v0  ;;  %12072 = vmatpush3.msra.mxu1 %v13576_v0 }
  0x1d   : > { %11906 = vmatprep.subr.mxu0 %v13576_v0  ;;  %12073 = vmatprep.subr.mxu1 %v13576_v0 }
  0x1e   : > { %11907 = vmatpush3.msra.mxu0 %v13576_v0  ;;  %11908 = vmatprep.mubr.msk.f32.mxu0 %vm334_vm1, %v232_v1  ;;  %v1251_v1 = vmul.f32 %v263_v63, %v263_v63 }
  0x1f   : > { %12074 = vmatpush3.msra.mxu1 %v13576_v0  ;;  %12075 = vmatprep.mubr.msk.f32.mxu1 %vm334_vm1, %v1220_v4  ;;  %v264_v0 = vld [vmem:[%s19575_s3 + $0x100] sm:$0xff]  ;;  %v266_v4 = vld [vmem:[%s19575_s3 + $0x110] sm:$0xff] }
  0x20   : > { %11909 = vmatmul.mubr.msk.f32.vlgmr.msra.gmra.mxu0 %vm334_vm1, %v233_v2  ;;  %12076 = vmatmul.mubr.msk.f32.vlgmr.msra.gmra.mxu1 %vm334_vm1, %v1221_v5  ;;  %v1252_v2 = vmul.f32 %v264_v0, %v264_v0 }
  0x21   : > { %11911 = vmatprep.mubr.msk.f32.mxu0 %vm334_vm1, %v234_v3  ;;  %12078 = vmatprep.mubr.msk.f32.mxu1 %vm334_vm1, %v1222_v6  ;;  %v265_v3 = vld [vmem:[%s19575_s3 + $0x108] sm:$0xff]  ;;  %v1254_v6 = vmul.f32 %v266_v4, %v266_v4 }
  0x22   : > { %v1253_v5 = vmul.f32 %v265_v3, %v265_v3 }
  0x24   : > { %11912 = vmatmul.mubr.msk.f32.gmra.mxu0 %vm334_vm1, %v235_v7  ;;  %12079 = vmatmul.mubr.msk.f32.gmra.mxu1 %vm334_vm1, %v1223_v9  ;;  %v267_v7 = vld [vmem:[%s19575_s3 + $0x118] sm:$0xff] }
  0x25   : > { %11914 = vmatprep.mubr.msk.f32.mxu0 %vm334_vm1, %v236_v8  ;;  %12081 = vmatprep.mubr.msk.f32.mxu1 %vm334_vm1, %v1224_v10  ;;  %v268_v8 = vld [vmem:[%s19575_s3 + $0x120] sm:$0xff]  ;;  %v1255_v9 = vmul.f32 %v267_v7, %v267_v7 }
  0x26   : > { %v1256_v10 = vmul.f32 %v268_v8, %v268_v8 }
  0x28   : > { %11915 = vmatmul.mubr.msk.f32.gmra.mxu0 %vm334_vm1, %v237_v11  ;;  %12082 = vmatmul.mubr.msk.f32.gmra.mxu1 %vm334_vm1, %v1225_v13  ;;  %v269_v11 = vld [vmem:[%s19575_s3 + $0x128] sm:$0xff] }
  0x29   : > { %11917 = vmatprep.mubr.msk.f32.mxu0 %vm334_vm1, %v238_v12  ;;  %12084 = vmatprep.mubr.msk.f32.mxu1 %vm334_vm1, %v1226_v14  ;;  %v270_v12 = vld [vmem:[%s19575_s3 + $0x130] sm:$0xff]  ;;  %v1257_v13 = vmul.f32 %v269_v11, %v269_v11 }
  0x2a   : > { %v1258_v14 = vmul.f32 %v270_v12, %v270_v12 }
  0x2c   : > { %11918 = vmatmul.mubr.msk.f32.gmra.mxu0 %vm334_vm1, %v239_v15  ;;  %12085 = vmatmul.mubr.msk.f32.gmra.mxu1 %vm334_vm1, %v1227_v17  ;;  %v271_v15 = vld [vmem:[%s19575_s3 + $0x138] sm:$0xff] }
  0x2d   : > { %11920 = vmatprep.mubr.msk.f32.mxu0 %vm334_vm1, %v240_v16  ;;  %12087 = vmatprep.mubr.msk.f32.mxu1 %vm334_vm1, %v1228_v18  ;;  %v272_v16 = vld [vmem:[%s19575_s3 + $0x140] sm:$0xff]  ;;  %v1259_v17 = vmul.f32 %v271_v15, %v271_v15 }
  0x2e   : > { %v1260_v18 = vmul.f32 %v272_v16, %v272_v16 }
  0x30   : > { %11921 = vmatmul.mubr.msk.f32.gmra.mxu0 %vm334_vm1, %v241_v19  ;;  %12088 = vmatmul.mubr.msk.f32.gmra.mxu1 %vm334_vm1, %v1229_v21  ;;  %v273_v19 = vld [vmem:[%s19575_s3 + $0x148] sm:$0xff] }
  0x31   : > { %11923 = vmatprep.mubr.msk.f32.mxu0 %vm334_vm1, %v242_v20  ;;  %12090 = vmatprep.mubr.msk.f32.mxu1 %vm334_vm1, %v1230_v22  ;;  %v274_v20 = vld [vmem:[%s19575_s3 + $0x150] sm:$0xff]  ;;  %v1261_v21 = vmul.f32 %v273_v19, %v273_v19 }
  0x32   : > { %v1262_v22 = vmul.f32 %v274_v20, %v274_v20 }
  0x34   : > { %11924 = vmatmul.mubr.msk.f32.gmra.mxu0 %vm334_vm1, %v243_v23  ;;  %12091 = vmatmul.mubr.msk.f32.gmra.mxu1 %vm334_vm1, %v1231_v25  ;;  %v275_v23 = vld [vmem:[%s19575_s3 + $0x158] sm:$0xff] }
  0x35   : > { %11926 = vmatprep.mubr.msk.f32.mxu0 %vm334_vm1, %v244_v24  ;;  %12093 = vmatprep.mubr.msk.f32.mxu1 %vm334_vm1, %v1232_v26  ;;  %v276_v24 = vld [vmem:[%s19575_s3 + $0x160] sm:$0xff]  ;;  %v1263_v25 = vmul.f32 %v275_v23, %v275_v23 }
  0x36   : > { %v1264_v26 = vmul.f32 %v276_v24, %v276_v24 }
  0x38   : > { %11927 = vmatmul.mubr.msk.f32.gmra.mxu0 %vm334_vm1, %v245_v27  ;;  %12094 = vmatmul.mubr.msk.f32.gmra.mxu1 %vm334_vm1, %v1233_v29  ;;  %v277_v27 = vld [vmem:[%s19575_s3 + $0x168] sm:$0xff] }
  0x39   : > { %11929 = vmatprep.mubr.msk.f32.mxu0 %vm334_vm1, %v246_v28  ;;  %12096 = vmatprep.mubr.msk.f32.mxu1 %vm334_vm1, %v1234_v30  ;;  %v278_v28 = vld [vmem:[%s19575_s3 + $0x170] sm:$0xff]  ;;  %v1265_v29 = vmul.f32 %v277_v27, %v277_v27 }
  0x3a   : > { %v1266_v30 = vmul.f32 %v278_v28, %v278_v28 }
  0x3c   : > { %11930 = vmatmul.mubr.msk.f32.gmra.mxu0 %vm334_vm1, %v247_v31  ;;  %12097 = vmatmul.mubr.msk.f32.gmra.mxu1 %vm334_vm1, %v1235_v33  ;;  %v279_v31 = vld [vmem:[%s19575_s3 + $0x178] sm:$0xff] }
  0x3d   : > { %11932 = vmatprep.mubr.msk.f32.mxu0 %vm334_vm1, %v248_v32  ;;  %12099 = vmatprep.mubr.msk.f32.mxu1 %vm334_vm1, %v1236_v34  ;;  %v280_v32 = vld [vmem:[%s19575_s3 + $0x180] sm:$0xff]  ;;  %v1267_v33 = vmul.f32 %v279_v31, %v279_v31 }
  0x3e   : > { %v1268_v34 = vmul.f32 %v280_v32, %v280_v32 }
  0x40   : > { %11933 = vmatmul.mubr.msk.f32.gmra.mxu0 %vm334_vm1, %v249_v35  ;;  %12100 = vmatmul.mubr.msk.f32.gmra.mxu1 %vm334_vm1, %v1237_v37  ;;  %v281_v35 = vld [vmem:[%s19575_s3 + $0x188] sm:$0xff]  ;;  %v19578_v37 = vmov 0  }
  0x41   : > { %11935 = vmatprep.mubr.msk.f32.mxu0 %vm334_vm1, %v250_v36  ;;  %12102 = vmatprep.mubr.msk.f32.mxu1 %vm334_vm1, %v1238_v38  ;;  %v282_v36 = vld [vmem:[%s19575_s3 + $0x190] sm:$0xff]  ;;  %v1269_v38 = vmul.f32 %v281_v35, %v281_v35 }
  0x42   : > { %12672 = vset.pattern.permute.xlu1 %v19578_v37  ;;  %12673 = vset.pattern.permute.xlu0 %v19578_v37 }
  0x44   : > { %11936 = vmatmul.mubr.msk.f32.gmra.mxu0 %vm334_vm1, %v251_v39  ;;  %12103 = vmatmul.mubr.msk.f32.gmra.mxu1 %vm334_vm1, %v1239_v41  ;;  %v1270_v39 = vmul.f32 %v282_v36, %v282_v36  ;;  %v284_v41 = vld [vmem:[%s19575_s3 + $0x1a0] sm:$0xff] }
  0x45   : > { %11938 = vmatprep.mubr.msk.f32.mxu0 %vm334_vm1, %v252_v40  ;;  %12105 = vmatprep.mubr.msk.f32.mxu1 %vm334_vm1, %v1240_v42  ;;  %v283_v40 = vld [vmem:[%s19575_s3 + $0x198] sm:$0xff] }
  0x46   : > { %v1271_v42 = vmul.f32 %v283_v40, %v283_v40 }
  0x48   : > { %11939 = vmatmul.mubr.msk.f32.gmra.mxu0 %vm334_vm1, %v253_v43  ;;  %12106 = vmatmul.mubr.msk.f32.gmra.mxu1 %vm334_vm1, %v1241_v45  ;;  %v1272_v43 = vmul.f32 %v284_v41, %v284_v41  ;;  %v286_v45 = vld [vmem:[%s19575_s3 + $0x1b0] sm:$0xff] }
  0x49   : > { %11941 = vmatprep.mubr.msk.f32.mxu0 %vm334_vm1, %v254_v44  ;;  %12108 = vmatprep.mubr.msk.f32.mxu1 %vm334_vm1, %v1242_v46  ;;  %v285_v44 = vld [vmem:[%s19575_s3 + $0x1a8] sm:$0xff] }
  0x4a   : > { %v1273_v46 = vmul.f32 %v285_v44, %v285_v44 }
  0x4c   : > { %11942 = vmatmul.mubr.msk.f32.gmra.mxu0 %vm334_vm1, %v255_v47  ;;  %12109 = vmatmul.mubr.msk.f32.gmra.mxu1 %vm334_vm1, %v1243_v49  ;;  %v1274_v47 = vmul.f32 %v286_v45, %v286_v45  ;;  %v288_v49 = vld [vmem:[%s19575_s3 + $0x1c0] sm:$0xff] }
  0x4d   : > { %11944 = vmatprep.mubr.msk.f32.mxu0 %vm334_vm1, %v256_v48  ;;  %12111 = vmatprep.mubr.msk.f32.mxu1 %vm334_vm1, %v1244_v50  ;;  %v287_v48 = vld [vmem:[%s19575_s3 + $0x1b8] sm:$0xff] }
  0x4e   : > { %v1275_v50 = vmul.f32 %v287_v48, %v287_v48 }
  0x50   : > { %11945 = vmatmul.mubr.msk.f32.gmra.mxu0 %vm334_vm1, %v257_v51  ;;  %12112 = vmatmul.mubr.msk.f32.gmra.mxu1 %vm334_vm1, %v1245_v53  ;;  %v1276_v51 = vmul.f32 %v288_v49, %v288_v49  ;;  %v290_v53 = vld [vmem:[%s19575_s3 + $0x1d0] sm:$0xff] }
  0x51   : > { %11947 = vmatprep.mubr.msk.f32.mxu0 %vm334_vm1, %v258_v52  ;;  %12114 = vmatprep.mubr.msk.f32.mxu1 %vm334_vm1, %v1246_v54  ;;  %v289_v52 = vld [vmem:[%s19575_s3 + $0x1c8] sm:$0xff] }
  0x52   : > { %v1277_v54 = vmul.f32 %v289_v52, %v289_v52 }
  0x54   : > { %11948 = vmatmul.mubr.msk.f32.gmra.mxu0 %vm334_vm1, %v259_v55  ;;  %12115 = vmatmul.mubr.msk.f32.gmra.mxu1 %vm334_vm1, %v1247_v57  ;;  %v1278_v55 = vmul.f32 %v290_v53, %v290_v53  ;;  %v292_v57 = vld [vmem:[%s19575_s3 + $0x1e0] sm:$0xff] }
  0x55   : > { %11950 = vmatprep.mubr.msk.f32.mxu0 %vm334_vm1, %v260_v56  ;;  %12117 = vmatprep.mubr.msk.f32.mxu1 %vm334_vm1, %v1248_v58  ;;  %v291_v56 = vld [vmem:[%s19575_s3 + $0x1d8] sm:$0xff] }
  0x56   : > { %v1279_v58 = vmul.f32 %v291_v56, %v291_v56 }
  0x58   : > { %11951 = vmatmul.mubr.msk.f32.gmra.mxu0 %vm334_vm1, %v261_v59  ;;  %12118 = vmatmul.mubr.msk.f32.gmra.mxu1 %vm334_vm1, %v1249_v61  ;;  %v1280_v59 = vmul.f32 %v292_v57, %v292_v57  ;;  %v294_v61 = vld [vmem:[%s19575_s3 + $0x1f0] sm:$0xff] }
  0x59   : > { %11953 = vmatprep.mubr.msk.f32.mxu0 %vm334_vm1, %v262_v60  ;;  %12120 = vmatprep.mubr.msk.f32.mxu1 %vm334_vm1, %v1250_v62  ;;  %v293_v60 = vld [vmem:[%s19575_s3 + $0x1e8] sm:$0xff] }
  0x5a   : > { %v1281_v62 = vmul.f32 %v293_v60, %v293_v60 }
  0x5c   : > { %11954 = vmatmul.mubr.msk.f32.gmra.mxu0 %vm334_vm1, %v263_v63  ;;  %12121 = vmatmul.mubr.msk.f32.gmra.mxu1 %vm334_vm1, %v1251_v1  ;;  %v1282_v63 = vmul.f32 %v294_v61, %v294_v61 }
  0x5d   : > { %11956 = vmatprep.mubr.msk.f32.mxu0 %vm334_vm1, %v264_v0  ;;  %12123 = vmatprep.mubr.msk.f32.mxu1 %vm334_vm1, %v1252_v2  ;;  %v295_v0 = vld [vmem:[%s19575_s3 + $0x1f8] sm:$0xff]  ;;  %v296_v2 = vld [vmem:[%s19575_s3 + $0x200] sm:$0xff] }
  0x5e   : > { %v1283_v1 = vmul.f32 %v295_v0, %v295_v0 }
  0x60   : > { %11957 = vmatmul.mubr.msk.f32.gmra.mxu0 %vm334_vm1, %v265_v3  ;;  %12124 = vmatmul.mubr.msk.f32.gmra.mxu1 %vm334_vm1, %v1253_v5  ;;  %v1284_v3 = vmul.f32 %v296_v2, %v296_v2 }
  0x61   : > { %11959 = vmatprep.mubr.msk.f32.mxu0 %vm334_vm1, %v266_v4  ;;  %12126 = vmatprep.mubr.msk.f32.mxu1 %vm334_vm1, %v1254_v6  ;;  %v297_v4 = vld [vmem:[%s19575_s3 + $0x208] sm:$0xff]  ;;  %v298_v6 = vld [vmem:[%s19575_s3 + $0x210] sm:$0xff] }
  0x62   : > { %v1285_v5 = vmul.f32 %v297_v4, %v297_v4 }
  0x64   : > { %11960 = vmatmul.mubr.msk.f32.gmra.mxu0 %vm334_vm1, %v267_v7  ;;  %12127 = vmatmul.mubr.msk.f32.gmra.mxu1 %vm334_vm1, %v1255_v9  ;;  %v299_v7 = vld [vmem:[%s19575_s3 + $0x218] sm:$0xff] }
  0x65   : > { %11962 = vmatprep.mubr.msk.f32.mxu0 %vm334_vm1, %v268_v8  ;;  %12129 = vmatprep.mubr.msk.f32.mxu1 %vm334_vm1, %v1256_v10  ;;  %v1286_v8 = vmul.f32 %v298_v6, %v298_v6  ;;  %v1287_v9 = vmul.f32 %v299_v7, %v299_v7  ;;  %v300_v10 = vld [vmem:[%s19575_s3 + $0x220] sm:$0xff] }
  0x68   : > { %11963 = vmatmul.mubr.msk.f32.gmra.mxu0 %vm334_vm1, %v269_v11  ;;  %12130 = vmatmul.mubr.msk.f32.gmra.mxu1 %vm334_vm1, %v1257_v13  ;;  %v301_v11 = vld [vmem:[%s19575_s3 + $0x228] sm:$0xff] }
  0x69   : > { %11965 = vmatprep.mubr.msk.f32.mxu0 %vm334_vm1, %v270_v12  ;;  %12132 = vmatprep.mubr.msk.f32.mxu1 %vm334_vm1, %v1258_v14  ;;  %v1288_v12 = vmul.f32 %v300_v10, %v300_v10  ;;  %v1289_v13 = vmul.f32 %v301_v11, %v301_v11  ;;  %v302_v14 = vld [vmem:[%s19575_s3 + $0x230] sm:$0xff] }
  0x6c   : > { %11966 = vmatmul.mubr.msk.f32.gmra.mxu0 %vm334_vm1, %v271_v15  ;;  %12133 = vmatmul.mubr.msk.f32.gmra.mxu1 %vm334_vm1, %v1259_v17  ;;  %v1290_v15 = vmul.f32 %v302_v14, %v302_v14 }
  0x6d   : > { %11968 = vmatprep.mubr.msk.f32.mxu0 %vm334_vm1, %v272_v16  ;;  %12135 = vmatprep.mubr.msk.f32.mxu1 %vm334_vm1, %v1260_v18  ;;  %v303_v16 = vld [vmem:[%s19575_s3 + $0x238] sm:$0xff]  ;;  %v304_v18 = vld [vmem:[%s19575_s3 + $0x240] sm:$0xff] }
  0x6e   : > { %v1291_v17 = vmul.f32 %v303_v16, %v303_v16 }
  0x70   : > { %11969 = vmatmul.mubr.msk.f32.gmra.mxu0 %vm334_vm1, %v273_v19  ;;  %12136 = vmatmul.mubr.msk.f32.gmra.mxu1 %vm334_vm1, %v1261_v21  ;;  %v305_v19 = vld [vmem:[%s19575_s3 + $0x248] sm:$0xff] }
  0x71   : > { %11971 = vmatprep.mubr.msk.f32.mxu0 %vm334_vm1, %v274_v20  ;;  %12138 = vmatprep.mubr.msk.f32.mxu1 %vm334_vm1, %v1262_v22  ;;  %v1292_v20 = vmul.f32 %v304_v18, %v304_v18  ;;  %v1293_v21 = vmul.f32 %v305_v19, %v305_v19  ;;  %v306_v22 = vld [vmem:[%s19575_s3 + $0x250] sm:$0xff] }
  0x74   : > { %11972 = vmatmul.mubr.msk.f32.gmra.mxu0 %vm334_vm1, %v275_v23  ;;  %12139 = vmatmul.mubr.msk.f32.gmra.mxu1 %vm334_vm1, %v1263_v25  ;;  %v307_v23 = vld [vmem:[%s19575_s3 + $0x258] sm:$0xff] }
  0x75   : > { %11974 = vmatprep.mubr.msk.f32.mxu0 %vm334_vm1, %v276_v24  ;;  %12141 = vmatprep.mubr.msk.f32.mxu1 %vm334_vm1, %v1264_v26  ;;  %v1294_v24 = vmul.f32 %v306_v22, %v306_v22  ;;  %v1295_v25 = vmul.f32 %v307_v23, %v307_v23  ;;  %v308_v26 = vld [vmem:[%s19575_s3 + $0x260] sm:$0xff] }
  0x78   : > { %11975 = vmatmul.mubr.msk.f32.gmra.mxu0 %vm334_vm1, %v277_v27  ;;  %12142 = vmatmul.mubr.msk.f32.gmra.mxu1 %vm334_vm1, %v1265_v29  ;;  %v309_v27 = vld [vmem:[%s19575_s3 + $0x268] sm:$0xff] }
  0x79   : > { %11977 = vmatprep.mubr.msk.f32.mxu0 %vm334_vm1, %v278_v28  ;;  %12144 = vmatprep.mubr.msk.f32.mxu1 %vm334_vm1, %v1266_v30  ;;  %v1296_v28 = vmul.f32 %v308_v26, %v308_v26  ;;  %v1297_v29 = vmul.f32 %v309_v27, %v309_v27 }
  0x7c   : > { %11978 = vmatmul.mubr.msk.f32.gmra.mxu0 %vm334_vm1, %v279_v31  ;;  %12145 = vmatmul.mubr.msk.f32.gmra.mxu1 %vm334_vm1, %v1267_v33 }
  0x7d   : > { %11980 = vmatprep.mubr.msk.f32.mxu0 %vm334_vm1, %v280_v32  ;;  %12147 = vmatprep.mubr.msk.f32.mxu1 %vm334_vm1, %v1268_v34 }
  0x80   : > { %11981 = vmatmul.mubr.msk.f32.gmra.mxu0 %vm334_vm1, %v281_v35  ;;  %12148 = vmatmul.mubr.msk.f32.gmra.mxu1 %vm334_vm1, %v1269_v38 }
  0x81   : > { %11983 = vmatprep.mubr.msk.f32.mxu0 %vm334_vm1, %v282_v36  ;;  %12150 = vmatprep.mubr.msk.f32.mxu1 %vm334_vm1, %v1270_v39 }
  0x84   : > { %11984 = vmatmul.mubr.msk.f32.gmra.mxu0 %vm334_vm1, %v283_v40  ;;  %12151 = vmatmul.mubr.msk.f32.gmra.mxu1 %vm334_vm1, %v1271_v42  ;;  %v310_v42 = vld [vmem:[%s19575_s3 + $0x270] sm:$0xff] }
  0x85   : > { %11986 = vmatprep.mubr.msk.f32.mxu0 %vm334_vm1, %v284_v41  ;;  %12153 = vmatprep.mubr.msk.f32.mxu1 %vm334_vm1, %v1272_v43  ;;  %v311_v43 = vld [vmem:[%s19575_s3 + $0x278] sm:$0xff] }
  0x88   : > { %11987 = vmatmul.mubr.msk.f32.gmra.mxu0 %vm334_vm1, %v285_v44  ;;  %12154 = vmatmul.mubr.msk.f32.gmra.mxu1 %vm334_vm1, %v1273_v46 }
  0x89   : > { %11989 = vmatprep.mubr.msk.f32.mxu0 %vm334_vm1, %v286_v45  ;;  %12156 = vmatprep.mubr.msk.f32.mxu1 %vm334_vm1, %v1274_v47 }
  0x8c   : > { %11990 = vmatmul.mubr.msk.f32.gmra.mxu0 %vm334_vm1, %v287_v48  ;;  %12157 = vmatmul.mubr.msk.f32.gmra.mxu1 %vm334_vm1, %v1275_v50  ;;  %v1298_v50 = vmul.f32 %v310_v42, %v310_v42 }
  0x8d   : > { %11992 = vmatprep.mubr.msk.f32.mxu0 %vm334_vm1, %v288_v49  ;;  %12159 = vmatprep.mubr.msk.f32.mxu1 %vm334_vm1, %v1276_v51  ;;  %v1299_v51 = vmul.f32 %v311_v43, %v311_v43 }
  0x90   : > { %11993 = vmatmul.mubr.msk.f32.gmra.mxu0 %vm334_vm1, %v289_v52  ;;  %12160 = vmatmul.mubr.msk.f32.gmra.mxu1 %vm334_vm1, %v1277_v54 }
  0x91   : > { %11995 = vmatprep.mubr.msk.f32.mxu0 %vm334_vm1, %v290_v53  ;;  %12162 = vmatprep.mubr.msk.f32.mxu1 %vm334_vm1, %v1278_v55 }
  0x94   : > { %11996 = vmatmul.mubr.msk.f32.gmra.mxu0 %vm334_vm1, %v291_v56  ;;  %12163 = vmatmul.mubr.msk.f32.gmra.mxu1 %vm334_vm1, %v1279_v58 }
  0x95   : > { %11998 = vmatprep.mubr.msk.f32.mxu0 %vm334_vm1, %v292_v57  ;;  %12165 = vmatprep.mubr.msk.f32.mxu1 %vm334_vm1, %v1280_v59 }
  0x98   : > { %11999 = vmatmul.mubr.msk.f32.gmra.mxu0 %vm334_vm1, %v293_v60  ;;  %12166 = vmatmul.mubr.msk.f32.gmra.mxu1 %vm334_vm1, %v1281_v62 }
  0x99   : > { %12001 = vmatprep.mubr.msk.f32.mxu0 %vm334_vm1, %v294_v61  ;;  %12168 = vmatprep.mubr.msk.f32.mxu1 %vm334_vm1, %v1282_v63 }
  0x9c   : > { %12002 = vmatmul.mubr.msk.f32.gmra.mxu0 %vm334_vm1, %v295_v0  ;;  %12169 = vmatmul.mubr.msk.f32.gmra.mxu1 %vm334_vm1, %v1283_v1 }
  0x9d   : > { %12004 = vmatprep.mubr.msk.f32.mxu0 %vm334_vm1, %v296_v2  ;;  %12171 = vmatprep.mubr.msk.f32.mxu1 %vm334_vm1, %v1284_v3 }
  0xa0   : > { %12005 = vmatmul.mubr.msk.f32.gmra.mxu0 %vm334_vm1, %v297_v4  ;;  %12172 = vmatmul.mubr.msk.f32.gmra.mxu1 %vm334_vm1, %v1285_v5 }
  0xa1   : > { %12007 = vmatprep.mubr.msk.f32.mxu0 %vm334_vm1, %v298_v6  ;;  %12174 = vmatprep.mubr.msk.f32.mxu1 %vm334_vm1, %v1286_v8 }
  0xa4   : > { %12008 = vmatmul.mubr.msk.f32.gmra.mxu0 %vm334_vm1, %v299_v7  ;;  %12175 = vmatmul.mubr.msk.f32.gmra.mxu1 %vm334_vm1, %v1287_v9 }
  0xa5   : > { %12010 = vmatprep.mubr.msk.f32.mxu0 %vm334_vm1, %v300_v10  ;;  %12177 = vmatprep.mubr.msk.f32.mxu1 %vm334_vm1, %v1288_v12  ;;  %v313_v12 = vld [vmem:[%s19575_s3 + $0x288] sm:$0xff] }
  0xa8   : > { %12011 = vmatmul.mubr.msk.f32.gmra.mxu0 %vm334_vm1, %v301_v11  ;;  %12178 = vmatmul.mubr.msk.f32.gmra.mxu1 %vm334_vm1, %v1289_v13  ;;  %v312_v11 = vld [vmem:[%s19575_s3 + $0x280] sm:$0xff] }
  0xa9   : > { %12013 = vmatprep.mubr.msk.f32.mxu0 %vm334_vm1, %v302_v14  ;;  %12180 = vmatprep.mubr.msk.f32.mxu1 %vm334_vm1, %v1290_v15 }
  0xac   : > { %12014 = vmatmul.mubr.msk.f32.gmra.mxu0 %vm334_vm1, %v303_v16  ;;  %12181 = vmatmul.mubr.msk.f32.gmra.mxu1 %vm334_vm1, %v1291_v17 }
  0xad   : > { %12016 = vmatprep.mubr.msk.f32.mxu0 %vm334_vm1, %v304_v18  ;;  %12183 = vmatprep.mubr.msk.f32.mxu1 %vm334_vm1, %v1292_v20 }
  0xb0   : > { %12017 = vmatmul.mubr.msk.f32.gmra.mxu0 %vm334_vm1, %v305_v19  ;;  %12184 = vmatmul.mubr.msk.f32.gmra.mxu1 %vm334_vm1, %v1293_v21  ;;  %v1300_v19 = vmul.f32 %v312_v11, %v312_v11 }
  0xb1   : > { %12019 = vmatprep.mubr.msk.f32.mxu0 %vm334_vm1, %v306_v22  ;;  %12186 = vmatprep.mubr.msk.f32.mxu1 %vm334_vm1, %v1294_v24 }
  0xb4   : > { %12020 = vmatmul.mubr.msk.f32.gmra.mxu0 %vm334_vm1, %v307_v23  ;;  %12187 = vmatmul.mubr.msk.f32.gmra.mxu1 %vm334_vm1, %v1295_v25  ;;  %v1301_v23 = vmul.f32 %v313_v12, %v313_v12 }
  0xb5   : > { %12022 = vmatprep.mubr.msk.f32.mxu0 %vm334_vm1, %v308_v26  ;;  %12189 = vmatprep.mubr.msk.f32.mxu1 %vm334_vm1, %v1296_v28 }
  0xb8   : > { %12023 = vmatmul.mubr.msk.f32.gmra.mxu0 %vm334_vm1, %v309_v27  ;;  %12190 = vmatmul.mubr.msk.f32.gmra.mxu1 %vm334_vm1, %v1297_v29 }
  0xb9   : > { %12025 = vmatprep.mubr.msk.f32.mxu0 %vm334_vm1, %v310_v42  ;;  %12192 = vmatprep.mubr.msk.f32.mxu1 %vm334_vm1, %v1298_v50 }
  0xbc   : > { %12026 = vmatmul.mubr.msk.f32.gmra.mxu0 %vm334_vm1, %v311_v43  ;;  %12193 = vmatmul.mubr.msk.f32.gmra.mxu1 %vm334_vm1, %v1299_v51 }
  0xbd   : > { %12028 = vmatprep.mubr.msk.f32.mxu0 %vm334_vm1, %v312_v11  ;;  %12195 = vmatprep.mubr.msk.f32.mxu1 %vm334_vm1, %v1300_v19 }
  0xc0   : > { %12029 = vmatmul.mubr.msk.f32.gmra.mxu0 %vm334_vm1, %v313_v12  ;;  %12196 = vmatmul.mubr.msk.f32.gmra.mxu1 %vm334_vm1, %v1301_v23 }
  0xe0   : > { %v11910_v30 = vpop.f32.mrf.mxu0  ;;  %v12077_v31 = vpop.f32.mrf.mxu1 }
  0xe1   : > { %v14028_v32 = vmul.f32 0.020408163, %v11910_v30  ;;  %v2306_v33 = vmul.f32 0.020408163, %v12077_v31 }
  0xe2   : > { %v711_v34 = vpop.f32.mrf.mxu0  ;;  %v1694_v35 = vpop.f32.mrf.mxu1 }
  0xe3   : > { %v2408_v36 = vmul.f32 %v14028_v32, %v14028_v32  ;;  %v14032_v38 = vmul.f32 0.020408163, %v711_v34  ;;  %v2305_v39 = vmul.f32 0.020408163, %v1694_v35  ;;  %v314_v34 = vld [vmem:[%s19575_s3 + $0x290] sm:$0xff]  ;;  %v315_v35 = vld [vmem:[%s19575_s3 + $0x298] sm:$0xff] }
  0xe4   : > { %v11913_v40 = vpop.f32.mrf.mxu0  ;;  %v12080_v41 = vpop.f32.mrf.mxu1  ;;  %12031 = vmatprep.mubr.msk.f32.mxu0 %vm334_vm1, %v314_v34  ;;  %v1302_v42 = vmul.f32 %v314_v34, %v314_v34  ;;  %v1303_v50 = vmul.f32 %v315_v35, %v315_v35 }
  0xe5   : > { %v2510_v44 = vsub.f32 %v2306_v33, %v2408_v36  ;;  %v2407_v45 = vmul.f32 %v14032_v38, %v14032_v38  ;;  %v14042_v46 = vmul.f32 0.020408163, %v11913_v40  ;;  %v2308_v47 = vmul.f32 0.020408163, %v12080_v41  ;;  %12032 = vmatmul.mubr.msk.f32.gmra.mxu0 %vm334_vm1, %v315_v35 }
  0xe6   : > { %v721_v48 = vpop.f32.mrf.mxu0  ;;  %v1704_v49 = vpop.f32.mrf.mxu1  ;;  %12198 = vmatprep.mubr.msk.f32.mxu1 %vm334_vm1, %v1302_v42 }
  0xe7   : > { %v2612_v52 = vmax.f32 %v2510_v44, 0.0  ;;  %v2509_v53 = vsub.f32 %v2305_v39, %v2407_v45  ;;  %v2410_v54 = vmul.f32 %v14042_v46, %v14042_v46  ;;  %v14048_v55 = vmul.f32 0.020408163, %v721_v48  ;;  %v2918_v44 = vld [vmem:[%s13628_s24 + $0x8] sm:$0xff]  ;;  %12199 = vmatmul.mubr.msk.f32.gmra.mxu1 %vm334_vm1, %v1303_v50  ;;  %v2921_v50 = vld [vmem:[%s13628_s24 + $0x20] sm:$0xff] }
  0xe8   : > { %v2307_v56 = vmul.f32 0.020408163, %v1704_v49  ;;  %v11916_v57 = vpop.f32.mrf.mxu0  ;;  %v12083_v58 = vpop.f32.mrf.mxu1 }
  0xe9   : > { %v2714_v59 = vadd.f32 1e-05, %v2612_v52  ;;  %v2611_v60 = vmax.f32 %v2509_v53, 0.0  ;;  %v2512_v61 = vsub.f32 %v2308_v47, %v2410_v54  ;;  %v2409_v62 = vmul.f32 %v14048_v55, %v14048_v55 }
  0xea   : > { %v14054_v63 = vmul.f32 0.020408163, %v11916_v57  ;;  %v731_v0 = vpop.f32.mrf.mxu0  ;;  %v2310_v1 = vmul.f32 0.020408163, %v12083_v58  ;;  %v1714_v2 = vpop.f32.mrf.mxu1 }
  0xeb   : > { %12702 = vrsqrt.f32 %v2714_v59  ;;  %v2713_v3 = vadd.f32 1e-05, %v2611_v60  ;;  %v2614_v4 = vmax.f32 %v2512_v61, 0.0  ;;  %v2511_v5 = vsub.f32 %v2307_v56, %v2409_v62 }
  0xec   : > { %v2412_v6 = vmul.f32 %v14054_v63, %v14054_v63  ;;  %v14058_v7 = vmul.f32 0.020408163, %v731_v0  ;;  %v11919_v8 = vpop.f32.mrf.mxu0  ;;  %v2309_v9 = vmul.f32 0.020408163, %v1714_v2  ;;  %v12086_v10 = vpop.f32.mrf.mxu1  ;;  %v14103_v0 = vld [vmem:[%s19575_s3 + $0x2a0] sm:$0xff] }
  0xed   : > { %v2716_v13 = vadd.f32 1e-05, %v2614_v4  ;;  %v2613_v14 = vmax.f32 %v2511_v5, 0.0  ;;  %v14069_v17 = vmul.f32 0.020408163, %v11919_v8  ;;  %12704 = vrsqrt.f32 %v2713_v3  ;;  %v2917_v3 = vld [vmem:[%s13628_s24] sm:$0xff]  ;;  %12034 = vmatprep.mubr.msk.f32.mxu0 %vm334_vm1, %v14103_v0 }
  0xee   : > { %v2411_v15 = vmul.f32 %v14058_v7, %v14058_v7  ;;  %v2514_v16 = vsub.f32 %v2310_v1, %v2412_v6  ;;  %v741_v18 = vpop.f32.mrf.mxu0  ;;  %v1724_v22 = vpop.f32.mrf.mxu1  ;;  %v2312_v28 = vmul.f32 0.020408163, %v12086_v10  ;;  %v2920_v4 = vld [vmem:[%s13628_s24 + $0x18] sm:$0xff] }
  0xef   : > { %v14072_v20 = vmul.f32 0.020408163, %v741_v18  ;;  %12706 = vrsqrt.f32 %v2716_v13  ;;  %v2715_v24 = vadd.f32 1e-05, %v2613_v14  ;;  %v2414_v27 = vmul.f32 %v14069_v17, %v14069_v17 }
  0xf0   : > { %v2513_v21 = vsub.f32 %v2309_v9, %v2411_v15  ;;  %v11922_v25 = vpop.f32.mrf.mxu0  ;;  %v2616_v26 = vmax.f32 %v2514_v16, 0.0  ;;  %v2311_v30 = vmul.f32 0.020408163, %v1724_v22  ;;  %v12089_v33 = vpop.f32.mrf.mxu1 }
  0xf1   : > { %v2413_v29 = vmul.f32 %v14072_v20, %v14072_v20  ;;  %12708 = vrsqrt.f32 %v2715_v24  ;;  %v2516_v40 = vsub.f32 %v2312_v28, %v2414_v27  ;;  %v14087_v41 = vmul.f32 0.020408163, %v11922_v25  ;;  %v2919_v24 = vld [vmem:[%s13628_s24 + $0x10] sm:$0xff] }
  0xf2   : > { %v2615_v31 = vmax.f32 %v2513_v21, 0.0  ;;  %v751_v36 = vpop.f32.mrf.mxu0  ;;  %v2718_v39 = vadd.f32 1e-05, %v2616_v26  ;;  %v1734_v49 = vpop.f32.mrf.mxu1  ;;  %v2314_v51 = vmul.f32 0.020408163, %v12089_v33 }
  0xf3   : > { %v2515_v43 = vsub.f32 %v2311_v30, %v2413_v29  ;;  %v14091_v48 = vmul.f32 0.020408163, %v751_v36  ;;  %v2618_v53 = vmax.f32 %v2516_v40, 0.0  ;;  %v2416_v54 = vmul.f32 %v14087_v41, %v14087_v41  ;;  %v2922_v36 = vld [vmem:[%s13628_s24 + $0x28] sm:$0xff] }
  0xf4   : > { %v2717_v47 = vadd.f32 1e-05, %v2615_v31  ;;  %v11925_v52 = vpop.f32.mrf.mxu0  ;;  %12710 = vrsqrt.f32 %v2718_v39  ;;  %v2313_v60 = vmul.f32 0.020408163, %v1734_v49  ;;  %v12092_v61 = vpop.f32.mrf.mxu1 }
  0xf5   : > { %v2617_v57 = vmax.f32 %v2515_v43, 0.0  ;;  %v2415_v59 = vmul.f32 %v14091_v48, %v14091_v48  ;;  %v2720_v5 = vadd.f32 1e-05, %v2618_v53  ;;  %v2518_v6 = vsub.f32 %v2314_v51, %v2416_v54 }
  0xf6   : > { %12712 = vrsqrt.f32 %v2717_v47  ;;  %v761_v2 = vpop.f32.mrf.mxu0  ;;  %v14109_v8 = vmul.f32 0.020408163, %v11925_v52  ;;  %v1744_v12 = vpop.f32.mrf.mxu1  ;;  %v2316_v15 = vmul.f32 0.020408163, %v12092_v61  ;;  %v14159_v61 = vld [vmem:[%s19575_s3 + $0x2c0] sm:$0xff] }
  0xf7   : > { %v2719_v9 = vadd.f32 1e-05, %v2617_v57  ;;  %v2517_v10 = vsub.f32 %v2313_v60, %v2415_v59  ;;  %v14119_v11 = vmul.f32 0.020408163, %v761_v2  ;;  %12714 = vrsqrt.f32 %v2720_v5  ;;  %v2924_v5 = vld [vmem:[%s13628_s24 + $0x38] sm:$0xff] }
  0xf8   : > { %v12703_v45 = vpop.eup %12702  ;;  %v11928_v16 = vpop.f32.mrf.mxu0  ;;  %v2620_v19 = vmax.f32 %v2518_v6, 0.0  ;;  %v2418_v21 = vmul.f32 %v14109_v8, %v14109_v8  ;;  %v2315_v23 = vmul.f32 0.020408163, %v1744_v12 }
  0xf9   : > { %v3020_v56 = vmul.f32 %v12703_v45, %v2918_v44  ;;  %12716 = vrsqrt.f32 %v2719_v9  ;;  %v2619_v25 = vmax.f32 %v2517_v10, 0.0  ;;  %v2417_v26 = vmul.f32 %v14119_v11, %v14119_v11  ;;  %v12095_v27 = vpop.f32.mrf.mxu1  ;;  %v14145_v44 = vld [vmem:[%s19575_s3 + $0x2b8] sm:$0xff] }
  0xfa   : > { %v12705_v58 = vpop.eup %12704  ;;  %v14129_v29 = vmul.f32 0.020408163, %v11928_v16  ;;  %v771_v30 = vpop.f32.mrf.mxu0  ;;  %v2722_v31 = vadd.f32 1e-05, %v2620_v19  ;;  %v2520_v33 = vsub.f32 %v2316_v15, %v2418_v21  ;;  %v2318_v49 = vmul.f32 0.020408163, %v12095_v27 }
  0xfb   : > { %3740 = vperm.xlu1 %12672, %v3020_v56   ;;  %v3122_v62 = vmul.f32 %v3020_v56, %v14028_v32  ;;  %v14115_v32 = vld [vmem:[%s19575_s3 + $0x2a8] sm:$0xff]  ;;  %v3019_v13 = vmul.f32 %v12705_v58, %v2917_v3  ;;  %v2519_v39 = vsub.f32 %v2315_v23, %v2417_v26  ;;  %v14140_v40 = vmul.f32 0.020408163, %v771_v30  ;;  %v1754_v42 = vpop.f32.mrf.mxu1 }
  0xfc   : > { %v12707_v1 = vpop.eup %12706  ;;  %12035 = vmatmul.mubr.msk.f32.gmra.mxu0 %vm334_vm1, %v14115_v32  ;;  %v11931_v43 = vpop.f32.mrf.mxu0  ;;  %v2420_v47 = vmul.f32 %v14129_v29, %v14129_v29  ;;  %12718 = vrsqrt.f32 %v2722_v31  ;;  %v2622_v51 = vmax.f32 %v2520_v33, 0.0  ;;  %v2317_v54 = vmul.f32 0.020408163, %v1754_v42 }
  0xfd   : > { %3327 = vrot.lane.b32.xlu0 %v3122_v62, %s13578_s30  ;;  %v3022_v14 = vmul.f32 %v12707_v1, %v2920_v4  ;;  %v3121_v28 = vmul.f32 %v3019_v13, %v14032_v38  ;;  %v2721_v38 = vadd.f32 1e-05, %v2619_v25  ;;  %v2621_v56 = vmax.f32 %v2519_v39, 0.0  ;;  %v12098_v59 = vpop.f32.mrf.mxu1  ;;  %v14187_v25 = vld [vmem:[%s19575_s3 + $0x2d0] sm:$0xff] }
  0xfe   : > { %v12709_v18 = vpop.eup %12708  ;;  %v2419_v57 = vmul.f32 %v14140_v40, %v14140_v40  ;;  %v781_v58 = vpop.f32.mrf.mxu0  ;;  %v2522_v62 = vsub.f32 %v2318_v49, %v2420_v47  ;;  %v14163_v1 = vmul.f32 0.020408163, %v11931_v43  ;;  %v2320_v19 = vmul.f32 0.020408163, %v12098_v59  ;;  %v14202_v43 = vld [vmem:[%s19575_s3 + $0x2d8] sm:$0xff] }
  0xff   : > { %v3124_v22 = vmul.f32 %v3022_v14, %v14042_v46  ;;  %v14134_v46 = vld [vmem:[%s19575_s3 + $0x2b0] sm:$0xff]  ;;  %v3021_v34 = vmul.f32 %v12709_v18, %v2919_v24  ;;  %12720 = vrsqrt.f32 %v2721_v38  ;;  %v14166_v4 = vmul.f32 0.020408163, %v781_v58  ;;  %v1764_v10 = vpop.f32.mrf.mxu1  ;;  %v14215_v58 = vld [vmem:[%s19575_s3 + $0x2e0] sm:$0xff] }
 0x100   : > { %12037 = vmatprep.mubr.msk.f32.mxu0 %vm334_vm1, %v14134_v46  ;;  %v2723_v6 = vadd.f32 1e-05, %v2621_v56  ;;  %v2521_v9 = vsub.f32 %v2317_v54, %v2419_v57  ;;  %v2624_v15 = vmax.f32 %v2522_v62, 0.0  ;;  %v11934_v16 = vpop.f32.mrf.mxu0  ;;  %v2422_v18 = vmul.f32 %v14163_v1, %v14163_v1 }
 0x101   : > { %3735 = vperm.xlu0 %12673, %v3019_v13   ;;  %3331 = vrot.lane.b32.xlu1 %v3124_v22, %s13578_s30  ;;  %v12711_v35 = vpop.eup %12710  ;;  %v3123_v52 = vmul.f32 %v3021_v34, %v14048_v55  ;;  %v2724_v55 = vadd.f32 1e-05, %v2622_v51  ;;  %v14174_v13 = vld [vmem:[%s19575_s3 + $0x2c8] sm:$0xff]  ;;  %v2421_v21 = vmul.f32 %v14166_v4, %v14166_v4  ;;  %v2319_v22 = vmul.f32 0.020408163, %v1764_v10 }
 0x102   : > { %12038 = vmatmul.mubr.msk.f32.gmra.mxu0 %vm334_vm1, %v14145_v44  ;;  %v3024_v53 = vmul.f32 %v12711_v35, %v2922_v36  ;;  %v2623_v23 = vmax.f32 %v2521_v9, 0.0  ;;  %v2726_v26 = vadd.f32 1e-05, %v2624_v15  ;;  %v791_v27 = vpop.f32.mrf.mxu0  ;;  %v2524_v30 = vsub.f32 %v2320_v19, %v2422_v18  ;;  %v2926_v36 = vld [vmem:[%s13628_s24 + $0x48] sm:$0xff]  ;;  %v2928_v9 = vld [vmem:[%s13628_s24 + $0x58] sm:$0xff] }
 0x103   : > { %v12713_v45 = vpop.eup %12712  ;;  %12040 = vmatprep.mubr.msk.f32.mxu0 %vm334_vm1, %v14159_v61  ;;  %12722 = vrsqrt.f32 %v2724_v55  ;;  %v14191_v31 = vmul.f32 0.020408163, %v11934_v16  ;;  %v2523_v35 = vsub.f32 %v2319_v22, %v2421_v21  ;;  %v14195_v39 = vmul.f32 0.020408163, %v791_v27  ;;  %v14230_v16 = vld [vmem:[%s19575_s3 + $0x2e8] sm:$0xff] }
 0x104   : > { %v3023_v60 = vmul.f32 %v12713_v45, %v2921_v50  ;;  %v3126_v2 = vmul.f32 %v3024_v53, %v14054_v63  ;;  %v12715_v3 = vpop.eup %12714  ;;  %v2923_v63 = vld [vmem:[%s13628_s24 + $0x30] sm:$0xff]  ;;  %12724 = vrsqrt.f32 %v2723_v6  ;;  %v2725_v38 = vadd.f32 1e-05, %v2623_v23  ;;  %v11937_v49 = vpop.f32.mrf.mxu0 }
 0x105   : > { %3325 = vrot.lane.b32.xlu0 %v3121_v28, %s13578_s30  ;;  %3745 = vperm.xlu1 %12672, %v3021_v34   ;;  %v12101_v28 = vpop.f32.mrf.mxu1  ;;  %12726 = vrsqrt.f32 %v2726_v26  ;;  %v2626_v50 = vmax.f32 %v2524_v30, 0.0  ;;  %v2424_v51 = vmul.f32 %v14191_v31, %v14191_v31  ;;  %v2423_v54 = vmul.f32 %v14195_v39, %v14195_v39  ;;  %v14243_v30 = vld [vmem:[%s19575_s3 + $0x2f0] sm:$0xff] }
 0x106   : > { %v3125_v12 = vmul.f32 %v3023_v60, %v14058_v7  ;;  %12041 = vmatmul.mubr.msk.f32.gmra.mxu0 %vm334_vm1, %v14174_v13  ;;  %v3026_v7 = vmul.f32 %v12715_v3, %v2924_v5  ;;  %12728 = vrsqrt.f32 %v2725_v38  ;;  %v14217_v59 = vmul.f32 0.020408163, %v11937_v49 }
 0x107   : > { %12043 = vmatprep.mubr.msk.f32.mxu0 %vm334_vm1, %v14187_v25  ;;  %v1774_v47 = vpop.f32.mrf.mxu1  ;;  %v2728_v55 = vadd.f32 1e-05, %v2626_v50 }
 0x108   : > { %v3128_v33 = vmul.f32 %v3026_v7, %v14069_v17  ;;  %v2925_v17 = vld [vmem:[%s13628_s24 + $0x40] sm:$0xff]  ;;  %v2321_v56 = vmul.f32 0.020408163, %v1774_v47 }
 0x109   : > { %3750 = vperm.xlu0 %12673, %v3022_v14   ;;  %3329 = vrot.lane.b32.xlu1 %v3123_v52, %s13578_s30  ;;  %v12717_v14 = vpop.eup %12716  ;;  %v2322_v52 = vmul.f32 0.020408163, %v12101_v28  ;;  %v12104_v62 = vpop.f32.mrf.mxu1  ;;  %12730 = vrsqrt.f32 %v2728_v55 }
 0x10a   : > { %v3025_v24 = vmul.f32 %v12717_v14, %v2923_v63  ;;  %v12719_v34 = vpop.eup %12718  ;;  %12044 = vmatmul.mubr.msk.f32.gmra.mxu0 %vm334_vm1, %v14202_v43  ;;  %v2525_v10 = vsub.f32 %v2321_v56, %v2423_v54  ;;  %v2324_v18 = vmul.f32 0.020408163, %v12104_v62  ;;  %v2929_v54 = vld [vmem:[%s13628_s24 + $0x60] sm:$0xff] }
 0x10b   : > { %12046 = vmatprep.mubr.msk.f32.mxu0 %vm334_vm1, %v14215_v58  ;;  %v1784_v19 = vpop.f32.mrf.mxu1 }
 0x10c   : > { %v3127_v42 = vmul.f32 %v3025_v24, %v14072_v20  ;;  %v12721_v45 = vpop.eup %12720  ;;  %v3028_v20 = vmul.f32 %v12719_v34, %v2926_v36  ;;  %v2627_v22 = vmax.f32 %v2525_v10, 0.0 }
 0x10d   : > { %3760 = vperm.xlu0 %12673, %v3024_v53   ;;  %3335 = vrot.lane.b32.xlu1 %v3126_v2, %s13578_s30  ;;  %v2625_v53 = vmax.f32 %v2523_v35, 0.0  ;;  %v3027_v57 = vmul.f32 %v12721_v45, %v2925_v17  ;;  %v2526_v2 = vsub.f32 %v2322_v52, %v2424_v51  ;;  %v12107_v27 = vpop.f32.mrf.mxu1  ;;  %v2930_v45 = vld [vmem:[%s13628_s24 + $0x68] sm:$0xff]  ;;  %v14258_v51 = vld [vmem:[%s19575_s3 + $0x2f8] sm:$0xff] }
 0x10e   : > { %v3130_v3 = vmul.f32 %v3028_v20, %v14087_v41  ;;  %v2426_v41 = vmul.f32 %v14217_v59, %v14217_v59  ;;  %12047 = vmatmul.mubr.msk.f32.gmra.mxu0 %vm334_vm1, %v14230_v16  ;;  %v2729_v47 = vadd.f32 1e-05, %v2627_v22  ;;  %v2326_v56 = vmul.f32 0.020408163, %v12107_v27 }
 0x10f   : > { %v2727_v6 = vadd.f32 1e-05, %v2625_v53  ;;  %v3129_v15 = vmul.f32 %v3027_v57, %v14091_v48  ;;  %v2628_v21 = vmax.f32 %v2526_v2, 0.0  ;;  %12049 = vmatprep.mubr.msk.f32.mxu0 %vm334_vm1, %v14243_v30  ;;  %v1794_v17 = vpop.f32.mrf.mxu1  ;;  %v14271_v2 = vld [vmem:[%s19575_s3 + $0x300] sm:$0xff] }
 0x110   : > { %v12723_v5 = vpop.eup %12722 }
 0x111   : > { %3333 = vrot.lane.b32.xlu0 %v3125_v12, %s13578_s30  ;;  %3755 = vperm.xlu1 %12672, %v3023_v60   ;;  %v801_v60 = vpop.f32.mrf.mxu0  ;;  %v12725_v63 = vpop.eup %12724  ;;  %v3030_v48 = vmul.f32 %v12723_v5, %v2928_v9  ;;  %12732 = vrsqrt.f32 %v2727_v6  ;;  %v2730_v35 = vadd.f32 1e-05, %v2628_v21 }
 0x112   : > { %v14223_v12 = vmul.f32 0.020408163, %v801_v60  ;;  %v12727_v34 = vpop.eup %12726  ;;  %12050 = vmatmul.mubr.msk.f32.gmra.mxu0 %vm334_vm1, %v14258_v51  ;;  %v2325_v60 = vmul.f32 0.020408163, %v1794_v17  ;;  %v12110_v6 = vpop.f32.mrf.mxu1 }
 0x113   : > { %v11940_v14 = vpop.f32.mrf.mxu0  ;;  %v3132_v38 = vmul.f32 %v3030_v48, %v14109_v8  ;;  %v12729_v52 = vpop.eup %12728  ;;  %12734 = vrsqrt.f32 %v2730_v35  ;;  %12052 = vmatprep.mubr.msk.f32.mxu0 %vm334_vm1, %v14271_v2  ;;  %v2328_v27 = vmul.f32 0.020408163, %v12110_v6 }
 0x114   : > { %v2425_v23 = vmul.f32 %v14223_v12, %v14223_v12  ;;  %v14247_v36 = vmul.f32 0.020408163, %v11940_v14  ;;  %12736 = vrsqrt.f32 %v2729_v47  ;;  %v3031_v55 = vmul.f32 %v12729_v52, %v2929_v54  ;;  %v1804_v22 = vpop.f32.mrf.mxu1  ;;  %v2934_v54 = vld [vmem:[%s13628_s24 + $0x88] sm:$0xff] }
 0x115   : > { %3770 = vperm.xlu0 %12673, %v3026_v7   ;;  %3339 = vrot.lane.b32.xlu1 %v3128_v33, %s13578_s30  ;;  %v2927_v7 = vld [vmem:[%s13628_s24 + $0x50] sm:$0xff]  ;;  %v811_v26 = vpop.f32.mrf.mxu0  ;;  %v2528_v33 = vsub.f32 %v2324_v18, %v2426_v41  ;;  %v2932_v41 = vld [vmem:[%s13628_s24 + $0x78] sm:$0xff] }
 0x116   : > { %v3029_v28 = vmul.f32 %v12725_v63, %v2927_v7  ;;  %v2428_v8 = vmul.f32 %v14247_v36, %v14247_v36  ;;  %v3133_v21 = vmul.f32 %v3031_v55, %v14140_v40 }
 0x117   : > { %v11943_v53 = vpop.f32.mrf.mxu0 }
 0x118   : > { %v3131_v50 = vmul.f32 %v3029_v28, %v14119_v11  ;;  %v3032_v11 = vmul.f32 %v12727_v34, %v2930_v45  ;;  %v2530_v9 = vsub.f32 %v2326_v56, %v2428_v8  ;;  %v14275_v10 = vmul.f32 0.020408163, %v11943_v53 }
 0x119   : > { %3337 = vrot.lane.b32.xlu0 %v3127_v42, %s13578_s30  ;;  %3765 = vperm.xlu1 %12672, %v3025_v24   ;;  %v2323_v24 = vmul.f32 0.020408163, %v1784_v19  ;;  %v14250_v42 = vmul.f32 0.020408163, %v811_v26  ;;  %v821_v5 = vpop.f32.mrf.mxu0  ;;  %v2327_v34 = vmul.f32 0.020408163, %v1804_v22 }
 0x11a   : > { %v3134_v14 = vmul.f32 %v3032_v11, %v14129_v29  ;;  %v14279_v7 = vmul.f32 0.020408163, %v821_v5  ;;  %v2931_v29 = vld [vmem:[%s13628_s24 + $0x70] sm:$0xff]  ;;  %v2430_v26 = vmul.f32 %v14275_v10, %v14275_v10  ;;  %v2933_v5 = vld [vmem:[%s13628_s24 + $0x80] sm:$0xff] }
 0x11b   : > { %v2527_v49 = vsub.f32 %v2323_v24, %v2425_v23  ;;  %v11946_v23 = vpop.f32.mrf.mxu0  ;;  %v2632_v24 = vmax.f32 %v2530_v9, 0.0 }
 0x11c   : > { %v14301_v45 = vmul.f32 0.020408163, %v11946_v23 }
 0x11d   : > { %3780 = vperm.xlu0 %12673, %v3028_v20   ;;  %3343 = vrot.lane.b32.xlu1 %v3130_v3, %s13578_s30  ;;  %v2630_v20 = vmax.f32 %v2528_v33, 0.0  ;;  %v2629_v62 = vmax.f32 %v2527_v49, 0.0  ;;  %v2429_v33 = vmul.f32 %v14279_v7, %v14279_v7  ;;  %v831_v47 = vpop.f32.mrf.mxu0  ;;  %v12113_v49 = vpop.f32.mrf.mxu1  ;;  %v2734_v17 = vadd.f32 1e-05, %v2632_v24 }
 0x11e   : > { %v14307_v56 = vmul.f32 0.020408163, %v831_v47  ;;  %v14342_v47 = vld [vmem:[%s19575_s3 + $0x328] sm:$0xff] }
 0x11f   : > { %v2732_v3 = vadd.f32 1e-05, %v2630_v20  ;;  %v2731_v19 = vadd.f32 1e-05, %v2629_v62  ;;  %v2531_v8 = vsub.f32 %v2327_v34, %v2429_v33  ;;  %v2432_v62 = vmul.f32 %v14301_v45, %v14301_v45 }
 0x121   : > { %3341 = vrot.lane.b32.xlu0 %v3129_v15, %s13578_s30  ;;  %3775 = vperm.xlu1 %12672, %v3027_v57   ;;  %v2427_v57 = vmul.f32 %v14250_v42, %v14250_v42  ;;  %v12731_v15 = vpop.eup %12730  ;;  %12738 = vrsqrt.f32 %v2732_v3  ;;  %v1814_v3 = vpop.f32.mrf.mxu1 }
 0x122   : > { %v12733_v18 = vpop.eup %12732  ;;  %v3034_v40 = vmul.f32 %v12731_v15, %v2932_v41  ;;  %12740 = vrsqrt.f32 %v2731_v19  ;;  %v2329_v15 = vmul.f32 0.020408163, %v1814_v3  ;;  %v14327_v19 = vld [vmem:[%s19575_s3 + $0x320] sm:$0xff]  ;;  %v1305_v3 = vmul.f32 %v14115_v32, %v14115_v32 }
 0x123   : > { %v2529_v63 = vsub.f32 %v2325_v60, %v2427_v57  ;;  %v3033_v35 = vmul.f32 %v12733_v18, %v2931_v29  ;;  %v12735_v20 = vpop.eup %12734  ;;  %12742 = vrsqrt.f32 %v2734_v17  ;;  %v12116_v41 = vpop.f32.mrf.mxu1 }
 0x124   : > { %v3136_v52 = vmul.f32 %v3034_v40, %v14163_v1  ;;  %v12737_v60 = vpop.eup %12736  ;;  %v14317_v1 = vld [vmem:[%s19575_s3 + $0x318] sm:$0xff]  ;;  %v3036_v9 = vmul.f32 %v12735_v20, %v2934_v54 }
 0x125   : > { %3790 = vperm.xlu0 %12673, %v3030_v48   ;;  %3347 = vrot.lane.b32.xlu1 %v3132_v38, %s13578_s30  ;;  %v14286_v48 = vld [vmem:[%s19575_s3 + $0x308] sm:$0xff]  ;;  %v14299_v38 = vld [vmem:[%s19575_s3 + $0x310] sm:$0xff]  ;;  %v3135_v57 = vmul.f32 %v3033_v35, %v14166_v4  ;;  %v2633_v4 = vmax.f32 %v2531_v8, 0.0  ;;  %v3035_v18 = vmul.f32 %v12737_v60, %v2933_v5  ;;  %v1824_v33 = vpop.f32.mrf.mxu1 }
 0x126   : > { %12053 = vmatmul.mubr.msk.f32.gmra.mxu0 %vm334_vm1, %v14286_v48  ;;  %v3138_v24 = vmul.f32 %v3036_v9, %v14191_v31 }
 0x127   : > { %12055 = vmatprep.mubr.msk.f32.mxu0 %vm334_vm1, %v14299_v38 }
 0x129   : > { %3345 = vrot.lane.b32.xlu0 %v3131_v50, %s13578_s30  ;;  %3785 = vperm.xlu1 %12672, %v3029_v28   ;;  %v2631_v28 = vmax.f32 %v2529_v63, 0.0  ;;  %v2532_v50 = vsub.f32 %v2328_v27, %v2430_v26  ;;  %v2936_v27 = vld [vmem:[%s13628_s24 + $0x98] sm:$0xff] }
 0x12a   : > { %12056 = vmatmul.mubr.msk.f32.gmra.mxu0 %vm334_vm1, %v14317_v1 }
 0x12b   : > { %v2733_v53 = vadd.f32 1e-05, %v2631_v28  ;;  %v2634_v6 = vmax.f32 %v2532_v50, 0.0  ;;  %12058 = vmatprep.mubr.msk.f32.mxu0 %vm334_vm1, %v14327_v19  ;;  %v2332_v50 = vmul.f32 0.020408163, %v12116_v41 }
 0x12d   : > { %3800 = vperm.xlu0 %12673, %v3032_v11   ;;  %3351 = vrot.lane.b32.xlu1 %v3134_v14, %s13578_s30  ;;  %v11949_v11 = vpop.f32.mrf.mxu0  ;;  %12744 = vrsqrt.f32 %v2733_v53  ;;  %v2431_v14 = vmul.f32 %v14307_v56, %v14307_v56  ;;  %v2736_v29 = vadd.f32 1e-05, %v2634_v6  ;;  %v2331_v53 = vmul.f32 0.020408163, %v1824_v33 }
 0x12e   : > { %v14329_v22 = vmul.f32 0.020408163, %v11949_v11  ;;  %v12739_v23 = vpop.eup %12738  ;;  %12059 = vmatmul.mubr.msk.f32.gmra.mxu0 %vm334_vm1, %v14342_v47  ;;  %v12119_v11 = vpop.f32.mrf.mxu1 }
 0x12f   : > { %v841_v63 = vpop.f32.mrf.mxu0  ;;  %v2533_v28 = vsub.f32 %v2329_v15, %v2431_v14  ;;  %12746 = vrsqrt.f32 %v2736_v29  ;;  %v3038_v20 = vmul.f32 %v12739_v23, %v2936_v27  ;;  %v1306_v23 = vmul.f32 %v14134_v46, %v14134_v46 }
 0x130   : > { %v14334_v26 = vmul.f32 0.020408163, %v841_v63  ;;  %v2434_v31 = vmul.f32 %v14329_v22, %v14329_v22  ;;  %v2938_v63 = vld [vmem:[%s13628_s24 + $0xa8] sm:$0xff] }
 0x131   : > { %3349 = vrot.lane.b32.xlu0 %v3133_v21, %s13578_s30  ;;  %3795 = vperm.xlu1 %12672, %v3031_v55   ;;  %v2330_v55 = vmul.f32 0.020408163, %v12113_v49  ;;  %v11952_v34 = vpop.f32.mrf.mxu0  ;;  %v12741_v49 = vpop.eup %12740  ;;  %v2635_v54 = vmax.f32 %v2533_v28, 0.0  ;;  %v3140_v6 = vmul.f32 %v3038_v20, %v14217_v59  ;;  %v2937_v59 = vld [vmem:[%s13628_s24 + $0xa0] sm:$0xff] }
 0x132   : > { %v14356_v5 = vmul.f32 0.020408163, %v11952_v34 }
 0x133   : > { %v2534_v21 = vsub.f32 %v2330_v55, %v2432_v62  ;;  %v851_v8 = vpop.f32.mrf.mxu0  ;;  %v2536_v62 = vsub.f32 %v2332_v50, %v2434_v31  ;;  %v1304_v55 = vmul.f32 %v14103_v0, %v14103_v0  ;;  %v1834_v0 = vpop.f32.mrf.mxu1 }
 0x134   : > { %v14359_v14 = vmul.f32 0.020408163, %v851_v8  ;;  %v2436_v29 = vmul.f32 %v14356_v5, %v14356_v5  ;;  %v2333_v33 = vmul.f32 0.020408163, %v1834_v0  ;;  %v1309_v8 = vmul.f32 %v14174_v13, %v14174_v13 }
 0x135   : > { %3810 = vperm.xlu0 %12673, %v3034_v40   ;;  %3355 = vrot.lane.b32.xlu1 %v3136_v52, %s13578_s30  ;;  %v2735_v40 = vadd.f32 1e-05, %v2633_v4  ;;  %v2636_v17 = vmax.f32 %v2534_v21, 0.0  ;;  %v2935_v52 = vld [vmem:[%s13628_s24 + $0x90] sm:$0xff]  ;;  %v11955_v15 = vpop.f32.mrf.mxu0  ;;  %v2638_v21 = vmax.f32 %v2536_v62, 0.0 }
 0x136   : > { %12201 = vmatprep.mubr.msk.f32.mxu1 %vm334_vm1, %v1304_v55  ;;  %v14378_v31 = vmul.f32 0.020408163, %v11955_v15  ;;  %v2939_v55 = vld [vmem:[%s13628_s24 + $0xb0] sm:$0xff] }
 0x137   : > { %12748 = vrsqrt.f32 %v2735_v40  ;;  %v2738_v60 = vadd.f32 1e-05, %v2636_v17  ;;  %12202 = vmatmul.mubr.msk.f32.gmra.mxu1 %vm334_vm1, %v1305_v3  ;;  %v1307_v40 = vmul.f32 %v14145_v44, %v14145_v44  ;;  %v861_v34 = vpop.f32.mrf.mxu0 }
 0x138   : > { %12204 = vmatprep.mubr.msk.f32.mxu1 %vm334_vm1, %v1306_v23  ;;  %v14380_v44 = vmul.f32 0.020408163, %v861_v34  ;;  %v2438_v3 = vmul.f32 %v14378_v31, %v14378_v31 }
 0x139   : > { %3353 = vrot.lane.b32.xlu0 %v3135_v57, %s13578_s30  ;;  %3805 = vperm.xlu1 %12672, %v3033_v35   ;;  %v3137_v35 = vmul.f32 %v3035_v18, %v14195_v39  ;;  %v2433_v39 = vmul.f32 %v14334_v26, %v14334_v26  ;;  %v3037_v57 = vmul.f32 %v12741_v49, %v2935_v52  ;;  %12750 = vrsqrt.f32 %v2738_v60  ;;  %v12122_v49 = vpop.f32.mrf.mxu1 }
 0x13b   : > { %v2535_v4 = vsub.f32 %v2331_v53, %v2433_v39  ;;  %v3139_v32 = vmul.f32 %v3037_v57, %v14223_v12  ;;  %v2435_v12 = vmul.f32 %v14359_v14, %v14359_v14  ;;  %12205 = vmatmul.mubr.msk.f32.gmra.mxu1 %vm334_vm1, %v1307_v40  ;;  %v2940_v53 = vld [vmem:[%s13628_s24 + $0xb8] sm:$0xff]  ;;  %v1844_v62 = vpop.f32.mrf.mxu1 }
 0x13d   : > { %3820 = vperm.xlu0 %12673, %v3036_v9   ;;  %3359 = vrot.lane.b32.xlu1 %v3138_v24, %s13578_s30  ;;  %v12743_v9 = vpop.eup %12742  ;;  %v2334_v24 = vmul.f32 0.020408163, %v12119_v11  ;;  %v2637_v28 = vmax.f32 %v2535_v4, 0.0  ;;  %v2537_v39 = vsub.f32 %v2333_v33, %v2435_v12  ;;  %v11958_v11 = vpop.f32.mrf.mxu0 }
 0x13e   : > { %v12745_v41 = vpop.eup %12744  ;;  %v3040_v27 = vmul.f32 %v12743_v9, %v2938_v63  ;;  %v2335_v9 = vmul.f32 0.020408163, %v1844_v62  ;;  %v12125_v15 = vpop.f32.mrf.mxu1  ;;  %v14402_v0 = vmul.f32 0.020408163, %v11958_v11 }
 0x13f   : > { %v3039_v46 = vmul.f32 %v12745_v41, %v2937_v59  ;;  %v2538_v17 = vsub.f32 %v2334_v24, %v2436_v29  ;;  %v12747_v52 = vpop.eup %12746  ;;  %v2639_v13 = vmax.f32 %v2537_v39, 0.0  ;;  %v871_v4 = vpop.f32.mrf.mxu0  ;;  %v1310_v41 = vmul.f32 %v14187_v25, %v14187_v25  ;;  %v2942_v24 = vld [vmem:[%s13628_s24 + $0xc8] sm:$0xff] }
 0x140   : > { %v3142_v50 = vmul.f32 %v3040_v27, %v14247_v36  ;;  %v14406_v29 = vmul.f32 0.020408163, %v871_v4  ;;  %v1854_v40 = vpop.f32.mrf.mxu1  ;;  %v2338_v33 = vmul.f32 0.020408163, %v12125_v15 }
 0x141   : > { %3357 = vrot.lane.b32.xlu0 %v3137_v35, %s13578_s30  ;;  %3815 = vperm.xlu1 %12672, %v3035_v18   ;;  %v2737_v18 = vadd.f32 1e-05, %v2635_v54  ;;  %v2740_v35 = vadd.f32 1e-05, %v2638_v21  ;;  %v1308_v54 = vmul.f32 %v14159_v61, %v14159_v61  ;;  %v2640_v36 = vmax.f32 %v2538_v17, 0.0  ;;  %v11961_v34 = vpop.f32.mrf.mxu0 }
 0x142   : > { %v3042_v61 = vmul.f32 %v12747_v52, %v2940_v53  ;;  %v2741_v25 = vadd.f32 1e-05, %v2639_v13  ;;  %v12128_v53 = vpop.f32.mrf.mxu1 }
 0x143   : > { %12752 = vrsqrt.f32 %v2737_v18  ;;  %12207 = vmatprep.mubr.msk.f32.mxu1 %vm334_vm1, %v1308_v54  ;;  %v1311_v18 = vmul.f32 %v14202_v43, %v14202_v43  ;;  %v2742_v21 = vadd.f32 1e-05, %v2640_v36  ;;  %v881_v39 = vpop.f32.mrf.mxu0 }
 0x144   : > { %v12749_v60 = vpop.eup %12748  ;;  %12754 = vrsqrt.f32 %v2740_v35  ;;  %12208 = vmatmul.mubr.msk.f32.gmra.mxu1 %vm334_vm1, %v1309_v8  ;;  %v3144_v23 = vmul.f32 %v3042_v61, %v14275_v10  ;;  %v2440_v10 = vmul.f32 %v14402_v0, %v14402_v0  ;;  %v1313_v35 = vmul.f32 %v14230_v16, %v14230_v16 }
 0x145   : > { %3830 = vperm.xlu0 %12673, %v3038_v20   ;;  %3363 = vrot.lane.b32.xlu1 %v3140_v6, %s13578_s30  ;;  %v2739_v20 = vadd.f32 1e-05, %v2637_v28  ;;  %v2336_v6 = vmul.f32 0.020408163, %v12122_v49  ;;  %v3041_v63 = vmul.f32 %v12749_v60, %v2939_v55  ;;  %v1312_v28 = vmul.f32 %v14215_v58, %v14215_v58  ;;  %v2944_v55 = vld [vmem:[%s13628_s24 + $0xd8] sm:$0xff] }
 0x146   : > { %12210 = vmatprep.mubr.msk.f32.mxu1 %vm334_vm1, %v1310_v41  ;;  %v2439_v58 = vmul.f32 %v14406_v29, %v14406_v29  ;;  %v14424_v16 = vmul.f32 0.020408163, %v11961_v34  ;;  %v1315_v60 = vmul.f32 %v14258_v51, %v14258_v51  ;;  %v2943_v51 = vld [vmem:[%s13628_s24 + $0xd0] sm:$0xff] }
 0x147   : > { %12756 = vrsqrt.f32 %v2739_v20  ;;  %v2540_v59 = vsub.f32 %v2336_v6, %v2438_v3  ;;  %v3143_v43 = vmul.f32 %v3041_v63, %v14279_v7  ;;  %v2337_v7 = vmul.f32 0.020408163, %v1854_v40 }
 0x148   : > { %12211 = vmatmul.mubr.msk.f32.gmra.mxu1 %vm334_vm1, %v1311_v18  ;;  %12758 = vrsqrt.f32 %v2742_v21  ;;  %v2542_v20 = vsub.f32 %v2338_v33, %v2440_v10  ;;  %v14432_v6 = vmul.f32 0.020408163, %v881_v39  ;;  %v1321_v39 = vmul.f32 %v14342_v47, %v14342_v47 }
 0x149   : > { %3361 = vrot.lane.b32.xlu0 %v3139_v32, %s13578_s30  ;;  %3825 = vperm.xlu1 %12672, %v3037_v57   ;;  %v3141_v57 = vmul.f32 %v3039_v46, %v14250_v42  ;;  %v2437_v42 = vmul.f32 %v14380_v44, %v14380_v44  ;;  %v12751_v32 = vpop.eup %12750  ;;  %v2642_v49 = vmax.f32 %v2540_v59, 0.0  ;;  %12760 = vrsqrt.f32 %v2741_v25 }
 0x14a   : > { %v3044_v17 = vmul.f32 %v12751_v32, %v2942_v24  ;;  %12213 = vmatprep.mubr.msk.f32.mxu1 %vm334_vm1, %v1312_v28  ;;  %v2541_v62 = vsub.f32 %v2337_v7, %v2439_v58  ;;  %v2441_v41 = vmul.f32 %v14432_v6, %v14432_v6  ;;  %v1318_v28 = vmul.f32 %v14299_v38, %v14299_v38 }
 0x14b   : > { %v2744_v8 = vadd.f32 1e-05, %v2642_v49  ;;  %v2945_v49 = vld [vmem:[%s13628_s24 + $0xe0] sm:$0xff] }
 0x14c   : > { %12214 = vmatmul.mubr.msk.f32.gmra.mxu1 %vm334_vm1, %v1313_v35  ;;  %v3146_v11 = vmul.f32 %v3044_v17, %v14301_v45  ;;  %v2644_v45 = vmax.f32 %v2542_v20, 0.0  ;;  %v2643_v15 = vmax.f32 %v2541_v62, 0.0  ;;  %v2948_v62 = vld [vmem:[%s13628_s24 + $0xf8] sm:$0xff] }
 0x14d   : > { %3840 = vperm.xlu0 %12673, %v3040_v27   ;;  %3367 = vrot.lane.b32.xlu1 %v3142_v50, %s13578_s30  ;;  %v2539_v27 = vsub.f32 %v2335_v9, %v2437_v42  ;;  %v2340_v42 = vmul.f32 0.020408163, %v12128_v53  ;;  %v1864_v9 = vpop.f32.mrf.mxu1  ;;  %12762 = vrsqrt.f32 %v2744_v8 }
 0x14e   : > { %v2339_v18 = vmul.f32 0.020408163, %v1864_v9  ;;  %v2746_v59 = vadd.f32 1e-05, %v2644_v45  ;;  %v2947_v45 = vld [vmem:[%s13628_s24 + $0xf0] sm:$0xff] }
 0x14f   : > { %v2641_v50 = vmax.f32 %v2539_v27, 0.0  ;;  %v12131_v24 = vpop.f32.mrf.mxu1  ;;  %v2745_v27 = vadd.f32 1e-05, %v2643_v15 }
 0x150   : > { %v12753_v12 = vpop.eup %12752  ;;  %v2342_v38 = vmul.f32 0.020408163, %v12131_v24  ;;  %v2950_v24 = vld [vmem:[%s13628_s24 + $0x108] sm:$0xff] }
 0x151   : > { %3365 = vrot.lane.b32.xlu0 %v3141_v57, %s13578_s30  ;;  %3835 = vperm.xlu1 %12672, %v3039_v46   ;;  %v2941_v46 = vld [vmem:[%s13628_s24 + $0xc0] sm:$0xff]  ;;  %v12755_v54 = vpop.eup %12754  ;;  %v1314_v57 = vmul.f32 %v14243_v30, %v14243_v30  ;;  %v2743_v3 = vadd.f32 1e-05, %v2641_v50  ;;  %v2442_v30 = vmul.f32 %v14424_v16, %v14424_v16  ;;  %v1874_v35 = vpop.f32.mrf.mxu1 }
 0x152   : > { %v3043_v52 = vmul.f32 %v12753_v12, %v2941_v46  ;;  %v3046_v4 = vmul.f32 %v12755_v54, %v2944_v55  ;;  %v2543_v12 = vsub.f32 %v2339_v18, %v2441_v41  ;;  %v2341_v50 = vmul.f32 0.020408163, %v1874_v35 }
 0x153   : > { %12216 = vmatprep.mubr.msk.f32.mxu1 %vm334_vm1, %v1314_v57  ;;  %12764 = vrsqrt.f32 %v2743_v3  ;;  %v12134_v54 = vpop.f32.mrf.mxu1 }
 0x154   : > { %v12757_v36 = vpop.eup %12756  ;;  %v3145_v13 = vmul.f32 %v3043_v52, %v14307_v56  ;;  %12217 = vmatmul.mubr.msk.f32.gmra.mxu1 %vm334_vm1, %v1315_v60  ;;  %v1317_v56 = vmul.f32 %v14286_v48, %v14286_v48  ;;  %12766 = vrsqrt.f32 %v2746_v59  ;;  %v2645_v7 = vmax.f32 %v2543_v12, 0.0 }
 0x155   : > { %3850 = vperm.xlu0 %12673, %v3042_v61   ;;  %3371 = vrot.lane.b32.xlu1 %v3144_v23, %s13578_s30  ;;  %v11964_v61 = vpop.f32.mrf.mxu0  ;;  %v3045_v21 = vmul.f32 %v12757_v36, %v2943_v51  ;;  %v2544_v23 = vsub.f32 %v2340_v42, %v2442_v30  ;;  %v12759_v48 = vpop.eup %12758  ;;  %12768 = vrsqrt.f32 %v2745_v27  ;;  %v2344_v42 = vmul.f32 0.020408163, %v12134_v54 }
 0x156   : > { %v14449_v25 = vmul.f32 0.020408163, %v11964_v61  ;;  %v12761_v34 = vpop.eup %12760  ;;  %v2747_v55 = vadd.f32 1e-05, %v2645_v7 }
 0x157   : > { %v891_v32 = vpop.f32.mrf.mxu0  ;;  %v3147_v33 = vmul.f32 %v3045_v21, %v14334_v26  ;;  %v2646_v46 = vmax.f32 %v2544_v23, 0.0  ;;  %v1320_v26 = vmul.f32 %v14327_v19, %v14327_v19  ;;  %v3047_v20 = vmul.f32 %v12761_v34, %v2945_v49 }
 0x158   : > { %v14453_v40 = vmul.f32 0.020408163, %v891_v32 }
 0x159   : > { %3369 = vrot.lane.b32.xlu0 %v3143_v43, %s13578_s30  ;;  %3845 = vperm.xlu1 %12672, %v3041_v63   ;;  %v1316_v63 = vmul.f32 %v14271_v2, %v14271_v2  ;;  %v3148_v2 = vmul.f32 %v3046_v4, %v14329_v22  ;;  %v2946_v43 = vld [vmem:[%s13628_s24 + $0xe8] sm:$0xff]  ;;  %v11967_v10 = vpop.f32.mrf.mxu0  ;;  %v1319_v22 = vmul.f32 %v14317_v1, %v14317_v1  ;;  %v2748_v53 = vadd.f32 1e-05, %v2646_v46 }
 0x15a   : > { %v3048_v58 = vmul.f32 %v12759_v48, %v2946_v43  ;;  %v2443_v1 = vmul.f32 %v14453_v40, %v14453_v40  ;;  %v14475_v19 = vmul.f32 0.020408163, %v11967_v10  ;;  %v12763_v57 = vpop.eup %12762  ;;  %v3149_v3 = vmul.f32 %v3047_v20, %v14359_v14 }
 0x15b   : > { %12219 = vmatprep.mubr.msk.f32.mxu1 %vm334_vm1, %v1316_v63  ;;  %12770 = vrsqrt.f32 %v2748_v53  ;;  %v3050_v9 = vmul.f32 %v12763_v57, %v2948_v62 }
 0x15c   : > { %12220 = vmatmul.mubr.msk.f32.gmra.mxu1 %vm334_vm1, %v1317_v56  ;;  %v2545_v36 = vsub.f32 %v2341_v50, %v2443_v1  ;;  %12772 = vrsqrt.f32 %v2747_v55 }
 0x15d   : > { %3860 = vperm.xlu0 %12673, %v3044_v17   ;;  %3375 = vrot.lane.b32.xlu1 %v3146_v11, %s13578_s30  ;;  %v2444_v17 = vmul.f32 %v14449_v25, %v14449_v25  ;;  %v3150_v11 = vmul.f32 %v3048_v58, %v14356_v5  ;;  %v2446_v5 = vmul.f32 %v14475_v19, %v14475_v19 }
 0x15e   : > { %12222 = vmatprep.mubr.msk.f32.mxu1 %vm334_vm1, %v1318_v28  ;;  %v3152_v59 = vmul.f32 %v3050_v9, %v14378_v31  ;;  %v2949_v31 = vld [vmem:[%s13628_s24 + $0x100] sm:$0xff] }
 0x15f   : > { %v2546_v8 = vsub.f32 %v2342_v38, %v2444_v17 }
 0x160   : > { %12223 = vmatmul.mubr.msk.f32.gmra.mxu1 %vm334_vm1, %v1319_v22  ;;  %v12765_v61 = vpop.eup %12764 }
 0x161   : > { %3373 = vrot.lane.b32.xlu0 %v3145_v13, %s13578_s30  ;;  %3855 = vperm.xlu1 %12672, %v3043_v52   ;;  %v901_v52 = vpop.f32.mrf.mxu0  ;;  %v1884_v13 = vpop.f32.mrf.mxu1  ;;  %v2648_v30 = vmax.f32 %v2546_v8, 0.0  ;;  %v3049_v56 = vmul.f32 %v12765_v61, %v2947_v45  ;;  %v2952_v8 = vld [vmem:[%s13628_s24 + $0x118] sm:$0xff] }
 0x162   : > { %12225 = vmatprep.mubr.msk.f32.mxu1 %vm334_vm1, %v1320_v26  ;;  %v14479_v60 = vmul.f32 0.020408163, %v901_v52  ;;  %v2343_v15 = vmul.f32 0.020408163, %v1884_v13  ;;  %v12767_v18 = vpop.eup %12766 }
 0x163   : > { %v11970_v47 = vpop.f32.mrf.mxu0  ;;  %v12137_v63 = vpop.f32.mrf.mxu1  ;;  %v2750_v32 = vadd.f32 1e-05, %v2648_v30  ;;  %v3151_v12 = vmul.f32 %v3049_v56, %v14380_v44  ;;  %v3052_v35 = vmul.f32 %v12767_v18, %v2950_v24 }
 0x164   : > { %12226 = vmatmul.mubr.msk.f32.gmra.mxu1 %vm334_vm1, %v1321_v39  ;;  %v2445_v51 = vmul.f32 %v14479_v60, %v14479_v60  ;;  %v14490_v41 = vmul.f32 0.020408163, %v11970_v47  ;;  %v2346_v46 = vmul.f32 0.020408163, %v12137_v63 }
 0x165   : > { %3870 = vperm.xlu0 %12673, %v3046_v4   ;;  %3379 = vrot.lane.b32.xlu1 %v3148_v2, %s13578_s30  ;;  %v2647_v4 = vmax.f32 %v2545_v36, 0.0  ;;  %v911_v14 = vpop.f32.mrf.mxu0  ;;  %v12769_v2 = vpop.eup %12768  ;;  %12774 = vrsqrt.f32 %v2750_v32  ;;  %v3154_v39 = vmul.f32 %v3052_v35, %v14402_v0  ;;  %v2951_v0 = vld [vmem:[%s13628_s24 + $0x110] sm:$0xff] }
 0x166   : > { %v14493_v23 = vmul.f32 0.020408163, %v911_v14  ;;  %v2547_v27 = vsub.f32 %v2343_v15, %v2445_v51  ;;  %v1894_v43 = vpop.f32.mrf.mxu1  ;;  %v2448_v10 = vmul.f32 %v14490_v41, %v14490_v41 }
 0x167   : > { %v2749_v48 = vadd.f32 1e-05, %v2647_v4  ;;  %v11973_v28 = vpop.f32.mrf.mxu0  ;;  %v2345_v17 = vmul.f32 0.020408163, %v1894_v43 }
 0x168   : > { %v2447_v49 = vmul.f32 %v14493_v23, %v14493_v23  ;;  %v2649_v44 = vmax.f32 %v2547_v27, 0.0  ;;  %v12140_v38 = vpop.f32.mrf.mxu1  ;;  %v14508_v26 = vmul.f32 0.020408163, %v11973_v28  ;;  %v12771_v50 = vpop.eup %12770 }
 0x169   : > { %3377 = vrot.lane.b32.xlu0 %v3147_v33, %s13578_s30  ;;  %3865 = vperm.xlu1 %12672, %v3045_v21   ;;  %v2548_v21 = vsub.f32 %v2344_v42, %v2446_v5  ;;  %12776 = vrsqrt.f32 %v2749_v48  ;;  %v921_v1 = vpop.f32.mrf.mxu0  ;;  %v12773_v36 = vpop.eup %12772  ;;  %v3054_v30 = vmul.f32 %v12771_v50, %v2952_v8 }
 0x16a   : > { %v2549_v53 = vsub.f32 %v2345_v17, %v2447_v49  ;;  %v14516_v57 = vmul.f32 0.020408163, %v921_v1  ;;  %v1904_v62 = vpop.f32.mrf.mxu1  ;;  %v2450_v47 = vmul.f32 %v14508_v26, %v14508_v26  ;;  %v3053_v4 = vmul.f32 %v12773_v36, %v2951_v0  ;;  %v2956_v36 = vld [vmem:[%s13628_s24 + $0x138] sm:$0xff] }
 0x16b   : > { %v2650_v34 = vmax.f32 %v2548_v21, 0.0  ;;  %v11976_v61 = vpop.f32.mrf.mxu0  ;;  %v3156_v32 = vmul.f32 %v3054_v30, %v14424_v16 }
 0x16c   : > { %v2651_v5 = vmax.f32 %v2549_v53, 0.0  ;;  %v12143_v51 = vpop.f32.mrf.mxu1  ;;  %v14532_v18 = vmul.f32 0.020408163, %v11976_v61  ;;  %v3155_v28 = vmul.f32 %v3053_v4, %v14432_v6 }
 0x16d   : > { %3880 = vperm.xlu0 %12673, %v3048_v58   ;;  %3383 = vrot.lane.b32.xlu1 %v3150_v11, %s13578_s30  ;;  %v3051_v58 = vmul.f32 %v12769_v2, %v2949_v31  ;;  %v2752_v52 = vadd.f32 1e-05, %v2650_v34  ;;  %v2751_v11 = vadd.f32 1e-05, %v2649_v44  ;;  %v931_v14 = vpop.f32.mrf.mxu0  ;;  %v2954_v2 = vld [vmem:[%s13628_s24 + $0x128] sm:$0xff] }
 0x16e   : > { %v14538_v27 = vmul.f32 0.020408163, %v931_v14  ;;  %v1914_v31 = vpop.f32.mrf.mxu1  ;;  %v2452_v16 = vmul.f32 %v14532_v18, %v14532_v18 }
 0x16f   : > { %v14500_v33 = vpop.permute.xlu0 %3327  ;;  %v3153_v55 = vmul.f32 %v3051_v58, %v14406_v29  ;;  %12778 = vrsqrt.f32 %v2752_v52  ;;  %v2449_v29 = vmul.f32 %v14516_v57, %v14516_v57  ;;  %v11979_v43 = vpop.f32.mrf.mxu0 }
 0x170   : > { %12780 = vrsqrt.f32 %v2751_v11  ;;  %v2451_v6 = vmul.f32 %v14538_v27, %v14538_v27  ;;  %v14554_v53 = vmul.f32 0.020408163, %v11979_v43 }
 0x171   : > { %3381 = vrot.lane.b32.xlu0 %v3149_v3, %s13578_s30  ;;  %3875 = vperm.xlu1 %12672, %v3047_v20   ;;  %v2550_v20 = vsub.f32 %v2346_v46, %v2448_v10  ;;  %v2348_v3 = vmul.f32 0.020408163, %v12140_v38  ;;  %v2953_v46 = vld [vmem:[%s13628_s24 + $0x120] sm:$0xff]  ;;  %v2349_v38 = vmul.f32 0.020408163, %v1914_v31  ;;  %v941_v1 = vpop.f32.mrf.mxu0 }
 0x172   : > { %v12775_v21 = vpop.eup %12774 }
 0x173   : > { %v2652_v45 = vmax.f32 %v2550_v20, 0.0  ;;  %v2552_v15 = vsub.f32 %v2348_v3, %v2450_v47  ;;  %v3056_v49 = vmul.f32 %v12775_v21, %v2954_v2  ;;  %v2553_v3 = vsub.f32 %v2349_v38, %v2451_v6 }
 0x175   : > { %3890 = vperm.xlu0 %12673, %v3050_v9   ;;  %3387 = vrot.lane.b32.xlu1 %v3152_v59, %s13578_s30  ;;  %v2347_v9 = vmul.f32 0.020408163, %v1904_v62  ;;  %v2753_v59 = vadd.f32 1e-05, %v2651_v5  ;;  %v2654_v10 = vmax.f32 %v2552_v15, 0.0  ;;  %v3158_v8 = vmul.f32 %v3056_v49, %v14449_v25 }
 0x176   : > { %v14502_v22 = vpop.permute.xlu1 %3740  ;;  %v14557_v62 = vmul.f32 0.020408163, %v941_v1 }
 0x177   : > { %v2551_v48 = vsub.f32 %v2347_v9, %v2449_v29  ;;  %v2756_v52 = vadd.f32 1e-05, %v2654_v10  ;;  %v2955_v29 = vld [vmem:[%s13628_s24 + $0x130] sm:$0xff]  ;;  %v2454_v9 = vmul.f32 %v14554_v53, %v14554_v53 }
 0x178   : > { %v2453_v15 = vmul.f32 %v14557_v62, %v14557_v62 }
 0x179   : > { %3385 = vrot.lane.b32.xlu0 %v3151_v12, %s13578_s30  ;;  %3885 = vperm.xlu1 %12672, %v3049_v56   ;;  %v2754_v56 = vadd.f32 1e-05, %v2652_v45  ;;  %v12777_v12 = vpop.eup %12776  ;;  %v2653_v44 = vmax.f32 %v2551_v48, 0.0 }
 0x17a   : > { %v14513_v54 = vpop.permute.xlu1 %3331  ;;  %v3055_v50 = vmul.f32 %v12777_v12, %v2953_v46 }
 0x17b   : > { %12782 = vrsqrt.f32 %v2754_v56  ;;  %v2755_v47 = vadd.f32 1e-05, %v2653_v44 }
 0x17c   : > { %v14510_v7 = vpop.permute.xlu0 %3735  ;;  %12784 = vrsqrt.f32 %v2753_v59  ;;  %v12779_v11 = vpop.eup %12778  ;;  %v3157_v0 = vmul.f32 %v3055_v50, %v14453_v40  ;;  %v2655_v40 = vmax.f32 %v2553_v3, 0.0 }
 0x17d   : > { %3900 = vperm.xlu0 %12673, %v3052_v35   ;;  %3391 = vrot.lane.b32.xlu1 %v3154_v39, %s13578_s30  ;;  %v2350_v35 = vmul.f32 0.020408163, %v12143_v51  ;;  %v12781_v45 = vpop.eup %12780  ;;  %12786 = vrsqrt.f32 %v2756_v52  ;;  %v2957_v52 = vld [vmem:[%s13628_s24 + $0x140] sm:$0xff] }
 0x17e   : > { %12788 = vrsqrt.f32 %v2755_v47  ;;  %v3057_v21 = vmul.f32 %v12781_v45, %v2955_v29 }
 0x17f   : > { %v2554_v39 = vsub.f32 %v2350_v35, %v2452_v16  ;;  %v2958_v16 = vld [vmem:[%s13628_s24 + $0x148] sm:$0xff] }
 0x180   : > { %v14522_v13 = vpop.permute.xlu0 %3325  ;;  %v14526_v42 = vpop.permute.xlu1 %3745  ;;  %v3159_v38 = vmul.f32 %v3057_v21, %v14479_v60 }
 0x181   : > { %3389 = vrot.lane.b32.xlu0 %v3153_v55, %s13578_s30  ;;  %3895 = vperm.xlu1 %12672, %v3051_v58   ;;  %v12146_v58 = vpop.f32.mrf.mxu1  ;;  %v2656_v25 = vmax.f32 %v2554_v39, 0.0 }
 0x182   : > { %v2352_v51 = vmul.f32 0.020408163, %v12146_v58 }
 0x183   : > { %v1924_v61 = vpop.f32.mrf.mxu1  ;;  %v2758_v43 = vadd.f32 1e-05, %v2656_v25 }
 0x184   : > { %v14530_v63 = vpop.permute.xlu0 %3750  ;;  %v14535_v24 = vpop.permute.xlu1 %3329  ;;  %v2351_v14 = vmul.f32 0.020408163, %v1924_v61 }
 0x185   : > { %3910 = vperm.xlu0 %12673, %v3054_v30   ;;  %3395 = vrot.lane.b32.xlu1 %v3156_v32, %s13578_s30  ;;  %v11982_v30 = vpop.f32.mrf.mxu0  ;;  %v12149_v32 = vpop.f32.mrf.mxu1  ;;  %12790 = vrsqrt.f32 %v2758_v43 }
 0x186   : > { %v14574_v59 = vmul.f32 0.020408163, %v11982_v30  ;;  %v2555_v31 = vsub.f32 %v2351_v14, %v2453_v15  ;;  %v2354_v1 = vmul.f32 0.020408163, %v12149_v32  ;;  %v2960_v14 = vld [vmem:[%s13628_s24 + $0x158] sm:$0xff] }
 0x187   : > { %v951_v2 = vpop.f32.mrf.mxu0  ;;  %v1934_v6 = vpop.f32.mrf.mxu1 }
 0x188   : > { %v14542_v34 = vpop.permute.xlu0 %3760  ;;  %v14548_v17 = vpop.permute.xlu1 %3335  ;;  %v14582_v44 = vmul.f32 0.020408163, %v951_v2  ;;  %v2456_v58 = vmul.f32 %v14574_v59, %v14574_v59  ;;  %v2353_v47 = vmul.f32 0.020408163, %v1934_v6 }
 0x189   : > { %3393 = vrot.lane.b32.xlu0 %v3155_v28, %s13578_s30  ;;  %3905 = vperm.xlu1 %12672, %v3053_v4   ;;  %v3058_v4 = vmul.f32 %v12779_v11, %v2956_v36  ;;  %v2556_v28 = vsub.f32 %v2352_v51, %v2454_v9  ;;  %v12783_v10 = vpop.eup %12782  ;;  %v2657_v11 = vmax.f32 %v2555_v31, 0.0  ;;  %v12152_v3 = vpop.f32.mrf.mxu1  ;;  %v2959_v31 = vld [vmem:[%s13628_s24 + $0x150] sm:$0xff] }
 0x18a   : > { %v12785_v35 = vpop.eup %12784  ;;  %v2455_v60 = vmul.f32 %v14582_v44, %v14582_v44 }
 0x18b   : > { %v3160_v12 = vmul.f32 %v3058_v4, %v14475_v19  ;;  %v2658_v39 = vmax.f32 %v2556_v28, 0.0  ;;  %v3059_v61 = vmul.f32 %v12785_v35, %v2957_v52  ;;  %v12787_v29 = vpop.eup %12786 }
 0x18c   : > { %v14552_v20 = vpop.permute.xlu0 %3333  ;;  %v14559_v55 = vpop.permute.xlu1 %3755  ;;  %v3062_v35 = vmul.f32 %v12787_v29, %v2960_v14 }
 0x18d   : > { %3920 = vperm.xlu0 %12673, %v3056_v49   ;;  %3399 = vrot.lane.b32.xlu1 %v3158_v8, %s13578_s30  ;;  %v2757_v49 = vadd.f32 1e-05, %v2655_v40  ;;  %v3060_v8 = vmul.f32 %v12783_v10, %v2958_v16  ;;  %v2760_v25 = vadd.f32 1e-05, %v2658_v39  ;;  %v2557_v40 = vsub.f32 %v2353_v47, %v2455_v60  ;;  %v12789_v43 = vpop.eup %12788 }
 0x18e   : > { %v3161_v2 = vmul.f32 %v3059_v61, %v14493_v23  ;;  %v2356_v16 = vmul.f32 0.020408163, %v12152_v3  ;;  %v3164_v60 = vmul.f32 %v3062_v35, %v14508_v26 }
 0x18f   : > { %12792 = vrsqrt.f32 %v2757_v49  ;;  %v3162_v51 = vmul.f32 %v3060_v8, %v14490_v41  ;;  %v2659_v6 = vmax.f32 %v2557_v40, 0.0 }
 0x190   : > { %v14564_v5 = vpop.permute.xlu0 %3770  ;;  %v14572_v56 = vpop.permute.xlu1 %3339  ;;  %12794 = vrsqrt.f32 %v2760_v25 }
 0x191   : > { %3397 = vrot.lane.b32.xlu0 %v3157_v0, %s13578_s30  ;;  %3915 = vperm.xlu1 %12672, %v3055_v50   ;;  %v11985_v50 = vpop.f32.mrf.mxu0  ;;  %v2558_v0 = vsub.f32 %v2354_v1, %v2456_v58  ;;  %v2761_v29 = vadd.f32 1e-05, %v2659_v6 }
 0x192   : > { %v14598_v9 = vmul.f32 0.020408163, %v11985_v50  ;;  %v3061_v50 = vmul.f32 %v12789_v43, %v2959_v31  ;;  %v12791_v47 = vpop.eup %12790 }
 0x193   : > { %v961_v45 = vpop.f32.mrf.mxu0  ;;  %v2660_v28 = vmax.f32 %v2558_v0, 0.0 }
 0x194   : > { %v14576_v48 = vpop.permute.xlu0 %3337  ;;  %v14579_v46 = vpop.permute.xlu1 %3765  ;;  %v14604_v32 = vmul.f32 0.020408163, %v961_v45  ;;  %v2458_v41 = vmul.f32 %v14598_v9, %v14598_v9  ;;  %v2962_v45 = vld [vmem:[%s13628_s24 + $0x168] sm:$0xff] }
 0x195   : > { %3930 = vperm.xlu0 %12673, %v3058_v4   ;;  %3403 = vrot.lane.b32.xlu1 %v3160_v12, %s13578_s30  ;;  %v2759_v4 = vadd.f32 1e-05, %v2657_v11  ;;  %v1944_v12 = vpop.f32.mrf.mxu1  ;;  %v2762_v52 = vadd.f32 1e-05, %v2660_v28  ;;  %v3064_v28 = vmul.f32 %v12791_v47, %v2962_v45  ;;  %v2964_v45 = vld [vmem:[%s13628_s24 + $0x178] sm:$0xff] }
 0x196   : > { %v2457_v23 = vmul.f32 %v14604_v32, %v14604_v32 }
 0x197   : > { %12796 = vrsqrt.f32 %v2759_v4  ;;  %v12155_v58 = vpop.f32.mrf.mxu1 }
 0x198   : > { %v14588_v19 = vpop.permute.xlu0 %3780  ;;  %v14592_v36 = vpop.permute.xlu1 %3343  ;;  %12798 = vrsqrt.f32 %v2762_v52  ;;  %v2358_v43 = vmul.f32 0.020408163, %v12155_v58  ;;  %v3166_v52 = vmul.f32 %v3064_v28, %v14532_v18 }
 0x199   : > { %3401 = vrot.lane.b32.xlu0 %v3159_v38, %s13578_s30  ;;  %3925 = vperm.xlu1 %12672, %v3057_v21   ;;  %v11988_v21 = vpop.f32.mrf.mxu0  ;;  %v2355_v38 = vmul.f32 0.020408163, %v1944_v12  ;;  %12800 = vrsqrt.f32 %v2761_v29 }
 0x19a   : > { %v14620_v11 = vmul.f32 0.020408163, %v11988_v21  ;;  %v2961_v21 = vld [vmem:[%s13628_s24 + $0x160] sm:$0xff] }
 0x19b   : > { %v971_v1 = vpop.f32.mrf.mxu0  ;;  %v2559_v25 = vsub.f32 %v2355_v38, %v2457_v23 }
 0x19c   : > { %v14596_v30 = vpop.permute.xlu0 %3341  ;;  %v14601_v15 = vpop.permute.xlu1 %3775  ;;  %v14623_v3 = vmul.f32 0.020408163, %v971_v1 }
 0x19d   : > { %3940 = vperm.xlu0 %12673, %v3060_v8   ;;  %3407 = vrot.lane.b32.xlu1 %v3162_v51, %s13578_s30  ;;  %v2560_v8 = vsub.f32 %v2356_v16, %v2458_v41  ;;  %v3163_v51 = vmul.f32 %v3061_v50, %v14516_v57  ;;  %v12793_v4 = vpop.eup %12792  ;;  %v11991_v14 = vpop.f32.mrf.mxu0  ;;  %v2661_v57 = vmax.f32 %v2559_v25, 0.0 }
 0x19e   : > { %v2459_v12 = vmul.f32 %v14623_v3, %v14623_v3  ;;  %v14640_v6 = vmul.f32 0.020408163, %v11991_v14 }
 0x19f   : > { %v2662_v26 = vmax.f32 %v2560_v8, 0.0  ;;  %v981_v23 = vpop.f32.mrf.mxu0  ;;  %v12795_v8 = vpop.eup %12794  ;;  %v2763_v25 = vadd.f32 1e-05, %v2661_v57 }
 0x1a0   : > { %v14608_v10 = vpop.permute.xlu0 %3790  ;;  %v14614_v49 = vpop.permute.xlu1 %3347 }
 0x1a1   : > { %3405 = vrot.lane.b32.xlu0 %v3161_v2, %s13578_s30  ;;  %3935 = vperm.xlu1 %12672, %v3059_v61   ;;  %v1954_v61 = vpop.f32.mrf.mxu1  ;;  %v2460_v2 = vmul.f32 %v14620_v11, %v14620_v11  ;;  %v2764_v58 = vadd.f32 1e-05, %v2662_v26  ;;  %v2963_v26 = vld [vmem:[%s13628_s24 + $0x170] sm:$0xff] }
 0x1a2   : > { %v2357_v31 = vmul.f32 0.020408163, %v1954_v61 }
 0x1a3   : > { %v12158_v16 = vpop.f32.mrf.mxu1  ;;  %v2562_v1 = vsub.f32 %v2358_v43, %v2460_v2  ;;  %12802 = vrsqrt.f32 %v2764_v58  ;;  %v3066_v43 = vmul.f32 %v12795_v8, %v2964_v45 }
 0x1a4   : > { %v14618_v39 = vpop.permute.xlu0 %3345  ;;  %v14625_v0 = vpop.permute.xlu1 %3785  ;;  %v2360_v14 = vmul.f32 0.020408163, %v12158_v16  ;;  %12804 = vrsqrt.f32 %v2763_v25 }
 0x1a5   : > { %3950 = vperm.xlu0 %12673, %v3062_v35   ;;  %3411 = vrot.lane.b32.xlu1 %v3164_v60, %s13578_s30  ;;  %v3063_v35 = vmul.f32 %v12793_v4, %v2961_v21  ;;  %v2561_v60 = vsub.f32 %v2357_v31, %v2459_v12  ;;  %v12797_v29 = vpop.eup %12796  ;;  %v1964_v61 = vpop.f32.mrf.mxu1  ;;  %v2462_v4 = vmul.f32 %v14640_v6, %v14640_v6  ;;  %v2664_v2 = vmax.f32 %v2562_v1, 0.0 }
 0x1a6   : > { %v11994_v21 = vpop.f32.mrf.mxu0  ;;  %v2359_v31 = vmul.f32 0.020408163, %v1964_v61  ;;  %v3065_v16 = vmul.f32 %v12797_v29, %v2963_v26  ;;  %v12799_v58 = vpop.eup %12798 }
 0x1a7   : > { %v12161_v57 = vpop.f32.mrf.mxu1  ;;  %v2766_v1 = vadd.f32 1e-05, %v2664_v2  ;;  %v14664_v8 = vmul.f32 0.020408163, %v11994_v21  ;;  %v12801_v29 = vpop.eup %12800  ;;  %v2965_v21 = vld [vmem:[%s13628_s24 + $0x180] sm:$0xff] }
 0x1a8   : > { %v14630_v40 = vpop.permute.xlu0 %3800  ;;  %v14638_v41 = vpop.permute.xlu1 %3351  ;;  %v2362_v2 = vmul.f32 0.020408163, %v12161_v57 }
 0x1a9   : > { %3409 = vrot.lane.b32.xlu0 %v3163_v51, %s13578_s30  ;;  %3945 = vperm.xlu1 %12672, %v3061_v50   ;;  %v14648_v50 = vmul.f32 0.020408163, %v981_v23  ;;  %v3165_v51 = vmul.f32 %v3063_v35, %v14538_v27  ;;  %v2564_v23 = vsub.f32 %v2360_v14, %v2462_v4  ;;  %v1974_v14 = vpop.f32.mrf.mxu1  ;;  %12806 = vrsqrt.f32 %v2766_v1 }
 0x1ab   : > { %v2461_v27 = vmul.f32 %v14648_v50, %v14648_v50  ;;  %v2666_v4 = vmax.f32 %v2564_v23, 0.0  ;;  %v3067_v23 = vmul.f32 %v12801_v29, %v2965_v21  ;;  %v2967_v21 = vld [vmem:[%s13628_s24 + $0x190] sm:$0xff] }
 0x1ac   : > { %v14642_v38 = vpop.permute.xlu0 %3349  ;;  %v14645_v47 = vpop.permute.xlu1 %3795 }
 0x1ad   : > { %3960 = vperm.xlu0 %12673, %v3064_v28   ;;  %3415 = vrot.lane.b32.xlu1 %v3166_v52, %s13578_s30  ;;  %v2663_v28 = vmax.f32 %v2561_v60, 0.0  ;;  %v991_v52 = vpop.f32.mrf.mxu0  ;;  %v3168_v60 = vmul.f32 %v3066_v43, %v14554_v53  ;;  %v2563_v61 = vsub.f32 %v2359_v31, %v2461_v27  ;;  %v2464_v53 = vmul.f32 %v14664_v8, %v14664_v8 }
 0x1ae   : > { %v2361_v31 = vmul.f32 0.020408163, %v1974_v14 }
 0x1af   : > { %v2765_v45 = vadd.f32 1e-05, %v2663_v28  ;;  %v2665_v27 = vmax.f32 %v2563_v61, 0.0  ;;  %v11997_v1 = vpop.f32.mrf.mxu0  ;;  %v2566_v57 = vsub.f32 %v2362_v2, %v2464_v53  ;;  %v2968_v61 = vld [vmem:[%s13628_s24 + $0x198] sm:$0xff] }
 0x1b0   : > { %v14654_v18 = vpop.permute.xlu0 %3810  ;;  %v14658_v12 = vpop.permute.xlu1 %3355 }
 0x1b1   : > { %19596 = vst [vmem:[#allocation2_spill] sm:$0xff] %v14654_v18  ;;  %3413 = vrot.lane.b32.xlu0 %v3165_v51, %s13578_s30  ;;  %3955 = vperm.xlu1 %12672, %v3063_v35   ;;  %v2966_v51 = vld [vmem:[%s13628_s24 + $0x188] sm:$0xff]  ;;  %v14670_v18 = vmul.f32 0.020408163, %v991_v52  ;;  %v3167_v35 = vmul.f32 %v3065_v16, %v14557_v62  ;;  %12808 = vrsqrt.f32 %v2765_v45  ;;  %v2768_v52 = vadd.f32 1e-05, %v2666_v4  ;;  %v12803_v45 = vpop.eup %12802  ;;  %v12164_v4 = vpop.f32.mrf.mxu1 }
 0x1b2   : > { %v12805_v29 = vpop.eup %12804  ;;  %v2668_v53 = vmax.f32 %v2566_v57, 0.0  ;;  %v2364_v2 = vmul.f32 0.020408163, %v12164_v4 }
 0x1b3   : > { %v2463_v62 = vmul.f32 %v14670_v18, %v14670_v18  ;;  %12810 = vrsqrt.f32 %v2768_v52 }
 0x1b4   : > { %v14662_v37 = vpop.permute.xlu0 %3353  ;;  %v14667_v25 = vpop.permute.xlu1 %3805  ;;  %v2770_v57 = vadd.f32 1e-05, %v2668_v53 }
 0x1b5   : > { %3970 = vperm.xlu0 %12673, %v3066_v43   ;;  %19597 = vst [vmem:[#allocation3_spill] sm:$0xff] %v14667_v25  ;;  %3419 = vrot.lane.b32.xlu1 %v3168_v60, %s13578_s30  ;;  %v3068_v43 = vmul.f32 %v12799_v58, %v2966_v51  ;;  %v2565_v25 = vsub.f32 %v2361_v31, %v2463_v62 }
 0x1b6   : > { %v3069_v31 = vmul.f32 %v12805_v29, %v2967_v21 }
 0x1b7   : > { %v3170_v58 = vmul.f32 %v3068_v43, %v14574_v59 }
 0x1b8   : > { %v14674_v26 = vpop.permute.xlu0 %3820  ;;  %v14680_v28 = vpop.permute.xlu1 %3359 }
 0x1b9   : > { %19598 = vst [vmem:[#allocation4_spill] sm:$0xff] %v14674_v26  ;;  %3417 = vrot.lane.b32.xlu0 %v3167_v35, %s13578_s30  ;;  %19599 = vst [vmem:[#allocation5_spill] sm:$0xff] %v14680_v28  ;;  %3965 = vperm.xlu1 %12672, %v3065_v16   ;;  %v14686_v26 = vmul.f32 0.020408163, %v11997_v1  ;;  %v2767_v35 = vadd.f32 1e-05, %v2665_v27  ;;  %v3169_v16 = vmul.f32 %v3067_v23, %v14582_v44 }
 0x1ba   : > { %v3070_v27 = vmul.f32 %v12803_v45, %v2968_v61  ;;  %v2667_v44 = vmax.f32 %v2565_v25, 0.0  ;;  %v12807_v45 = vpop.eup %12806 }
 0x1bb   : > { %v2466_v59 = vmul.f32 %v14686_v26, %v14686_v26  ;;  %12812 = vrsqrt.f32 %v2767_v35 }
 0x1bc   : > { %v14684_v60 = vpop.permute.xlu0 %3357  ;;  %v14689_v51 = vpop.permute.xlu1 %3815  ;;  %v2769_v25 = vadd.f32 1e-05, %v2667_v44  ;;  %12814 = vrsqrt.f32 %v2770_v57 }
 0x1bd   : > { %3980 = vperm.xlu0 %12673, %v3068_v43   ;;  %19600 = vst [vmem:[#allocation6_spill] sm:$0xff] %v14689_v51  ;;  %3423 = vrot.lane.b32.xlu1 %v3170_v58, %s13578_s30  ;;  %v1001_v43 = vpop.f32.mrf.mxu0  ;;  %v2568_v58 = vsub.f32 %v2364_v2, %v2466_v59  ;;  %v2970_v51 = vld [vmem:[%s13628_s24 + $0x1a8] sm:$0xff]  ;;  %v2969_v59 = vld [vmem:[%s13628_s24 + $0x1a0] sm:$0xff] }
 0x1be   : > { %v14702_v52 = vmul.f32 0.020408163, %v1001_v43  ;;  %v12809_v35 = vpop.eup %12808  ;;  %12816 = vrsqrt.f32 %v2769_v25 }
 0x1bf   : > { %v12000_v4 = vpop.f32.mrf.mxu0  ;;  %v2670_v2 = vmax.f32 %v2568_v58, 0.0 }
 0x1c0   : > { %v14694_v14 = vpop.permute.xlu0 %3830  ;;  %v14700_v62 = vpop.permute.xlu1 %3363  ;;  %v2465_v29 = vmul.f32 %v14702_v52, %v14702_v52 }
 0x1c1   : > { %19601 = vst [vmem:[#allocation7_spill] sm:$0xff] %v14694_v14  ;;  %3421 = vrot.lane.b32.xlu0 %v3169_v16, %s13578_s30  ;;  %19602 = vst [vmem:[#allocation8_spill] sm:$0xff] %v14700_v62  ;;  %3975 = vperm.xlu1 %12672, %v3067_v23   ;;  %v1984_v14 = vpop.f32.mrf.mxu1  ;;  %v3172_v16 = vmul.f32 %v3070_v27, %v14598_v9  ;;  %v3171_v23 = vmul.f32 %v3069_v31, %v14604_v32  ;;  %v1011_v43 = vpop.f32.mrf.mxu0  ;;  %v2772_v58 = vadd.f32 1e-05, %v2670_v2 }
 0x1c2   : > { %v2363_v21 = vmul.f32 0.020408163, %v1984_v14  ;;  %v3071_v32 = vmul.f32 %v12809_v35, %v2969_v59  ;;  %v14722_v14 = vmul.f32 0.020408163, %v1011_v43  ;;  %v12811_v57 = vpop.eup %12810 }
 0x1c3   : > { %v12167_v9 = vpop.f32.mrf.mxu1  ;;  %v12003_v28 = vpop.f32.mrf.mxu0  ;;  %12818 = vrsqrt.f32 %v2772_v58 }
 0x1c4   : > { %v14704_v1 = vpop.permute.xlu0 %3361  ;;  %v14707_v61 = vpop.permute.xlu1 %3825  ;;  %v3173_v35 = vmul.f32 %v3071_v32, %v14623_v3  ;;  %v14742_v3 = vmul.f32 0.020408163, %v12003_v28 }
 0x1c5   : > { %3990 = vperm.xlu0 %12673, %v3070_v27   ;;  %19603 = vst [vmem:[#allocation9_spill] sm:$0xff] %v14707_v61  ;;  %3427 = vrot.lane.b32.xlu1 %v3172_v16, %s13578_s30  ;;  %v3072_v27 = vmul.f32 %v12807_v45, %v2970_v51  ;;  %v14718_v61 = vmul.f32 0.020408163, %v12000_v4  ;;  %v2567_v16 = vsub.f32 %v2363_v21, %v2465_v29  ;;  %v1994_v62 = vpop.f32.mrf.mxu1  ;;  %v2366_v45 = vmul.f32 0.020408163, %v12167_v9  ;;  %v1021_v43 = vpop.f32.mrf.mxu0 }
 0x1c6   : > { %v2467_v21 = vmul.f32 %v14722_v14, %v14722_v14  ;;  %v2365_v59 = vmul.f32 0.020408163, %v1994_v62  ;;  %v14744_v62 = vmul.f32 0.020408163, %v1021_v43  ;;  %v2470_v28 = vmul.f32 %v14742_v3, %v14742_v3 }
 0x1c7   : > { %v3174_v51 = vmul.f32 %v3072_v27, %v14620_v11  ;;  %v2468_v4 = vmul.f32 %v14718_v61, %v14718_v61  ;;  %v2669_v29 = vmax.f32 %v2567_v16, 0.0  ;;  %v2971_v11 = vld [vmem:[%s13628_s24 + $0x1b0] sm:$0xff] }
 0x1c8   : > { %v14714_v53 = vpop.permute.xlu0 %3840  ;;  %v14720_v44 = vpop.permute.xlu1 %3367 }
 0x1c9   : > { %19604 = vst [vmem:[#allocation10_spill] sm:$0xff] %v14714_v53  ;;  %3425 = vrot.lane.b32.xlu0 %v3171_v23, %s13578_s30  ;;  %19605 = vst [vmem:[#allocation11_spill] sm:$0xff] %v14720_v44  ;;  %3985 = vperm.xlu1 %12672, %v3069_v31   ;;  %v2972_v31 = vld [vmem:[%s13628_s24 + $0x1b8] sm:$0xff]  ;;  %v12813_v23 = vpop.eup %12812  ;;  %v2771_v44 = vadd.f32 1e-05, %v2669_v29 }
 0x1ca   : > { %v3074_v9 = vmul.f32 %v12811_v57, %v2972_v31  ;;  %v3073_v16 = vmul.f32 %v12813_v23, %v2971_v11  ;;  %v12815_v57 = vpop.eup %12814 }
 0x1cb   : > { %v12817_v29 = vpop.eup %12816  ;;  %12820 = vrsqrt.f32 %v2771_v44 }
 0x1cc   : > { %v14724_v53 = vpop.permute.xlu0 %3365  ;;  %v14729_v25 = vpop.permute.xlu1 %3835  ;;  %v3175_v23 = vmul.f32 %v3073_v16, %v14648_v50 }
 0x1cd   : > { %19606 = vst [vmem:[#allocation12_spill] sm:$0xff] %v14724_v53  ;;  %4000 = vperm.xlu0 %12673, %v3072_v27   ;;  %19607 = vst [vmem:[#allocation13_spill] sm:$0xff] %v14729_v25  ;;  %3431 = vrot.lane.b32.xlu1 %v3174_v51, %s13578_s30  ;;  %v12170_v27 = vpop.f32.mrf.mxu1  ;;  %v2570_v25 = vsub.f32 %v2366_v45, %v2468_v4  ;;  %v2569_v53 = vsub.f32 %v2365_v59, %v2467_v21  ;;  %v2974_v45 = vld [vmem:[%s13628_s24 + $0x1c8] sm:$0xff] }
 0x1ce   : > { %v2469_v59 = vmul.f32 %v14744_v62, %v14744_v62  ;;  %v3076_v43 = vmul.f32 %v12815_v57, %v2974_v45  ;;  %v2976_v45 = vld [vmem:[%s13628_s24 + $0x1d8] sm:$0xff] }
 0x1cf   : > { %v2004_v58 = vpop.f32.mrf.mxu1  ;;  %v2672_v31 = vmax.f32 %v2570_v25, 0.0  ;;  %v2671_v21 = vmax.f32 %v2569_v53, 0.0  ;;  %v2973_v25 = vld [vmem:[%s13628_s24 + $0x1c0] sm:$0xff] }
 0x1d0   : > { %v14736_v2 = vpop.permute.xlu0 %3850  ;;  %v14740_v51 = vpop.permute.xlu1 %3371  ;;  %v3075_v50 = vmul.f32 %v12817_v29, %v2973_v25 }
 0x1d1   : > { %19608 = vst [vmem:[#allocation14_spill] sm:$0xff] %v14736_v2  ;;  %3429 = vrot.lane.b32.xlu0 %v3173_v35, %s13578_s30  ;;  %19609 = vst [vmem:[#allocation15_spill] sm:$0xff] %v14740_v51  ;;  %3995 = vperm.xlu1 %12672, %v3071_v32   ;;  %v3176_v35 = vmul.f32 %v3074_v9, %v14640_v6  ;;  %v2368_v32 = vmul.f32 0.020408163, %v12170_v27  ;;  %v2367_v6 = vmul.f32 0.020408163, %v2004_v58  ;;  %v12173_v58 = vpop.f32.mrf.mxu1 }
 0x1d2   : > { %v2773_v44 = vadd.f32 1e-05, %v2671_v21 }
 0x1d3   : > { %v2571_v53 = vsub.f32 %v2367_v6, %v2469_v59  ;;  %v2014_v59 = vpop.f32.mrf.mxu1 }
 0x1d4   : > { %v14746_v2 = vpop.permute.xlu0 %3369  ;;  %v14749_v4 = vpop.permute.xlu1 %3845 }
 0x1d5   : > { %19610 = vst [vmem:[#allocation16_spill] sm:$0xff] %v14746_v2  ;;  %4010 = vperm.xlu0 %12673, %v3074_v9   ;;  %19611 = vst [vmem:[#allocation17_spill] sm:$0xff] %v14749_v4  ;;  %3435 = vrot.lane.b32.xlu1 %v3176_v35, %s13578_s30  ;;  %v2774_v9 = vadd.f32 1e-05, %v2672_v31  ;;  %v12006_v4 = vpop.f32.mrf.mxu0  ;;  %v2572_v35 = vsub.f32 %v2368_v32, %v2470_v28  ;;  %v2370_v32 = vmul.f32 0.020408163, %v12173_v58 }
 0x1d6   : > { %v14764_v51 = vmul.f32 0.020408163, %v12006_v4  ;;  %v2673_v4 = vmax.f32 %v2571_v53, 0.0  ;;  %v2975_v58 = vld [vmem:[%s13628_s24 + $0x1d0] sm:$0xff] }
 0x1d7   : > { %12822 = vrsqrt.f32 %v2774_v9  ;;  %v1031_v57 = vpop.f32.mrf.mxu0 }
 0x1d8   : > { %v14758_v11 = vpop.permute.xlu0 %3860  ;;  %v14762_v27 = vpop.permute.xlu1 %3375  ;;  %12824 = vrsqrt.f32 %v2773_v44  ;;  %v2472_v28 = vmul.f32 %v14764_v51, %v14764_v51  ;;  %v2369_v44 = vmul.f32 0.020408163, %v2014_v59 }
 0x1d9   : > { %19612 = vst [vmem:[#allocation18_spill] sm:$0xff] %v14758_v11  ;;  %3433 = vrot.lane.b32.xlu0 %v3175_v23, %s13578_s30  ;;  %19613 = vst [vmem:[#allocation19_spill] sm:$0xff] %v14762_v27  ;;  %4005 = vperm.xlu1 %12672, %v3073_v16   ;;  %v3178_v11 = vmul.f32 %v3076_v43, %v14664_v8  ;;  %v12819_v23 = vpop.eup %12818  ;;  %v2674_v27 = vmax.f32 %v2572_v35, 0.0  ;;  %v3177_v16 = vmul.f32 %v3075_v50, %v14670_v18 }
 0x1da   : > { %v14778_v8 = vmul.f32 0.020408163, %v1031_v57  ;;  %v3078_v21 = vmul.f32 %v12819_v23, %v2976_v45  ;;  %v2775_v18 = vadd.f32 1e-05, %v2673_v4  ;;  %v2574_v25 = vsub.f32 %v2370_v32, %v2472_v28  ;;  %v12821_v9 = vpop.eup %12820  ;;  %v12009_v57 = vpop.f32.mrf.mxu0 }
 0x1db   : > { %v3077_v4 = vmul.f32 %v12821_v9, %v2975_v58  ;;  %v14796_v32 = vmul.f32 0.020408163, %v12009_v57 }
 0x1dc   : > { %v14766_v2 = vpop.permute.xlu0 %3373  ;;  %v14769_v31 = vpop.permute.xlu1 %3855  ;;  %v2471_v35 = vmul.f32 %v14778_v8, %v14778_v8  ;;  %v3180_v53 = vmul.f32 %v3078_v21, %v14686_v26  ;;  %v2676_v45 = vmax.f32 %v2574_v25, 0.0  ;;  %v19580_v26 = vmov 1  }
 0x1dd   : > { %4020 = vperm.xlu0 %12673, %v3076_v43   ;;  %19614 = vst [vmem:[#allocation20_spill] sm:$0xff] %v14769_v31  ;;  %3439 = vrot.lane.b32.xlu1 %v3178_v11, %s13578_s30  ;;  %v2776_v11 = vadd.f32 1e-05, %v2674_v27  ;;  %v12906_v27 = vld [vmem:[%s13628_s24 + $0x8] sm:$0xff]  ;;  %v3179_v9 = vmul.f32 %v3077_v4, %v14702_v52  ;;  %v2474_v58 = vmul.f32 %v14796_v32, %v14796_v32  ;;  %v19621_v31 = vmov 1  }
 0x1de   : > { %v2573_v28 = vsub.f32 %v2369_v44, %v2471_v35  ;;  %v19622_v52 = vmov 0  }
 0x1df   : > { %12826 = vrsqrt.f32 %v2776_v11  ;;  %v1041_v11 = vpop.f32.mrf.mxu0 }
 0x1e0   : > { %v14776_v29 = vpop.permute.xlu0 %3870  ;;  %v14781_v6 = vpop.permute.xlu1 %3379  ;;  %12828 = vrsqrt.f32 %v2775_v18  ;;  %v2778_v18 = vadd.f32 1e-05, %v2676_v45  ;;  %v2675_v44 = vmax.f32 %v2573_v28, 0.0 }
 0x1e1   : > { %19615 = vst [vmem:[#allocation21_spill] sm:$0xff] %v14776_v29  ;;  %3437 = vrot.lane.b32.xlu0 %v3177_v16, %s13578_s30  ;;  %19616 = vst [vmem:[#allocation22_spill] sm:$0xff] %v14781_v6  ;;  %4015 = vperm.xlu1 %12672, %v3075_v50   ;;  %v3632_v50 = vsub.f32 %v12906_v27, %v14500_v33  ;;  %v2978_v33 = vld [vmem:[%s13628_s24 + $0x1e8] sm:$0xff]  ;;  %v2977_v27 = vld [vmem:[%s13628_s24 + $0x1e0] sm:$0xff] }
 0x1e2   : > { %12830 = vrsqrt.f32 %v2778_v18 }
 0x1e4   : > { %v14783_v43 = vpop.permute.xlu0 %3377  ;;  %v14789_v23 = vpop.permute.xlu1 %3865 }
 0x1e5   : > { %4030 = vperm.xlu0 %12673, %v3078_v21   ;;  %19617 = vst [vmem:[#allocation23_spill] sm:$0xff] %v14789_v23  ;;  %3443 = vrot.lane.b32.xlu1 %v3180_v53, %s13578_s30  ;;  %v12823_v59 = vpop.eup %12822  ;;  %v12176_v53 = vpop.f32.mrf.mxu1 }
 0x1e6   : > { %v12825_v35 = vpop.eup %12824  ;;  %v2372_v57 = vmul.f32 0.020408163, %v12176_v53  ;;  %v3080_v45 = vmul.f32 %v12823_v59, %v2978_v33  ;;  %v2777_v53 = vadd.f32 1e-05, %v2675_v44 }
 0x1e7   : > { %v2024_v23 = vpop.f32.mrf.mxu1  ;;  %v3079_v28 = vmul.f32 %v12825_v35, %v2977_v27 }
 0x1e8   : > { %v14794_v16 = vpop.permute.xlu0 %3880  ;;  %v14799_v21 = vpop.permute.xlu1 %3383  ;;  %v3182_v59 = vmul.f32 %v3080_v45, %v14718_v61  ;;  %12832 = vrsqrt.f32 %v2777_v53 }
 0x1e9   : > { %19618 = vst [vmem:[#allocation24_spill] sm:$0xff] %v14794_v16  ;;  %12674 = vset.pattern.permute.xlu0 %v19580_v26  ;;  %19619 = vst [vmem:[#allocation25_spill] sm:$0xff] %v14799_v21  ;;  %4025 = vperm.xlu1 %12672, %v3077_v4   ;;  %v12907_v26 = vld [vmem:[%s13628_s24] sm:$0xff]  ;;  %v14810_v16 = vmul.f32 0.020408163, %v1041_v11  ;;  %v3181_v35 = vmul.f32 %v3079_v28, %v14722_v14 }
 0x1ea   : > { %4352 = vperm.xlu0 %12674, %v3632_v50   ;;  %v3631_v50 = vsub.f32 %v12907_v26, %v14522_v13  ;;  %v2576_v13 = vsub.f32 %v2372_v57, %v2474_v58  ;;  %v2371_v11 = vmul.f32 0.020408163, %v2024_v23  ;;  %v2980_v57 = vld [vmem:[%s13628_s24 + $0x1f8] sm:$0xff]  ;;  %v2979_v23 = vld [vmem:[%s13628_s24 + $0x1f0] sm:$0xff] }
 0x1eb   : > { %v2473_v26 = vmul.f32 %v14810_v16, %v14810_v16 }
 0x1ec   : > { %v14802_v25 = vpop.permute.xlu0 %3381  ;;  %v14812_v29 = vpop.permute.xlu1 %3875  ;;  %v2678_v58 = vmax.f32 %v2576_v13, 0.0 }
 0x1ed   : > { %19620 = vst [vmem:[#allocation26_spill] sm:$0xff] %v14812_v29  ;;  %12676 = vset.pattern.permute.xlu1 %v19621_v31  ;;  %v12827_v33 = vpop.eup %12826  ;;  %v12012_v29 = vpop.f32.mrf.mxu0  ;;  %v2575_v27 = vsub.f32 %v2371_v11, %v2473_v26 }
 0x1ee   : > { %3441 = vrot.lane.b32.xlu0 %v3179_v9, %s13578_s30  ;;  %4347 = vperm.xlu1 %12676, %v3631_v50   ;;  %v12829_v44 = vpop.eup %12828  ;;  %v14831_v50 = vmul.f32 0.020408163, %v12012_v29  ;;  %v3082_v14 = vmul.f32 %v12827_v33, %v2980_v57  ;;  %v2780_v13 = vadd.f32 1e-05, %v2678_v58  ;;  %v2982_v57 = vld [vmem:[%s13628_s24 + $0x208] sm:$0xff] }
 0x1ef   : > { %12675 = vset.pattern.permute.xlu0 %v19622_v52  ;;  %v3081_v53 = vmul.f32 %v12829_v44, %v2979_v23  ;;  %v12831_v58 = vpop.eup %12830 }
 0x1f0   : > { %v14817_v4 = vpop.permute.xlu0 %3890  ;;  %v14821_v9 = vpop.permute.xlu1 %3387  ;;  %v2476_v26 = vmul.f32 %v14831_v50, %v14831_v50  ;;  %12834 = vrsqrt.f32 %v2780_v13  ;;  %v3084_v13 = vmul.f32 %v12831_v58, %v2982_v57 }
 0x1f1   : > { %19623 = vst [vmem:[#allocation27_spill] sm:$0xff] %v14817_v4  ;;  %19624 = vst [vmem:[#allocation28_spill] sm:$0xff] %v14821_v9  ;;  %v2677_v9 = vmax.f32 %v2575_v27, 0.0  ;;  %v3183_v44 = vmul.f32 %v3081_v53, %v14744_v62 }
 0x1f2   : > { %4040 = vperm.xlu0 %12675, %v3080_v45   ;;  %3447 = vrot.lane.b32.xlu1 %v3182_v59, %s13578_s30  ;;  %v12179_v45 = vpop.f32.mrf.mxu1  ;;  %v1051_v59 = vpop.f32.mrf.mxu0 }
 0x1f3   : > { %12677 = vset.pattern.permute.xlu1 %v19622_v52  ;;  %v2374_v11 = vmul.f32 0.020408163, %v12179_v45  ;;  %v14844_v21 = vmul.f32 0.020408163, %v1051_v59  ;;  %v2779_v23 = vadd.f32 1e-05, %v2677_v9 }
 0x1f4   : > { %v14825_v18 = vpop.permute.xlu0 %3385  ;;  %v14833_v61 = vpop.permute.xlu1 %3885 }
 0x1f5   : > { %19625 = vst [vmem:[#allocation29_spill] sm:$0xff] %v14833_v61  ;;  %v12908_v61 = vld [vmem:[%s13628_s24 + $0x18] sm:$0xff]  ;;  %v2578_v27 = vsub.f32 %v2374_v11, %v2476_v26  ;;  %v2475_v59 = vmul.f32 %v14844_v21, %v14844_v21  ;;  %v12833_v9 = vpop.eup %12832  ;;  %12836 = vrsqrt.f32 %v2779_v23 }
 0x1f6   : > { %3445 = vrot.lane.b32.xlu0 %v3181_v35, %s13578_s30  ;;  %4035 = vperm.xlu1 %12677, %v3079_v28   ;;  %v3634_v35 = vsub.f32 %v12908_v61, %v14513_v54  ;;  %v2034_v28 = vpop.f32.mrf.mxu1  ;;  %v12909_v54 = vld [vmem:[%s13628_s24 + $0x10] sm:$0xff] }
 0x1f7   : > { %v3633_v61 = vsub.f32 %v12909_v54, %v14535_v24  ;;  %v2680_v26 = vmax.f32 %v2578_v27, 0.0  ;;  %v3184_v24 = vmul.f32 %v3082_v14, %v14742_v3 }
 0x1f8   : > { %v14836_v4 = vpop.permute.xlu0 %3900  ;;  %v14840_v29 = vpop.permute.xlu1 %3391 }
 0x1f9   : > { %19626 = vst [vmem:[#allocation30_spill] sm:$0xff] %v14836_v4  ;;  %19627 = vst [vmem:[#allocation31_spill] sm:$0xff] %v14840_v29  ;;  %v2373_v4 = vmul.f32 0.020408163, %v2034_v28  ;;  %v12910_v28 = vld [vmem:[%s13628_s24 + $0x20] sm:$0xff]  ;;  %v12182_v58 = vpop.f32.mrf.mxu1 }
 0x1fa   : > { %4050 = vperm.xlu0 %12675, %v3082_v14   ;;  %12678 = vset.pattern.permute.xlu1 %v19621_v31  ;;  %v2782_v27 = vadd.f32 1e-05, %v2680_v26  ;;  %v2376_v14 = vmul.f32 0.020408163, %v12182_v58  ;;  %v12911_v58 = vld [vmem:[%s13628_s24 + $0x28] sm:$0xff] }
 0x1fb   : > { %4362 = vperm.xlu1 %12678, %v3634_v35   ;;  %v12015_v35 = vpop.f32.mrf.mxu0 }
 0x1fc   : > { %v14847_v33 = vpop.permute.xlu0 %3389  ;;  %v14851_v45 = vpop.permute.xlu1 %3895  ;;  %v14863_v29 = vmul.f32 0.020408163, %v12015_v35  ;;  %12838 = vrsqrt.f32 %v2782_v27 }
 0x1fd   : > { %19628 = vst [vmem:[#allocation32_spill] sm:$0xff] %v14847_v33  ;;  %19629 = vst [vmem:[#allocation33_spill] sm:$0xff] %v14851_v45  ;;  %v2577_v45 = vsub.f32 %v2373_v4, %v2475_v59  ;;  %v1061_v57 = vpop.f32.mrf.mxu0  ;;  %v2044_v35 = vpop.f32.mrf.mxu1 }
 0x1fe   : > { %3449 = vrot.lane.b32.xlu0 %v3183_v44, %s13578_s30  ;;  %v2981_v44 = vld [vmem:[%s13628_s24 + $0x200] sm:$0xff]  ;;  %v2478_v3 = vmul.f32 %v14863_v29, %v14863_v29  ;;  %v12835_v26 = vpop.eup %12834 }
 0x1ff   : > { %4357 = vperm.xlu1 %12678, %v3633_v61   ;;  %v3083_v23 = vmul.f32 %v12833_v9, %v2981_v44  ;;  %v2679_v4 = vmax.f32 %v2577_v45, 0.0  ;;  %v12018_v27 = vpop.f32.mrf.mxu0 }
 0x200   : > { %v14858_v62 = vpop.permute.xlu0 %3910  ;;  %v14860_v11 = vpop.permute.xlu1 %3395 }
 0x201   : > { %19630 = vst [vmem:[#allocation34_spill] sm:$0xff] %v14858_v62  ;;  %19631 = vst [vmem:[#allocation35_spill] sm:$0xff] %v14860_v11  ;;  %v3635_v62 = vsub.f32 %v12910_v28, %v14552_v20  ;;  %v14877_v20 = vmul.f32 0.020408163, %v1061_v57  ;;  %v3185_v9 = vmul.f32 %v3083_v23, %v14778_v8  ;;  %v2781_v45 = vadd.f32 1e-05, %v2679_v4 }
 0x202   : > { %4060 = vperm.xlu0 %12675, %v3084_v13   ;;  %v2580_v28 = vsub.f32 %v2376_v14, %v2478_v3  ;;  %v12837_v3 = vpop.eup %12836  ;;  %v12912_v11 = vld [vmem:[%s13628_s24 + $0x30] sm:$0xff] }
 0x203   : > { %3451 = vrot.lane.b32.xlu1 %v3184_v24, %s13578_s30  ;;  %v2984_v24 = vld [vmem:[%s13628_s24 + $0x218] sm:$0xff]  ;;  %v2477_v57 = vmul.f32 %v14877_v20, %v14877_v20  ;;  %12840 = vrsqrt.f32 %v2781_v45 }
 0x204   : > { %v14866_v54 = vpop.permute.xlu0 %3393  ;;  %v14871_v61 = vpop.permute.xlu1 %3905  ;;  %12679 = vset.pattern.permute.xlu1 %v19622_v52  ;;  %v3086_v8 = vmul.f32 %v12835_v26, %v2984_v24  ;;  %v2682_v14 = vmax.f32 %v2580_v28, 0.0  ;;  %v3637_v26 = vsub.f32 %v12912_v11, %v14576_v48 }
 0x205   : > { %19632 = vst [vmem:[#allocation36_spill] sm:$0xff] %v14866_v54  ;;  %19633 = vst [vmem:[#allocation37_spill] sm:$0xff] %v14871_v61  ;;  %v3186_v61 = vmul.f32 %v3084_v13, %v14764_v51  ;;  %v1071_v24 = vpop.f32.mrf.mxu0 }
 0x206   : > { %12681 = vset.pattern.permute.xlu0 %v19621_v31  ;;  %v2784_v28 = vadd.f32 1e-05, %v2682_v14  ;;  %v14915_v11 = vmul.f32 0.020408163, %v1071_v24  ;;  %v2986_v14 = vld [vmem:[%s13628_s24 + $0x228] sm:$0xff] }
 0x207   : > { %4367 = vperm.xlu0 %12681, %v3635_v62   ;;  %4045 = vperm.xlu1 %12679, %v3081_v53   ;;  %v3636_v62 = vsub.f32 %v12911_v58, %v14548_v17  ;;  %v2983_v17 = vld [vmem:[%s13628_s24 + $0x210] sm:$0xff]  ;;  %v14897_v58 = vmul.f32 0.020408163, %v12018_v27 }
 0x208   : > { %v14879_v59 = vpop.permute.xlu0 %3920  ;;  %v14882_v44 = vpop.permute.xlu1 %3399  ;;  %v14907_v45 = vmul.f32 %v12837_v3, %v2983_v17  ;;  %12842 = vrsqrt.f32 %v2784_v28 }
 0x209   : > { %19634 = vst [vmem:[#allocation38_spill] sm:$0xff] %v14879_v59  ;;  %19635 = vst [vmem:[#allocation39_spill] sm:$0xff] %v14882_v44  ;;  %v2375_v59 = vmul.f32 0.020408163, %v2044_v35  ;;  %v12185_v44 = vpop.f32.mrf.mxu1  ;;  %v2480_v51 = vmul.f32 %v14897_v58, %v14897_v58  ;;  %v12839_v3 = vpop.eup %12838 }
 0x20a   : > { %v2378_v13 = vmul.f32 0.020408163, %v12185_v44  ;;  %v3187_v27 = vmul.f32 %v14907_v45, %v14810_v16 }
 0x20b   : > { %3453 = vrot.lane.b32.xlu0 %v3185_v9, %s13578_s30  ;;  %12680 = vset.pattern.permute.xlu1 %v19621_v31  ;;  %v2579_v9 = vsub.f32 %v2375_v59, %v2477_v57  ;;  %v12021_v57 = vpop.f32.mrf.mxu0 }
 0x20c   : > { %v14890_v53 = vpop.permute.xlu0 %3397  ;;  %12684 = vset.pattern.permute.xlu0 %v19622_v52  ;;  %v14894_v4 = vpop.permute.xlu1 %3915  ;;  %4372 = vperm.xlu1 %12680, %v3636_v62  }
 0x20d   : > { %19636 = vst [vmem:[#allocation40_spill] sm:$0xff] %v14890_v53  ;;  %19637 = vst [vmem:[#allocation41_spill] sm:$0xff] %v14894_v4  ;;  %v2681_v59 = vmax.f32 %v2579_v9, 0.0  ;;  %v2582_v9 = vsub.f32 %v2378_v13, %v2480_v51  ;;  %v1081_v16 = vpop.f32.mrf.mxu0  ;;  %v14935_v51 = vmul.f32 0.020408163, %v12021_v57  ;;  %v12914_v57 = vld [vmem:[%s13628_s24 + $0x40] sm:$0xff] }
 0x20f   : > { %4070 = vperm.xlu0 %12684, %v3086_v8   ;;  %v2783_v17 = vadd.f32 1e-05, %v2681_v59  ;;  %v14933_v59 = vmul.f32 %v12839_v3, %v2986_v14  ;;  %v2684_v13 = vmax.f32 %v2582_v9, 0.0  ;;  %v12024_v3 = vpop.f32.mrf.mxu0  ;;  %v3639_v14 = vsub.f32 %v12914_v57, %v14596_v30 }
 0x210   : > { %v14899_v35 = vpop.permute.xlu0 %3930  ;;  %v14904_v53 = vpop.permute.xlu1 %3403  ;;  %3455 = vrot.lane.b32.xlu1 %v3186_v61, %s13578_s30  ;;  %v14964_v57 = vmul.f32 0.020408163, %v12024_v3 }
 0x211   : > { %19638 = vst [vmem:[#allocation42_spill] sm:$0xff] %v14899_v35  ;;  %19639 = vst [vmem:[#allocation43_spill] sm:$0xff] %v14904_v53  ;;  %12682 = vset.pattern.permute.xlu1 %v19622_v52  ;;  %v2054_v61 = vpop.f32.mrf.mxu1  ;;  %12844 = vrsqrt.f32 %v2783_v17  ;;  %v2482_v17 = vmul.f32 %v14935_v51, %v14935_v51 }
 0x212   : > { %v2377_v35 = vmul.f32 0.020408163, %v2054_v61  ;;  %v2985_v61 = vld [vmem:[%s13628_s24 + $0x220] sm:$0xff] }
 0x213   : > { %12685 = vset.pattern.permute.xlu0 %v19621_v31 }
 0x214   : > { %v14913_v48 = vpop.permute.xlu0 %3401  ;;  %4377 = vperm.xlu0 %12685, %v3637_v26   ;;  %v14917_v62 = vpop.permute.xlu1 %3925  ;;  %4055 = vperm.xlu1 %12682, %v3083_v23   ;;  %v12913_v26 = vld [vmem:[%s13628_s24 + $0x38] sm:$0xff]  ;;  %v2479_v23 = vmul.f32 %v14915_v11, %v14915_v11 }
 0x215   : > { %19640 = vst [vmem:[#allocation44_spill] sm:$0xff] %v14913_v48  ;;  %19641 = vst [vmem:[#allocation45_spill] sm:$0xff] %v14917_v62  ;;  %v3638_v24 = vsub.f32 %v12913_v26, %v14572_v56  ;;  %v12188_v62 = vpop.f32.mrf.mxu1  ;;  %v12841_v56 = vpop.eup %12840 }
 0x216   : > { %v2581_v26 = vsub.f32 %v2377_v35, %v2479_v23  ;;  %v2380_v9 = vmul.f32 0.020408163, %v12188_v62  ;;  %v2786_v35 = vadd.f32 1e-05, %v2684_v13  ;;  %v1091_v62 = vpop.f32.mrf.mxu0 }
 0x217   : > { %v2064_v4 = vpop.f32.mrf.mxu1 }
 0x218   : > { %v14922_v44 = vpop.permute.xlu0 %3940  ;;  %3457 = vrot.lane.b32.xlu0 %v3187_v27, %s13578_s30  ;;  %v14930_v28 = vpop.permute.xlu1 %3407  ;;  %12683 = vset.pattern.permute.xlu1 %v19621_v31  ;;  %12846 = vrsqrt.f32 %v2786_v35 }
 0x219   : > { %19642 = vst [vmem:[#allocation46_spill] sm:$0xff] %v14922_v44  ;;  %12688 = vset.pattern.permute.xlu0 %v19622_v52  ;;  %19643 = vst [vmem:[#allocation47_spill] sm:$0xff] %v14930_v28  ;;  %4382 = vperm.xlu1 %12683, %v3638_v24   ;;  %v14941_v44 = vmul.f32 0.020408163, %v1081_v16  ;;  %v3188_v28 = vmul.f32 %v3086_v8, %v14796_v32  ;;  %v14951_v24 = vmul.f32 %v12841_v56, %v2985_v61  ;;  %v12191_v16 = vpop.f32.mrf.mxu1  ;;  %v12843_v61 = vpop.eup %12842 }
 0x21a   : > { %v2683_v32 = vmax.f32 %v2581_v26, 0.0  ;;  %v2379_v8 = vmul.f32 0.020408163, %v2064_v4  ;;  %v2584_v56 = vsub.f32 %v2380_v9, %v2482_v17  ;;  %v12915_v17 = vld [vmem:[%s13628_s24 + $0x48] sm:$0xff] }
 0x21b   : > { %v2481_v30 = vmul.f32 %v14941_v44, %v14941_v44  ;;  %v3189_v13 = vmul.f32 %v14951_v24, %v14844_v21  ;;  %v12027_v21 = vpop.f32.mrf.mxu0 }
 0x21c   : > { %v14937_v27 = vpop.permute.xlu0 %3405  ;;  %4080 = vperm.xlu0 %12688, %v14933_v59   ;;  %v14944_v53 = vpop.permute.xlu1 %3935  ;;  %v2785_v4 = vadd.f32 1e-05, %v2683_v32  ;;  %v2686_v3 = vmax.f32 %v2584_v56, 0.0  ;;  %v2484_v32 = vmul.f32 %v14964_v57, %v14964_v57 }
 0x21d   : > { %19644 = vst [vmem:[#allocation48_spill] sm:$0xff] %v14937_v27  ;;  %19645 = vst [vmem:[#allocation49_spill] sm:$0xff] %v14944_v53  ;;  %3459 = vrot.lane.b32.xlu1 %v3188_v28, %s13578_s30  ;;  %v2583_v53 = vsub.f32 %v2379_v8, %v2481_v30  ;;  %v2074_v27 = vpop.f32.mrf.mxu1  ;;  %v2382_v30 = vmul.f32 0.020408163, %v12191_v16  ;;  %v3190_v16 = vmul.f32 %v14933_v59, %v14831_v50 }
 0x21e   : > { %12686 = vset.pattern.permute.xlu1 %v19622_v52  ;;  %12848 = vrsqrt.f32 %v2785_v4 }
 0x21f   : > { %v12194_v56 = vpop.f32.mrf.mxu1  ;;  %v2586_v4 = vsub.f32 %v2382_v30, %v2484_v32 }
 0x220   : > { %v14953_v23 = vpop.permute.xlu0 %3950  ;;  %12689 = vset.pattern.permute.xlu0 %v19621_v31  ;;  %v14959_v28 = vpop.permute.xlu1 %3411 }
 0x221   : > { %19646 = vst [vmem:[#allocation50_spill] sm:$0xff] %v14953_v23  ;;  %4387 = vperm.xlu0 %12689, %v3639_v14   ;;  %19647 = vst [vmem:[#allocation51_spill] sm:$0xff] %v14959_v28  ;;  %4065 = vperm.xlu1 %12686, %v14907_v45   ;;  %v2988_v23 = vld [vmem:[%s13628_s24 + $0x238] sm:$0xff]  ;;  %v14969_v14 = vmul.f32 0.020408163, %v1091_v62  ;;  %v3640_v45 = vsub.f32 %v12915_v17, %v14592_v36  ;;  %v12845_v36 = vpop.eup %12844  ;;  %v2685_v62 = vmax.f32 %v2583_v53, 0.0  ;;  %v2084_v6 = vpop.f32.mrf.mxu1 }
 0x222   : > { %v14978_v35 = vmul.f32 %v12843_v61, %v2988_v23  ;;  %v2381_v17 = vmul.f32 0.020408163, %v2074_v27  ;;  %v2987_v23 = vld [vmem:[%s13628_s24 + $0x230] sm:$0xff]  ;;  %v1101_v61 = vpop.f32.mrf.mxu0  ;;  %v14994_v53 = vmul.f32 0.020408163, %v12027_v21  ;;  %v2688_v59 = vmax.f32 %v2586_v4, 0.0 }
 0x223   : > { %v12916_v28 = vld [vmem:[%s13628_s24 + $0x50] sm:$0xff]  ;;  %v14999_v48 = vmul.f32 %v12845_v36, %v2987_v23  ;;  %v2787_v54 = vadd.f32 1e-05, %v2685_v62  ;;  %v12197_v50 = vpop.f32.mrf.mxu1  ;;  %v2384_v21 = vmul.f32 0.020408163, %v12194_v56 }
 0x224   : > { %v14966_v26 = vpop.permute.xlu0 %3409  ;;  %v14974_v9 = vpop.permute.xlu1 %3945 }
 0x225   : > { %19648 = vst [vmem:[#allocation52_spill] sm:$0xff] %v14966_v26  ;;  %3461 = vrot.lane.b32.xlu0 %v3189_v13, %s13578_s30  ;;  %19649 = vst [vmem:[#allocation53_spill] sm:$0xff] %v14974_v9  ;;  %12687 = vset.pattern.permute.xlu1 %v19621_v31  ;;  %v2483_v13 = vmul.f32 %v14969_v14, %v14969_v14  ;;  %v12030_v26 = vpop.f32.mrf.mxu0  ;;  %v3191_v30 = vmul.f32 %v14999_v48, %v14877_v20  ;;  %v12847_v36 = vpop.eup %12846 }
 0x226   : > { %12692 = vset.pattern.permute.xlu0 %v19622_v52  ;;  %4392 = vperm.xlu1 %12687, %v3640_v45   ;;  %v2788_v45 = vadd.f32 1e-05, %v2686_v3  ;;  %v15017_v23 = vmul.f32 0.020408163, %v12030_v26  ;;  %v2094_v20 = vpop.f32.mrf.mxu1 }
 0x227   : > { %v2585_v33 = vsub.f32 %v2381_v17, %v2483_v13  ;;  %v1111_v3 = vpop.f32.mrf.mxu0  ;;  %v2383_v13 = vmul.f32 0.020408163, %v2084_v6  ;;  %v2990_v17 = vld [vmem:[%s13628_s24 + $0x248] sm:$0xff] }
 0x228   : > { %v14982_v8 = vpop.permute.xlu0 %3960  ;;  %v14988_v9 = vpop.permute.xlu1 %3415  ;;  %12850 = vrsqrt.f32 %v2788_v45  ;;  %v15030_v45 = vmul.f32 %v12847_v36, %v2990_v17 }
 0x229   : > { %19650 = vst [vmem:[#allocation54_spill] sm:$0xff] %v14982_v8  ;;  %4090 = vperm.xlu0 %12692, %v14978_v35   ;;  %19651 = vst [vmem:[#allocation55_spill] sm:$0xff] %v14988_v9  ;;  %v3641_v8 = vsub.f32 %v12916_v28, %v14618_v39  ;;  %v15001_v9 = vmul.f32 0.020408163, %v1101_v61  ;;  %v2486_v28 = vmul.f32 %v14994_v53, %v14994_v53  ;;  %12852 = vrsqrt.f32 %v2787_v54  ;;  %v12033_v26 = vpop.f32.mrf.mxu0  ;;  %v12200_v36 = vpop.f32.mrf.mxu1 }
 0x22a   : > { %3463 = vrot.lane.b32.xlu1 %v3190_v16, %s13578_s30  ;;  %v2687_v62 = vmax.f32 %v2585_v33, 0.0  ;;  %v15024_v16 = vmul.f32 0.020408163, %v1111_v3  ;;  %v2790_v33 = vadd.f32 1e-05, %v2688_v59  ;;  %v2488_v3 = vmul.f32 %v15017_v23, %v15017_v23  ;;  %v2989_v59 = vld [vmem:[%s13628_s24 + $0x240] sm:$0xff] }
 0x22b   : > { %12690 = vset.pattern.permute.xlu1 %v19622_v52  ;;  %v2588_v54 = vsub.f32 %v2384_v21, %v2486_v28  ;;  %v2385_v21 = vmul.f32 0.020408163, %v2094_v20  ;;  %v15049_v20 = vmul.f32 0.020408163, %v12033_v26 }
 0x22c   : > { %v14997_v27 = vpop.permute.xlu0 %3413  ;;  %v15005_v39 = vpop.permute.xlu1 %3955  ;;  %v2789_v4 = vadd.f32 1e-05, %v2687_v62  ;;  %v2487_v28 = vmul.f32 %v15024_v16, %v15024_v16  ;;  %v3192_v62 = vmul.f32 %v14978_v35, %v14863_v29  ;;  %12854 = vrsqrt.f32 %v2790_v33 }
 0x22d   : > { %12693 = vset.pattern.permute.xlu0 %v19621_v31  ;;  %19652 = vst [vmem:[#allocation56_spill] sm:$0xff] %v15005_v39 }
 0x22e   : > { %4397 = vperm.xlu0 %12693, %v3641_v8   ;;  %4075 = vperm.xlu1 %12690, %v14951_v24   ;;  %v2485_v8 = vmul.f32 %v15001_v9, %v15001_v9  ;;  %v12917_v24 = vld [vmem:[%s13628_s24 + $0x58] sm:$0xff]  ;;  %12856 = vrsqrt.f32 %v2789_v4  ;;  %v2589_v29 = vsub.f32 %v2385_v21, %v2487_v28  ;;  %v2388_v28 = vmul.f32 0.020408163, %v12200_v36 }
 0x22f   : > { %v3642_v56 = vsub.f32 %v12917_v24, %v14614_v49  ;;  %v12849_v49 = vpop.eup %12848  ;;  %v2386_v24 = vmul.f32 0.020408163, %v12197_v50 }
 0x230   : > { %v15010_v32 = vpop.permute.xlu0 %3970  ;;  %v15019_v61 = vpop.permute.xlu1 %3419  ;;  %v15047_v39 = vmul.f32 %v12849_v49, %v2989_v59  ;;  %v2490_v59 = vmul.f32 %v15049_v20, %v15049_v20 }
 0x231   : > { %19653 = vst [vmem:[#allocation57_spill] sm:$0xff] %v15010_v32  ;;  %19654 = vst [vmem:[#allocation58_spill] sm:$0xff] %v15019_v61  ;;  %v2590_v61 = vsub.f32 %v2386_v24, %v2488_v3 }
 0x232   : > { %3465 = vrot.lane.b32.xlu0 %v3191_v30, %s13578_s30  ;;  %12691 = vset.pattern.permute.xlu1 %v19621_v31  ;;  %v2587_v30 = vsub.f32 %v2383_v13, %v2485_v8  ;;  %v2690_v8 = vmax.f32 %v2588_v54, 0.0  ;;  %v1121_v13 = vpop.f32.mrf.mxu0  ;;  %v2104_v54 = vpop.f32.mrf.mxu1  ;;  %v3193_v49 = vmul.f32 %v15047_v39, %v14915_v11 }
 0x233   : > { %12696 = vset.pattern.permute.xlu0 %v19622_v52  ;;  %4402 = vperm.xlu1 %12691, %v3642_v56   ;;  %v12918_v56 = vld [vmem:[%s13628_s24 + $0x60] sm:$0xff]  ;;  %v15055_v35 = vmul.f32 0.020408163, %v1121_v13  ;;  %v2692_v24 = vmax.f32 %v2590_v61, 0.0  ;;  %v2691_v13 = vmax.f32 %v2589_v29, 0.0 }
 0x234   : > { %v15028_v6 = vpop.permute.xlu0 %3417  ;;  %v15034_v32 = vpop.permute.xlu1 %3965  ;;  %v3643_v50 = vsub.f32 %v12918_v56, %v14642_v38  ;;  %v2792_v33 = vadd.f32 1e-05, %v2690_v8  ;;  %v2991_v8 = vld [vmem:[%s13628_s24 + $0x250] sm:$0xff]  ;;  %v2387_v56 = vmul.f32 0.020408163, %v2104_v54 }
 0x235   : > { %19655 = vst [vmem:[#allocation59_spill] sm:$0xff] %v15028_v6  ;;  %19656 = vst [vmem:[#allocation60_spill] sm:$0xff] %v15034_v32  ;;  %v2689_v32 = vmax.f32 %v2587_v30, 0.0  ;;  %v12851_v38 = vpop.eup %12850  ;;  %v12036_v30 = vpop.f32.mrf.mxu0 }
 0x236   : > { %4100 = vperm.xlu0 %12696, %v15030_v45   ;;  %v12853_v3 = vpop.eup %12852  ;;  %12858 = vrsqrt.f32 %v2792_v33  ;;  %v12203_v54 = vpop.f32.mrf.mxu1  ;;  %v15081_v33 = vmul.f32 0.020408163, %v12036_v30  ;;  %v2994_v30 = vld [vmem:[%s13628_s24 + $0x268] sm:$0xff] }
 0x237   : > { %3467 = vrot.lane.b32.xlu1 %v3192_v62, %s13578_s30  ;;  %v2791_v26 = vadd.f32 1e-05, %v2689_v32  ;;  %v2992_v62 = vld [vmem:[%s13628_s24 + $0x258] sm:$0xff]  ;;  %v2489_v32 = vmul.f32 %v15055_v35, %v15055_v35  ;;  %v1131_v36 = vpop.f32.mrf.mxu0  ;;  %v15077_v29 = vmul.f32 %v12853_v3, %v2991_v8 }
 0x238   : > { %v15042_v17 = vpop.permute.xlu0 %3980  ;;  %v15051_v6 = vpop.permute.xlu1 %3423  ;;  %12694 = vset.pattern.permute.xlu1 %v19622_v52 }
 0x239   : > { %19657 = vst [vmem:[#allocation61_spill] sm:$0xff] %v15042_v17  ;;  %19658 = vst [vmem:[#allocation62_spill] sm:$0xff] %v15051_v6  ;;  %12860 = vrsqrt.f32 %v2791_v26  ;;  %v2794_v17 = vadd.f32 1e-05, %v2692_v24  ;;  %v12855_v3 = vpop.eup %12854  ;;  %v12039_v24 = vpop.f32.mrf.mxu0 }
 0x23a   : > { %12697 = vset.pattern.permute.xlu0 %v19621_v31 }
 0x23b   : > { %4407 = vperm.xlu0 %12697, %v3643_v50   ;;  %4085 = vperm.xlu1 %12694, %v14999_v48   ;;  %v12919_v48 = vld [vmem:[%s13628_s24 + $0x68] sm:$0xff]  ;;  %v3094_v50 = vmul.f32 %v12851_v38, %v2992_v62  ;;  %v3194_v38 = vmul.f32 %v15030_v45, %v14897_v58  ;;  %v15087_v62 = vmul.f32 0.020408163, %v1131_v36  ;;  %12862 = vrsqrt.f32 %v2794_v17 }
 0x23c   : > { %v15057_v4 = vpop.permute.xlu0 %3421  ;;  %v15064_v21 = vpop.permute.xlu1 %3975  ;;  %v3644_v11 = vsub.f32 %v12919_v48, %v14638_v41  ;;  %v2591_v41 = vsub.f32 %v2387_v56, %v2489_v32  ;;  %v2993_v56 = vld [vmem:[%s13628_s24 + $0x260] sm:$0xff]  ;;  %v2492_v58 = vmul.f32 %v15081_v33, %v15081_v33  ;;  %v3096_v36 = vmul.f32 %v12855_v3, %v2994_v30 }
 0x23d   : > { %19659 = vst [vmem:[#allocation63_spill] sm:$0xff] %v15057_v4  ;;  %19660 = vst [vmem:[#allocation64_spill] sm:$0xff] %v15064_v21  ;;  %v2592_v21 = vsub.f32 %v2388_v28, %v2490_v59  ;;  %v3195_v59 = vmul.f32 %v15077_v29, %v14941_v44  ;;  %v12857_v28 = vpop.eup %12856  ;;  %v2390_v44 = vmul.f32 0.020408163, %v12203_v54  ;;  %v2491_v17 = vmul.f32 %v15087_v62, %v15087_v62 }
 0x23e   : > { %v2693_v48 = vmax.f32 %v2591_v41, 0.0 }
 0x23f   : > { %3469 = vrot.lane.b32.xlu0 %v3193_v49, %s13578_s30  ;;  %12695 = vset.pattern.permute.xlu1 %v19621_v31  ;;  %v2793_v49 = vadd.f32 1e-05, %v2691_v13  ;;  %v2694_v8 = vmax.f32 %v2592_v21, 0.0  ;;  %v2114_v13 = vpop.f32.mrf.mxu1  ;;  %v2594_v54 = vsub.f32 %v2390_v44, %v2492_v58 }
 0x240   : > { %v15073_v61 = vpop.permute.xlu0 %3990  ;;  %12699 = vset.pattern.permute.xlu0 %v19622_v52  ;;  %v15079_v6 = vpop.permute.xlu1 %3427  ;;  %4412 = vperm.xlu1 %12695, %v3644_v11   ;;  %v2389_v21 = vmul.f32 0.020408163, %v2114_v13  ;;  %v3196_v13 = vmul.f32 %v3094_v50, %v14935_v51 }
 0x241   : > { %19661 = vst [vmem:[#allocation65_spill] sm:$0xff] %v15073_v61  ;;  %19662 = vst [vmem:[#allocation66_spill] sm:$0xff] %v15079_v6  ;;  %12864 = vrsqrt.f32 %v2793_v49  ;;  %v1141_v11 = vpop.f32.mrf.mxu0  ;;  %v2796_v49 = vadd.f32 1e-05, %v2694_v8  ;;  %v12206_v41 = vpop.f32.mrf.mxu1  ;;  %v2696_v51 = vmax.f32 %v2594_v54, 0.0  ;;  %v2997_v6 = vld [vmem:[%s13628_s24 + $0x280] sm:$0xff] }
 0x242   : > { %v15114_v30 = vmul.f32 0.020408163, %v1141_v11  ;;  %v2392_v58 = vmul.f32 0.020408163, %v12206_v41 }
 0x243   : > { %4110 = vperm.xlu0 %12699, %v3094_v50   ;;  %v12859_v3 = vpop.eup %12858  ;;  %v12042_v8 = vpop.f32.mrf.mxu0  ;;  %12866 = vrsqrt.f32 %v2796_v49 }
 0x244   : > { %v15083_v26 = vpop.permute.xlu0 %3425  ;;  %v15091_v32 = vpop.permute.xlu1 %3985  ;;  %3471 = vrot.lane.b32.xlu1 %v3194_v38, %s13578_s30  ;;  %v15104_v38 = vmul.f32 %v12857_v28, %v2993_v56  ;;  %v2593_v28 = vsub.f32 %v2389_v21, %v2491_v17  ;;  %v2493_v21 = vmul.f32 %v15114_v30, %v15114_v30 }
 0x245   : > { %19663 = vst [vmem:[#allocation67_spill] sm:$0xff] %v15083_v26  ;;  %19664 = vst [vmem:[#allocation68_spill] sm:$0xff] %v15091_v32  ;;  %12698 = vset.pattern.permute.xlu1 %v19622_v52  ;;  %v2996_v32 = vld [vmem:[%s13628_s24 + $0x278] sm:$0xff]  ;;  %v1151_v49 = vpop.f32.mrf.mxu0 }
 0x246   : > { %v3197_v56 = vmul.f32 %v15104_v38, %v14969_v14  ;;  %v3098_v14 = vmul.f32 %v12859_v3, %v2996_v32  ;;  %v2695_v17 = vmax.f32 %v2593_v28, 0.0  ;;  %v15135_v3 = vmul.f32 0.020408163, %v12042_v8 }
 0x247   : > { %3473 = vrot.lane.b32.xlu0 %v3195_v59, %s13578_s30  ;;  %v2795_v59 = vadd.f32 1e-05, %v2693_v48  ;;  %v2124_v48 = vpop.f32.mrf.mxu1 }
 0x248   : > { %v15100_v45 = vpop.permute.xlu0 %4000  ;;  %v15106_v52 = vpop.permute.xlu1 %3431  ;;  %4095 = vperm.xlu1 %12698, %v15047_v39   ;;  %v2391_v11 = vmul.f32 0.020408163, %v2124_v48  ;;  %v2998_v48 = vld [vmem:[%s13628_s24 + $0x288] sm:$0xff] }
 0x249   : > { %19665 = vst [vmem:[#allocation69_spill] sm:$0xff] %v15100_v45  ;;  %19666 = vst [vmem:[#allocation70_spill] sm:$0xff] %v15106_v52  ;;  %v15109_v45 = vmul.f32 0.020408163, %v12039_v24  ;;  %v12861_v39 = vpop.eup %12860  ;;  %v2995_v24 = vld [vmem:[%s13628_s24 + $0x270] sm:$0xff]  ;;  %12868 = vrsqrt.f32 %v2795_v59  ;;  %v12209_v59 = vpop.f32.mrf.mxu1 }
 0x24a   : > { %v12863_v54 = vpop.eup %12862 }
 0x24b   : > { %4120 = vperm.xlu0 %12699, %v3096_v36   ;;  %v2494_v50 = vmul.f32 %v15109_v45, %v15109_v45  ;;  %v2134_v26 = vpop.f32.mrf.mxu1  ;;  %v3100_v8 = vmul.f32 %v12863_v54, %v2998_v48  ;;  %v3200_v48 = vmul.f32 %v3098_v14, %v14994_v53 }
 0x24c   : > { %v15111_v61 = vpop.permute.xlu0 %3429  ;;  %v15119_v52 = vpop.permute.xlu1 %3995  ;;  %3475 = vrot.lane.b32.xlu1 %v3196_v13, %s13578_s30  ;;  %v15130_v13 = vmul.f32 %v12861_v39, %v2995_v24  ;;  %v2797_v39 = vadd.f32 1e-05, %v2695_v17  ;;  %v2595_v24 = vsub.f32 %v2391_v11, %v2493_v21  ;;  %v2393_v17 = vmul.f32 0.020408163, %v2134_v26 }
 0x24d   : > { %19667 = vst [vmem:[#allocation71_spill] sm:$0xff] %v15111_v61  ;;  %19668 = vst [vmem:[#allocation72_spill] sm:$0xff] %v15119_v52  ;;  %v2596_v32 = vsub.f32 %v2392_v58, %v2494_v50  ;;  %v3198_v52 = vmul.f32 %v3096_v36, %v14964_v57  ;;  %v15142_v61 = vmul.f32 0.020408163, %v1151_v49  ;;  %v2496_v36 = vmul.f32 %v15135_v3, %v15135_v3  ;;  %v12212_v11 = vpop.f32.mrf.mxu1 }
 0x24e   : > { %v12865_v41 = vpop.eup %12864  ;;  %v2394_v50 = vmul.f32 0.020408163, %v12209_v59 }
 0x24f   : > { %3477 = vrot.lane.b32.xlu0 %v3197_v56, %s13578_s30  ;;  %v2698_v57 = vmax.f32 %v2596_v32, 0.0 }
 0x250   : > { %v15126_v44 = vpop.permute.xlu0 %4010  ;;  %v15132_v56 = vpop.permute.xlu1 %3435  ;;  %4105 = vperm.xlu1 %12698, %v15077_v29   ;;  %v3199_v29 = vmul.f32 %v15130_v13, %v15001_v9  ;;  %v2697_v9 = vmax.f32 %v2595_v24, 0.0  ;;  %v2598_v54 = vsub.f32 %v2394_v50, %v2496_v36  ;;  %v2999_v24 = vld [vmem:[%s13628_s24 + $0x290] sm:$0xff]  ;;  %v2396_v36 = vmul.f32 0.020408163, %v12212_v11 }
 0x251   : > { %19669 = vst [vmem:[#allocation73_spill] sm:$0xff] %v15126_v44  ;;  %19670 = vst [vmem:[#allocation74_spill] sm:$0xff] %v15132_v56  ;;  %v2798_v44 = vadd.f32 1e-05, %v2696_v51  ;;  %v12045_v56 = vpop.f32.mrf.mxu0  ;;  %v15150_v51 = vmul.f32 %v12865_v41, %v2997_v6  ;;  %v2800_v59 = vadd.f32 1e-05, %v2698_v57 }
 0x252   : > { %v15161_v41 = vmul.f32 0.020408163, %v12045_v56  ;;  %v2799_v26 = vadd.f32 1e-05, %v2697_v9  ;;  %v2700_v53 = vmax.f32 %v2598_v54, 0.0 }
 0x253   : > { %4130 = vperm.xlu0 %12699, %v3098_v14   ;;  %12870 = vrsqrt.f32 %v2798_v44  ;;  %v1161_v21 = vpop.f32.mrf.mxu0  ;;  %v12867_v44 = vpop.eup %12866 }
 0x254   : > { %v15137_v28 = vpop.permute.xlu0 %3433  ;;  %v15146_v4 = vpop.permute.xlu1 %4005  ;;  %3479 = vrot.lane.b32.xlu1 %v3198_v52, %s13578_s30  ;;  %12872 = vrsqrt.f32 %v2797_v39  ;;  %v2495_v52 = vmul.f32 %v15142_v61, %v15142_v61  ;;  %v3000_v39 = vld [vmem:[%s13628_s24 + $0x298] sm:$0xff]  ;;  %v2498_v14 = vmul.f32 %v15161_v41, %v15161_v41 }
 0x255   : > { %19671 = vst [vmem:[#allocation75_spill] sm:$0xff] %v15137_v28  ;;  %19672 = vst [vmem:[#allocation76_spill] sm:$0xff] %v15146_v4  ;;  %v12048_v4 = vpop.f32.mrf.mxu0  ;;  %v3102_v56 = vmul.f32 %v12867_v44, %v3000_v39  ;;  %12874 = vrsqrt.f32 %v2800_v59  ;;  %v12920_v44 = vld [vmem:[%s19575_s3 + $0x8] sm:$0xff]  ;;  %v2802_v59 = vadd.f32 1e-05, %v2700_v53  ;;  %v3202_v39 = vmul.f32 %v3100_v8, %v15017_v23 }
 0x256   : > { %v12869_v49 = vpop.eup %12868  ;;  %12876 = vrsqrt.f32 %v2799_v26  ;;  %v4244_v11 = vmul.f32 %v12920_v44, %v14502_v22  ;;  %v2600_v54 = vsub.f32 %v2396_v36, %v2498_v14  ;;  %v3002_v14 = vld [vmem:[%s13628_s24 + $0x2a8] sm:$0xff]  ;;  %v15203_v36 = vld [vmem:[%s13628_s24 + $0x2a0] sm:$0xff] }
 0x257   : > { %3481 = vrot.lane.b32.xlu0 %v3199_v29, %s13578_s30  ;;  %v2597_v29 = vsub.f32 %v2393_v17, %v2495_v52  ;;  %v15176_v57 = vmul.f32 %v12869_v49, %v2999_v24  ;;  %v15191_v49 = vmul.f32 0.020408163, %v12048_v4  ;;  %19678 = vst [vmem:[#allocation82_spill] sm:$0xff] %v15203_v36  ;;  %12878 = vrsqrt.f32 %v2802_v59 }
 0x258   : > { %v15154_v58 = vpop.permute.xlu0 %4020  ;;  %v15158_v6 = vpop.permute.xlu1 %3439  ;;  %4115 = vperm.xlu1 %12698, %v15104_v38   ;;  %v3201_v38 = vmul.f32 %v15150_v51, %v15024_v16 }
 0x259   : > { %19673 = vst [vmem:[#allocation77_spill] sm:$0xff] %v15154_v58  ;;  %19674 = vst [vmem:[#allocation78_spill] sm:$0xff] %v15158_v6  ;;  %v15168_v58 = vmul.f32 0.020408163, %v1161_v21  ;;  %v2144_v6 = vpop.f32.mrf.mxu1  ;;  %v2699_v16 = vmax.f32 %v2597_v29, 0.0  ;;  %v1171_v21 = vpop.f32.mrf.mxu0  ;;  %v3203_v22 = vmul.f32 %v15176_v57, %v15055_v35  ;;  %v2500_v23 = vmul.f32 %v15191_v49, %v15191_v49 }
 0x25a   : > { %v2395_v52 = vmul.f32 0.020408163, %v2144_v6  ;;  %v15193_v6 = vmul.f32 0.020408163, %v1171_v21 }
 0x25b   : > { %4140 = vperm.xlu0 %12699, %v3100_v8   ;;  %v2497_v9 = vmul.f32 %v15168_v58, %v15168_v58  ;;  %v12215_v17 = vpop.f32.mrf.mxu1  ;;  %v12051_v24 = vpop.f32.mrf.mxu0 }
 0x25c   : > { %v15163_v32 = vpop.permute.xlu0 %3437  ;;  %v15172_v28 = vpop.permute.xlu1 %4015  ;;  %3483 = vrot.lane.b32.xlu1 %v3200_v48, %s13578_s30  ;;  %v2398_v8 = vmul.f32 0.020408163, %v12215_v17  ;;  %v2499_v35 = vmul.f32 %v15193_v6, %v15193_v6  ;;  %v12921_v17 = vld [vmem:[%s19575_s3] sm:$0xff] }
 0x25d   : > { %19675 = vst [vmem:[#allocation79_spill] sm:$0xff] %v15172_v28  ;;  %v2599_v29 = vsub.f32 %v2395_v52, %v2497_v9  ;;  %v4243_v59 = vmul.f32 %v12921_v17, %v14510_v7 }
 0x25f   : > { %3485 = vrot.lane.b32.xlu0 %v3201_v38, %s13578_s30  ;;  %v2154_v38 = vpop.f32.mrf.mxu1  ;;  %v2701_v52 = vmax.f32 %v2599_v29, 0.0 }
 0x260   : > { %v15180_v50 = vpop.permute.xlu0 %4030  ;;  %v15184_v48 = vpop.permute.xlu1 %3443  ;;  %4125 = vperm.xlu1 %12698, %v15130_v13   ;;  %v2801_v13 = vadd.f32 1e-05, %v2699_v16  ;;  %v2702_v16 = vmax.f32 %v2600_v54, 0.0  ;;  %v2397_v9 = vmul.f32 0.020408163, %v2154_v38  ;;  %v2602_v38 = vsub.f32 %v2398_v8, %v2500_v23 }
 0x261   : > { %19676 = vst [vmem:[#allocation80_spill] sm:$0xff] %v15180_v50  ;;  %v12871_v26 = vpop.eup %12870  ;;  %v12218_v54 = vpop.f32.mrf.mxu1  ;;  %v2803_v17 = vadd.f32 1e-05, %v2701_v52 }
 0x262   : > { %v12873_v4 = vpop.eup %12872  ;;  %12880 = vrsqrt.f32 %v2801_v13  ;;  %v15222_v13 = vmul.f32 0.020408163, %v12051_v24  ;;  %v2704_v8 = vmax.f32 %v2602_v38, 0.0 }
 0x263   : > { %4150 = vperm.xlu0 %12699, %v3102_v56   ;;  %v12875_v7 = vpop.eup %12874  ;;  %v2164_v23 = vpop.f32.mrf.mxu1 }
 0x264   : > { %v15198_v44 = vpop.permute.xlu1 %4025  ;;  %3487 = vrot.lane.b32.xlu1 %v3202_v39, %s13578_s30  ;;  %v15215_v39 = vmul.f32 %v12873_v4, %v15203_v36  ;;  %v2601_v4 = vsub.f32 %v2397_v9, %v2499_v35  ;;  %v12877_v24 = vpop.eup %12876  ;;  %v2400_v9 = vmul.f32 0.020408163, %v12218_v54 }
 0x265   : > { %v4353_v50 = vpop.permute.xlu0 %4352  ;;  %19677 = vst [vmem:[#allocation81_spill] sm:$0xff] %v15198_v44 }
 0x266   : > { %v4856_v53 = vadd.f32 %v4353_v50, %v4244_v11  ;;  %v1181_v50 = vpop.f32.mrf.mxu0  ;;  %v3104_v11 = vmul.f32 %v12871_v26, %v3002_v14  ;;  %v3204_v26 = vmul.f32 %v3102_v56, %v15049_v20  ;;  %v15235_v20 = vld [vmem:[%s13628_s24 + $0x2b8] sm:$0xff]  ;;  %v15238_v56 = vld [vmem:[%s13628_s24 + $0x2b0] sm:$0xff] }
 0x267   : > { %3489 = vrot.lane.b32.xlu0 %v3203_v22, %s13578_s30  ;;  %v2804_v22 = vadd.f32 1e-05, %v2702_v16  ;;  %19680 = vst [vmem:[#allocation84_spill] sm:$0xff] %v15235_v20  ;;  %19681 = vst [vmem:[#allocation85_spill] sm:$0xff] %v15238_v56  ;;  %v2502_v16 = vmul.f32 %v15222_v13, %v15222_v13  ;;  %v3106_v38 = vmul.f32 %v12875_v7, %v15235_v20  ;;  %v12879_v20 = vpop.eup %12878 }
 0x268   : > { %4958 = vst.msk [vmem:[%s13633_s27 + $0x8] sm:$0xff] %vm334_vm1, %v4856_v53  ;;  %4135 = vperm.xlu1 %12698, %v15150_v51   ;;  %v15225_v53 = vmul.f32 0.020408163, %v1181_v50  ;;  %v12054_v44 = vpop.f32.mrf.mxu0  ;;  %v3205_v51 = vmul.f32 %v15215_v39, %v15087_v62  ;;  %v2703_v62 = vmax.f32 %v2601_v4, 0.0 }
 0x269   : > { %v15212_v21 = vpop.permute.xlu0 %3441  ;;  %v4348_v29 = vpop.permute.xlu1 %4347  ;;  %12882 = vrsqrt.f32 %v2804_v22  ;;  %v15254_v22 = vmul.f32 0.020408163, %v12054_v44 }
 0x26a   : > { %v4855_v14 = vadd.f32 %v4348_v29, %v4243_v59  ;;  %v2501_v52 = vmul.f32 %v15225_v53, %v15225_v53  ;;  %v1191_v50 = vpop.f32.mrf.mxu0  ;;  %12884 = vrsqrt.f32 %v2803_v17  ;;  %v2399_v59 = vmul.f32 0.020408163, %v2164_v23  ;;  %v12221_v29 = vpop.f32.mrf.mxu1 }
 0x26b   : > { %4160 = vperm.xlu0 %12699, %v3104_v11   ;;  %v2805_v4 = vadd.f32 1e-05, %v2703_v62  ;;  %v2604_v17 = vsub.f32 %v2400_v9, %v2502_v16  ;;  %v15258_v23 = vmul.f32 0.020408163, %v1191_v50  ;;  %v15270_v62 = vld [vmem:[%s13628_s24 + $0x2c0] sm:$0xff]  ;;  %v2504_v16 = vmul.f32 %v15254_v22, %v15254_v22 }
 0x26c   : > { %4957 = vst.msk [vmem:[%s13633_s27] sm:$0xff] %vm334_vm1, %v4855_v14  ;;  %3491 = vrot.lane.b32.xlu1 %v3204_v26, %s13578_s30  ;;  %v15251_v14 = vmul.f32 %v12877_v24, %v15238_v56  ;;  %v12057_v7 = vpop.f32.mrf.mxu0  ;;  %v2603_v24 = vsub.f32 %v2399_v59, %v2501_v52  ;;  %v2174_v56 = vpop.f32.mrf.mxu1  ;;  %v2402_v9 = vmul.f32 0.020408163, %v12221_v29 }
 0x26d   : > { %v15227_v28 = vpop.permute.xlu0 %4040  ;;  %v15242_v35 = vpop.permute.xlu1 %3447  ;;  %v2401_v52 = vmul.f32 0.020408163, %v2174_v56 }
 0x26e   : > { %19679 = vst [vmem:[#allocation83_spill] sm:$0xff] %v15227_v28  ;;  %19682 = vst [vmem:[#allocation86_spill] sm:$0xff] %v15242_v35  ;;  %v3206_v28 = vmul.f32 %v3104_v11, %v15081_v33  ;;  %v12922_v33 = vld [vmem:[%s19575_s3 + $0x18] sm:$0xff]  ;;  %v2705_v59 = vmax.f32 %v2603_v24, 0.0  ;;  %v12224_v29 = vpop.f32.mrf.mxu1  ;;  %v15292_v24 = vmul.f32 0.020408163, %v12057_v7 }
 0x26f   : > { %3493 = vrot.lane.b32.xlu0 %v3205_v51, %s13578_s30  ;;  %v2806_v51 = vadd.f32 1e-05, %v2704_v8  ;;  %v12881_v44 = vpop.eup %12880  ;;  %v15267_v8 = vld [vmem:[%s13628_s24 + $0x2c8] sm:$0xff]  ;;  %v4246_v11 = vmul.f32 %v12922_v33, %v14530_v63 }
 0x270   : > { %4145 = vperm.xlu1 %12698, %v15176_v57   ;;  %v3207_v57 = vmul.f32 %v15251_v14, %v15114_v30  ;;  %19685 = vst [vmem:[#allocation89_spill] sm:$0xff] %v15267_v8  ;;  %v2706_v30 = vmax.f32 %v2604_v17, 0.0  ;;  %v3108_v63 = vmul.f32 %v12879_v20, %v15267_v8  ;;  %v2606_v17 = vsub.f32 %v2402_v9, %v2504_v16  ;;  %v2184_v9 = vpop.f32.mrf.mxu1 }
 0x271   : > { %v15247_v26 = vpop.permute.xlu0 %3445  ;;  %v15256_v54 = vpop.permute.xlu1 %4035  ;;  %12886 = vrsqrt.f32 %v2806_v51  ;;  %v15285_v51 = vmul.f32 %v12881_v44, %v15270_v62 }
 0x272   : > { %19683 = vst [vmem:[#allocation87_spill] sm:$0xff] %v15256_v54  ;;  %12888 = vrsqrt.f32 %v2805_v4  ;;  %v1201_v54 = vpop.f32.mrf.mxu0  ;;  %v12923_v4 = vld [vmem:[%s19575_s3 + $0x10] sm:$0xff]  ;;  %v2808_v20 = vadd.f32 1e-05, %v2706_v30  ;;  %v15305_v30 = vld [vmem:[%s13628_s24 + $0x2d8] sm:$0xff] }
 0x273   : > { %4170 = vperm.xlu0 %12699, %v3106_v38   ;;  %v4245_v56 = vmul.f32 %v12923_v4, %v14526_v42  ;;  %v15296_v44 = vmul.f32 0.020408163, %v1201_v54  ;;  %19687 = vst [vmem:[#allocation91_spill] sm:$0xff] %v15305_v30  ;;  %v15308_v54 = vld [vmem:[%s13628_s24 + $0x2d0] sm:$0xff] }
 0x274   : > { %3495 = vrot.lane.b32.xlu1 %v3206_v28, %s13578_s30  ;;  %v2503_v28 = vmul.f32 %v15258_v23, %v15258_v23  ;;  %v12060_v7 = vpop.f32.mrf.mxu0  ;;  %19688 = vst [vmem:[#allocation92_spill] sm:$0xff] %v15308_v54  ;;  %12890 = vrsqrt.f32 %v2808_v20 }
 0x275   : > { %v15261_v36 = vpop.permute.xlu0 %4050  ;;  %v2505_v4 = vmul.f32 %v15296_v44, %v15296_v44 }
 0x276   : > { %19684 = vst [vmem:[#allocation88_spill] sm:$0xff] %v15261_v36  ;;  %v4363_v50 = vpop.permute.xlu1 %4362 }
 0x277   : > { %3497 = vrot.lane.b32.xlu0 %v3207_v57, %s13578_s30  ;;  %v4858_v36 = vadd.f32 %v4363_v50, %v4246_v11  ;;  %v2605_v57 = vsub.f32 %v2401_v52, %v2503_v28  ;;  %v12883_v11 = vpop.eup %12882  ;;  %v2807_v50 = vadd.f32 1e-05, %v2705_v59  ;;  %v2708_v28 = vmax.f32 %v2606_v17, 0.0 }
 0x278   : > { %4155 = vperm.xlu1 %12698, %v15215_v39   ;;  %v3208_v39 = vmul.f32 %v3106_v38, %v15109_v45  ;;  %v12885_v16 = vpop.eup %12884  ;;  %v12924_v45 = vld [vmem:[%s19575_s3 + $0x20] sm:$0xff]  ;;  %v2506_v52 = vmul.f32 %v15292_v24, %v15292_v24  ;;  %v2404_v59 = vmul.f32 0.020408163, %v12224_v29  ;;  %v15328_v29 = vmul.f32 0.020408163, %v12060_v7 }
 0x279   : > { %v15281_v35 = vpop.permute.xlu0 %3449  ;;  %4960 = vst.msk [vmem:[%s13633_s27 + $0x18] sm:$0xff] %vm334_vm1, %v4858_v36  ;;  %v3209_v36 = vmul.f32 %v15285_v51, %v15142_v61  ;;  %v4247_v38 = vmul.f32 %v12924_v45, %v14559_v55  ;;  %v2707_v61 = vmax.f32 %v2605_v57, 0.0  ;;  %12892 = vrsqrt.f32 %v2807_v50 }
 0x27a   : > { %v4358_v33 = vpop.permute.xlu1 %4357  ;;  %v3110_v55 = vmul.f32 %v12883_v11, %v15305_v30  ;;  %v15325_v17 = vmul.f32 %v12885_v16, %v15308_v54  ;;  %v2810_v57 = vadd.f32 1e-05, %v2708_v28  ;;  %v2608_v45 = vsub.f32 %v2404_v59, %v2506_v52  ;;  %v15343_v28 = vld [vmem:[%s13628_s24 + $0x2e8] sm:$0xff]  ;;  %v15346_v52 = vld [vmem:[%s13628_s24 + $0x2e0] sm:$0xff] }
 0x27b   : > { %4180 = vperm.xlu0 %12699, %v3108_v63   ;;  %v4857_v8 = vadd.f32 %v4358_v33, %v4245_v56  ;;  %v2403_v33 = vmul.f32 0.020408163, %v2184_v9  ;;  %v2809_v9 = vadd.f32 1e-05, %v2707_v61  ;;  %v3210_v16 = vmul.f32 %v3108_v63, %v15135_v3  ;;  %v12925_v3 = vld [vmem:[%s19575_s3 + $0x28] sm:$0xff] }
 0x27c   : > { %3499 = vrot.lane.b32.xlu1 %v3208_v39, %s13578_s30  ;;  %v1211_v39 = vpop.f32.mrf.mxu0  ;;  %v4248_v63 = vmul.f32 %v12925_v3, %v14542_v34  ;;  %12894 = vrsqrt.f32 %v2810_v57  ;;  %v2508_v61 = vmul.f32 %v15328_v29, %v15328_v29 }
 0x27d   : > { %v15299_v42 = vpop.permute.xlu0 %4060  ;;  %4959 = vst.msk [vmem:[%s13633_s27 + $0x10] sm:$0xff] %vm334_vm1, %v4857_v8  ;;  %v12227_v8 = vpop.f32.mrf.mxu1  ;;  %v2607_v54 = vsub.f32 %v2403_v33, %v2505_v4  ;;  %12896 = vrsqrt.f32 %v2809_v9 }
 0x27e   : > { %19686 = vst [vmem:[#allocation90_spill] sm:$0xff] %v15299_v42  ;;  %v15321_v56 = vpop.permute.xlu1 %3451  ;;  %v12887_v50 = vpop.eup %12886  ;;  %v15330_v42 = vmul.f32 0.020408163, %v1211_v39  ;;  %v2406_v59 = vmul.f32 0.020408163, %v12227_v8 }
 0x27f   : > { %3501 = vrot.lane.b32.xlu0 %v3209_v36, %s13578_s30  ;;  %v12889_v30 = vpop.eup %12888  ;;  %v2194_v7 = vpop.f32.mrf.mxu1  ;;  %v2709_v33 = vmax.f32 %v2607_v54, 0.0  ;;  %v3212_v54 = vmul.f32 %v3110_v55, %v15161_v41  ;;  %v15377_v41 = vld [vmem:[%s13628_s24 + $0x2f0] sm:$0xff] }
 0x280   : > { %4165 = vperm.xlu1 %12698, %v15251_v14   ;;  %v3211_v14 = vmul.f32 %v15325_v17, %v15168_v58  ;;  %v2710_v58 = vmax.f32 %v2608_v45, 0.0  ;;  %v2507_v4 = vmul.f32 %v15330_v42, %v15330_v42  ;;  %v2405_v39 = vmul.f32 0.020408163, %v2194_v7 }
 0x281   : > { %v3111_v34 = vmul.f32 %v12889_v30, %v15346_v52  ;;  %v2610_v8 = vsub.f32 %v2406_v59, %v2508_v61  ;;  %v12891_v45 = vpop.eup %12890  ;;  %v15374_v61 = vld [vmem:[%s13628_s24 + $0x2f8] sm:$0xff] }
 0x282   : > { %v4368_v20 = vpop.permute.xlu0 %4367  ;;  %v15332_v11 = vpop.permute.xlu1 %4045  ;;  %v2812_v9 = vadd.f32 1e-05, %v2710_v58  ;;  %v2609_v7 = vsub.f32 %v2405_v39, %v2507_v4 }
 0x283   : > { %v4859_v36 = vadd.f32 %v4368_v20, %v4247_v38  ;;  %4190 = vperm.xlu0 %12699, %v3110_v55   ;;  %v3213_v30 = vmul.f32 %v3111_v34, %v15193_v6  ;;  %v2712_v58 = vmax.f32 %v2610_v8, 0.0 }
 0x284   : > { %3503 = vrot.lane.b32.xlu1 %v3210_v16, %s13578_s30  ;;  %12898 = vrsqrt.f32 %v2812_v9  ;;  %v2711_v59 = vmax.f32 %v2609_v7, 0.0 }
 0x285   : > { %4961 = vst.msk [vmem:[%s13633_s27 + $0x20] sm:$0xff] %vm334_vm1, %v4859_v36  ;;  %v3112_v36 = vmul.f32 %v12887_v50, %v15343_v28 }
 0x286   : > { %v15340_v38 = vpop.permute.xlu0 %3453  ;;  %v12893_v3 = vpop.eup %12892 }
 0x287   : > { %3505 = vrot.lane.b32.xlu0 %v3211_v14, %s13578_s30  ;;  %v4373_v20 = vpop.permute.xlu1 %4372  ;;  %v2811_v14 = vadd.f32 1e-05, %v2709_v33  ;;  %v3114_v33 = vmul.f32 %v12891_v45, %v15374_v61  ;;  %v3214_v9 = vmul.f32 %v3112_v36, %v15191_v49 }
 0x288   : > { %v4860_v57 = vadd.f32 %v4373_v20, %v4248_v63  ;;  %4175 = vperm.xlu1 %12698, %v15285_v51   ;;  %v12926_v51 = vld [vmem:[%s19575_s3 + $0x30] sm:$0xff] }
 0x289   : > { %v4249_v63 = vmul.f32 %v12926_v51, %v14579_v46  ;;  %12900 = vrsqrt.f32 %v2811_v14  ;;  %v3113_v46 = vmul.f32 %v12893_v3, %v15377_v41  ;;  %v12895_v20 = vpop.eup %12894  ;;  %v2813_v14 = vadd.f32 1e-05, %v2711_v59  ;;  %v15400_v3 = vld [vmem:[%s13628_s24 + $0x300] sm:$0xff] }
 0x28a   : > { %v15360_v16 = vpop.permute.xlu0 %4070  ;;  %4962 = vst.msk [vmem:[%s13633_s27 + $0x28] sm:$0xff] %vm334_vm1, %v4860_v57  ;;  %v2814_v57 = vadd.f32 1e-05, %v2712_v58  ;;  %v12897_v8 = vpop.eup %12896 }
 0x28b   : > { %4200 = vperm.xlu0 %12699, %v3112_v36   ;;  %v15365_v50 = vpop.permute.xlu1 %3455  ;;  %v3215_v7 = vmul.f32 %v3113_v46, %v15225_v53  ;;  %v3115_v53 = vmul.f32 %v12897_v8, %v15400_v3 }
 0x28c   : > { %3507 = vrot.lane.b32.xlu1 %v3212_v54, %s13578_s30  ;;  %v12927_v54 = vld [vmem:[%s19575_s3 + $0x38] sm:$0xff]  ;;  %12902 = vrsqrt.f32 %v2814_v57 }
 0x28d   : > { %v4250_v45 = vmul.f32 %v12927_v54, %v14564_v5  ;;  %12904 = vrsqrt.f32 %v2813_v14  ;;  %v15424_v54 = vld [vmem:[%s13628_s24 + $0x310] sm:$0xff] }
 0x28f   : > { %v4378_v55 = vpop.permute.xlu0 %4377  ;;  %3509 = vrot.lane.b32.xlu0 %v3213_v30, %s13578_s30  ;;  %v15380_v4 = vpop.permute.xlu1 %4055 }
 0x290   : > { %v4861_v6 = vadd.f32 %v4378_v55, %v4249_v63  ;;  %4185 = vperm.xlu1 %12698, %v15325_v17   ;;  %v15397_v17 = vld [vmem:[%s13628_s24 + $0x308] sm:$0xff]  ;;  %v12928_v63 = vld [vmem:[%s19575_s3 + $0x40] sm:$0xff] }
 0x291   : > { %v3116_v5 = vmul.f32 %v12895_v20, %v15397_v17  ;;  %v4251_v55 = vmul.f32 %v12928_v63, %v14601_v15  ;;  %v12899_v59 = vpop.eup %12898  ;;  %v3217_v20 = vmul.f32 %v3115_v53, %v15258_v23 }
 0x292   : > { %4963 = vst.msk [vmem:[%s13633_s27 + $0x30] sm:$0xff] %vm334_vm1, %v4861_v6  ;;  %v3216_v6 = vmul.f32 %v3114_v33, %v15222_v13 }
 0x293   : > { %v15387_v39 = vpop.permute.xlu0 %3457  ;;  %4210 = vperm.xlu0 %12699, %v3114_v33   ;;  %v12929_v33 = vld [vmem:[%s19575_s3 + $0x48] sm:$0xff] }
 0x294   : > { %v4383_v30 = vpop.permute.xlu1 %4382  ;;  %3511 = vrot.lane.b32.xlu1 %v3214_v9, %s13578_s30 }
 0x295   : > { %v4862_v51 = vadd.f32 %v4383_v30, %v4250_v45  ;;  %v4252_v45 = vmul.f32 %v12929_v33, %v14588_v19  ;;  %v3218_v30 = vmul.f32 %v3116_v5, %v15254_v22  ;;  %v15448_v19 = vld [vmem:[%s13628_s24 + $0x320] sm:$0xff]  ;;  %v12930_v22 = vld [vmem:[%s19575_s3 + $0x50] sm:$0xff] }
 0x296   : > { %v12901_v9 = vpop.eup %12900 }
 0x297   : > { %3513 = vrot.lane.b32.xlu0 %v3215_v7, %s13578_s30  ;;  %v15403_v49 = vpop.permute.xlu0 %4080  ;;  %4964 = vst.msk [vmem:[%s13633_s27 + $0x38] sm:$0xff] %vm334_vm1, %v4862_v51  ;;  %v3117_v23 = vmul.f32 %v12901_v9, %v15424_v54 }
 0x298   : > { %19689 = vst [vmem:[#allocation93_spill] sm:$0xff] %v15403_v49  ;;  %v15409_v36 = vpop.permute.xlu1 %3459  ;;  %4195 = vperm.xlu1 %12698, %v3111_v34   ;;  %v15421_v34 = vld [vmem:[%s13628_s24 + $0x318] sm:$0xff] }
 0x299   : > { %v3118_v13 = vmul.f32 %v12899_v59, %v15421_v34  ;;  %v12903_v63 = vpop.eup %12902 }
 0x29b   : > { %4220 = vperm.xlu0 %12699, %v3116_v5   ;;  %v3220_v33 = vmul.f32 %v3118_v13, %v15292_v24 }
 0x29c   : > { %v4388_v58 = vpop.permute.xlu0 %4387  ;;  %v15417_v8 = vpop.permute.xlu1 %4065  ;;  %3515 = vrot.lane.b32.xlu1 %v3216_v6, %s13578_s30  ;;  %v15445_v6 = vld [vmem:[%s13628_s24 + $0x328] sm:$0xff] }
 0x29d   : > { %v4863_v57 = vadd.f32 %v4388_v58, %v4251_v55  ;;  %v3219_v55 = vmul.f32 %v3117_v23, %v15296_v44  ;;  %v12905_v58 = vpop.eup %12904  ;;  %v4253_v44 = vmul.f32 %v12930_v22, %v14625_v0  ;;  %v3120_v59 = vmul.f32 %v12903_v63, %v15445_v6 }
 0x29f   : > { %4965 = vst.msk [vmem:[%s13633_s27 + $0x40] sm:$0xff] %vm334_vm1, %v4863_v57  ;;  %3517 = vrot.lane.b32.xlu0 %v3217_v20, %s13578_s30  ;;  %v3119_v57 = vmul.f32 %v12905_v58, %v15448_v19 }
 0x2a0   : > { %v15429_v15 = vpop.permute.xlu0 %3461  ;;  %4205 = vperm.xlu1 %12698, %v3113_v46  }
 0x2a1   : > { %v4393_v14 = vpop.permute.xlu1 %4392  ;;  %v3221_v0 = vmul.f32 %v3119_v57, %v15330_v42 }
 0x2a2   : > { %v4864_v7 = vadd.f32 %v4393_v14, %v4252_v45  ;;  %v12931_v14 = vld [vmem:[%s19575_s3 + $0x58] sm:$0xff] }
 0x2a3   : > { %4230 = vperm.xlu0 %12699, %v3118_v13  }
 0x2a4   : > { %v15438_v51 = vpop.permute.xlu0 %4090  ;;  %4966 = vst.msk [vmem:[%s13633_s27 + $0x48] sm:$0xff] %vm334_vm1, %v4864_v7  ;;  %3519 = vrot.lane.b32.xlu1 %v3218_v30, %s13578_s30  ;;  %v12932_v30 = vld [vmem:[%s13628_s24 + $0x70] sm:$0xff] }
 0x2a5   : > { %19690 = vst [vmem:[#allocation94_spill] sm:$0xff] %v15438_v51  ;;  %v15450_v46 = vpop.permute.xlu1 %3463  ;;  %v3645_v24 = vsub.f32 %v12932_v30, %v14662_v37  ;;  %v12934_v37 = vld [vmem:[%s13628_s24 + $0x80] sm:$0xff] }
 0x2a6   : > { %v3647_v22 = vsub.f32 %v12934_v37, %v14684_v60  ;;  %v12936_v60 = vld [vmem:[%s19575_s3 + $0x68] sm:$0xff] }
 0x2a7   : > { %3521 = vrot.lane.b32.xlu0 %v3219_v55, %s13578_s30  ;;  %v12933_v55 = vld [vmem:[%s19575_s3 + $0x60] sm:$0xff] }
 0x2a8   : > { %4215 = vperm.xlu1 %12698, %v3115_v53   ;;  %v4254_v53 = vmul.f32 %v12931_v14, %v14608_v10  ;;  %v3222_v10 = vmul.f32 %v3120_v59, %v15328_v29  ;;  %v4255_v58 = vmul.f32 %v12933_v55, %v14645_v47  ;;  %v12938_v14 = vld [vmem:[%s13628_s24 + $0xa0] sm:$0xff] }
 0x2a9   : > { %v4398_v5 = vpop.permute.xlu0 %4397  ;;  %v15459_v9 = vpop.permute.xlu1 %4075 }
 0x2aa   : > { %v4865_v20 = vadd.f32 %v4398_v5, %v4253_v44 }
 0x2ab   : > { %4240 = vperm.xlu0 %12699, %v3120_v59   ;;  %v4256_v59 = vmul.f32 %v12936_v60, %v14630_v40  ;;  %v19694_v40 = vld [vmem:[#allocation5_spill] sm:$0xff] }
 0x2ac   : > { %4967 = vst.msk [vmem:[%s13633_s27 + $0x50] sm:$0xff] %vm334_vm1, %v4865_v20  ;;  %3523 = vrot.lane.b32.xlu1 %v3220_v33, %s13578_s30  ;;  %v12935_v20 = vld [vmem:[%s13628_s24 + $0x90] sm:$0xff]  ;;  %v12937_v33 = vld [vmem:[%s13628_s24 + $0x78] sm:$0xff] }
 0x2ad   : > { %v15464_v45 = vpop.permute.xlu0 %3465  ;;  %v3649_v29 = vsub.f32 %v12935_v20, %v14704_v1  ;;  %v19692_v1 = vld [vmem:[#allocation12_spill] sm:$0xff] }
 0x2ae   : > { %v4403_v7 = vpop.permute.xlu1 %4402 }
 0x2af   : > { %3525 = vrot.lane.b32.xlu0 %v3221_v0, %s13578_s30  ;;  %v4866_v13 = vadd.f32 %v4403_v7, %v4254_v53  ;;  %v3646_v0 = vsub.f32 %v12937_v33, %v14658_v12  ;;  %v3651_v53 = vsub.f32 %v12938_v14, %v19692_v1  ;;  %v12940_v12 = vld [vmem:[%s13628_s24 + $0xb0] sm:$0xff]  ;;  %v19698_v33 = vld [vmem:[#allocation11_spill] sm:$0xff] }
 0x2b0   : > { %12700 = vset.pattern.permute.xlu0 %v19621_v31  ;;  %4225 = vperm.xlu1 %12698, %v3117_v23   ;;  %v12944_v14 = vld [vmem:[%s13628_s24 + $0xd0] sm:$0xff] }
 0x2b1   : > { %v15476_v42 = vpop.permute.xlu0 %4100  ;;  %4968 = vst.msk [vmem:[%s13633_s27 + $0x58] sm:$0xff] %vm334_vm1, %v4866_v13  ;;  %v3657_v1 = vsub.f32 %v12944_v14, %v14783_v43  ;;  %v12947_v43 = vld [vmem:[%s13628_s24 + $0xc8] sm:$0xff]  ;;  %v19704_v14 = vld [vmem:[#allocation32_spill] sm:$0xff] }
 0x2b2   : > { %19691 = vst [vmem:[#allocation95_spill] sm:$0xff] %v15476_v42  ;;  %v15480_v63 = vpop.permute.xlu1 %3467 }
 0x2b3   : > { %4417 = vperm.xlu0 %12700, %v3645_v24   ;;  %v12939_v24 = vld [vmem:[%s13628_s24 + $0x88] sm:$0xff] }
 0x2b4   : > { %3527 = vrot.lane.b32.xlu1 %v3222_v10, %s13578_s30  ;;  %v3648_v13 = vsub.f32 %v12939_v24, %v19694_v40  ;;  %v19695_v10 = vld [vmem:[#allocation16_spill] sm:$0xff]  ;;  %v12946_v40 = vld [vmem:[%s13628_s24 + $0xe0] sm:$0xff] }
 0x2b5   : > { %v3653_v55 = vsub.f32 %v12940_v12, %v19695_v10 }
 0x2b6   : > { %v4408_v23 = vpop.permute.xlu0 %4407  ;;  %v15490_v5 = vpop.permute.xlu1 %4085 }
 0x2b7   : > { %v4867_v44 = vadd.f32 %v4408_v23, %v4255_v58  ;;  %4427 = vperm.xlu0 %12700, %v3647_v22   ;;  %v19696_v22 = vld [vmem:[#allocation8_spill] sm:$0xff] }
 0x2b8   : > { %4235 = vperm.xlu1 %12698, %v3119_v57  }
 0x2b9   : > { %4969 = vst.msk [vmem:[%s13633_s27 + $0x60] sm:$0xff] %vm334_vm1, %v4867_v44  ;;  %v12942_v44 = vld [vmem:[%s13628_s24 + $0xc0] sm:$0xff] }
 0x2ba   : > { %v15496_v47 = vpop.permute.xlu0 %3469  ;;  %v3655_v20 = vsub.f32 %v12942_v44, %v14766_v2  ;;  %v12945_v2 = vld [vmem:[%s13628_s24 + $0xb8] sm:$0xff] }
 0x2bb   : > { %4437 = vperm.xlu0 %12700, %v3649_v29   ;;  %v4413_v7 = vpop.permute.xlu1 %4412 }
 0x2bc   : > { %v4868_v57 = vadd.f32 %v4413_v7, %v4256_v59  ;;  %12701 = vset.pattern.permute.xlu1 %v19621_v31  ;;  %v12941_v31 = vld [vmem:[%s13628_s24 + $0x98] sm:$0xff]  ;;  %v12943_v59 = vld [vmem:[%s13628_s24 + $0xa8] sm:$0xff] }
 0x2bd   : > { %4422 = vperm.xlu1 %12701, %v3646_v0   ;;  %v3650_v23 = vsub.f32 %v12941_v31, %v19696_v22  ;;  %v3652_v0 = vsub.f32 %v12943_v59, %v19698_v33  ;;  %v12948_v22 = vld [vmem:[%s13628_s24 + $0xf0] sm:$0xff]  ;;  %v19703_v59 = vld [vmem:[#allocation22_spill] sm:$0xff] }
 0x2be   : > { %v15507_v30 = vpop.permute.xlu0 %4110  ;;  %4970 = vst.msk [vmem:[%s13633_s27 + $0x68] sm:$0xff] %vm334_vm1, %v4868_v57  ;;  %v19699_v57 = vld [vmem:[#allocation15_spill] sm:$0xff] }
 0x2bf   : > { %19693 = vst [vmem:[#allocation12_spill] sm:$0xff] %v15507_v30  ;;  %4447 = vperm.xlu0 %12700, %v3651_v53   ;;  %v15515_v58 = vpop.permute.xlu1 %3471  ;;  %v3654_v24 = vsub.f32 %v12945_v2, %v19699_v57 }
 0x2c1   : > { %4432 = vperm.xlu1 %12701, %v3648_v13   ;;  %v3659_v13 = vsub.f32 %v12946_v40, %v14802_v25  ;;  %v12949_v25 = vld [vmem:[%s13628_s24 + $0xd8] sm:$0xff] }
 0x2c2   : > { %v15517_v37 = vpop.permute.xlu0 %3473  ;;  %v3658_v33 = vsub.f32 %v12949_v25, %v19703_v59  ;;  %v19709_v25 = vld [vmem:[#allocation28_spill] sm:$0xff] }
 0x2c3   : > { %4457 = vperm.xlu0 %12700, %v3653_v55   ;;  %v15523_v29 = vpop.permute.xlu1 %4095  ;;  %v19702_v55 = vld [vmem:[#allocation19_spill] sm:$0xff] }
 0x2c4   : > { %v3656_v31 = vsub.f32 %v12947_v43, %v19702_v55  ;;  %v19708_v43 = vld [vmem:[#allocation36_spill] sm:$0xff] }
 0x2c5   : > { %4442 = vperm.xlu1 %12701, %v3650_v23   ;;  %v3661_v23 = vsub.f32 %v12948_v22, %v14825_v18  ;;  %v12951_v18 = vld [vmem:[%s13628_s24 + $0xe8] sm:$0xff] }
 0x2c6   : > { %v15525_v60 = vpop.permute.xlu0 %4120 }
 0x2c7   : > { %19697 = vst [vmem:[#allocation5_spill] sm:$0xff] %v15525_v60  ;;  %4467 = vperm.xlu0 %12700, %v3655_v20   ;;  %v15531_v53 = vpop.permute.xlu1 %3475 }
 0x2c9   : > { %4452 = vperm.xlu1 %12701, %v3652_v0   ;;  %v12950_v0 = vld [vmem:[%s13628_s24 + $0x100] sm:$0xff] }
 0x2ca   : > { %v15533_v7 = vpop.permute.xlu0 %3477 }
 0x2cb   : > { %4477 = vperm.xlu0 %12700, %v3657_v1   ;;  %v15539_v12 = vpop.permute.xlu1 %4105  ;;  %v3663_v1 = vsub.f32 %v12950_v0, %v19704_v14  ;;  %v19710_v0 = vld [vmem:[#allocation40_spill] sm:$0xff] }
 0x2cc   : > { %19700 = vst [vmem:[#allocation16_spill] sm:$0xff] %v15539_v12 }
 0x2cd   : > { %4462 = vperm.xlu1 %12701, %v3654_v24   ;;  %v19707_v24 = vld [vmem:[#allocation25_spill] sm:$0xff] }
 0x2ce   : > { %v15541_v10 = vpop.permute.xlu0 %4130  ;;  %v3660_v40 = vsub.f32 %v12951_v18, %v19707_v24  ;;  %v12955_v24 = vld [vmem:[%s13628_s24 + $0x108] sm:$0xff] }
 0x2cf   : > { %19701 = vst [vmem:[#allocation8_spill] sm:$0xff] %v15541_v10  ;;  %4487 = vperm.xlu0 %12700, %v3659_v13   ;;  %v15547_v44 = vpop.permute.xlu1 %3479  ;;  %v12952_v13 = vld [vmem:[%s13628_s24 + $0x110] sm:$0xff] }
 0x2d0   : > { %v3665_v55 = vsub.f32 %v12952_v13, %v19708_v43  ;;  %v19713_v13 = vld [vmem:[#allocation31_spill] sm:$0xff] }
 0x2d1   : > { %4472 = vperm.xlu1 %12701, %v3656_v31   ;;  %v3664_v43 = vsub.f32 %v12955_v24, %v19713_v13  ;;  %v12959_v13 = vld [vmem:[%s13628_s24 + $0x128] sm:$0xff] }
 0x2d2   : > { %v15549_v20 = vpop.permute.xlu0 %3481 }
 0x2d3   : > { %4497 = vperm.xlu0 %12700, %v3661_v23   ;;  %v15555_v2 = vpop.permute.xlu1 %4115  ;;  %v12953_v23 = vld [vmem:[%s13628_s24 + $0xf8] sm:$0xff] }
 0x2d4   : > { %19705 = vst [vmem:[#allocation11_spill] sm:$0xff] %v15555_v2  ;;  %v3662_v59 = vsub.f32 %v12953_v23, %v19709_v25  ;;  %v12957_v25 = vld [vmem:[%s13628_s24 + $0x118] sm:$0xff] }
 0x2d5   : > { %4482 = vperm.xlu1 %12701, %v3658_v33   ;;  %v12954_v33 = vld [vmem:[%s13628_s24 + $0x120] sm:$0xff] }
 0x2d6   : > { %v15557_v57 = vpop.permute.xlu0 %4140  ;;  %v3667_v14 = vsub.f32 %v12954_v33, %v19710_v0  ;;  %v19715_v33 = vld [vmem:[#allocation35_spill] sm:$0xff] }
 0x2d7   : > { %19706 = vst [vmem:[#allocation15_spill] sm:$0xff] %v15557_v57  ;;  %4507 = vperm.xlu0 %12700, %v3663_v1   ;;  %v15563_v31 = vpop.permute.xlu1 %3483  ;;  %v3666_v0 = vsub.f32 %v12957_v25, %v19715_v33  ;;  %v12961_v33 = vld [vmem:[%s13628_s24 + $0x138] sm:$0xff] }
 0x2d9   : > { %4492 = vperm.xlu1 %12701, %v3660_v40   ;;  %v12956_v40 = vld [vmem:[%s13628_s24 + $0x130] sm:$0xff] }
 0x2da   : > { %v15565_v22 = vpop.permute.xlu0 %3485 }
 0x2db   : > { %4517 = vperm.xlu0 %12700, %v3665_v55   ;;  %v15571_v1 = vpop.permute.xlu1 %4125  ;;  %v19714_v55 = vld [vmem:[#allocation44_spill] sm:$0xff] }
 0x2dc   : > { %19711 = vst [vmem:[#allocation19_spill] sm:$0xff] %v15571_v1  ;;  %v3669_v57 = vsub.f32 %v12956_v40, %v19714_v55  ;;  %v19719_v40 = vld [vmem:[#allocation39_spill] sm:$0xff] }
 0x2dd   : > { %4502 = vperm.xlu1 %12701, %v3662_v59   ;;  %v12958_v59 = vld [vmem:[%s13628_s24 + $0x140] sm:$0xff]  ;;  %v3668_v55 = vsub.f32 %v12959_v13, %v19719_v40  ;;  %v12963_v40 = vld [vmem:[%s13628_s24 + $0x148] sm:$0xff] }
 0x2de   : > { %v15573_v18 = vpop.permute.xlu0 %4150 }
 0x2df   : > { %19712 = vst [vmem:[#allocation22_spill] sm:$0xff] %v15573_v18  ;;  %4527 = vperm.xlu0 %12700, %v3667_v14   ;;  %v15579_v10 = vpop.permute.xlu1 %3487  ;;  %v19716_v14 = vld [vmem:[#allocation48_spill] sm:$0xff] }
 0x2e0   : > { %v3671_v18 = vsub.f32 %v12958_v59, %v19716_v14  ;;  %v19721_v59 = vld [vmem:[#allocation43_spill] sm:$0xff] }
 0x2e1   : > { %4512 = vperm.xlu1 %12701, %v3664_v43   ;;  %v12960_v43 = vld [vmem:[%s13628_s24 + $0x150] sm:$0xff]  ;;  %v3670_v14 = vsub.f32 %v12961_v33, %v19721_v59  ;;  %v19726_v59 = vld [vmem:[#allocation51_spill] sm:$0xff] }
 0x2e2   : > { %v15581_v23 = vpop.permute.xlu0 %3489 }
 0x2e3   : > { %4537 = vperm.xlu0 %12700, %v3669_v57   ;;  %v15587_v60 = vpop.permute.xlu1 %4135  ;;  %v19720_v57 = vld [vmem:[#allocation52_spill] sm:$0xff] }
 0x2e4   : > { %19717 = vst [vmem:[#allocation32_spill] sm:$0xff] %v15587_v60  ;;  %v3673_v30 = vsub.f32 %v12960_v43, %v19720_v57  ;;  %v19724_v43 = vld [vmem:[#allocation47_spill] sm:$0xff] }
 0x2e5   : > { %4522 = vperm.xlu1 %12701, %v3666_v0   ;;  %v12962_v0 = vld [vmem:[%s13628_s24 + $0x160] sm:$0xff]  ;;  %v3672_v57 = vsub.f32 %v12963_v40, %v19724_v43  ;;  %v12967_v43 = vld [vmem:[%s13628_s24 + $0x168] sm:$0xff] }
 0x2e6   : > { %v15589_v24 = vpop.permute.xlu0 %4160 }
 0x2e7   : > { %19718 = vst [vmem:[#allocation25_spill] sm:$0xff] %v15589_v24  ;;  %4547 = vperm.xlu0 %12700, %v3671_v18   ;;  %v15595_v1 = vpop.permute.xlu1 %3491  ;;  %v3675_v18 = vsub.f32 %v12962_v0, %v14997_v27  ;;  %v12965_v27 = vld [vmem:[%s13628_s24 + $0x158] sm:$0xff] }
 0x2e8   : > { %v3674_v0 = vsub.f32 %v12965_v27, %v19726_v59  ;;  %v12969_v59 = vld [vmem:[%s13628_s24 + $0x178] sm:$0xff] }
 0x2e9   : > { %4532 = vperm.xlu1 %12701, %v3668_v55   ;;  %v12964_v55 = vld [vmem:[%s13628_s24 + $0x170] sm:$0xff] }
 0x2ea   : > { %v15597_v25 = vpop.permute.xlu0 %3493 }
 0x2eb   : > { %4557 = vperm.xlu0 %12700, %v3673_v30   ;;  %v15603_v24 = vpop.permute.xlu1 %4145  ;;  %v19725_v30 = vld [vmem:[#allocation59_spill] sm:$0xff] }
 0x2ec   : > { %19722 = vst [vmem:[#allocation36_spill] sm:$0xff] %v15603_v24  ;;  %v3677_v60 = vsub.f32 %v12964_v55, %v19725_v30  ;;  %v19730_v55 = vld [vmem:[#allocation55_spill] sm:$0xff] }
 0x2ed   : > { %4542 = vperm.xlu1 %12701, %v3670_v14   ;;  %v12966_v14 = vld [vmem:[%s13628_s24 + $0x180] sm:$0xff]  ;;  %v3676_v30 = vsub.f32 %v12967_v43, %v19730_v55  ;;  %v12971_v55 = vld [vmem:[%s13628_s24 + $0x188] sm:$0xff] }
 0x2ee   : > { %v15605_v13 = vpop.permute.xlu0 %4170 }
 0x2ef   : > { %19723 = vst [vmem:[#allocation28_spill] sm:$0xff] %v15605_v13  ;;  %4567 = vperm.xlu0 %12700, %v3675_v18   ;;  %v15611_v42 = vpop.permute.xlu1 %3495  ;;  %v19727_v18 = vld [vmem:[#allocation63_spill] sm:$0xff] }
 0x2f0   : > { %v3679_v13 = vsub.f32 %v12966_v14, %v19727_v18  ;;  %v19732_v14 = vld [vmem:[#allocation58_spill] sm:$0xff] }
 0x2f1   : > { %4552 = vperm.xlu1 %12701, %v3672_v57   ;;  %v12968_v57 = vld [vmem:[%s13628_s24 + $0x190] sm:$0xff]  ;;  %v3678_v18 = vsub.f32 %v12969_v59, %v19732_v14  ;;  %v12973_v14 = vld [vmem:[%s13628_s24 + $0x198] sm:$0xff] }
 0x2f2   : > { %v15613_v33 = vpop.permute.xlu0 %3497 }
 0x2f3   : > { %4577 = vperm.xlu0 %12700, %v3677_v60   ;;  %v15619_v24 = vpop.permute.xlu1 %4155  ;;  %v19731_v60 = vld [vmem:[#allocation67_spill] sm:$0xff] }
 0x2f4   : > { %19728 = vst [vmem:[#allocation40_spill] sm:$0xff] %v15619_v24  ;;  %v3681_v2 = vsub.f32 %v12968_v57, %v19731_v60  ;;  %v19736_v57 = vld [vmem:[#allocation62_spill] sm:$0xff] }
 0x2f5   : > { %4562 = vperm.xlu1 %12701, %v3674_v0   ;;  %v12970_v0 = vld [vmem:[%s13628_s24 + $0x1a0] sm:$0xff]  ;;  %v3680_v60 = vsub.f32 %v12971_v55, %v19736_v57  ;;  %v12975_v57 = vld [vmem:[%s13628_s24 + $0x1a8] sm:$0xff] }
 0x2f6   : > { %v15621_v40 = vpop.permute.xlu0 %4180 }
 0x2f7   : > { %19729 = vst [vmem:[#allocation31_spill] sm:$0xff] %v15621_v40  ;;  %4587 = vperm.xlu0 %12700, %v3679_v13   ;;  %v15627_v51 = vpop.permute.xlu1 %3499  ;;  %v19733_v13 = vld [vmem:[#allocation71_spill] sm:$0xff] }
 0x2f8   : > { %v3683_v40 = vsub.f32 %v12970_v0, %v19733_v13  ;;  %v19738_v0 = vld [vmem:[#allocation66_spill] sm:$0xff] }
 0x2f9   : > { %4572 = vperm.xlu1 %12701, %v3676_v30   ;;  %v12972_v30 = vld [vmem:[%s13628_s24 + $0x1b0] sm:$0xff]  ;;  %v3682_v13 = vsub.f32 %v12973_v14, %v19738_v0  ;;  %v19742_v0 = vld [vmem:[#allocation74_spill] sm:$0xff] }
 0x2fa   : > { %v15629_v27 = vpop.permute.xlu0 %3501 }
 0x2fb   : > { %4597 = vperm.xlu0 %12700, %v3681_v2   ;;  %v15635_v24 = vpop.permute.xlu1 %4165  ;;  %v19737_v2 = vld [vmem:[#allocation75_spill] sm:$0xff] }
 0x2fc   : > { %19734 = vst [vmem:[#allocation44_spill] sm:$0xff] %v15635_v24  ;;  %v3685_v12 = vsub.f32 %v12972_v30, %v19737_v2  ;;  %v19741_v30 = vld [vmem:[#allocation70_spill] sm:$0xff] }
 0x2fd   : > { %4582 = vperm.xlu1 %12701, %v3678_v18   ;;  %v12974_v18 = vld [vmem:[%s13628_s24 + $0x1c0] sm:$0xff]  ;;  %v3684_v2 = vsub.f32 %v12975_v57, %v19741_v30 }
 0x2fe   : > { %v15637_v43 = vpop.permute.xlu0 %4190  ;;  %v19744_v30 = vld [vmem:[#allocation78_spill] sm:$0xff] }
 0x2ff   : > { %19735 = vst [vmem:[#allocation35_spill] sm:$0xff] %v15637_v43  ;;  %4607 = vperm.xlu0 %12700, %v3683_v40   ;;  %v15643_v49 = vpop.permute.xlu1 %3503  ;;  %v3687_v40 = vsub.f32 %v12974_v18, %v15163_v32  ;;  %v12977_v32 = vld [vmem:[%s13628_s24 + $0x1b8] sm:$0xff] }
 0x300   : > { %v3686_v18 = vsub.f32 %v12977_v32, %v19742_v0 }
 0x301   : > { %4592 = vperm.xlu1 %12701, %v3680_v60   ;;  %v12976_v60 = vld [vmem:[%s13628_s24 + $0x1d0] sm:$0xff] }
 0x302   : > { %v15645_v59 = vpop.permute.xlu0 %3505 }
 0x303   : > { %4617 = vperm.xlu0 %12700, %v3685_v12   ;;  %v15651_v43 = vpop.permute.xlu1 %4175  ;;  %v3689_v12 = vsub.f32 %v12976_v60, %v15212_v21  ;;  %v12979_v21 = vld [vmem:[%s13628_s24 + $0x1c8] sm:$0xff] }
 0x304   : > { %19739 = vst [vmem:[#allocation48_spill] sm:$0xff] %v15651_v43  ;;  %v3688_v60 = vsub.f32 %v12979_v21, %v19744_v30  ;;  %v19745_v30 = vld [vmem:[#allocation86_spill] sm:$0xff] }
 0x305   : > { %4602 = vperm.xlu1 %12701, %v3682_v13   ;;  %v12978_v13 = vld [vmem:[%s13628_s24 + $0x1e0] sm:$0xff] }
 0x306   : > { %v15653_v55 = vpop.permute.xlu0 %4200 }
 0x307   : > { %19740 = vst [vmem:[#allocation39_spill] sm:$0xff] %v15653_v55  ;;  %4627 = vperm.xlu0 %12700, %v3687_v40   ;;  %v15659_v24 = vpop.permute.xlu1 %3507  ;;  %v3691_v40 = vsub.f32 %v12978_v13, %v15247_v26  ;;  %v12981_v26 = vld [vmem:[%s13628_s24 + $0x1d8] sm:$0xff] }
 0x308   : > { %v3690_v0 = vsub.f32 %v12981_v26, %v15184_v48 }
 0x309   : > { %4612 = vperm.xlu1 %12701, %v3684_v2   ;;  %v12980_v2 = vld [vmem:[%s13628_s24 + $0x1f0] sm:$0xff] }
 0x30a   : > { %v15661_v14 = vpop.permute.xlu0 %3509 }
 0x30b   : > { %4637 = vperm.xlu0 %12700, %v3689_v12   ;;  %v15667_v55 = vpop.permute.xlu1 %4185  ;;  %v3693_v12 = vsub.f32 %v12980_v2, %v15281_v35  ;;  %v12983_v35 = vld [vmem:[%s13628_s24 + $0x1e8] sm:$0xff] }
 0x30c   : > { %v3692_v2 = vsub.f32 %v12983_v35, %v19745_v30 }
 0x30d   : > { %4622 = vperm.xlu1 %12701, %v3686_v18   ;;  %v12982_v18 = vld [vmem:[%s13628_s24 + $0x200] sm:$0xff] }
 0x30e   : > { %v15669_v57 = vpop.permute.xlu0 %4210  ;;  %v3695_v13 = vsub.f32 %v12982_v18, %v15340_v38  ;;  %v12985_v38 = vld [vmem:[%s13628_s24 + $0x1f8] sm:$0xff] }
 0x30f   : > { %19743 = vst [vmem:[#allocation52_spill] sm:$0xff] %v15669_v57  ;;  %4647 = vperm.xlu0 %12700, %v3691_v40   ;;  %v15675_v43 = vpop.permute.xlu1 %3511  ;;  %v3694_v26 = vsub.f32 %v12985_v38, %v15321_v56 }
 0x311   : > { %4632 = vperm.xlu1 %12701, %v3688_v60   ;;  %v12984_v60 = vld [vmem:[%s13628_s24 + $0x210] sm:$0xff] }
 0x312   : > { %v15677_v32 = vpop.permute.xlu0 %3513 }
 0x313   : > { %4657 = vperm.xlu0 %12700, %v3693_v12   ;;  %v15683_v40 = vpop.permute.xlu1 %4195  ;;  %v3697_v12 = vsub.f32 %v12984_v60, %v15387_v39  ;;  %v12987_v39 = vld [vmem:[%s13628_s24 + $0x208] sm:$0xff] }
 0x314   : > { %v3696_v30 = vsub.f32 %v12987_v39, %v15365_v50 }
 0x315   : > { %4642 = vperm.xlu1 %12701, %v3690_v0   ;;  %v12986_v0 = vld [vmem:[%s13628_s24 + $0x220] sm:$0xff] }
 0x316   : > { %v15685_v21 = vpop.permute.xlu0 %4220  ;;  %v3699_v18 = vsub.f32 %v12986_v0, %v15429_v15  ;;  %v12989_v15 = vld [vmem:[%s13628_s24 + $0x218] sm:$0xff]  ;;  %v12990_v0 = vld [vmem:[%s13628_s24 + $0x240] sm:$0xff] }
 0x317   : > { %4667 = vperm.xlu0 %12700, %v3695_v13   ;;  %v15691_v57 = vpop.permute.xlu1 %3515  ;;  %v3698_v38 = vsub.f32 %v12989_v15, %v15409_v36  ;;  %v19747_v15 = vld [vmem:[#allocation3_spill] sm:$0xff] }
 0x319   : > { %4652 = vperm.xlu1 %12701, %v3692_v2   ;;  %v12988_v2 = vld [vmem:[%s13628_s24 + $0x230] sm:$0xff] }
 0x31a   : > { %v15693_v48 = vpop.permute.xlu0 %3517  ;;  %v3701_v60 = vsub.f32 %v12988_v2, %v15464_v45  ;;  %v12991_v45 = vld [vmem:[%s13628_s24 + $0x228] sm:$0xff]  ;;  %v12992_v2 = vld [vmem:[%s13628_s24 + $0x250] sm:$0xff] }
 0x31b   : > { %4677 = vperm.xlu0 %12700, %v3697_v12   ;;  %v15699_v13 = vpop.permute.xlu1 %4205  ;;  %v3700_v39 = vsub.f32 %v12991_v45, %v15450_v46 }
 0x31d   : > { %4662 = vperm.xlu1 %12701, %v3694_v26   ;;  %v3703_v26 = vsub.f32 %v12990_v0, %v15496_v47  ;;  %v12993_v47 = vld [vmem:[%s19575_s3 + $0x70] sm:$0xff]  ;;  %v12994_v0 = vld [vmem:[%s13628_s24 + $0x238] sm:$0xff] }
 0x31e   : > { %v15701_v35 = vpop.permute.xlu0 %4230  ;;  %v3702_v46 = vsub.f32 %v12994_v0, %v15480_v63  ;;  %v12998_v0 = vld [vmem:[%s13628_s24 + $0x270] sm:$0xff] }
 0x31f   : > { %4687 = vperm.xlu0 %12700, %v3699_v18   ;;  %v15707_v12 = vpop.permute.xlu1 %3519 }
 0x321   : > { %4672 = vperm.xlu1 %12701, %v3696_v30   ;;  %v3705_v30 = vsub.f32 %v12992_v2, %v15517_v37 }
 0x322   : > { %v15709_v56 = vpop.permute.xlu0 %3521 }
 0x323   : > { %4697 = vperm.xlu0 %12700, %v3701_v60   ;;  %v15715_v18 = vpop.permute.xlu1 %4215 }
 0x325   : > { %4682 = vperm.xlu1 %12701, %v3698_v38   ;;  %v4257_v38 = vmul.f32 %v12993_v47, %v19747_v15  ;;  %v12997_v15 = vld [vmem:[%s13628_s24 + $0x248] sm:$0xff] }
 0x326   : > { %v15717_v50 = vpop.permute.xlu0 %4240  ;;  %v3704_v63 = vsub.f32 %v12997_v15, %v15515_v58 }
 0x327   : > { %19746 = vst [vmem:[#allocation43_spill] sm:$0xff] %v15717_v50  ;;  %4707 = vperm.xlu0 %12700, %v3703_v26   ;;  %v15723_v60 = vpop.permute.xlu1 %3523  ;;  %v12995_v26 = vld [vmem:[%s13628_s24 + $0x260] sm:$0xff] }
 0x328   : > { %v3707_v37 = vsub.f32 %v12995_v26, %v15533_v7  ;;  %v19748_v50 = vld [vmem:[#allocation6_spill] sm:$0xff]  ;;  %v3709_v7 = vsub.f32 %v12998_v0, %v15549_v20  ;;  %v13002_v0 = vld [vmem:[%s19575_s3 + $0x78] sm:$0xff] }
 0x329   : > { %4692 = vperm.xlu1 %12701, %v3700_v39   ;;  %v13001_v20 = vld [vmem:[%s13628_s24 + $0x280] sm:$0xff] }
 0x32a   : > { %v15725_v36 = vpop.permute.xlu0 %3525 }
 0x32b   : > { %4717 = vperm.xlu0 %12700, %v3705_v30   ;;  %v15735_v45 = vpop.permute.xlu1 %4225  ;;  %v12996_v30 = vld [vmem:[%s19575_s3 + $0x80] sm:$0xff] }
 0x32c   : > { %v4259_v47 = vmul.f32 %v12996_v30, %v19748_v50  ;;  %v19749_v50 = vld [vmem:[#allocation9_spill] sm:$0xff] }
 0x32d   : > { %4702 = vperm.xlu1 %12701, %v3702_v46   ;;  %v13000_v30 = vld [vmem:[%s13628_s24 + $0x258] sm:$0xff] }
 0x32e   : > { %v4418_v2 = vpop.permute.xlu0 %4417  ;;  %v3706_v58 = vsub.f32 %v13000_v30, %v15531_v53  ;;  %v13003_v53 = vld [vmem:[%s19575_s3 + $0xa0] sm:$0xff]  ;;  %v13005_v30 = vld [vmem:[%s13628_s24 + $0x290] sm:$0xff] }
 0x32f   : > { %v4869_v39 = vadd.f32 %v4418_v2, %v4257_v38  ;;  %4727 = vperm.xlu0 %12700, %v3707_v37   ;;  %v15747_v46 = vpop.permute.xlu1 %3527  ;;  %v12999_v37 = vld [vmem:[%s19575_s3 + $0x90] sm:$0xff] }
 0x330   : > { %v4261_v2 = vmul.f32 %v12999_v37, %v19749_v50  ;;  %v19751_v37 = vld [vmem:[#allocation13_spill] sm:$0xff] }
 0x331   : > { %4971 = vst.msk [vmem:[%s13633_s27 + $0x70] sm:$0xff] %vm334_vm1, %v4869_v39  ;;  %4712 = vperm.xlu1 %12701, %v3704_v63   ;;  %v3711_v39 = vsub.f32 %v13001_v20, %v15565_v22  ;;  %v4263_v22 = vmul.f32 %v13003_v53, %v19751_v37 }
 0x332   : > { %v4428_v38 = vpop.permute.xlu0 %4427 }
 0x333   : > { %v4871_v26 = vadd.f32 %v4428_v38, %v4259_v47  ;;  %4737 = vperm.xlu0 %12700, %v3709_v7   ;;  %v15759_v15 = vpop.permute.xlu1 %4235  ;;  %v19750_v7 = vld [vmem:[#allocation2_spill] sm:$0xff] }
 0x334   : > { %v4258_v38 = vmul.f32 %v13002_v0, %v19750_v7  ;;  %v13006_v0 = vld [vmem:[%s19575_s3 + $0x88] sm:$0xff]  ;;  %v19752_v7 = vld [vmem:[#allocation4_spill] sm:$0xff] }
 0x335   : > { %4973 = vst.msk [vmem:[%s13633_s27 + $0x80] sm:$0xff] %vm334_vm1, %v4871_v26  ;;  %4722 = vperm.xlu1 %12701, %v3706_v58   ;;  %v13004_v26 = vld [vmem:[%s13628_s24 + $0x268] sm:$0xff]  ;;  %v4260_v53 = vmul.f32 %v13006_v0, %v19752_v7 }
 0x336   : > { %v4438_v47 = vpop.permute.xlu0 %4437  ;;  %v3708_v50 = vsub.f32 %v13004_v26, %v15547_v44  ;;  %v13007_v44 = vld [vmem:[%s19575_s3 + $0xb0] sm:$0xff] }
 0x337   : > { %v4873_v63 = vadd.f32 %v4438_v47, %v4261_v2  ;;  %4747 = vperm.xlu0 %12700, %v3711_v39   ;;  %v3713_v2 = vsub.f32 %v13005_v30, %v15581_v23  ;;  %v19753_v23 = vld [vmem:[#allocation17_spill] sm:$0xff] }
 0x338   : > { %v4423_v58 = vpop.permute.xlu1 %4422  ;;  %v4265_v37 = vmul.f32 %v13007_v44, %v19753_v23 }
 0x339   : > { %4975 = vst.msk [vmem:[%s13633_s27 + $0x90] sm:$0xff] %vm334_vm1, %v4873_v63  ;;  %v4870_v39 = vadd.f32 %v4423_v58, %v4258_v38  ;;  %4732 = vperm.xlu1 %12701, %v3708_v50   ;;  %v13008_v63 = vld [vmem:[%s13628_s24 + $0x278] sm:$0xff]  ;;  %v19754_v38 = vld [vmem:[#allocation82_spill] sm:$0xff] }
 0x33a   : > { %v4448_v20 = vpop.permute.xlu0 %4447  ;;  %v3710_v26 = vsub.f32 %v13008_v63, %v15563_v31  ;;  %v19755_v31 = vld [vmem:[#allocation7_spill] sm:$0xff] }
 0x33b   : > { %v4875_v47 = vadd.f32 %v4448_v20, %v4263_v22  ;;  %4757 = vperm.xlu0 %12700, %v3713_v2   ;;  %v3715_v22 = vsub.f32 %v19754_v38, %v15597_v25  ;;  %4972 = vst.msk [vmem:[%s13633_s27 + $0x78] sm:$0xff] %vm334_vm1, %v4870_v39  ;;  %v13009_v20 = vld [vmem:[%s19575_s3 + $0x98] sm:$0xff]  ;;  %v13010_v25 = vld [vmem:[%s19575_s3 + $0xc0] sm:$0xff]  ;;  %v19756_v39 = vld [vmem:[#allocation20_spill] sm:$0xff] }
 0x33c   : > { %v4433_v50 = vpop.permute.xlu1 %4432  ;;  %v4262_v0 = vmul.f32 %v13009_v20, %v19755_v31  ;;  %v4267_v7 = vmul.f32 %v13010_v25, %v19756_v39  ;;  %v3719_v31 = vsub.f32 %v15270_v62, %v15629_v27  ;;  %v13016_v62 = vld [vmem:[%s19575_s3 + $0xe0] sm:$0xff] }
 0x33d   : > { %4977 = vst.msk [vmem:[%s13633_s27 + $0xa0] sm:$0xff] %vm334_vm1, %v4875_v47  ;;  %v4872_v2 = vadd.f32 %v4433_v50, %v4260_v53  ;;  %4742 = vperm.xlu1 %12701, %v3710_v26   ;;  %v13011_v47 = vld [vmem:[%s13628_s24 + $0x288] sm:$0xff]  ;;  %v19757_v53 = vld [vmem:[#allocation85_spill] sm:$0xff]  ;;  %v19761_v27 = vld [vmem:[#allocation26_spill] sm:$0xff] }
 0x33e   : > { %v4458_v30 = vpop.permute.xlu0 %4457  ;;  %v3712_v44 = vsub.f32 %v13011_v47, %v15579_v10  ;;  %v3717_v23 = vsub.f32 %v19757_v53, %v15613_v33  ;;  %v19758_v10 = vld [vmem:[#allocation10_spill] sm:$0xff]  ;;  %v13013_v33 = vld [vmem:[%s19575_s3 + $0xd0] sm:$0xff]  ;;  %v13015_v47 = vld [vmem:[%s19575_s3 + $0xb8] sm:$0xff]  ;;  %v4271_v53 = vmul.f32 %v13016_v62, %v19761_v27 }
 0x33f   : > { %v4877_v58 = vadd.f32 %v4458_v30, %v4265_v37  ;;  %4767 = vperm.xlu0 %12700, %v3715_v22   ;;  %4974 = vst.msk [vmem:[%s13633_s27 + $0x88] sm:$0xff] %vm334_vm1, %v4872_v2  ;;  %v13012_v22 = vld [vmem:[%s19575_s3 + $0xa8] sm:$0xff]  ;;  %v19768_v27 = vld [vmem:[#allocation89_spill] sm:$0xff] }
 0x340   : > { %v4443_v37 = vpop.permute.xlu1 %4442  ;;  %v4264_v50 = vmul.f32 %v13012_v22, %v19758_v10  ;;  %v19759_v30 = vld [vmem:[#allocation23_spill] sm:$0xff] }
 0x341   : > { %4979 = vst.msk [vmem:[%s13633_s27 + $0xb0] sm:$0xff] %vm334_vm1, %v4877_v58  ;;  %v4874_v26 = vadd.f32 %v4443_v37, %v4262_v0  ;;  %4752 = vperm.xlu1 %12701, %v3712_v44   ;;  %v4269_v2 = vmul.f32 %v13013_v33, %v19759_v30  ;;  %v13014_v58 = vld [vmem:[%s13628_s24 + $0x298] sm:$0xff]  ;;  %v13018_v33 = vld [vmem:[%s19575_s3 + $0xc8] sm:$0xff] }
 0x342   : > { %v4468_v63 = vpop.permute.xlu0 %4467  ;;  %v3714_v20 = vsub.f32 %v13014_v58, %v15595_v1  ;;  %v19760_v1 = vld [vmem:[#allocation14_spill] sm:$0xff] }
 0x343   : > { %v4879_v38 = vadd.f32 %v4468_v63, %v4267_v7  ;;  %4777 = vperm.xlu0 %12700, %v3717_v23   ;;  %4976 = vst.msk [vmem:[%s13633_s27 + $0x98] sm:$0xff] %vm334_vm1, %v4874_v26  ;;  %v4266_v44 = vmul.f32 %v13015_v47, %v19760_v1  ;;  %v13017_v23 = vld [vmem:[%s13628_s24 + $0x2a8] sm:$0xff]  ;;  %v19762_v63 = vld [vmem:[#allocation92_spill] sm:$0xff]  ;;  %v13020_v1 = vld [vmem:[%s19575_s3 + $0xd8] sm:$0xff] }
 0x344   : > { %v4453_v0 = vpop.permute.xlu1 %4452  ;;  %v3716_v37 = vsub.f32 %v13017_v23, %v15611_v42  ;;  %v3721_v26 = vsub.f32 %v19762_v63, %v15645_v59  ;;  %v19763_v42 = vld [vmem:[#allocation18_spill] sm:$0xff]  ;;  %v13019_v59 = vld [vmem:[%s19575_s3 + $0xf0] sm:$0xff]  ;;  %v3725_v23 = vsub.f32 %v15377_v41, %v15677_v32  ;;  %v19770_v32 = vld [vmem:[#allocation37_spill] sm:$0xff] }
 0x345   : > { %4981 = vst.msk [vmem:[%s13633_s27 + $0xc0] sm:$0xff] %vm334_vm1, %v4879_v38  ;;  %v4876_v39 = vadd.f32 %v4453_v0, %v4264_v50  ;;  %4762 = vperm.xlu1 %12701, %v3714_v20   ;;  %v4268_v30 = vmul.f32 %v13018_v33, %v19763_v42  ;;  %v19765_v20 = vld [vmem:[#allocation84_spill] sm:$0xff]  ;;  %v3723_v0 = vsub.f32 %v15346_v52, %v15661_v14  ;;  %v13021_v52 = vld [vmem:[%s19575_s3 + $0x100] sm:$0xff]  ;;  %v19767_v14 = vld [vmem:[#allocation33_spill] sm:$0xff] }
 0x346   : > { %v4478_v25 = vpop.permute.xlu0 %4477  ;;  %v4275_v62 = vmul.f32 %v13021_v52, %v19767_v14  ;;  %v13023_v41 = vld [vmem:[%s19575_s3 + $0x110] sm:$0xff]  ;;  %v19771_v33 = vld [vmem:[#allocation91_spill] sm:$0xff] }
 0x347   : > { %v4881_v7 = vadd.f32 %v4478_v25, %v4269_v2  ;;  %4787 = vperm.xlu0 %12700, %v3719_v31   ;;  %4978 = vst.msk [vmem:[%s13633_s27 + $0xa8] sm:$0xff] %vm334_vm1, %v4876_v39  ;;  %v19764_v2 = vld [vmem:[#allocation29_spill] sm:$0xff]  ;;  %v3718_v31 = vsub.f32 %v19765_v20, %v15627_v51  ;;  %v3722_v42 = vsub.f32 %v19771_v33, %v15659_v24  ;;  %v19772_v24 = vld [vmem:[#allocation27_spill] sm:$0xff]  ;;  %v19778_v33 = vld [vmem:[#allocation38_spill] sm:$0xff] }
 0x348   : > { %v4463_v38 = vpop.permute.xlu1 %4462  ;;  %v4273_v58 = vmul.f32 %v13019_v59, %v19764_v2  ;;  %v19766_v51 = vld [vmem:[#allocation21_spill] sm:$0xff]  ;;  %v13026_v52 = vld [vmem:[%s19575_s3 + $0x108] sm:$0xff] }
 0x349   : > { %4983 = vst.msk [vmem:[%s13633_s27 + $0xd0] sm:$0xff] %vm334_vm1, %v4881_v7  ;;  %v4878_v10 = vadd.f32 %v4463_v38, %v4266_v44  ;;  %4772 = vperm.xlu1 %12701, %v3716_v37   ;;  %v4270_v44 = vmul.f32 %v13020_v1, %v19766_v51 }
 0x34a   : > { %v4488_v22 = vpop.permute.xlu0 %4487 }
 0x34b   : > { %v4883_v50 = vadd.f32 %v4488_v22, %v4271_v53  ;;  %4797 = vperm.xlu0 %12700, %v3721_v26   ;;  %4980 = vst.msk [vmem:[%s13633_s27 + $0xb8] sm:$0xff] %vm334_vm1, %v4878_v10  ;;  %v3720_v53 = vsub.f32 %v19768_v27, %v15643_v49  ;;  %v13022_v22 = vld [vmem:[%s19575_s3 + $0xe8] sm:$0xff]  ;;  %v19769_v49 = vld [vmem:[#allocation24_spill] sm:$0xff]  ;;  %v3731_v27 = vsub.f32 %v15448_v19, %v15725_v36  ;;  %v13029_v19 = vld [vmem:[%s19575_s3 + $0x140] sm:$0xff] }
 0x34c   : > { %v4473_v25 = vpop.permute.xlu1 %4472  ;;  %v4272_v10 = vmul.f32 %v13022_v22, %v19769_v49  ;;  %v3728_v22 = vsub.f32 %v15397_v17, %v15707_v12  ;;  %v13031_v17 = vld [vmem:[%s19575_s3 + $0x150] sm:$0xff]  ;;  %v19779_v12 = vld [vmem:[#allocation53_spill] sm:$0xff] }
 0x34d   : > { %4985 = vst.msk [vmem:[%s13633_s27 + $0xe0] sm:$0xff] %vm334_vm1, %v4883_v50  ;;  %v4880_v7 = vadd.f32 %v4473_v25, %v4268_v30  ;;  %4782 = vperm.xlu1 %12701, %v3718_v31   ;;  %v4277_v50 = vmul.f32 %v13023_v41, %v19770_v32  ;;  %v3727_v30 = vsub.f32 %v15400_v3, %v15693_v48  ;;  %v13024_v31 = vld [vmem:[%s19575_s3 + $0xf8] sm:$0xff]  ;;  %v13025_v3 = vld [vmem:[%s19575_s3 + $0x120] sm:$0xff] }
 0x34e   : > { %v4498_v39 = vpop.permute.xlu0 %4497  ;;  %v19773_v48 = vld [vmem:[#allocation41_spill] sm:$0xff] }
 0x34f   : > { %v4885_v47 = vadd.f32 %v4498_v39, %v4273_v58  ;;  %4807 = vperm.xlu0 %12700, %v3723_v0   ;;  %4982 = vst.msk [vmem:[%s13633_s27 + $0xc8] sm:$0xff] %vm334_vm1, %v4880_v7  ;;  %v4274_v0 = vmul.f32 %v13024_v31, %v19772_v24  ;;  %v4279_v25 = vmul.f32 %v13025_v3, %v19773_v48  ;;  %v13032_v24 = vld [vmem:[%s19575_s3 + $0x138] sm:$0xff] }
 0x350   : > { %v4483_v37 = vpop.permute.xlu1 %4482  ;;  %v3724_v39 = vsub.f32 %v15343_v28, %v15675_v43  ;;  %v3729_v7 = vsub.f32 %v15424_v54, %v15709_v56  ;;  %v19774_v28 = vld [vmem:[#allocation30_spill] sm:$0xff]  ;;  %v13027_v54 = vld [vmem:[%s19575_s3 + $0x130] sm:$0xff]  ;;  %v19775_v56 = vld [vmem:[#allocation45_spill] sm:$0xff] }
 0x351   : > { %4987 = vst.msk [vmem:[%s13633_s27 + $0xf0] sm:$0xff] %vm334_vm1, %v4885_v47  ;;  %v4882_v26 = vadd.f32 %v4483_v37, %v4270_v44  ;;  %4792 = vperm.xlu1 %12701, %v3720_v53   ;;  %v4276_v43 = vmul.f32 %v13026_v52, %v19774_v28  ;;  %v4281_v14 = vmul.f32 %v13027_v54, %v19775_v56 }
 0x352   : > { %v4508_v63 = vpop.permute.xlu0 %4507 }
 0x353   : > { %v4887_v38 = vadd.f32 %v4508_v63, %v4275_v62  ;;  %4817 = vperm.xlu0 %12700, %v3725_v23   ;;  %4984 = vst.msk [vmem:[%s13633_s27 + $0xd8] sm:$0xff] %vm334_vm1, %v4882_v26  ;;  %v3726_v62 = vsub.f32 %v15374_v61, %v15691_v57  ;;  %v13028_v26 = vld [vmem:[%s19575_s3 + $0x118] sm:$0xff] }
 0x354   : > { %v4493_v59 = vpop.permute.xlu1 %4492  ;;  %v19777_v57 = vld [vmem:[#allocation49_spill] sm:$0xff] }
 0x355   : > { %4989 = vst.msk [vmem:[%s13633_s27 + $0x100] sm:$0xff] %vm334_vm1, %v4887_v38  ;;  %v4884_v58 = vadd.f32 %v4493_v59, %v4272_v10  ;;  %4802 = vperm.xlu1 %12701, %v3722_v42   ;;  %v19776_v38 = vld [vmem:[#allocation34_spill] sm:$0xff]  ;;  %v4283_v36 = vmul.f32 %v13029_v19, %v19777_v57  ;;  %v3730_v59 = vsub.f32 %v15421_v34, %v15723_v60  ;;  %v19781_v60 = vld [vmem:[#allocation56_spill] sm:$0xff]  ;;  %v13038_v57 = vld [vmem:[%s19575_s3 + $0x168] sm:$0xff] }
 0x356   : > { %v4518_v2 = vpop.permute.xlu0 %4517  ;;  %v4278_v61 = vmul.f32 %v13028_v26, %v19776_v38  ;;  %v13033_v34 = vld [vmem:[%s19575_s3 + $0x160] sm:$0xff] }
 0x357   : > { %v4889_v20 = vadd.f32 %v4518_v2, %v4277_v50  ;;  %4827 = vperm.xlu0 %12700, %v3727_v30   ;;  %4986 = vst.msk [vmem:[%s13633_s27 + $0xe8] sm:$0xff] %vm334_vm1, %v4884_v58  ;;  %v13030_v50 = vld [vmem:[%s19575_s3 + $0x128] sm:$0xff]  ;;  %v4285_v30 = vmul.f32 %v13031_v17, %v19779_v12  ;;  %v4287_v48 = vmul.f32 %v13033_v34, %v19781_v60  ;;  %v13040_v17 = vld [vmem:[%s19575_s3 + $0x178] sm:$0xff] }
 0x358   : > { %v4503_v47 = vpop.permute.xlu1 %4502  ;;  %v4280_v42 = vmul.f32 %v13030_v50, %v19778_v33  ;;  %v19788_v12 = vld [vmem:[#allocation57_spill] sm:$0xff] }
 0x359   : > { %4991 = vst.msk [vmem:[%s13633_s27 + $0x110] sm:$0xff] %vm334_vm1, %v4889_v20  ;;  %v4886_v51 = vadd.f32 %v4503_v47, %v4274_v0  ;;  %4812 = vperm.xlu1 %12701, %v3724_v39   ;;  %v19780_v0 = vld [vmem:[#allocation42_spill] sm:$0xff]  ;;  %v19790_v34 = vld [vmem:[#allocation61_spill] sm:$0xff] }
 0x35a   : > { %v4528_v1 = vpop.permute.xlu0 %4527  ;;  %v4282_v3 = vmul.f32 %v13032_v24, %v19780_v0 }
 0x35b   : > { %v4891_v44 = vadd.f32 %v4528_v1, %v4279_v25  ;;  %4837 = vperm.xlu0 %12700, %v3729_v7   ;;  %4988 = vst.msk [vmem:[%s13633_s27 + $0xf8] sm:$0xff] %vm334_vm1, %v4886_v51  ;;  %v3732_v25 = vsub.f32 %v15445_v6, %v15747_v46  ;;  %v13034_v51 = vld [vmem:[%s19575_s3 + $0x148] sm:$0xff]  ;;  %v13035_v6 = vld [vmem:[%s19575_s3 + $0x170] sm:$0xff] }
 0x35c   : > { %v4513_v53 = vpop.permute.xlu1 %4512  ;;  %v19783_v46 = vld [vmem:[#allocation60_spill] sm:$0xff] }
 0x35d   : > { %4993 = vst.msk [vmem:[%s13633_s27 + $0x120] sm:$0xff] %vm334_vm1, %v4891_v44  ;;  %v4888_v37 = vadd.f32 %v4513_v53, %v4276_v43  ;;  %4822 = vperm.xlu1 %12701, %v3726_v62   ;;  %v19782_v44 = vld [vmem:[#allocation46_spill] sm:$0xff]  ;;  %v4289_v28 = vmul.f32 %v13035_v6, %v19783_v46  ;;  %v13036_v62 = vld [vmem:[%s19575_s3 + $0x158] sm:$0xff] }
 0x35e   : > { %v4538_v23 = vpop.permute.xlu0 %4537  ;;  %v4284_v52 = vmul.f32 %v13034_v51, %v19782_v44  ;;  %v13044_v44 = vld [vmem:[%s19575_s3 + $0x198] sm:$0xff]  ;;  %v13045_v46 = vld [vmem:[%s19575_s3 + $0x1c0] sm:$0xff] }
 0x35f   : > { %v4893_v63 = vadd.f32 %v4538_v23, %v4281_v14  ;;  %4847 = vperm.xlu0 %12700, %v3731_v27   ;;  %4990 = vst.msk [vmem:[%s13633_s27 + $0x108] sm:$0xff] %vm334_vm1, %v4888_v37  ;;  %v19784_v27 = vld [vmem:[#allocation50_spill] sm:$0xff]  ;;  %v19785_v37 = vld [vmem:[#allocation64_spill] sm:$0xff] }
 0x360   : > { %v4523_v49 = vpop.permute.xlu1 %4522  ;;  %v4286_v53 = vmul.f32 %v13036_v62, %v19784_v27  ;;  %v13037_v23 = vld [vmem:[%s19575_s3 + $0x180] sm:$0xff]  ;;  %v13046_v27 = vld [vmem:[%s19575_s3 + $0x1a8] sm:$0xff] }
 0x361   : > { %4995 = vst.msk [vmem:[%s13633_s27 + $0x130] sm:$0xff] %vm334_vm1, %v4893_v63  ;;  %v4890_v41 = vadd.f32 %v4523_v49, %v4278_v61  ;;  %4832 = vperm.xlu1 %12701, %v3728_v22   ;;  %v4291_v63 = vmul.f32 %v13037_v23, %v19785_v37  ;;  %v13039_v49 = vld [vmem:[%s19575_s3 + $0x190] sm:$0xff] }
 0x362   : > { %v4548_v10 = vpop.permute.xlu0 %4547  ;;  %v13047_v37 = vld [vmem:[%s19575_s3 + $0x1d0] sm:$0xff] }
 0x363   : > { %v4895_v32 = vadd.f32 %v4548_v10, %v4283_v36  ;;  %4992 = vst.msk [vmem:[%s13633_s27 + $0x118] sm:$0xff] %vm334_vm1, %v4890_v41  ;;  %v19786_v36 = vld [vmem:[#allocation54_spill] sm:$0xff]  ;;  %v19787_v10 = vld [vmem:[#allocation68_spill] sm:$0xff] }
 0x364   : > { %v4533_v2 = vpop.permute.xlu1 %4532  ;;  %v4288_v22 = vmul.f32 %v13038_v57, %v19786_v36  ;;  %v4293_v41 = vmul.f32 %v13039_v49, %v19787_v10  ;;  %v13048_v36 = vld [vmem:[%s19575_s3 + $0x1b8] sm:$0xff]  ;;  %v13049_v10 = vld [vmem:[%s19575_s3 + $0x1e0] sm:$0xff] }
 0x365   : > { %4997 = vst.msk [vmem:[%s13633_s27 + $0x140] sm:$0xff] %vm334_vm1, %v4895_v32  ;;  %v4892_v20 = vadd.f32 %v4533_v2, %v4280_v42  ;;  %4842 = vperm.xlu1 %12701, %v3730_v59   ;;  %v13041_v59 = vld [vmem:[%s19575_s3 + $0x1a0] sm:$0xff]  ;;  %v19789_v2 = vld [vmem:[#allocation72_spill] sm:$0xff] }
 0x366   : > { %v4558_v58 = vpop.permute.xlu0 %4557 }
 0x367   : > { %v4897_v31 = vadd.f32 %v4558_v58, %v4285_v30  ;;  %4994 = vst.msk [vmem:[%s13633_s27 + $0x128] sm:$0xff] %vm334_vm1, %v4892_v20  ;;  %v4290_v30 = vmul.f32 %v13040_v17, %v19788_v12  ;;  %v4295_v58 = vmul.f32 %v13041_v59, %v19789_v2  ;;  %v13050_v12 = vld [vmem:[%s19575_s3 + $0x1c8] sm:$0xff]  ;;  %v13051_v2 = vld [vmem:[%s19575_s3 + $0x1f0] sm:$0xff] }
 0x368   : > { %v4543_v39 = vpop.permute.xlu1 %4542 }
 0x369   : > { %4999 = vst.msk [vmem:[%s13633_s27 + $0x150] sm:$0xff] %vm334_vm1, %v4897_v31  ;;  %v4894_v47 = vadd.f32 %v4543_v39, %v4282_v3  ;;  %4852 = vperm.xlu1 %12701, %v3732_v25   ;;  %v13042_v3 = vld [vmem:[%s19575_s3 + $0x188] sm:$0xff]  ;;  %v19791_v25 = vld [vmem:[#allocation76_spill] sm:$0xff] }
 0x36a   : > { %v4568_v7 = vpop.permute.xlu0 %4567  ;;  %v4292_v60 = vmul.f32 %v13042_v3, %v19790_v34  ;;  %v13052_v3 = vld [vmem:[%s19575_s3 + $0x1d8] sm:$0xff]  ;;  %v19799_v34 = vld [vmem:[#allocation80_spill] sm:$0xff] }
 0x36b   : > { %v4899_v1 = vadd.f32 %v4568_v7, %v4287_v48  ;;  %4996 = vst.msk [vmem:[%s13633_s27 + $0x138] sm:$0xff] %vm334_vm1, %v4894_v47  ;;  %v13043_v48 = vld [vmem:[%s19575_s3 + $0x1b0] sm:$0xff] }
 0x36c   : > { %v4553_v43 = vpop.permute.xlu1 %4552  ;;  %v4297_v39 = vmul.f32 %v13043_v48, %v19791_v25 }
 0x36d   : > { %5001 = vst.msk [vmem:[%s13633_s27 + $0x160] sm:$0xff] %vm334_vm1, %v4899_v1  ;;  %v4896_v56 = vadd.f32 %v4553_v43, %v4284_v52  ;;  %v19792_v52 = vld [vmem:[#allocation65_spill] sm:$0xff] }
 0x36e   : > { %v4578_v54 = vpop.permute.xlu0 %4577  ;;  %v4294_v6 = vmul.f32 %v13044_v44, %v19792_v52 }
 0x36f   : > { %v4901_v14 = vadd.f32 %v4578_v54, %v4289_v28  ;;  %4998 = vst.msk [vmem:[%s13633_s27 + $0x148] sm:$0xff] %vm334_vm1, %v4896_v56  ;;  %v19793_v28 = vld [vmem:[#allocation79_spill] sm:$0xff] }
 0x370   : > { %v4563_v26 = vpop.permute.xlu1 %4562  ;;  %v4299_v43 = vmul.f32 %v13045_v46, %v19793_v28 }
 0x371   : > { %5003 = vst.msk [vmem:[%s13633_s27 + $0x170] sm:$0xff] %vm334_vm1, %v4901_v14  ;;  %v4898_v61 = vadd.f32 %v4563_v26, %v4286_v53  ;;  %v19794_v53 = vld [vmem:[#allocation69_spill] sm:$0xff] }
 0x372   : > { %v4588_v38 = vpop.permute.xlu0 %4587  ;;  %v4296_v23 = vmul.f32 %v13046_v27, %v19794_v53 }
 0x373   : > { %v4903_v19 = vadd.f32 %v4588_v38, %v4291_v63  ;;  %5000 = vst.msk [vmem:[%s13633_s27 + $0x158] sm:$0xff] %vm334_vm1, %v4898_v61  ;;  %v19795_v63 = vld [vmem:[#allocation81_spill] sm:$0xff] }
 0x374   : > { %v4573_v32 = vpop.permute.xlu1 %4572  ;;  %v4301_v26 = vmul.f32 %v13047_v37, %v19795_v63  ;;  %v13058_v63 = vld [vmem:[%s19575_s3 + $0x208] sm:$0xff] }
 0x375   : > { %5005 = vst.msk [vmem:[%s13633_s27 + $0x180] sm:$0xff] %vm334_vm1, %v4903_v19  ;;  %v4900_v33 = vadd.f32 %v4573_v32, %v4288_v22  ;;  %v19796_v22 = vld [vmem:[#allocation73_spill] sm:$0xff] }
 0x376   : > { %v4598_v50 = vpop.permute.xlu0 %4597  ;;  %v4298_v49 = vmul.f32 %v13048_v36, %v19796_v22 }
 0x377   : > { %v4905_v42 = vadd.f32 %v4598_v50, %v4293_v41  ;;  %5002 = vst.msk [vmem:[%s13633_s27 + $0x168] sm:$0xff] %vm334_vm1, %v4900_v33  ;;  %v19797_v41 = vld [vmem:[#allocation87_spill] sm:$0xff] }
 0x378   : > { %v4583_v20 = vpop.permute.xlu1 %4582  ;;  %v4303_v32 = vmul.f32 %v13049_v10, %v19797_v41 }
 0x379   : > { %5007 = vst.msk [vmem:[%s13633_s27 + $0x190] sm:$0xff] %vm334_vm1, %v4905_v42  ;;  %v4902_v24 = vadd.f32 %v4583_v20, %v4290_v30  ;;  %v19798_v30 = vld [vmem:[#allocation77_spill] sm:$0xff] }
 0x37a   : > { %v4608_v31 = vpop.permute.xlu0 %4607  ;;  %v4300_v59 = vmul.f32 %v13050_v12, %v19798_v30  ;;  %v19804_v30 = vld [vmem:[#allocation16_spill] sm:$0xff] }
 0x37b   : > { %v4907_v0 = vadd.f32 %v4608_v31, %v4295_v58  ;;  %5004 = vst.msk [vmem:[%s13633_s27 + $0x178] sm:$0xff] %vm334_vm1, %v4902_v24  ;;  %v4305_v58 = vmul.f32 %v13051_v2, %v15332_v11  ;;  %v13053_v11 = vld [vmem:[%s19575_s3 + $0x200] sm:$0xff] }
 0x37c   : > { %v4593_v7 = vpop.permute.xlu1 %4592  ;;  %v4307_v48 = vmul.f32 %v13053_v11, %v15380_v4  ;;  %v13055_v4 = vld [vmem:[%s19575_s3 + $0x210] sm:$0xff] }
 0x37d   : > { %5009 = vst.msk [vmem:[%s13633_s27 + $0x1a0] sm:$0xff] %vm334_vm1, %v4907_v0  ;;  %v4904_v1 = vadd.f32 %v4593_v7, %v4292_v60  ;;  %v4302_v60 = vmul.f32 %v13052_v3, %v19799_v34  ;;  %v4309_v52 = vmul.f32 %v13055_v4, %v15417_v8  ;;  %v13057_v8 = vld [vmem:[%s19575_s3 + $0x220] sm:$0xff]  ;;  %v19808_v4 = vld [vmem:[#allocation19_spill] sm:$0xff] }
 0x37e   : > { %v4618_v47 = vpop.permute.xlu0 %4617  ;;  %v13065_v34 = vld [vmem:[%s19575_s3 + $0x260] sm:$0xff] }
 0x37f   : > { %v4909_v51 = vadd.f32 %v4618_v47, %v4297_v39  ;;  %5006 = vst.msk [vmem:[%s13633_s27 + $0x188] sm:$0xff] %vm334_vm1, %v4904_v1  ;;  %v13054_v1 = vld [vmem:[%s19575_s3 + $0x1e8] sm:$0xff] }
 0x380   : > { %v4603_v54 = vpop.permute.xlu1 %4602 }
 0x381   : > { %5011 = vst.msk [vmem:[%s13633_s27 + $0x1b0] sm:$0xff] %vm334_vm1, %v4909_v51  ;;  %v4906_v14 = vadd.f32 %v4603_v54, %v4294_v6  ;;  %v19800_v51 = vld [vmem:[#allocation83_spill] sm:$0xff]  ;;  %v13056_v54 = vld [vmem:[%s19575_s3 + $0x1f8] sm:$0xff] }
 0x382   : > { %v4628_v56 = vpop.permute.xlu0 %4627  ;;  %v4304_v44 = vmul.f32 %v13054_v1, %v19800_v51  ;;  %v19807_v1 = vld [vmem:[#allocation95_spill] sm:$0xff] }
 0x383   : > { %v4911_v62 = vadd.f32 %v4628_v56, %v4299_v43  ;;  %5008 = vst.msk [vmem:[%s13633_s27 + $0x198] sm:$0xff] %vm334_vm1, %v4906_v14  ;;  %v19801_v56 = vld [vmem:[#allocation88_spill] sm:$0xff] }
 0x384   : > { %v4613_v38 = vpop.permute.xlu1 %4612  ;;  %v4306_v14 = vmul.f32 %v13056_v54, %v19801_v56  ;;  %v13068_v54 = vld [vmem:[%s19575_s3 + $0x258] sm:$0xff]  ;;  %v19809_v56 = vld [vmem:[#allocation12_spill] sm:$0xff] }
 0x385   : > { %5013 = vst.msk [vmem:[%s13633_s27 + $0x1c0] sm:$0xff] %vm334_vm1, %v4911_v62  ;;  %v4908_v19 = vadd.f32 %v4613_v38, %v4296_v23  ;;  %v4311_v62 = vmul.f32 %v13057_v8, %v15459_v9  ;;  %v13059_v9 = vld [vmem:[%s19575_s3 + $0x230] sm:$0xff]  ;;  %v13069_v8 = vld [vmem:[%s19575_s3 + $0x280] sm:$0xff] }
 0x386   : > { %v4638_v61 = vpop.permute.xlu0 %4637 }
 0x387   : > { %v4913_v57 = vadd.f32 %v4638_v61, %v4301_v26  ;;  %5010 = vst.msk [vmem:[%s13633_s27 + $0x1a8] sm:$0xff] %vm334_vm1, %v4908_v19  ;;  %v19802_v26 = vld [vmem:[#allocation90_spill] sm:$0xff]  ;;  %v4313_v61 = vmul.f32 %v13059_v9, %v15490_v5 }
 0x388   : > { %v4623_v50 = vpop.permute.xlu1 %4622  ;;  %v4308_v38 = vmul.f32 %v13058_v63, %v19802_v26  ;;  %v13061_v5 = vld [vmem:[%s19575_s3 + $0x240] sm:$0xff]  ;;  %v13070_v26 = vld [vmem:[%s19575_s3 + $0x268] sm:$0xff] }
 0x389   : > { %5015 = vst.msk [vmem:[%s13633_s27 + $0x1d0] sm:$0xff] %vm334_vm1, %v4913_v57  ;;  %v4910_v42 = vadd.f32 %v4623_v50, %v4298_v49  ;;  %v13060_v49 = vld [vmem:[%s19575_s3 + $0x218] sm:$0xff]  ;;  %v4315_v41 = vmul.f32 %v13061_v5, %v15523_v29  ;;  %v13063_v29 = vld [vmem:[%s19575_s3 + $0x250] sm:$0xff] }
 0x38a   : > { %v4648_v33 = vpop.permute.xlu0 %4647  ;;  %v4310_v10 = vmul.f32 %v13060_v49, %v15360_v16  ;;  %v13062_v16 = vld [vmem:[%s19575_s3 + $0x228] sm:$0xff]  ;;  %v13072_v5 = vld [vmem:[%s19575_s3 + $0x278] sm:$0xff] }
 0x38b   : > { %v4915_v17 = vadd.f32 %v4648_v33, %v4303_v32  ;;  %5012 = vst.msk [vmem:[%s13633_s27 + $0x1b8] sm:$0xff] %vm334_vm1, %v4910_v42 }
 0x38c   : > { %v4633_v20 = vpop.permute.xlu1 %4632 }
 0x38d   : > { %5017 = vst.msk [vmem:[%s13633_s27 + $0x1e0] sm:$0xff] %vm334_vm1, %v4915_v17  ;;  %v4912_v24 = vadd.f32 %v4633_v20, %v4300_v59  ;;  %v19803_v17 = vld [vmem:[#allocation93_spill] sm:$0xff]  ;;  %v4317_v59 = vmul.f32 %v13063_v29, %v19804_v30  ;;  %v13074_v30 = vld [vmem:[%s19575_s3 + $0x288] sm:$0xff] }
 0x38e   : > { %v4658_v31 = vpop.permute.xlu0 %4657  ;;  %v4312_v12 = vmul.f32 %v13062_v16, %v19803_v17 }
 0x38f   : > { %v4917_v0 = vadd.f32 %v4658_v31, %v4305_v58  ;;  %5014 = vst.msk [vmem:[%s13633_s27 + $0x1c8] sm:$0xff] %vm334_vm1, %v4912_v24  ;;  %v13064_v24 = vld [vmem:[%s19575_s3 + $0x238] sm:$0xff] }
 0x390   : > { %v4643_v25 = vpop.permute.xlu1 %4642 }
 0x391   : > { %5019 = vst.msk [vmem:[%s13633_s27 + $0x1f0] sm:$0xff] %vm334_vm1, %v4917_v0  ;;  %v4914_v7 = vadd.f32 %v4643_v25, %v4302_v60  ;;  %v19805_v0 = vld [vmem:[#allocation94_spill] sm:$0xff]  ;;  %v19806_v60 = vld [vmem:[#allocation11_spill] sm:$0xff] }
 0x392   : > { %v4668_v39 = vpop.permute.xlu0 %4667  ;;  %v4314_v3 = vmul.f32 %v13064_v24, %v19805_v0  ;;  %v4319_v11 = vmul.f32 %v13065_v34, %v19806_v60  ;;  %v13076_v60 = vld [vmem:[%s19575_s3 + $0x298] sm:$0xff] }
 0x393   : > { %v4919_v47 = vadd.f32 %v4668_v39, %v4307_v48  ;;  %5016 = vst.msk [vmem:[%s13633_s27 + $0x1d8] sm:$0xff] %vm334_vm1, %v4914_v7 }
 0x394   : > { %v4653_v6 = vpop.permute.xlu1 %4652 }
 0x395   : > { %5021 = vst.msk [vmem:[%s13633_s27 + $0x200] sm:$0xff] %vm334_vm1, %v4919_v47  ;;  %v4916_v28 = vadd.f32 %v4653_v6, %v4304_v44  ;;  %v13066_v47 = vld [vmem:[%s19575_s3 + $0x248] sm:$0xff]  ;;  %v13067_v44 = vld [vmem:[%s19575_s3 + $0x270] sm:$0xff] }
 0x396   : > { %v4678_v46 = vpop.permute.xlu0 %4677  ;;  %v4316_v51 = vmul.f32 %v13066_v47, %v19807_v1 }
 0x397   : > { %v4921_v43 = vadd.f32 %v4678_v46, %v4309_v52  ;;  %5018 = vst.msk [vmem:[%s13633_s27 + $0x1e8] sm:$0xff] %vm334_vm1, %v4916_v28  ;;  %v4321_v52 = vmul.f32 %v13067_v44, %v19808_v4  ;;  %v13078_v4 = vld [vmem:[%s19575_s3 + $0x2a8] sm:$0xff] }
 0x398   : > { %v4663_v27 = vpop.permute.xlu1 %4662 }
 0x399   : > { %5023 = vst.msk [vmem:[%s13633_s27 + $0x210] sm:$0xff] %vm334_vm1, %v4921_v43  ;;  %v4918_v23 = vadd.f32 %v4663_v27, %v4306_v14  ;;  %v4318_v14 = vmul.f32 %v13068_v54, %v19809_v56 }
 0x39a   : > { %v4688_v53 = vpop.permute.xlu0 %4687 }
 0x39b   : > { %v4923_v37 = vadd.f32 %v4688_v53, %v4311_v62  ;;  %5020 = vst.msk [vmem:[%s13633_s27 + $0x1f8] sm:$0xff] %vm334_vm1, %v4918_v23  ;;  %v19810_v62 = vld [vmem:[#allocation32_spill] sm:$0xff] }
 0x39c   : > { %v4673_v19 = vpop.permute.xlu1 %4672  ;;  %v4323_v27 = vmul.f32 %v13069_v8, %v19810_v62  ;;  %v13080_v8 = vld [vmem:[%s19575_s3 + $0x2b8] sm:$0xff]  ;;  %v19820_v62 = vld [vmem:[#allocation28_spill] sm:$0xff] }
 0x39d   : > { %5025 = vst.msk [vmem:[%s13633_s27 + $0x220] sm:$0xff] %vm334_vm1, %v4923_v37  ;;  %v4920_v36 = vadd.f32 %v4673_v19, %v4308_v38  ;;  %v19811_v38 = vld [vmem:[#allocation5_spill] sm:$0xff]  ;;  %v19812_v19 = vld [vmem:[#allocation36_spill] sm:$0xff] }
 0x39e   : > { %v4698_v57 = vpop.permute.xlu0 %4697  ;;  %v4320_v9 = vmul.f32 %v13070_v26, %v19811_v38  ;;  %v13082_v38 = vld [vmem:[%s19575_s3 + $0x2c8] sm:$0xff] }
 0x39f   : > { %v4925_v22 = vadd.f32 %v4698_v57, %v4313_v61  ;;  %5022 = vst.msk [vmem:[%s13633_s27 + $0x208] sm:$0xff] %vm334_vm1, %v4920_v36  ;;  %v13071_v61 = vld [vmem:[%s19575_s3 + $0x290] sm:$0xff] }
 0x3a0   : > { %v4683_v32 = vpop.permute.xlu1 %4682  ;;  %v4325_v57 = vmul.f32 %v13071_v61, %v19812_v19 }
 0x3a1   : > { %5027 = vst.msk [vmem:[%s13633_s27 + $0x230] sm:$0xff] %vm334_vm1, %v4925_v22  ;;  %v4922_v33 = vadd.f32 %v4683_v32, %v4310_v10 }
 0x3a2   : > { %v4708_v50 = vpop.permute.xlu0 %4707 }
 0x3a3   : > { %v4927_v42 = vadd.f32 %v4708_v50, %v4315_v41  ;;  %5024 = vst.msk [vmem:[%s13633_s27 + $0x218] sm:$0xff] %vm334_vm1, %v4922_v33  ;;  %v19813_v41 = vld [vmem:[#allocation8_spill] sm:$0xff]  ;;  %v13073_v50 = vld [vmem:[%s19575_s3 + $0x2a0] sm:$0xff] }
 0x3a4   : > { %v4693_v2 = vpop.permute.xlu1 %4692  ;;  %v4322_v32 = vmul.f32 %v13072_v5, %v19813_v41  ;;  %v19814_v33 = vld [vmem:[#allocation40_spill] sm:$0xff]  ;;  %v19822_v5 = vld [vmem:[#allocation35_spill] sm:$0xff] }
 0x3a5   : > { %5029 = vst.msk [vmem:[%s13633_s27 + $0x240] sm:$0xff] %vm334_vm1, %v4927_v42  ;;  %v4924_v20 = vadd.f32 %v4693_v2, %v4312_v12  ;;  %v4327_v42 = vmul.f32 %v13073_v50, %v19814_v33 }
 0x3a6   : > { %v4718_v58 = vpop.permute.xlu0 %4717 }
 0x3a7   : > { %v4929_v31 = vadd.f32 %v4718_v58, %v4317_v59  ;;  %5026 = vst.msk [vmem:[%s13633_s27 + $0x228] sm:$0xff] %vm334_vm1, %v4924_v20  ;;  %v19815_v59 = vld [vmem:[#allocation15_spill] sm:$0xff]  ;;  %v13075_v58 = vld [vmem:[%s19575_s3 + $0x2b0] sm:$0xff] }
 0x3a8   : > { %v4703_v48 = vpop.permute.xlu1 %4702  ;;  %v4324_v2 = vmul.f32 %v13074_v30, %v19815_v59  ;;  %v19816_v20 = vld [vmem:[#allocation44_spill] sm:$0xff] }
 0x3a9   : > { %5031 = vst.msk [vmem:[%s13633_s27 + $0x250] sm:$0xff] %vm334_vm1, %v4929_v31  ;;  %v4926_v39 = vadd.f32 %v4703_v48, %v4314_v3  ;;  %v4329_v31 = vmul.f32 %v13075_v58, %v19816_v20 }
 0x3aa   : > { %v4728_v25 = vpop.permute.xlu0 %4727 }
 0x3ab   : > { %v4931_v7 = vadd.f32 %v4728_v25, %v4319_v11  ;;  %5028 = vst.msk [vmem:[%s13633_s27 + $0x238] sm:$0xff] %vm334_vm1, %v4926_v39  ;;  %v19817_v11 = vld [vmem:[#allocation22_spill] sm:$0xff]  ;;  %v19818_v39 = vld [vmem:[#allocation48_spill] sm:$0xff] }
 0x3ac   : > { %v4713_v6 = vpop.permute.xlu1 %4712  ;;  %v4326_v48 = vmul.f32 %v13076_v60, %v19817_v11  ;;  %v13077_v25 = vld [vmem:[%s19575_s3 + $0x2c0] sm:$0xff] }
 0x3ad   : > { %5033 = vst.msk [vmem:[%s13633_s27 + $0x260] sm:$0xff] %vm334_vm1, %v4931_v7  ;;  %v4928_v28 = vadd.f32 %v4713_v6, %v4316_v51  ;;  %v4331_v7 = vmul.f32 %v13077_v25, %v19818_v39  ;;  %v13090_v25 = vld [vmem:[%s19575_s3 + $0x308] sm:$0xff] }
 0x3ae   : > { %v4738_v46 = vpop.permute.xlu0 %4737  ;;  %v4340_v39 = vmul.f32 %v13090_v25, %v15685_v21  ;;  %v13092_v21 = vld [vmem:[%s19575_s3 + $0x328] sm:$0xff] }
 0x3af   : > { %v4933_v43 = vadd.f32 %v4738_v46, %v4321_v52  ;;  %5030 = vst.msk [vmem:[%s13633_s27 + $0x248] sm:$0xff] %vm334_vm1, %v4928_v28  ;;  %v19819_v52 = vld [vmem:[#allocation25_spill] sm:$0xff]  ;;  %v13079_v46 = vld [vmem:[%s19575_s3 + $0x2d0] sm:$0xff] }
 0x3b0   : > { %v4723_v53 = vpop.permute.xlu1 %4722  ;;  %v4328_v6 = vmul.f32 %v13078_v4, %v19819_v52  ;;  %v4333_v28 = vmul.f32 %v13079_v46, %v15667_v55  ;;  %v13081_v55 = vld [vmem:[%s19575_s3 + $0x2e0] sm:$0xff]  ;;  %v19825_v4 = vld [vmem:[#allocation43_spill] sm:$0xff] }
 0x3b1   : > { %5035 = vst.msk [vmem:[%s13633_s27 + $0x270] sm:$0xff] %vm334_vm1, %v4933_v43  ;;  %v4930_v37 = vadd.f32 %v4723_v53, %v4318_v14  ;;  %v4335_v53 = vmul.f32 %v13081_v55, %v15683_v40  ;;  %v13083_v40 = vld [vmem:[%s19575_s3 + $0x2f0] sm:$0xff]  ;;  %v4344_v52 = vmul.f32 %v13092_v21, %v19825_v4 }
 0x3b2   : > { %v4748_v23 = vpop.permute.xlu0 %4747  ;;  %v4337_v19 = vmul.f32 %v13083_v40, %v15699_v13  ;;  %v13085_v13 = vld [vmem:[%s19575_s3 + $0x300] sm:$0xff] }
 0x3b3   : > { %v4935_v63 = vadd.f32 %v4748_v23, %v4323_v27  ;;  %5032 = vst.msk [vmem:[%s13633_s27 + $0x258] sm:$0xff] %vm334_vm1, %v4930_v37  ;;  %v4330_v27 = vmul.f32 %v13080_v8, %v19820_v62 }
 0x3b4   : > { %v4733_v36 = vpop.permute.xlu1 %4732 }
 0x3b5   : > { %5037 = vst.msk [vmem:[%s13633_s27 + $0x280] sm:$0xff] %vm334_vm1, %v4935_v63  ;;  %v4932_v49 = vadd.f32 %v4733_v36, %v4320_v9  ;;  %v19821_v9 = vld [vmem:[#allocation31_spill] sm:$0xff] }
 0x3b6   : > { %v4758_v22 = vpop.permute.xlu0 %4757  ;;  %v4332_v61 = vmul.f32 %v13082_v38, %v19821_v9 }
 0x3b7   : > { %v4937_v10 = vadd.f32 %v4758_v22, %v4325_v57  ;;  %5034 = vst.msk [vmem:[%s13633_s27 + $0x268] sm:$0xff] %vm334_vm1, %v4932_v49 }
 0x3b8   : > { %v4743_v16 = vpop.permute.xlu1 %4742 }
 0x3b9   : > { %5039 = vst.msk [vmem:[%s13633_s27 + $0x290] sm:$0xff] %vm334_vm1, %v4937_v10  ;;  %v4934_v12 = vadd.f32 %v4743_v16, %v4322_v32  ;;  %v13084_v10 = vld [vmem:[%s19575_s3 + $0x2d8] sm:$0xff]  ;;  %v4339_v32 = vmul.f32 %v13085_v13, %v15715_v18  ;;  %v13087_v18 = vld [vmem:[%s19575_s3 + $0x310] sm:$0xff] }
 0x3ba   : > { %v4768_v17 = vpop.permute.xlu0 %4767  ;;  %v4334_v41 = vmul.f32 %v13084_v10, %v19822_v5  ;;  %v4341_v30 = vmul.f32 %v13087_v18, %v15735_v45  ;;  %v13089_v45 = vld [vmem:[%s19575_s3 + $0x320] sm:$0xff] }
 0x3bb   : > { %v4939_v29 = vadd.f32 %v4768_v17, %v4327_v42  ;;  %5036 = vst.msk [vmem:[%s13633_s27 + $0x278] sm:$0xff] %vm334_vm1, %v4934_v12  ;;  %v13086_v17 = vld [vmem:[%s19575_s3 + $0x2e8] sm:$0xff] }
 0x3bc   : > { %v4753_v24 = vpop.permute.xlu1 %4752  ;;  %v19823_v12 = vld [vmem:[#allocation39_spill] sm:$0xff] }
 0x3bd   : > { %5041 = vst.msk [vmem:[%s13633_s27 + $0x2a0] sm:$0xff] %vm334_vm1, %v4939_v29  ;;  %v4936_v3 = vadd.f32 %v4753_v24, %v4324_v2  ;;  %v4336_v29 = vmul.f32 %v13086_v17, %v19823_v12  ;;  %v19824_v24 = vld [vmem:[#allocation52_spill] sm:$0xff] }
 0x3be   : > { %v4778_v0 = vpop.permute.xlu0 %4777 }
 0x3bf   : > { %v4941_v34 = vadd.f32 %v4778_v0, %v4329_v31  ;;  %5038 = vst.msk [vmem:[%s13633_s27 + $0x288] sm:$0xff] %vm334_vm1, %v4936_v3  ;;  %v13088_v31 = vld [vmem:[%s19575_s3 + $0x2f8] sm:$0xff]  ;;  %v4343_v3 = vmul.f32 %v13089_v45, %v15759_v15 }
 0x3c0   : > { %v4763_v47 = vpop.permute.xlu1 %4762  ;;  %v4338_v0 = vmul.f32 %v13088_v31, %v19824_v24 }
 0x3c1   : > { %5043 = vst.msk [vmem:[%s13633_s27 + $0x2b0] sm:$0xff] %vm334_vm1, %v4941_v34  ;;  %v4938_v51 = vadd.f32 %v4763_v47, %v4326_v48  ;;  %v13091_v47 = vld [vmem:[%s19575_s3 + $0x318] sm:$0xff] }
 0x3c2   : > { %v4788_v1 = vpop.permute.xlu0 %4787 }
 0x3c3   : > { %v4943_v44 = vadd.f32 %v4788_v1, %v4331_v7  ;;  %5040 = vst.msk [vmem:[%s13633_s27 + $0x298] sm:$0xff] %vm334_vm1, %v4938_v51  ;;  %v4342_v1 = vmul.f32 %v13091_v47, %v15701_v35 }
 0x3c4   : > { %v4773_v43 = vpop.permute.xlu1 %4772 }
 0x3c5   : > { %5045 = vst.msk [vmem:[%s13633_s27 + $0x2c0] sm:$0xff] %vm334_vm1, %v4943_v44  ;;  %v4940_v56 = vadd.f32 %v4773_v43, %v4328_v6 }
 0x3c6   : > { %v4798_v54 = vpop.permute.xlu0 %4797 }
 0x3c7   : > { %v4945_v14 = vadd.f32 %v4798_v54, %v4333_v28  ;;  %5042 = vst.msk [vmem:[%s13633_s27 + $0x2a8] sm:$0xff] %vm334_vm1, %v4940_v56 }
 0x3c8   : > { %v4783_v23 = vpop.permute.xlu1 %4782 }
 0x3c9   : > { %5047 = vst.msk [vmem:[%s13633_s27 + $0x2d0] sm:$0xff] %vm334_vm1, %v4945_v14  ;;  %v4942_v63 = vadd.f32 %v4783_v23, %v4330_v27 }
 0x3ca   : > { %v4808_v37 = vpop.permute.xlu0 %4807 }
 0x3cb   : > { %v4947_v26 = vadd.f32 %v4808_v37, %v4335_v53  ;;  %5044 = vst.msk [vmem:[%s13633_s27 + $0x2b8] sm:$0xff] %vm334_vm1, %v4942_v63 }
 0x3cc   : > { %v4793_v57 = vpop.permute.xlu1 %4792 }
 0x3cd   : > { %5049 = vst.msk [vmem:[%s13633_s27 + $0x2e0] sm:$0xff] %vm334_vm1, %v4947_v26  ;;  %v4944_v22 = vadd.f32 %v4793_v57, %v4332_v61 }
 0x3ce   : > { %v4818_v36 = vpop.permute.xlu0 %4817 }
 0x3cf   : > { %v4949_v49 = vadd.f32 %v4818_v36, %v4337_v19  ;;  %5046 = vst.msk [vmem:[%s13633_s27 + $0x2c8] sm:$0xff] %vm334_vm1, %v4944_v22 }
 0x3d0   : > { %v4803_v50 = vpop.permute.xlu1 %4802 }
 0x3d1   : > { %5051 = vst.msk [vmem:[%s13633_s27 + $0x2f0] sm:$0xff] %vm334_vm1, %v4949_v49  ;;  %v4946_v42 = vadd.f32 %v4803_v50, %v4334_v41 }
 0x3d2   : > { %v4828_v33 = vpop.permute.xlu0 %4827 }
 0x3d3   : > { %v4951_v16 = vadd.f32 %v4828_v33, %v4339_v32  ;;  %5048 = vst.msk [vmem:[%s13633_s27 + $0x2d8] sm:$0xff] %vm334_vm1, %v4946_v42 }
 0x3d4   : > { %v4813_v59 = vpop.permute.xlu1 %4812 }
 0x3d5   : > { %5053 = vst.msk [vmem:[%s13633_s27 + $0x300] sm:$0xff] %vm334_vm1, %v4951_v16  ;;  %v4948_v58 = vadd.f32 %v4813_v59, %v4336_v29 }
 0x3d6   : > { %v4838_v2 = vpop.permute.xlu0 %4837 }
 0x3d7   : > { %v4953_v20 = vadd.f32 %v4838_v2, %v4341_v30  ;;  %5050 = vst.msk [vmem:[%s13633_s27 + $0x2e8] sm:$0xff] %vm334_vm1, %v4948_v58 }
 0x3d8   : > { %v4823_v34 = vpop.permute.xlu1 %4822 }
 0x3d9   : > { %5055 = vst.msk [vmem:[%s13633_s27 + $0x310] sm:$0xff] %vm334_vm1, %v4953_v20  ;;  %v4950_v11 = vadd.f32 %v4823_v34, %v4338_v0 }
 0x3da   : > { %v4848_v60 = vpop.permute.xlu0 %4847 }
 0x3db   : > { %v4955_v48 = vadd.f32 %v4848_v60, %v4343_v3  ;;  %5052 = vst.msk [vmem:[%s13633_s27 + $0x2f8] sm:$0xff] %vm334_vm1, %v4950_v11 }
 0x3dc   : > { %v4833_v15 = vpop.permute.xlu1 %4832 }
 0x3dd   : > { %5057 = vst.msk [vmem:[%s13633_s27 + $0x320] sm:$0xff] %vm334_vm1, %v4955_v48  ;;  %v4952_v7 = vadd.f32 %v4833_v15, %v4340_v39 }
 0x3df   : > { %5054 = vst.msk [vmem:[%s13633_s27 + $0x308] sm:$0xff] %vm334_vm1, %v4952_v7 }
 0x3e0   : > { %v4843_v51 = vpop.permute.xlu1 %4842 }
 0x3e1   : > { %v4954_v44 = vadd.f32 %v4843_v51, %v4342_v1 }
 0x3e3   : > { %5056 = vst.msk [vmem:[%s13633_s27 + $0x318] sm:$0xff] %vm334_vm1, %v4954_v44 }
 0x3e4   : > { %v4853_v6 = vpop.permute.xlu1 %4852 }
 0x3e5   : > { %v4956_v46 = vadd.f32 %v4853_v6, %v4344_v52 }
 0x3e7   : > { %5058 = vst.msk [vmem:[%s13633_s27 + $0x328] sm:$0xff] %vm334_vm1, %v4956_v46 }
 0x3e8 PF: > { %p11021_p5 = scmp.ne.s32.totalorder %s13620_s19, 1 }
 0x3ea   : > { %5062 = sbr.rel (%p11021_p5) target bundleno = 2136 (0x858), region = 48 }
 0x3ef   : > { %v5130_v35 = vld [vmem:[%s19572_s0 + $0xf8] sm:$0xff]  ;;  %v5129_v56 = vld [vmem:[%s19572_s0 + $0xf0] sm:$0xff]  ;;  %v5128_v27 = vld [vmem:[%s19572_s0 + $0xe8] sm:$0xff]  ;;  %vm6045_vm2 = vcmask 1040384   ;;  %vm5762_vm3 = vcmask 400384   ;;  %s13582_s13 = smov 1  }
 0x3f0   : > { %v5162_v28 = vld [vmem:[%s19572_s0 + $0x1f8] sm:$0xff]  ;;  %11452 = vmatprep.subr.mxu0 %v5130_v35  ;;  %v5161_v14 = vld [vmem:[%s19572_s0 + $0x1f0] sm:$0xff]  ;;  %v5160_v55 = vld [vmem:[%s19572_s0 + $0x1e8] sm:$0xff] }
 0x3f1   : > { %v5114_v43 = vld [vmem:[%s19572_s0 + $0x78] sm:$0xff]  ;;  %11496 = vmatprep.subr.mxu1 %v5162_v28  ;;  %v5113_v8 = vld [vmem:[%s19572_s0 + $0x70] sm:$0xff]  ;;  %v5112_v53 = vld [vmem:[%s19572_s0 + $0x68] sm:$0xff] }
 0x3f2   : > { %v5146_v54 = vld [vmem:[%s19572_s0 + $0x178] sm:$0xff]  ;;  %11453 = vmatpush3.msra.mxu0 %v5114_v43  ;;  %v5145_v62 = vld [vmem:[%s19572_s0 + $0x170] sm:$0xff]  ;;  %v5144_v23 = vld [vmem:[%s19572_s0 + $0x168] sm:$0xff] }
 0x3f3   : > { %11497 = vmatpush3.msra.mxu1 %v5146_v54  ;;  %11454 = vmatprep.subr.mxu0 %v5129_v56  ;;  %v5127_v37 = vld [vmem:[%s19572_s0 + $0xe0] sm:$0xff]  ;;  %v5126_v9 = vld [vmem:[%s19572_s0 + $0xd8] sm:$0xff]  ;;  %v5125_v57 = vld [vmem:[%s19572_s0 + $0xd0] sm:$0xff] }
 0x3f4   : > { %11498 = vmatprep.subr.mxu1 %v5161_v14  ;;  %11455 = vmatpush3.msra.mxu0 %v5113_v8  ;;  %v5159_v63 = vld [vmem:[%s19572_s0 + $0x1e0] sm:$0xff]  ;;  %v5158_v61 = vld [vmem:[%s19572_s0 + $0x1d8] sm:$0xff]  ;;  %v5157_v36 = vld [vmem:[%s19572_s0 + $0x1d0] sm:$0xff] }
 0x3f5   : > { %11499 = vmatpush3.msra.mxu1 %v5145_v62  ;;  %11456 = vmatprep.subr.mxu0 %v5128_v27  ;;  %v5111_v26 = vld [vmem:[%s19572_s0 + $0x60] sm:$0xff]  ;;  %v5110_v40 = vld [vmem:[%s19572_s0 + $0x58] sm:$0xff]  ;;  %v5109_v22 = vld [vmem:[%s19572_s0 + $0x50] sm:$0xff] }
 0x3f6   : > { %11500 = vmatprep.subr.mxu1 %v5160_v55  ;;  %v5143_v38 = vld [vmem:[%s19572_s0 + $0x160] sm:$0xff]  ;;  %11457 = vmatpush3.msra.mxu0 %v5112_v53  ;;  %v5142_v19 = vld [vmem:[%s19572_s0 + $0x158] sm:$0xff]  ;;  %v5141_v49 = vld [vmem:[%s19572_s0 + $0x150] sm:$0xff] }
 0x3f7   : > { %11501 = vmatpush3.msra.mxu1 %v5144_v23  ;;  %11458 = vmatprep.subr.mxu0 %v5127_v37  ;;  %v5124_v10 = vld [vmem:[%s19572_s0 + $0xc8] sm:$0xff]  ;;  %v5123_v32 = vld [vmem:[%s19572_s0 + $0xc0] sm:$0xff]  ;;  %v5122_v16 = vld [vmem:[%s19572_s0 + $0xb8] sm:$0xff] }
 0x3f8   : > { %11502 = vmatprep.subr.mxu1 %v5159_v63  ;;  %11459 = vmatpush3.msra.mxu0 %v5111_v26  ;;  %v5156_v5 = vld [vmem:[%s19572_s0 + $0x1c8] sm:$0xff]  ;;  %v5155_v50 = vld [vmem:[%s19572_s0 + $0x1c0] sm:$0xff]  ;;  %v5154_v17 = vld [vmem:[%s19572_s0 + $0x1b8] sm:$0xff] }
 0x3f9   : > { %11503 = vmatpush3.msra.mxu1 %v5143_v38  ;;  %11460 = vmatprep.subr.mxu0 %v5126_v9  ;;  %v5108_v41 = vld [vmem:[%s19572_s0 + $0x48] sm:$0xff]  ;;  %v5107_v33 = vld [vmem:[%s19572_s0 + $0x40] sm:$0xff]  ;;  %v5106_v12 = vld [vmem:[%s19572_s0 + $0x38] sm:$0xff] }
 0x3fa   : > { %11504 = vmatprep.subr.mxu1 %v5158_v61  ;;  %11461 = vmatpush3.msra.mxu0 %v5110_v40  ;;  %v5140_v13 = vld [vmem:[%s19572_s0 + $0x148] sm:$0xff]  ;;  %v5139_v42 = vld [vmem:[%s19572_s0 + $0x140] sm:$0xff]  ;;  %v5138_v29 = vld [vmem:[%s19572_s0 + $0x138] sm:$0xff] }
 0x3fb   : > { %11505 = vmatpush3.msra.mxu1 %v5142_v19  ;;  %11462 = vmatprep.subr.mxu0 %v5125_v57  ;;  %v5121_v18 = vld [vmem:[%s19572_s0 + $0xb0] sm:$0xff]  ;;  %v5120_v58 = vld [vmem:[%s19572_s0 + $0xa8] sm:$0xff]  ;;  %v5119_v0 = vld [vmem:[%s19572_s0 + $0xa0] sm:$0xff] }
 0x3fc   : > { %11506 = vmatprep.subr.mxu1 %v5157_v36  ;;  %11463 = vmatpush3.msra.mxu0 %v5109_v22  ;;  %v5153_v30 = vld [vmem:[%s19572_s0 + $0x1b0] sm:$0xff]  ;;  %v5152_v20 = vld [vmem:[%s19572_s0 + $0x1a8] sm:$0xff]  ;;  %v5151_v45 = vld [vmem:[%s19572_s0 + $0x1a0] sm:$0xff] }
 0x3fd   : > { %11507 = vmatpush3.msra.mxu1 %v5141_v49  ;;  %11464 = vmatprep.subr.mxu0 %v5124_v10  ;;  %v5105_v59 = vld [vmem:[%s19572_s0 + $0x30] sm:$0xff]  ;;  %v5104_v31 = vld [vmem:[%s19572_s0 + $0x28] sm:$0xff]  ;;  %v5103_v3 = vld [vmem:[%s19572_s0 + $0x20] sm:$0xff] }
 0x3fe   : > { %11508 = vmatprep.subr.mxu1 %v5156_v5  ;;  %11465 = vmatpush3.msra.mxu0 %v5108_v41  ;;  %v5137_v2 = vld [vmem:[%s19572_s0 + $0x130] sm:$0xff]  ;;  %v5136_v24 = vld [vmem:[%s19572_s0 + $0x128] sm:$0xff]  ;;  %v5135_v34 = vld [vmem:[%s19572_s0 + $0x120] sm:$0xff] }
 0x3ff   : > { %11509 = vmatpush3.msra.mxu1 %v5140_v13  ;;  %11466 = vmatprep.subr.mxu0 %v5123_v32  ;;  %v5118_v60 = vld [vmem:[%s19572_s0 + $0x98] sm:$0xff]  ;;  %v5117_v39 = vld [vmem:[%s19572_s0 + $0x90] sm:$0xff]  ;;  %v5116_v1 = vld [vmem:[%s19572_s0 + $0x88] sm:$0xff] }
 0x400   : > { %11510 = vmatprep.subr.mxu1 %v5155_v50  ;;  %11467 = vmatpush3.msra.mxu0 %v5107_v33  ;;  %v5150_v11 = vld [vmem:[%s19572_s0 + $0x198] sm:$0xff]  ;;  %v5149_v15 = vld [vmem:[%s19572_s0 + $0x190] sm:$0xff]  ;;  %v5148_v51 = vld [vmem:[%s19572_s0 + $0x188] sm:$0xff] }
 0x401   : > { %11511 = vmatpush3.msra.mxu1 %v5139_v42  ;;  %11468 = vmatprep.subr.mxu0 %v5122_v16  ;;  %v5102_v48 = vld [vmem:[%s19572_s0 + $0x18] sm:$0xff]  ;;  %v5101_v7 = vld [vmem:[%s19572_s0 + $0x10] sm:$0xff]  ;;  %v5100_v44 = vld [vmem:[%s19572_s0 + $0x8] sm:$0xff] }
 0x402   : > { %11512 = vmatprep.subr.mxu1 %v5154_v17  ;;  %11469 = vmatpush3.msra.mxu0 %v5106_v12  ;;  %v5134_v25 = vld [vmem:[%s19572_s0 + $0x118] sm:$0xff]  ;;  %v5133_v47 = vld [vmem:[%s19572_s0 + $0x110] sm:$0xff]  ;;  %v5132_v21 = vld [vmem:[%s19572_s0 + $0x108] sm:$0xff] }
 0x403   : > { %11513 = vmatpush3.msra.mxu1 %v5138_v29  ;;  %11470 = vmatprep.subr.mxu0 %v5121_v18  ;;  %v5115_v4 = vld [vmem:[%s19572_s0 + $0x80] sm:$0xff]  ;;  %v5064_v46 = vld [vmem:[%s19573_s1 + $0x8] sm:$0xff]  ;;  %v5066_v28 = vld [vmem:[%s19573_s1 + $0x18] sm:$0xff] }
 0x404   : > { %11514 = vmatprep.subr.mxu1 %v5153_v30  ;;  %11471 = vmatpush3.msra.mxu0 %v5105_v59  ;;  %v5147_v52 = vld [vmem:[%s19572_s0 + $0x180] sm:$0xff]  ;;  %v5065_v54 = vld [vmem:[%s19573_s1 + $0x10] sm:$0xff]  ;;  %v5194_v56 = vld [vmem:[%s19572_s0 + $0x2f8] sm:$0xff] }
 0x405   : > { %11515 = vmatpush3.msra.mxu1 %v5137_v2  ;;  %11472 = vmatprep.subr.mxu0 %v5120_v58  ;;  %v5099_v6 = vld [vmem:[%s19572_s0] sm:$0xff]  ;;  %v5226_v14 = vld [vmem:[%s19572_s0 + $0x3f8] sm:$0xff]  ;;  %v5193_v27 = vld [vmem:[%s19572_s0 + $0x2f0] sm:$0xff] }
 0x406   : > { %11516 = vmatprep.subr.mxu1 %v5152_v20  ;;  %11473 = vmatpush3.msra.mxu0 %v5104_v31  ;;  %v5131_v35 = vld [vmem:[%s19572_s0 + $0x100] sm:$0xff]  ;;  %v5178_v8 = vld [vmem:[%s19572_s0 + $0x278] sm:$0xff]  ;;  %v5225_v55 = vld [vmem:[%s19572_s0 + $0x3f0] sm:$0xff] }
 0x407   : > { %11517 = vmatpush3.msra.mxu1 %v5136_v24  ;;  %11474 = vmatprep.subr.mxu0 %v5119_v0  ;;  %v5063_v43 = vld [vmem:[%s19573_s1] sm:$0xff]  ;;  %v5210_v62 = vld [vmem:[%s19572_s0 + $0x378] sm:$0xff]  ;;  %v5177_v53 = vld [vmem:[%s19572_s0 + $0x270] sm:$0xff] }
 0x408   : > { %11518 = vmatprep.subr.mxu1 %v5151_v45  ;;  %11475 = vmatpush3.msra.mxu0 %v5103_v3  ;;  %v5209_v23 = vld [vmem:[%s19572_s0 + $0x370] sm:$0xff]  ;;  %v5192_v37 = vld [vmem:[%s19572_s0 + $0x2e8] sm:$0xff]  ;;  %v5191_v9 = vld [vmem:[%s19572_s0 + $0x2e0] sm:$0xff] }
 0x409   : > { %11519 = vmatpush3.msra.mxu1 %v5135_v34  ;;  %11476 = vmatprep.subr.mxu0 %v5118_v60  ;;  %v5224_v63 = vld [vmem:[%s19572_s0 + $0x3e8] sm:$0xff]  ;;  %v5223_v61 = vld [vmem:[%s19572_s0 + $0x3e0] sm:$0xff]  ;;  %v5190_v57 = vld [vmem:[%s19572_s0 + $0x2d8] sm:$0xff] }
 0x40a   : > { %11520 = vmatprep.subr.mxu1 %v5150_v11  ;;  %11477 = vmatpush3.msra.mxu0 %v5102_v48  ;;  %v5176_v26 = vld [vmem:[%s19572_s0 + $0x268] sm:$0xff]  ;;  %v5175_v40 = vld [vmem:[%s19572_s0 + $0x260] sm:$0xff]  ;;  %v5222_v36 = vld [vmem:[%s19572_s0 + $0x3d8] sm:$0xff] }
 0x40b   : > { %11521 = vmatpush3.msra.mxu1 %v5134_v25  ;;  %11478 = vmatprep.subr.mxu0 %v5117_v39  ;;  %v5208_v38 = vld [vmem:[%s19572_s0 + $0x368] sm:$0xff]  ;;  %v5207_v19 = vld [vmem:[%s19572_s0 + $0x360] sm:$0xff]  ;;  %v5174_v22 = vld [vmem:[%s19572_s0 + $0x258] sm:$0xff] }
 0x40c   : > { %11522 = vmatprep.subr.mxu1 %v5149_v15  ;;  %11479 = vmatpush3.msra.mxu0 %v5101_v7  ;;  %v5206_v49 = vld [vmem:[%s19572_s0 + $0x358] sm:$0xff]  ;;  %v5189_v10 = vld [vmem:[%s19572_s0 + $0x2d0] sm:$0xff]  ;;  %v5188_v32 = vld [vmem:[%s19572_s0 + $0x2c8] sm:$0xff] }
 0x40d   : > { %11523 = vmatpush3.msra.mxu1 %v5133_v47  ;;  %11480 = vmatprep.subr.mxu0 %v5116_v1  ;;  %v5221_v5 = vld [vmem:[%s19572_s0 + $0x3d0] sm:$0xff]  ;;  %v5220_v50 = vld [vmem:[%s19572_s0 + $0x3c8] sm:$0xff]  ;;  %v5187_v16 = vld [vmem:[%s19572_s0 + $0x2c0] sm:$0xff] }
 0x40e   : > { %11524 = vmatprep.subr.mxu1 %v5148_v51  ;;  %11481 = vmatpush3.msra.mxu0 %v5100_v44  ;;  %v5173_v41 = vld [vmem:[%s19572_s0 + $0x250] sm:$0xff]  ;;  %v5172_v33 = vld [vmem:[%s19572_s0 + $0x248] sm:$0xff]  ;;  %v5219_v17 = vld [vmem:[%s19572_s0 + $0x3c0] sm:$0xff] }
 0x40f   : > { %11525 = vmatpush3.msra.mxu1 %v5132_v21  ;;  %11482 = vmatprep.subr.mxu0 %v5115_v4  ;;  %v5205_v13 = vld [vmem:[%s19572_s0 + $0x350] sm:$0xff]  ;;  %v5204_v42 = vld [vmem:[%s19572_s0 + $0x348] sm:$0xff]  ;;  %v5171_v12 = vld [vmem:[%s19572_s0 + $0x240] sm:$0xff] }
 0x410   : > { %11526 = vmatprep.subr.mxu1 %v5147_v52  ;;  %11483 = vmatpush3.msra.mxu0 %v5099_v6  ;;  %v5203_v29 = vld [vmem:[%s19572_s0 + $0x340] sm:$0xff]  ;;  %v5186_v18 = vld [vmem:[%s19572_s0 + $0x2b8] sm:$0xff]  ;;  %v5073_v30 = vld [vmem:[%s19573_s1 + $0x50] sm:$0xff] }
 0x411   : > { %5307 = vmatprep.mubr.f32.mxu0 %v5064_v46  ;;  %11527 = vmatpush3.msra.mxu1 %v5131_v35  ;;  %v5170_v59 = vld [vmem:[%s19572_s0 + $0x238] sm:$0xff]  ;;  %v5075_v2 = vld [vmem:[%s19573_s1 + $0x60] sm:$0xff]  ;;  %v5185_v58 = vld [vmem:[%s19572_s0 + $0x2b0] sm:$0xff] }
 0x412   : > { %5392 = vmatprep.mubr.f32.mxu1 %v5066_v28  ;;  %5308 = vmatmul.mubr.f32.vlgmr.msra.gmra.mxu0 %v5063_v43  ;;  %v5218_v20 = vld [vmem:[%s19572_s0 + $0x3b8] sm:$0xff]  ;;  %v5072_v31 = vld [vmem:[%s19573_s1 + $0x48] sm:$0xff]  ;;  %v5169_v0 = vld [vmem:[%s19572_s0 + $0x230] sm:$0xff] }
 0x413   : > { %5393 = vmatmul.mubr.f32.vlgmr.msra.gmra.mxu1 %v5065_v54  ;;  %11540 = vmatprep.subr.mxu0 %v5194_v56  ;;  %v5074_v24 = vld [vmem:[%s19573_s1 + $0x58] sm:$0xff]  ;;  %v5184_v3 = vld [vmem:[%s19572_s0 + $0x2a8] sm:$0xff]  ;;  %v5217_v34 = vld [vmem:[%s19572_s0 + $0x3b0] sm:$0xff] }
 0x414   : > { %11584 = vmatprep.subr.mxu1 %v5226_v14  ;;  %11541 = vmatpush3.msra.mxu0 %v5178_v8  ;;  %v5202_v45 = vld [vmem:[%s19572_s0 + $0x338] sm:$0xff]  ;;  %v5168_v60 = vld [vmem:[%s19572_s0 + $0x228] sm:$0xff]  ;;  %v5201_v11 = vld [vmem:[%s19572_s0 + $0x330] sm:$0xff] }
 0x415   : > { %11585 = vmatpush3.msra.mxu1 %v5210_v62  ;;  %11542 = vmatprep.subr.mxu0 %v5193_v27  ;;  %v5082_v48 = vld [vmem:[%s19573_s1 + $0x98] sm:$0xff]  ;;  %v5084_v25 = vld [vmem:[%s19573_s1 + $0xa8] sm:$0xff]  ;;  %v5183_v39 = vld [vmem:[%s19572_s0 + $0x2a0] sm:$0xff] }
 0x416   : > { %11586 = vmatprep.subr.mxu1 %v5225_v55  ;;  %11543 = vmatpush3.msra.mxu0 %v5177_v53  ;;  %v5216_v15 = vld [vmem:[%s19572_s0 + $0x3a8] sm:$0xff]  ;;  %v5081_v7 = vld [vmem:[%s19573_s1 + $0x90] sm:$0xff]  ;;  %v5083_v47 = vld [vmem:[%s19573_s1 + $0xa0] sm:$0xff] }
 0x417   : > { %11587 = vmatpush3.msra.mxu1 %v5209_v23  ;;  %11544 = vmatprep.subr.mxu0 %v5192_v37  ;;  %v5167_v1 = vld [vmem:[%s19572_s0 + $0x220] sm:$0xff]  ;;  %v5200_v51 = vld [vmem:[%s19572_s0 + $0x328] sm:$0xff]  ;;  %v5182_v44 = vld [vmem:[%s19572_s0 + $0x298] sm:$0xff] }
 0x418   : > { %11588 = vmatprep.subr.mxu1 %v5224_v63  ;;  %11545 = vmatpush3.msra.mxu0 %v5176_v26  ;;  %v5215_v21 = vld [vmem:[%s19572_s0 + $0x3a0] sm:$0xff]  ;;  %v5166_v4 = vld [vmem:[%s19572_s0 + $0x218] sm:$0xff]  ;;  %v5093_v46 = vld [vmem:[%s19573_s1 + $0xf0] sm:$0xff] }
 0x419   : > { %11589 = vmatpush3.msra.mxu1 %v5208_v38  ;;  %11546 = vmatprep.subr.mxu0 %v5191_v9  ;;  %v5199_v52 = vld [vmem:[%s19572_s0 + $0x320] sm:$0xff]  ;;  %v5181_v35 = vld [vmem:[%s19572_s0 + $0x290] sm:$0xff]  ;;  %v5214_v28 = vld [vmem:[%s19572_s0 + $0x398] sm:$0xff] }
 0x41a   : > { %11590 = vmatprep.subr.mxu1 %v5223_v61  ;;  %11547 = vmatpush3.msra.mxu0 %v5175_v40  ;;  %v5091_v6 = vld [vmem:[%s19573_s1 + $0xe0] sm:$0xff]  ;;  %v5090_v43 = vld [vmem:[%s19573_s1 + $0xd8] sm:$0xff]  ;;  %v5092_v54 = vld [vmem:[%s19573_s1 + $0xe8] sm:$0xff] }
 0x41b   : > { %11591 = vmatpush3.msra.mxu1 %v5207_v19  ;;  %11548 = vmatprep.subr.mxu0 %v5190_v57  ;;  %v5165_v56 = vld [vmem:[%s19572_s0 + $0x210] sm:$0xff]  ;;  %v5198_v14 = vld [vmem:[%s19572_s0 + $0x318] sm:$0xff]  ;;  %v5180_v8 = vld [vmem:[%s19572_s0 + $0x288] sm:$0xff] }
 0x41c   : > { %11592 = vmatprep.subr.mxu1 %v5222_v36  ;;  %11549 = vmatpush3.msra.mxu0 %v5174_v22  ;;  %v5213_v62 = vld [vmem:[%s19572_s0 + $0x390] sm:$0xff]  ;;  %v5164_v27 = vld [vmem:[%s19572_s0 + $0x208] sm:$0xff]  ;;  %v5179_v53 = vld [vmem:[%s19572_s0 + $0x280] sm:$0xff] }
 0x41d   : > { %11593 = vmatpush3.msra.mxu1 %v5206_v49  ;;  %11550 = vmatprep.subr.mxu0 %v5189_v10  ;;  %v5197_v55 = vld [vmem:[%s19572_s0 + $0x310] sm:$0xff]  ;;  %v5212_v23 = vld [vmem:[%s19572_s0 + $0x388] sm:$0xff]  ;;  %v5163_v37 = vld [vmem:[%s19572_s0 + $0x200] sm:$0xff] }
 0x41e   : > { %11594 = vmatprep.subr.mxu1 %v5221_v5  ;;  %11551 = vmatpush3.msra.mxu0 %v5173_v41  ;;  %v5068_v63 = vld [vmem:[%s19573_s1 + $0x28] sm:$0xff]  ;;  %v5067_v38 = vld [vmem:[%s19573_s1 + $0x20] sm:$0xff]  ;;  %v5242_v61 = vld [vmem:[%s19572_s0 + $0x478] sm:$0xff] }
 0x41f   : > { %11595 = vmatpush3.msra.mxu1 %v5205_v13  ;;  %11552 = vmatprep.subr.mxu0 %v5188_v32  ;;  %v5196_v26 = vld [vmem:[%s19572_s0 + $0x308] sm:$0xff]  ;;  %v5211_v9 = vld [vmem:[%s19572_s0 + $0x380] sm:$0xff]  ;;  %v5070_v19 = vld [vmem:[%s19573_s1 + $0x38] sm:$0xff] }
 0x420   : > { %11596 = vmatprep.subr.mxu1 %v5220_v50  ;;  %11553 = vmatpush3.msra.mxu0 %v5172_v33  ;;  %v5195_v40 = vld [vmem:[%s19572_s0 + $0x300] sm:$0xff]  ;;  %v5069_v57 = vld [vmem:[%s19573_s1 + $0x30] sm:$0xff]  ;;  %v5076_v10 = vld [vmem:[%s19573_s1 + $0x68] sm:$0xff] }
 0x421   : > { %11597 = vmatpush3.msra.mxu1 %v5204_v42  ;;  %11554 = vmatprep.subr.mxu0 %v5187_v16  ;;  %v5241_v36 = vld [vmem:[%s19572_s0 + $0x470] sm:$0xff]  ;;  %v5079_v49 = vld [vmem:[%s19573_s1 + $0x80] sm:$0xff]  ;;  %v5240_v5 = vld [vmem:[%s19572_s0 + $0x468] sm:$0xff] }
 0x422   : > { %11598 = vmatprep.subr.mxu1 %v5219_v17  ;;  %11555 = vmatpush3.msra.mxu0 %v5171_v12  ;;  %v5077_v22 = vld [vmem:[%s19573_s1 + $0x70] sm:$0xff]  ;;  %v5078_v41 = vld [vmem:[%s19573_s1 + $0x78] sm:$0xff]  ;;  %v5239_v13 = vld [vmem:[%s19572_s0 + $0x460] sm:$0xff] }
 0x423   : > { %11599 = vmatpush3.msra.mxu1 %v5203_v29  ;;  %11556 = vmatprep.subr.mxu0 %v5186_v18  ;;  %v5086_v32 = vld [vmem:[%s19573_s1 + $0xb8] sm:$0xff]  ;;  %v5088_v50 = vld [vmem:[%s19573_s1 + $0xc8] sm:$0xff]  ;;  %v5085_v33 = vld [vmem:[%s19573_s1 + $0xb0] sm:$0xff] }
 0x424   : > { %5312 = vmatprep.mubr.f32.mxu0 %v5073_v30  ;;  %11557 = vmatpush3.msra.mxu0 %v5170_v59  ;;  %v5238_v42 = vld [vmem:[%s19572_s0 + $0x458] sm:$0xff]  ;;  %v5087_v16 = vld [vmem:[%s19573_s1 + $0xc0] sm:$0xff]  ;;  %v5237_v17 = vld [vmem:[%s19572_s0 + $0x450] sm:$0xff] }
 0x425   : > { %5397 = vmatprep.mubr.f32.mxu1 %v5075_v2  ;;  %11558 = vmatprep.subr.mxu0 %v5185_v58  ;;  %v5095_v12 = vld [vmem:[%s19573_s1 + $0x100] sm:$0xff]  ;;  %v5097_v29 = vld [vmem:[%s19573_s1 + $0x110] sm:$0xff]  ;;  %v5094_v18 = vld [vmem:[%s19573_s1 + $0xf8] sm:$0xff] }
 0x426   : > { %11600 = vmatprep.subr.mxu1 %v5218_v20  ;;  %5313 = vmatmul.mubr.f32.gmra.mxu0 %v5072_v31  ;;  %v5236_v30 = vld [vmem:[%s19572_s0 + $0x448] sm:$0xff]  ;;  %v5235_v2 = vld [vmem:[%s19572_s0 + $0x440] sm:$0xff]  ;;  %v5234_v58 = vld [vmem:[%s19572_s0 + $0x438] sm:$0xff]  ;;  %v13580_v20 = vmov 1.0  }
 0x427   : > { %5398 = vmatmul.mubr.f32.gmra.mxu1 %v5074_v24  ;;  %11559 = vmatpush3.msra.mxu0 %v5169_v0  ;;  %v5096_v59 = vld [vmem:[%s19573_s1 + $0x108] sm:$0xff]  ;;  %v5071_v31 = vld [vmem:[%s19573_s1 + $0x40] sm:$0xff]  ;;  %v5233_v24 = vld [vmem:[%s19572_s0 + $0x430] sm:$0xff] }
 0x428   : > { %11601 = vmatpush3.msra.mxu1 %v5202_v45  ;;  %11560 = vmatprep.subr.mxu0 %v5184_v3  ;;  %v5232_v0 = vld [vmem:[%s19572_s0 + $0x428] sm:$0xff]  ;;  %v5231_v45 = vld [vmem:[%s19572_s0 + $0x420] sm:$0xff]  ;;  %v5230_v3 = vld [vmem:[%s19572_s0 + $0x418] sm:$0xff] }
 0x429   : > { %11602 = vmatprep.subr.mxu1 %v5217_v34  ;;  %11561 = vmatpush3.msra.mxu0 %v5168_v60  ;;  %v5229_v34 = vld [vmem:[%s19572_s0 + $0x410] sm:$0xff]  ;;  %v5228_v60 = vld [vmem:[%s19572_s0 + $0x408] sm:$0xff] }
 0x42a   : > { %11603 = vmatpush3.msra.mxu1 %v5201_v11  ;;  %5317 = vmatprep.mubr.f32.mxu0 %v5082_v48  ;;  %v5668_v11 = vld [vmem:[%s19575_s3 + $0x330] sm:$0xff]  ;;  %v5227_v48 = vld [vmem:[%s19572_s0 + $0x400] sm:$0xff] }
 0x42b   : > { %5402 = vmatprep.mubr.f32.mxu1 %v5084_v25  ;;  %11562 = vmatprep.subr.mxu0 %v5183_v39  ;;  %v5669_v25 = vld [vmem:[%s19575_s3 + $0x338] sm:$0xff]  ;;  %v5670_v39 = vld [vmem:[%s19575_s3 + $0x340] sm:$0xff] }
 0x42c   : > { %11604 = vmatprep.subr.mxu1 %v5216_v15  ;;  %5318 = vmatmul.mubr.f32.gmra.mxu0 %v5081_v7  ;;  %v5080_v15 = vld [vmem:[%s19573_s1 + $0x88] sm:$0xff]  ;;  %v5089_v7 = vld [vmem:[%s19573_s1 + $0xd0] sm:$0xff] }
 0x42d   : > { %5403 = vmatmul.mubr.f32.gmra.mxu1 %v5083_v47  ;;  %11563 = vmatpush3.msra.mxu0 %v5167_v1  ;;  %v5671_v47 = vld [vmem:[%s19575_s3 + $0x348] sm:$0xff]  ;;  %v5672_v1 = vld [vmem:[%s19575_s3 + $0x350] sm:$0xff] }
 0x42e   : > { %11605 = vmatpush3.msra.mxu1 %v5200_v51  ;;  %11564 = vmatprep.subr.mxu0 %v5182_v44  ;;  %v5098_v51 = vld [vmem:[%s19573_s1 + $0x118] sm:$0xff]  ;;  %v6584_v44 = vmul.f32 %v5668_v11, %v5668_v11 }
 0x42f   : > { %11606 = vmatprep.subr.mxu1 %v5215_v21  ;;  %11565 = vmatpush3.msra.mxu0 %v5166_v4  ;;  %v5673_v21 = vld [vmem:[%s19575_s3 + $0x358] sm:$0xff]  ;;  %v5674_v4 = vld [vmem:[%s19575_s3 + $0x360] sm:$0xff] }
 0x430   : > { %11607 = vmatpush3.msra.mxu1 %v5199_v52  ;;  %5322 = vmatprep.mubr.f32.mxu0 %v5091_v6  ;;  %v5675_v52 = vld [vmem:[%s19575_s3 + $0x368] sm:$0xff]  ;;  %v5676_v6 = vld [vmem:[%s19575_s3 + $0x370] sm:$0xff] }
 0x431   : > { %5407 = vmatprep.mubr.f32.mxu1 %v5093_v46  ;;  %11566 = vmatprep.subr.mxu0 %v5181_v35  ;;  %v6585_v46 = vmul.f32 %v5669_v25, %v5669_v25  ;;  %v6586_v35 = vmul.f32 %v5670_v39, %v5670_v39 }
 0x432   : > { %11608 = vmatprep.subr.mxu1 %v5214_v28  ;;  %5323 = vmatmul.mubr.f32.gmra.mxu0 %v5090_v43  ;;  %v5677_v28 = vld [vmem:[%s19575_s3 + $0x378] sm:$0xff]  ;;  %v5678_v43 = vld [vmem:[%s19575_s3 + $0x380] sm:$0xff] }
 0x433   : > { %5408 = vmatmul.mubr.f32.gmra.mxu1 %v5092_v54  ;;  %11567 = vmatpush3.msra.mxu0 %v5165_v56  ;;  %v6587_v54 = vmul.f32 %v5671_v47, %v5671_v47  ;;  %v6588_v56 = vmul.f32 %v5672_v1, %v5672_v1 }
 0x434   : > { %11609 = vmatpush3.msra.mxu1 %v5198_v14  ;;  %11568 = vmatprep.subr.mxu0 %v5180_v8  ;;  %v5679_v14 = vld [vmem:[%s19575_s3 + $0x388] sm:$0xff]  ;;  %v5680_v8 = vld [vmem:[%s19575_s3 + $0x390] sm:$0xff] }
 0x435   : > { %11610 = vmatprep.subr.mxu1 %v5213_v62  ;;  %11569 = vmatpush3.msra.mxu0 %v5164_v27  ;;  %v6589_v62 = vmul.f32 %v5673_v21, %v5673_v21  ;;  %v6590_v27 = vmul.f32 %v5674_v4, %v5674_v4 }
 0x436   : > { %11611 = vmatpush3.msra.mxu1 %v5197_v55  ;;  %11570 = vmatprep.subr.mxu0 %v5179_v53  ;;  %v5681_v55 = vld [vmem:[%s19575_s3 + $0x398] sm:$0xff]  ;;  %v5682_v53 = vld [vmem:[%s19575_s3 + $0x3a0] sm:$0xff] }
 0x437   : > { %11612 = vmatprep.subr.mxu1 %v5212_v23  ;;  %11571 = vmatpush3.msra.mxu0 %v5163_v37  ;;  %v6591_v23 = vmul.f32 %v5675_v52, %v5675_v52  ;;  %v6592_v37 = vmul.f32 %v5676_v6, %v5676_v6 }
 0x438   : > { %5477 = vmatprep.mubr.f32.mxu0 %v5068_v63  ;;  %11613 = vmatpush3.msra.mxu1 %v5196_v26  ;;  %v5683_v63 = vld [vmem:[%s19575_s3 + $0x3a8] sm:$0xff]  ;;  %v5684_v26 = vld [vmem:[%s19575_s3 + $0x3b0] sm:$0xff] }
 0x439   : > { %5478 = vmatmul.mubr.f32.vlgmr.msra.gmra.mxu0 %v5067_v38  ;;  %11614 = vmatprep.subr.mxu1 %v5211_v9  ;;  %v6593_v38 = vmul.f32 %v5677_v28, %v5677_v28  ;;  %v6594_v9 = vmul.f32 %v5678_v43, %v5678_v43 }
 0x43a   : > { %12228 = vmatprep.subr.mxu0 %v5242_v61  ;;  %11615 = vmatpush3.msra.mxu1 %v5195_v40  ;;  %v5686_v40 = vld [vmem:[%s19575_s3 + $0x3c0] sm:$0xff] }
 0x43b   : > { %5562 = vmatprep.mubr.f32.mxu1 %v5070_v19  ;;  %12229 = vmatpush3.msra.mxu0 %v5242_v61  ;;  %v5685_v61 = vld [vmem:[%s19575_s3 + $0x3b8] sm:$0xff]  ;;  %v6595_v19 = vmul.f32 %v5679_v14, %v5679_v14 }
 0x43c   : > { %5563 = vmatmul.mubr.f32.vlgmr.msra.gmra.mxu1 %v5069_v57  ;;  %12230 = vmatprep.subr.mxu0 %v5241_v36  ;;  %v6596_v57 = vmul.f32 %v5680_v8, %v5680_v8 }
 0x43d   : > { %5482 = vmatprep.mubr.f32.mxu0 %v5077_v22  ;;  %12231 = vmatpush3.msra.mxu0 %v5241_v36  ;;  %v5687_v36 = vld [vmem:[%s19575_s3 + $0x3c8] sm:$0xff]  ;;  %v5688_v22 = vld [vmem:[%s19575_s3 + $0x3d0] sm:$0xff] }
 0x43e   : > { %5567 = vmatprep.mubr.f32.mxu1 %v5079_v49  ;;  %5483 = vmatmul.mubr.f32.gmra.mxu0 %v5076_v10  ;;  %v6597_v49 = vmul.f32 %v5681_v55, %v5681_v55  ;;  %v6598_v10 = vmul.f32 %v5682_v53, %v5682_v53 }
 0x43f   : > { %12232 = vmatprep.subr.mxu0 %v5240_v5  ;;  %5487 = vmatprep.mubr.f32.mxu0 %v5086_v32  ;;  %v6600_v32 = vmul.f32 %v5684_v26, %v5684_v26 }
 0x440   : > { %12233 = vmatpush3.msra.mxu0 %v5240_v5  ;;  %5568 = vmatmul.mubr.f32.gmra.mxu1 %v5078_v41  ;;  %v5689_v5 = vld [vmem:[%s19575_s3 + $0x3d8] sm:$0xff]  ;;  %v5690_v41 = vld [vmem:[%s19575_s3 + $0x3e0] sm:$0xff] }
 0x441   : > { %12234 = vmatprep.subr.mxu0 %v5239_v13  ;;  %5572 = vmatprep.mubr.f32.mxu1 %v5088_v50  ;;  %v5691_v50 = vld [vmem:[%s19575_s3 + $0x3e8] sm:$0xff] }
 0x442   : > { %12235 = vmatpush3.msra.mxu0 %v5239_v13  ;;  %12266 = vmatprep.subr.msk.mxu1 %vm6045_vm2, %v13580_v20  ;;  %v6599_v13 = vmul.f32 %v5683_v63, %v5683_v63 }
 0x443   : > { %5488 = vmatmul.mubr.f32.gmra.mxu0 %v5085_v33  ;;  %12236 = vmatprep.subr.mxu0 %v5238_v42  ;;  %v5692_v33 = vld [vmem:[%s19575_s3 + $0x3f0] sm:$0xff] }
 0x444   : > { %12237 = vmatpush3.msra.mxu0 %v5238_v42  ;;  %5573 = vmatmul.mubr.f32.gmra.mxu1 %v5087_v16  ;;  %v6601_v42 = vmul.f32 %v5685_v61, %v5685_v61  ;;  %v6602_v16 = vmul.f32 %v5686_v40, %v5686_v40 }
 0x445   : > { %12238 = vmatprep.subr.mxu0 %v5237_v17  ;;  %5492 = vmatprep.mubr.f32.mxu0 %v5095_v12  ;;  %v5694_v12 = vld [vmem:[%s19575_s3 + $0x400] sm:$0xff] }
 0x446   : > { %12239 = vmatpush3.msra.mxu0 %v5237_v17  ;;  %5577 = vmatprep.mubr.f32.mxu1 %v5097_v29  ;;  %v5693_v17 = vld [vmem:[%s19575_s3 + $0x3f8] sm:$0xff]  ;;  %v6603_v29 = vmul.f32 %v5687_v36, %v5687_v36 }
 0x447   : > { %5493 = vmatmul.mubr.f32.gmra.mxu0 %v5094_v18  ;;  %12240 = vmatprep.subr.mxu0 %v5236_v30  ;;  %v6604_v18 = vmul.f32 %v5688_v22, %v5688_v22 }
 0x448   : > { %12241 = vmatpush3.msra.mxu0 %v5236_v30  ;;  %5578 = vmatmul.mubr.f32.gmra.mxu1 %v5096_v59  ;;  %v5695_v30 = vld [vmem:[%s19575_s3 + $0x408] sm:$0xff]  ;;  %v5696_v59 = vld [vmem:[%s19575_s3 + $0x410] sm:$0xff] }
 0x449   : > { %12242 = vmatprep.subr.mxu0 %v5235_v2  ;;  %12267 = vmatpush3.msk.msra.mxu1 %vm6045_vm2, %v13580_v20 }
 0x44a   : > { %12243 = vmatpush3.msra.mxu0 %v5235_v2  ;;  %12268 = vmatprep.subr.mxu1 %v13580_v20  ;;  %v6605_v2 = vmul.f32 %v5689_v5, %v5689_v5 }
 0x44b   : > { %12244 = vmatprep.subr.mxu0 %v5234_v58  ;;  %12260 = vmatprep.mubr.f32.mxu0 %v5071_v31  ;;  %v5697_v31 = vld [vmem:[%s19575_s3 + $0x418] sm:$0xff] }
 0x44c   : > { %12245 = vmatpush3.msra.mxu0 %v5234_v58  ;;  %12269 = vmatpush3.msra.mxu1 %v13580_v20  ;;  %v6606_v58 = vmul.f32 %v5690_v41, %v5690_v41 }
 0x44d   : > { %12246 = vmatprep.subr.mxu0 %v5233_v24  ;;  %12270 = vmatprep.subr.mxu1 %v13580_v20 }
 0x44e   : > { %12247 = vmatpush3.msra.mxu0 %v5233_v24  ;;  %12271 = vmatpush3.msra.mxu1 %v13580_v20  ;;  %v5698_v24 = vld [vmem:[%s19575_s3 + $0x420] sm:$0xff] }
 0x44f   : > { %12248 = vmatprep.subr.mxu0 %v5232_v0  ;;  %12272 = vmatprep.subr.mxu1 %v13580_v20 }
 0x450   : > { %12249 = vmatpush3.msra.mxu0 %v5232_v0  ;;  %12273 = vmatpush3.msra.mxu1 %v13580_v20  ;;  %v6607_v0 = vmul.f32 %v5691_v50, %v5691_v50 }
 0x451   : > { %12250 = vmatprep.subr.mxu0 %v5231_v45  ;;  %12274 = vmatprep.subr.mxu1 %v13580_v20 }
 0x452   : > { %12251 = vmatpush3.msra.mxu0 %v5231_v45  ;;  %12275 = vmatpush3.msra.mxu1 %v13580_v20  ;;  %v6608_v45 = vmul.f32 %v5692_v33, %v5692_v33 }
 0x453   : > { %12252 = vmatprep.subr.mxu0 %v5230_v3  ;;  %12276 = vmatprep.subr.mxu1 %v13580_v20 }
 0x454   : > { %12253 = vmatpush3.msra.mxu0 %v5230_v3  ;;  %12277 = vmatpush3.msra.mxu1 %v13580_v20  ;;  %v5699_v3 = vld [vmem:[%s19575_s3 + $0x428] sm:$0xff] }
 0x455   : > { %12254 = vmatprep.subr.mxu0 %v5229_v34  ;;  %12278 = vmatprep.subr.mxu1 %v13580_v20 }
 0x456   : > { %12255 = vmatpush3.msra.mxu0 %v5229_v34  ;;  %12279 = vmatpush3.msra.mxu1 %v13580_v20  ;;  %v5700_v34 = vld [vmem:[%s19575_s3 + $0x430] sm:$0xff] }
 0x457   : > { %12256 = vmatprep.subr.mxu0 %v5228_v60  ;;  %12280 = vmatprep.mubr.msk.f32.mxu1 %vm5762_vm3, %v5668_v11  ;;  %v6610_v11 = vmul.f32 %v5694_v12, %v5694_v12 }
 0x458   : > { %12257 = vmatpush3.msra.mxu0 %v5228_v60  ;;  %12281 = vmatmul.mubr.msk.f32.vlgmr.msra.gmra.mxu1 %vm5762_vm3, %v5669_v25  ;;  %v6609_v60 = vmul.f32 %v5693_v17, %v5693_v17  ;;  %v5702_v25 = vld [vmem:[%s19575_s3 + $0x440] sm:$0xff] }
 0x459   : > { %12258 = vmatprep.subr.mxu0 %v5227_v48  ;;  %12283 = vmatprep.mubr.msk.f32.mxu1 %vm5762_vm3, %v5670_v39  ;;  %v6611_v39 = vmul.f32 %v5695_v30, %v5695_v30 }
 0x45a   : > { %12259 = vmatpush3.msra.mxu0 %v5227_v48  ;;  %12576 = vmatprep.subr.msk.mxu1 %vm6045_vm2, %v13580_v20  ;;  %v5701_v48 = vld [vmem:[%s19575_s3 + $0x438] sm:$0xff] }
 0x45b   : > { %12261 = vmatmul.mubr.f32.vlgmr.msra.gmra.mxu0 %v5080_v15  ;;  %12421 = vmatprep.subr.msk.mxu0 %vm6045_vm2, %v13580_v20  ;;  %v6612_v15 = vmul.f32 %v5696_v59, %v5696_v59 }
 0x45c   : > { %12422 = vmatpush3.msk.msra.mxu0 %vm6045_vm2, %v13580_v20  ;;  %12263 = vmatprep.mubr.f32.mxu0 %v5089_v7  ;;  %v5703_v7 = vld [vmem:[%s19575_s3 + $0x448] sm:$0xff] }
 0x45d   : > { %12423 = vmatprep.subr.mxu0 %v13580_v20  ;;  %12284 = vmatmul.mubr.msk.f32.gmra.mxu1 %vm5762_vm3, %v5671_v47  ;;  %v5704_v47 = vld [vmem:[%s19575_s3 + $0x450] sm:$0xff] }
 0x45e   : > { %12424 = vmatpush3.msra.mxu0 %v13580_v20  ;;  %12286 = vmatprep.mubr.msk.f32.mxu1 %vm5762_vm3, %v5672_v1  ;;  %v6613_v1 = vmul.f32 %v5697_v31, %v5697_v31 }
 0x45f   : > { %12264 = vmatmul.mubr.f32.gmra.mxu0 %v5098_v51  ;;  %12425 = vmatprep.subr.mxu0 %v13580_v20  ;;  %v6614_v51 = vmul.f32 %v5698_v24, %v5698_v24 }
 0x460   : > { %12426 = vmatpush3.msra.mxu0 %v13580_v20  ;;  %12435 = vmatprep.mubr.msk.f32.mxu0 %vm5762_vm3, %v6584_v44  ;;  %v5705_v44 = vld [vmem:[%s19575_s3 + $0x458] sm:$0xff] }
 0x461   : > { %12427 = vmatprep.subr.mxu0 %v13580_v20  ;;  %12287 = vmatmul.mubr.msk.f32.gmra.mxu1 %vm5762_vm3, %v5673_v21  ;;  %v5706_v21 = vld [vmem:[%s19575_s3 + $0x460] sm:$0xff] }
 0x462   : > { %12428 = vmatpush3.msra.mxu0 %v13580_v20  ;;  %12289 = vmatprep.mubr.msk.f32.mxu1 %vm5762_vm3, %v5674_v4  ;;  %v6615_v4 = vmul.f32 %v5699_v3, %v5699_v3 }
 0x463   : > { %12429 = vmatprep.subr.mxu0 %v13580_v20  ;;  %12577 = vmatpush3.msk.msra.mxu1 %vm6045_vm2, %v13580_v20 }
 0x464   : > { %12430 = vmatpush3.msra.mxu0 %v13580_v20  ;;  %12578 = vmatprep.subr.mxu1 %v13580_v20 }
 0x465   : > { %12431 = vmatprep.subr.mxu0 %v13580_v20  ;;  %12290 = vmatmul.mubr.msk.f32.gmra.mxu1 %vm5762_vm3, %v5675_v52  ;;  %v6616_v52 = vmul.f32 %v5700_v34, %v5700_v34 }
 0x466   : > { %12432 = vmatpush3.msra.mxu0 %v13580_v20  ;;  %12292 = vmatprep.mubr.msk.f32.mxu1 %vm5762_vm3, %v5676_v6  ;;  %v5707_v6 = vld [vmem:[%s19575_s3 + $0x468] sm:$0xff] }
 0x467   : > { %12433 = vmatprep.subr.mxu0 %v13580_v20  ;;  %12579 = vmatpush3.msra.mxu1 %v13580_v20 }
 0x468   : > { %12434 = vmatpush3.msra.mxu0 %v13580_v20  ;;  %12580 = vmatprep.subr.mxu1 %v13580_v20 }
 0x469   : > { %12436 = vmatmul.mubr.msk.f32.vlgmr.msra.gmra.mxu0 %vm5762_vm3, %v6585_v46  ;;  %12293 = vmatmul.mubr.msk.f32.gmra.mxu1 %vm5762_vm3, %v5677_v28  ;;  %v5708_v46 = vld [vmem:[%s19575_s3 + $0x470] sm:$0xff]  ;;  %v6618_v28 = vmul.f32 %v5702_v25, %v5702_v25 }
 0x46a   : > { %12438 = vmatprep.mubr.msk.f32.mxu0 %vm5762_vm3, %v6586_v35  ;;  %12295 = vmatprep.mubr.msk.f32.mxu1 %vm5762_vm3, %v5678_v43  ;;  %v6617_v35 = vmul.f32 %v5701_v48, %v5701_v48  ;;  %v5709_v43 = vld [vmem:[%s19575_s3 + $0x478] sm:$0xff] }
 0x46b   : > { %12636 = vmatprep.subr.msk.mxu0 %vm6045_vm2, %v13580_v20  ;;  %12581 = vmatpush3.msra.mxu1 %v13580_v20 }
 0x46c   : > { %12637 = vmatpush3.msk.msra.mxu0 %vm6045_vm2, %v13580_v20  ;;  %12582 = vmatprep.subr.mxu1 %v13580_v20 }
 0x46d   : > { %12439 = vmatmul.mubr.msk.f32.gmra.mxu0 %vm5762_vm3, %v6587_v54  ;;  %12296 = vmatmul.mubr.msk.f32.gmra.mxu1 %vm5762_vm3, %v5679_v14  ;;  %v5710_v54 = vld [vmem:[%s19575_s3 + $0x480] sm:$0xff]  ;;  %v6620_v14 = vmul.f32 %v5704_v47, %v5704_v47 }
 0x46e   : > { %12441 = vmatprep.mubr.msk.f32.mxu0 %vm5762_vm3, %v6588_v56  ;;  %12298 = vmatprep.mubr.msk.f32.mxu1 %vm5762_vm3, %v5680_v8  ;;  %v6619_v56 = vmul.f32 %v5703_v7, %v5703_v7  ;;  %v5711_v8 = vld [vmem:[%s19575_s3 + $0x488] sm:$0xff] }
 0x46f   : > { %12638 = vmatprep.subr.mxu0 %v13580_v20  ;;  %12583 = vmatpush3.msra.mxu1 %v13580_v20 }
 0x470   : > { %12639 = vmatpush3.msra.mxu0 %v13580_v20  ;;  %12584 = vmatprep.subr.mxu1 %v13580_v20 }
 0x471   : > { %12442 = vmatmul.mubr.msk.f32.gmra.mxu0 %vm5762_vm3, %v6589_v62  ;;  %12299 = vmatmul.mubr.msk.f32.gmra.mxu1 %vm5762_vm3, %v5681_v55  ;;  %v5712_v62 = vld [vmem:[%s19575_s3 + $0x490] sm:$0xff]  ;;  %v6622_v55 = vmul.f32 %v5706_v21, %v5706_v21 }
 0x472   : > { %12444 = vmatprep.mubr.msk.f32.mxu0 %vm5762_vm3, %v6590_v27  ;;  %12301 = vmatprep.mubr.msk.f32.mxu1 %vm5762_vm3, %v5682_v53  ;;  %v6621_v27 = vmul.f32 %v5705_v44, %v5705_v44  ;;  %v5713_v53 = vld [vmem:[%s19575_s3 + $0x498] sm:$0xff] }
 0x473   : > { %12640 = vmatprep.subr.mxu0 %v13580_v20  ;;  %12585 = vmatpush3.msra.mxu1 %v13580_v20 }
 0x474   : > { %12641 = vmatpush3.msra.mxu0 %v13580_v20  ;;  %12586 = vmatprep.subr.mxu1 %v13580_v20 }
 0x475   : > { %12445 = vmatmul.mubr.msk.f32.gmra.mxu0 %vm5762_vm3, %v6591_v23  ;;  %12302 = vmatmul.mubr.msk.f32.gmra.mxu1 %vm5762_vm3, %v5683_v63  ;;  %v5714_v23 = vld [vmem:[%s19575_s3 + $0x4a0] sm:$0xff]  ;;  %v6624_v63 = vmul.f32 %v5708_v46, %v5708_v46 }
 0x476   : > { %12447 = vmatprep.mubr.msk.f32.mxu0 %vm5762_vm3, %v6592_v37  ;;  %12304 = vmatprep.mubr.msk.f32.mxu1 %vm5762_vm3, %v5684_v26  ;;  %v6623_v37 = vmul.f32 %v5707_v6, %v5707_v6  ;;  %v5715_v26 = vld [vmem:[%s19575_s3 + $0x4a8] sm:$0xff] }
 0x477   : > { %12642 = vmatprep.subr.mxu0 %v13580_v20  ;;  %12587 = vmatpush3.msra.mxu1 %v13580_v20 }
 0x478   : > { %12643 = vmatpush3.msra.mxu0 %v13580_v20  ;;  %12588 = vmatprep.subr.mxu1 %v13580_v20 }
 0x479   : > { %12448 = vmatmul.mubr.msk.f32.gmra.mxu0 %vm5762_vm3, %v6593_v38  ;;  %12305 = vmatmul.mubr.msk.f32.gmra.mxu1 %vm5762_vm3, %v5685_v61  ;;  %v5716_v38 = vld [vmem:[%s19575_s3 + $0x4b0] sm:$0xff]  ;;  %v6626_v61 = vmul.f32 %v5710_v54, %v5710_v54 }
 0x47a   : > { %12450 = vmatprep.mubr.msk.f32.mxu0 %vm5762_vm3, %v6594_v9  ;;  %12307 = vmatprep.mubr.msk.f32.mxu1 %vm5762_vm3, %v5686_v40  ;;  %v6625_v9 = vmul.f32 %v5709_v43, %v5709_v43  ;;  %v5717_v40 = vld [vmem:[%s19575_s3 + $0x4b8] sm:$0xff] }
 0x47b   : > { %12644 = vmatprep.subr.mxu0 %v13580_v20  ;;  %12589 = vmatpush3.msra.mxu1 %v13580_v20 }
 0x47c   : > { %12645 = vmatpush3.msra.mxu0 %v13580_v20  ;;  %12596 = vmatprep.subr.msk.mxu1 %vm6045_vm2, %v13580_v20 }
 0x47d   : > { %12451 = vmatmul.mubr.msk.f32.gmra.mxu0 %vm5762_vm3, %v6595_v19  ;;  %12308 = vmatmul.mubr.msk.f32.gmra.mxu1 %vm5762_vm3, %v5687_v36  ;;  %v5718_v19 = vld [vmem:[%s19575_s3 + $0x4c0] sm:$0xff]  ;;  %v6628_v36 = vmul.f32 %v5712_v62, %v5712_v62 }
 0x47e   : > { %12453 = vmatprep.mubr.msk.f32.mxu0 %vm5762_vm3, %v6596_v57  ;;  %12310 = vmatprep.mubr.msk.f32.mxu1 %vm5762_vm3, %v5688_v22  ;;  %v6627_v57 = vmul.f32 %v5711_v8, %v5711_v8  ;;  %v5719_v22 = vld [vmem:[%s19575_s3 + $0x4c8] sm:$0xff] }
 0x47f   : > { %12646 = vmatprep.subr.mxu0 %v13580_v20 }
 0x480   : > { %12647 = vmatpush3.msra.mxu0 %v13580_v20 }
 0x481   : > { %12454 = vmatmul.mubr.msk.f32.gmra.mxu0 %vm5762_vm3, %v6597_v49  ;;  %12311 = vmatmul.mubr.msk.f32.gmra.mxu1 %vm5762_vm3, %v5689_v5  ;;  %v5720_v49 = vld [vmem:[%s19575_s3 + $0x4d0] sm:$0xff]  ;;  %v6630_v5 = vmul.f32 %v5714_v23, %v5714_v23 }
 0x482   : > { %12456 = vmatprep.mubr.msk.f32.mxu0 %vm5762_vm3, %v6598_v10  ;;  %12313 = vmatprep.mubr.msk.f32.mxu1 %vm5762_vm3, %v5690_v41  ;;  %v6629_v10 = vmul.f32 %v5713_v53, %v5713_v53  ;;  %v5721_v41 = vld [vmem:[%s19575_s3 + $0x4d8] sm:$0xff] }
 0x483   : > { %12648 = vmatprep.subr.mxu0 %v13580_v20 }
 0x484   : > { %12649 = vmatpush3.msra.mxu0 %v13580_v20 }
 0x485   : > { %12457 = vmatmul.mubr.msk.f32.gmra.mxu0 %vm5762_vm3, %v6599_v13  ;;  %12314 = vmatmul.mubr.msk.f32.gmra.mxu1 %vm5762_vm3, %v5691_v50  ;;  %v5722_v13 = vld [vmem:[%s19575_s3 + $0x4e0] sm:$0xff]  ;;  %v6632_v50 = vmul.f32 %v5716_v38, %v5716_v38 }
 0x486   : > { %12459 = vmatprep.mubr.msk.f32.mxu0 %vm5762_vm3, %v6600_v32  ;;  %12316 = vmatprep.mubr.msk.f32.mxu1 %vm5762_vm3, %v5692_v33  ;;  %v6631_v32 = vmul.f32 %v5715_v26, %v5715_v26  ;;  %v5723_v33 = vld [vmem:[%s19575_s3 + $0x4e8] sm:$0xff] }
 0x489   : > { %12460 = vmatmul.mubr.msk.f32.gmra.mxu0 %vm5762_vm3, %v6601_v42  ;;  %12317 = vmatmul.mubr.msk.f32.gmra.mxu1 %vm5762_vm3, %v5693_v17  ;;  %v5724_v42 = vld [vmem:[%s19575_s3 + $0x4f0] sm:$0xff]  ;;  %v6633_v17 = vmul.f32 %v5717_v40, %v5717_v40 }
 0x48a   : > { %12462 = vmatprep.mubr.msk.f32.mxu0 %vm5762_vm3, %v6602_v16  ;;  %12319 = vmatprep.mubr.msk.f32.mxu1 %vm5762_vm3, %v5694_v12  ;;  %v19588_v16 = vmov 0   ;;  %v6634_v12 = vmul.f32 %v5718_v19, %v5718_v19 }
 0x48b   : > { %13093 = vset.pattern.permute.xlu1 %v19588_v16  ;;  %13094 = vset.pattern.permute.xlu0 %v19588_v16 }
 0x48d   : > { %12463 = vmatmul.mubr.msk.f32.gmra.mxu0 %vm5762_vm3, %v6603_v29  ;;  %12320 = vmatmul.mubr.msk.f32.gmra.mxu1 %vm5762_vm3, %v5695_v30  ;;  %v5725_v29 = vld [vmem:[%s19575_s3 + $0x4f8] sm:$0xff]  ;;  %v6635_v30 = vmul.f32 %v5719_v22, %v5719_v22 }
 0x48e   : > { %12322 = vmatprep.mubr.msk.f32.mxu1 %vm5762_vm3, %v5696_v59  ;;  %12465 = vmatprep.mubr.msk.f32.mxu0 %vm5762_vm3, %v6604_v18  ;;  %v5726_v18 = vld [vmem:[%s19575_s3 + $0x500] sm:$0xff]  ;;  %v6636_v59 = vmul.f32 %v5720_v49, %v5720_v49 }
 0x491   : > { %12323 = vmatmul.mubr.msk.f32.gmra.mxu1 %vm5762_vm3, %v5697_v31  ;;  %12466 = vmatmul.mubr.msk.f32.gmra.mxu0 %vm5762_vm3, %v6605_v2  ;;  %v5727_v2 = vld [vmem:[%s19575_s3 + $0x508] sm:$0xff]  ;;  %v6637_v31 = vmul.f32 %v5721_v41, %v5721_v41 }
 0x492   : > { %12325 = vmatprep.mubr.msk.f32.mxu1 %vm5762_vm3, %v5698_v24  ;;  %12468 = vmatprep.mubr.msk.f32.mxu0 %vm5762_vm3, %v6606_v58  ;;  %v5728_v58 = vld [vmem:[%s19575_s3 + $0x510] sm:$0xff]  ;;  %v6638_v24 = vmul.f32 %v5722_v13, %v5722_v13 }
 0x495   : > { %12326 = vmatmul.mubr.msk.f32.gmra.mxu1 %vm5762_vm3, %v5699_v3  ;;  %12469 = vmatmul.mubr.msk.f32.gmra.mxu0 %vm5762_vm3, %v6607_v0  ;;  %v5729_v0 = vld [vmem:[%s19575_s3 + $0x518] sm:$0xff]  ;;  %v6639_v3 = vmul.f32 %v5723_v33, %v5723_v33 }
 0x496   : > { %12328 = vmatprep.mubr.msk.f32.mxu1 %vm5762_vm3, %v5700_v34  ;;  %12471 = vmatprep.mubr.msk.f32.mxu0 %vm5762_vm3, %v6608_v45  ;;  %v5730_v45 = vld [vmem:[%s19575_s3 + $0x520] sm:$0xff]  ;;  %v6640_v34 = vmul.f32 %v5724_v42, %v5724_v42 }
 0x499   : > { %12329 = vmatmul.mubr.msk.f32.gmra.mxu1 %vm5762_vm3, %v5701_v48  ;;  %12472 = vmatmul.mubr.msk.f32.gmra.mxu0 %vm5762_vm3, %v6609_v60  ;;  %v5731_v60 = vld [vmem:[%s19575_s3 + $0x528] sm:$0xff]  ;;  %v6641_v48 = vmul.f32 %v5725_v29, %v5725_v29 }
 0x49a   : > { %12331 = vmatprep.mubr.msk.f32.mxu1 %vm5762_vm3, %v5702_v25  ;;  %12474 = vmatprep.mubr.msk.f32.mxu0 %vm5762_vm3, %v6610_v11  ;;  %v5732_v11 = vld [vmem:[%s19575_s3 + $0x530] sm:$0xff]  ;;  %v6642_v25 = vmul.f32 %v5726_v18, %v5726_v18 }
 0x49d   : > { %12332 = vmatmul.mubr.msk.f32.gmra.mxu1 %vm5762_vm3, %v5703_v7  ;;  %12475 = vmatmul.mubr.msk.f32.gmra.mxu0 %vm5762_vm3, %v6611_v39  ;;  %v5733_v39 = vld [vmem:[%s19575_s3 + $0x538] sm:$0xff]  ;;  %v6643_v7 = vmul.f32 %v5727_v2, %v5727_v2 }
 0x49e   : > { %12334 = vmatprep.mubr.msk.f32.mxu1 %vm5762_vm3, %v5704_v47  ;;  %12477 = vmatprep.mubr.msk.f32.mxu0 %vm5762_vm3, %v6612_v15  ;;  %v5734_v15 = vld [vmem:[%s19575_s3 + $0x540] sm:$0xff]  ;;  %v6644_v47 = vmul.f32 %v5728_v58, %v5728_v58 }
 0x4a1   : > { %12335 = vmatmul.mubr.msk.f32.gmra.mxu1 %vm5762_vm3, %v5705_v44  ;;  %12478 = vmatmul.mubr.msk.f32.gmra.mxu0 %vm5762_vm3, %v6613_v1  ;;  %v5735_v1 = vld [vmem:[%s19575_s3 + $0x548] sm:$0xff]  ;;  %v6645_v44 = vmul.f32 %v5729_v0, %v5729_v0 }
 0x4a2   : > { %12337 = vmatprep.mubr.msk.f32.mxu1 %vm5762_vm3, %v5706_v21  ;;  %12480 = vmatprep.mubr.msk.f32.mxu0 %vm5762_vm3, %v6614_v51  ;;  %v5736_v51 = vld [vmem:[%s19575_s3 + $0x550] sm:$0xff]  ;;  %v6646_v21 = vmul.f32 %v5730_v45, %v5730_v45 }
 0x4a5   : > { %12338 = vmatmul.mubr.msk.f32.gmra.mxu1 %vm5762_vm3, %v5707_v6  ;;  %12481 = vmatmul.mubr.msk.f32.gmra.mxu0 %vm5762_vm3, %v6615_v4  ;;  %v5737_v4 = vld [vmem:[%s19575_s3 + $0x558] sm:$0xff] }
 0x4a6   : > { %12340 = vmatprep.mubr.msk.f32.mxu1 %vm5762_vm3, %v5708_v46  ;;  %12483 = vmatprep.mubr.msk.f32.mxu0 %vm5762_vm3, %v6616_v52  ;;  %v5738_v52 = vld [vmem:[%s19575_s3 + $0x560] sm:$0xff] }
 0x4a9   : > { %12341 = vmatmul.mubr.msk.f32.gmra.mxu1 %vm5762_vm3, %v5709_v43  ;;  %12484 = vmatmul.mubr.msk.f32.gmra.mxu0 %vm5762_vm3, %v6617_v35  ;;  %v6647_v35 = vmul.f32 %v5731_v60, %v5731_v60  ;;  %v5739_v43 = vld [vmem:[%s19575_s3 + $0x568] sm:$0xff] }
 0x4aa   : > { %12343 = vmatprep.mubr.msk.f32.mxu1 %vm5762_vm3, %v5710_v54  ;;  %12486 = vmatprep.mubr.msk.f32.mxu0 %vm5762_vm3, %v6618_v28  ;;  %v6648_v28 = vmul.f32 %v5732_v11, %v5732_v11  ;;  %v5740_v54 = vld [vmem:[%s19575_s3 + $0x570] sm:$0xff] }
 0x4ad   : > { %12344 = vmatmul.mubr.msk.f32.gmra.mxu1 %vm5762_vm3, %v5711_v8  ;;  %12487 = vmatmul.mubr.msk.f32.gmra.mxu0 %vm5762_vm3, %v6619_v56  ;;  %v6649_v8 = vmul.f32 %v5733_v39, %v5733_v39 }
 0x4ae   : > { %12346 = vmatprep.mubr.msk.f32.mxu1 %vm5762_vm3, %v5712_v62  ;;  %12489 = vmatprep.mubr.msk.f32.mxu0 %vm5762_vm3, %v6620_v14  ;;  %v6650_v62 = vmul.f32 %v5734_v15, %v5734_v15 }
 0x4b1   : > { %12347 = vmatmul.mubr.msk.f32.gmra.mxu1 %vm5762_vm3, %v5713_v53  ;;  %12490 = vmatmul.mubr.msk.f32.gmra.mxu0 %vm5762_vm3, %v6621_v27  ;;  %v5741_v27 = vld [vmem:[%s19575_s3 + $0x578] sm:$0xff] }
 0x4b2   : > { %12349 = vmatprep.mubr.msk.f32.mxu1 %vm5762_vm3, %v5714_v23  ;;  %12492 = vmatprep.mubr.msk.f32.mxu0 %vm5762_vm3, %v6622_v55  ;;  %v5742_v23 = vld [vmem:[%s19575_s3 + $0x580] sm:$0xff] }
 0x4b5   : > { %12350 = vmatmul.mubr.msk.f32.gmra.mxu1 %vm5762_vm3, %v5715_v26  ;;  %12493 = vmatmul.mubr.msk.f32.gmra.mxu0 %vm5762_vm3, %v6623_v37  ;;  %v6651_v37 = vmul.f32 %v5735_v1, %v5735_v1  ;;  %v6652_v26 = vmul.f32 %v5736_v51, %v5736_v51 }
 0x4b6   : > { %12352 = vmatprep.mubr.msk.f32.mxu1 %vm5762_vm3, %v5716_v38  ;;  %12495 = vmatprep.mubr.msk.f32.mxu0 %vm5762_vm3, %v6624_v63 }
 0x4b9   : > { %12353 = vmatmul.mubr.msk.f32.gmra.mxu1 %vm5762_vm3, %v5717_v40  ;;  %12496 = vmatmul.mubr.msk.f32.gmra.mxu0 %vm5762_vm3, %v6625_v9  ;;  %v5743_v9 = vld [vmem:[%s19575_s3 + $0x588] sm:$0xff]  ;;  %v6653_v40 = vmul.f32 %v5737_v4, %v5737_v4 }
 0x4ba   : > { %12355 = vmatprep.mubr.msk.f32.mxu1 %vm5762_vm3, %v5718_v19  ;;  %12498 = vmatprep.mubr.msk.f32.mxu0 %vm5762_vm3, %v6626_v61  ;;  %v5744_v61 = vld [vmem:[%s19575_s3 + $0x590] sm:$0xff] }
 0x4bd   : > { %12356 = vmatmul.mubr.msk.f32.gmra.mxu1 %vm5762_vm3, %v5719_v22  ;;  %12499 = vmatmul.mubr.msk.f32.gmra.mxu0 %vm5762_vm3, %v6627_v57  ;;  %v6654_v57 = vmul.f32 %v5738_v52, %v5738_v52  ;;  %v5745_v22 = vld [vmem:[%s19575_s3 + $0x598] sm:$0xff] }
 0x4be   : > { %12358 = vmatprep.mubr.msk.f32.mxu1 %vm5762_vm3, %v5720_v49  ;;  %12501 = vmatprep.mubr.msk.f32.mxu0 %vm5762_vm3, %v6628_v36 }
 0x4c1   : > { %12359 = vmatmul.mubr.msk.f32.gmra.mxu1 %vm5762_vm3, %v5721_v41  ;;  %12502 = vmatmul.mubr.msk.f32.gmra.mxu0 %vm5762_vm3, %v6629_v10  ;;  %v5746_v10 = vld [vmem:[%s19575_s3 + $0x5a0] sm:$0xff] }
 0x4c2   : > { %12361 = vmatprep.mubr.msk.f32.mxu1 %vm5762_vm3, %v5722_v13  ;;  %12504 = vmatprep.mubr.msk.f32.mxu0 %vm5762_vm3, %v6630_v5  ;;  %v6655_v5 = vmul.f32 %v5739_v43, %v5739_v43  ;;  %v6656_v13 = vmul.f32 %v5740_v54, %v5740_v54 }
 0x4c5   : > { %12362 = vmatmul.mubr.msk.f32.gmra.mxu1 %vm5762_vm3, %v5723_v33  ;;  %12505 = vmatmul.mubr.msk.f32.gmra.mxu0 %vm5762_vm3, %v6631_v32  ;;  %v5747_v32 = vld [vmem:[%s19575_s3 + $0x5a8] sm:$0xff]  ;;  %v5748_v33 = vld [vmem:[%s19575_s3 + $0x5b0] sm:$0xff] }
 0x4c6   : > { %12364 = vmatprep.mubr.msk.f32.mxu1 %vm5762_vm3, %v5724_v42  ;;  %12507 = vmatprep.mubr.msk.f32.mxu0 %vm5762_vm3, %v6632_v50  ;;  %v6657_v42 = vmul.f32 %v5741_v27, %v5741_v27 }
 0x4c9   : > { %12365 = vmatmul.mubr.msk.f32.gmra.mxu1 %vm5762_vm3, %v5725_v29  ;;  %12508 = vmatmul.mubr.msk.f32.gmra.mxu0 %vm5762_vm3, %v6633_v17  ;;  %v6658_v29 = vmul.f32 %v5742_v23, %v5742_v23 }
 0x4ca   : > { %12367 = vmatprep.mubr.msk.f32.mxu1 %vm5762_vm3, %v5726_v18  ;;  %12510 = vmatprep.mubr.msk.f32.mxu0 %vm5762_vm3, %v6634_v12  ;;  %v5749_v18 = vld [vmem:[%s19575_s3 + $0x5b8] sm:$0xff] }
 0x4cd   : > { %12368 = vmatmul.mubr.msk.f32.gmra.mxu1 %vm5762_vm3, %v5727_v2  ;;  %12511 = vmatmul.mubr.msk.f32.gmra.mxu0 %vm5762_vm3, %v6635_v30  ;;  %v5750_v30 = vld [vmem:[%s19575_s3 + $0x5c0] sm:$0xff] }
 0x4ce   : > { %12370 = vmatprep.mubr.msk.f32.mxu1 %vm5762_vm3, %v5728_v58  ;;  %12513 = vmatprep.mubr.msk.f32.mxu0 %vm5762_vm3, %v6636_v59  ;;  %v6659_v59 = vmul.f32 %v5743_v9, %v5743_v9 }
 0x4d1   : > { %12371 = vmatmul.mubr.msk.f32.gmra.mxu1 %vm5762_vm3, %v5729_v0  ;;  %12514 = vmatmul.mubr.msk.f32.gmra.mxu0 %vm5762_vm3, %v6637_v31  ;;  %v6660_v31 = vmul.f32 %v5744_v61, %v5744_v61  ;;  %v5752_v0 = vld [vmem:[%s19575_s3 + $0x5d0] sm:$0xff] }
 0x4d2   : > { %12373 = vmatprep.mubr.msk.f32.mxu1 %vm5762_vm3, %v5730_v45  ;;  %12516 = vmatprep.mubr.msk.f32.mxu0 %vm5762_vm3, %v6638_v24  ;;  %v17271_v6 = vpop.f32.mrf.mxu0  ;;  %v5751_v24 = vld [vmem:[%s19575_s3 + $0x5c8] sm:$0xff] }
 0x4d3   : > { %v17273_v46 = vpop.f32.mrf.mxu1 }
 0x4d4   : > { %v17285_v56 = vpop.f32.mrf.mxu0 }
 0x4d5   : > { %12374 = vmatmul.mubr.msk.f32.gmra.mxu1 %vm5762_vm3, %v5731_v60  ;;  %12517 = vmatmul.mubr.msk.f32.gmra.mxu0 %vm5762_vm3, %v6639_v3  ;;  %v17287_v14 = vpop.f32.mrf.mxu1  ;;  %v6661_v3 = vmul.f32 %v5745_v22, %v5745_v22  ;;  %v6662_v60 = vmul.f32 %v5746_v10, %v5746_v10 }
 0x4d6   : > { %12376 = vmatprep.mubr.msk.f32.mxu1 %vm5762_vm3, %v5732_v11  ;;  %12519 = vmatprep.mubr.msk.f32.mxu0 %vm5762_vm3, %v6640_v34  ;;  %v5753_v11 = vld [vmem:[%s19575_s3 + $0x5d8] sm:$0xff] }
 0x4d9   : > { %12377 = vmatmul.mubr.msk.f32.gmra.mxu1 %vm5762_vm3, %v5733_v39  ;;  %12520 = vmatmul.mubr.msk.f32.gmra.mxu0 %vm5762_vm3, %v6641_v48  ;;  %v6663_v39 = vmul.f32 %v5747_v32, %v5747_v32 }
 0x4da   : > { %12379 = vmatprep.mubr.msk.f32.mxu1 %vm5762_vm3, %v5734_v15  ;;  %12522 = vmatprep.mubr.msk.f32.mxu0 %vm5762_vm3, %v6642_v25  ;;  %v5754_v25 = vld [vmem:[%s19575_s3 + $0x5e0] sm:$0xff] }
 0x4dd   : > { %12380 = vmatmul.mubr.msk.f32.gmra.mxu1 %vm5762_vm3, %v5735_v1  ;;  %12523 = vmatmul.mubr.msk.f32.gmra.mxu0 %vm5762_vm3, %v6643_v7  ;;  %v6664_v7 = vmul.f32 %v5748_v33, %v5748_v33 }
 0x4de   : > { %12382 = vmatprep.mubr.msk.f32.mxu1 %vm5762_vm3, %v5736_v51  ;;  %12525 = vmatprep.mubr.msk.f32.mxu0 %vm5762_vm3, %v6644_v47  ;;  %v5755_v47 = vld [vmem:[%s19575_s3 + $0x5e8] sm:$0xff]  ;;  %v5756_v51 = vld [vmem:[%s19575_s3 + $0x5f0] sm:$0xff] }
 0x4e1   : > { %12383 = vmatmul.mubr.msk.f32.gmra.mxu1 %vm5762_vm3, %v5737_v4  ;;  %12526 = vmatmul.mubr.msk.f32.gmra.mxu0 %vm5762_vm3, %v6645_v44  ;;  %v6665_v44 = vmul.f32 %v5749_v18, %v5749_v18  ;;  %v6666_v4 = vmul.f32 %v5750_v30, %v5750_v30 }
 0x4e2   : > { %12385 = vmatprep.mubr.msk.f32.mxu1 %vm5762_vm3, %v5738_v52  ;;  %12528 = vmatprep.mubr.msk.f32.mxu0 %vm5762_vm3, %v6646_v21  ;;  %v5757_v52 = vld [vmem:[%s19575_s3 + $0x5f8] sm:$0xff] }
 0x4e5   : > { %12386 = vmatmul.mubr.msk.f32.gmra.mxu1 %vm5762_vm3, %v5739_v43  ;;  %12529 = vmatmul.mubr.msk.f32.gmra.mxu0 %vm5762_vm3, %v6647_v35  ;;  %v6667_v43 = vmul.f32 %v5751_v24, %v5751_v24 }
 0x4e6   : > { %12388 = vmatprep.mubr.msk.f32.mxu1 %vm5762_vm3, %v5740_v54  ;;  %12531 = vmatprep.mubr.msk.f32.mxu0 %vm5762_vm3, %v6648_v28  ;;  %v17296_v55 = vpop.f32.mrf.mxu0  ;;  %v5758_v28 = vld [vmem:[%s19575_s3 + $0x600] sm:$0xff] }
 0x4e7   : > { %v17298_v53 = vpop.f32.mrf.mxu1 }
 0x4e8   : > { %v17303_v63 = vpop.f32.mrf.mxu0 }
 0x4e9   : > { %12389 = vmatmul.mubr.msk.f32.gmra.mxu1 %vm5762_vm3, %v5741_v27  ;;  %12532 = vmatmul.mubr.msk.f32.gmra.mxu0 %vm5762_vm3, %v6649_v8  ;;  %v17307_v38 = vpop.f32.mrf.mxu1  ;;  %v6668_v8 = vmul.f32 %v5752_v0, %v5752_v0 }
 0x4ea   : > { %12391 = vmatprep.mubr.msk.f32.mxu1 %vm5762_vm3, %v5742_v23  ;;  %12534 = vmatprep.mubr.msk.f32.mxu0 %vm5762_vm3, %v6650_v62  ;;  %v5759_v62 = vld [vmem:[%s19575_s3 + $0x608] sm:$0xff]  ;;  %v5760_v23 = vld [vmem:[%s19575_s3 + $0x610] sm:$0xff] }
 0x4ec   : > { %v17317_v19 = vpop.f32.mrf.mxu0 }
 0x4ed   : > { %12392 = vmatmul.mubr.msk.f32.gmra.mxu1 %vm5762_vm3, %v5743_v9  ;;  %12535 = vmatmul.mubr.msk.f32.gmra.mxu0 %vm5762_vm3, %v6651_v37  ;;  %v17321_v36 = vpop.f32.mrf.mxu1  ;;  %v6669_v37 = vmul.f32 %v5753_v11, %v5753_v11  ;;  %v6670_v9 = vmul.f32 %v5754_v25, %v5754_v25 }
 0x4ee   : > { %12394 = vmatprep.mubr.msk.f32.mxu1 %vm5762_vm3, %v5744_v61  ;;  %12537 = vmatprep.mubr.msk.f32.mxu0 %vm5762_vm3, %v6652_v26  ;;  %v17328_v49 = vpop.f32.mrf.mxu0  ;;  %v5761_v61 = vld [vmem:[%s19575_s3 + $0x618] sm:$0xff] }
 0x4ef   : > { %v17335_v41 = vpop.f32.mrf.mxu1 }
 0x4f1   : > { %12395 = vmatmul.mubr.msk.f32.gmra.mxu1 %vm5762_vm3, %v5745_v22  ;;  %12538 = vmatmul.mubr.msk.f32.gmra.mxu0 %vm5762_vm3, %v6653_v40  ;;  %v11486_v22 = vadd.f32 %v17285_v56, %v17271_v6  ;;  %v11536_v56 = vadd.f32 %v17335_v41, %v17321_v36  ;;  %v6675_v41 = vmul.f32 %v5759_v62, %v5759_v62 }
 0x4f2   : > { %12397 = vmatprep.mubr.msk.f32.mxu1 %vm5762_vm3, %v5746_v10  ;;  %12540 = vmatprep.mubr.msk.f32.mxu0 %vm5762_vm3, %v6654_v57  ;;  %v17342_v50 = vpop.f32.mrf.mxu0  ;;  %v6671_v57 = vmul.f32 %v5755_v47, %v5755_v47  ;;  %v11530_v10 = vadd.f32 %v17287_v14, %v17273_v46  ;;  %v11492_v46 = vadd.f32 %v17328_v49, %v17317_v19 }
 0x4f3   : > { %v17349_v17 = vpop.f32.mrf.mxu1 }
 0x4f4   : > { %v17351_v12 = vpop.f32.mrf.mxu0  ;;  %v5395_v6 = vadd.f32 %v11530_v10, %v11486_v22 }
 0x4f5   : > { %12398 = vmatmul.mubr.msk.f32.gmra.mxu1 %vm5762_vm3, %v5747_v32  ;;  %12541 = vmatmul.mubr.msk.f32.gmra.mxu0 %vm5762_vm3, %v6655_v5  ;;  %v17363_v2 = vpop.f32.mrf.mxu1  ;;  %v11489_v32 = vadd.f32 %v17303_v63, %v17296_v55 }
 0x4f6   : > { %12400 = vmatprep.mubr.msk.f32.mxu1 %vm5762_vm3, %v5748_v33  ;;  %12543 = vmatprep.mubr.msk.f32.mxu0 %vm5762_vm3, %v6656_v13  ;;  %v6672_v13 = vmul.f32 %v5756_v51, %v5756_v51  ;;  %v11533_v33 = vadd.f32 %v17307_v38, %v17298_v53  ;;  %v11495_v53 = vadd.f32 %v17351_v12, %v17342_v50 }
 0x4f7   : > { %v11539_v63 = vadd.f32 %v17363_v2, %v17349_v17 }
 0x4f8   : > { %v5400_v55 = vadd.f32 %v11533_v33, %v11489_v32 }
 0x4f9   : > { %12401 = vmatmul.mubr.msk.f32.gmra.mxu1 %vm5762_vm3, %v5749_v18  ;;  %12544 = vmatmul.mubr.msk.f32.gmra.mxu0 %vm5762_vm3, %v6657_v42  ;;  %v17365_v58 = vpop.f32.mrf.mxu0  ;;  %v5410_v50 = vadd.f32 %v11539_v63, %v11495_v53 }
 0x4fa   : > { %12403 = vmatprep.mubr.msk.f32.mxu1 %vm5762_vm3, %v5750_v30  ;;  %12546 = vmatprep.mubr.msk.f32.mxu0 %vm5762_vm3, %v6658_v29  ;;  %v6673_v30 = vmul.f32 %v5757_v52, %v5757_v52 }
 0x4fb   : > { %v11573_v34 = vpop.f32.mrf.mxu0 }
 0x4fc   : > { %v17375_v45 = vpop.f32.mrf.mxu1  ;;  %v11574_v29 = vadd.f32 %v11573_v34, %v17365_v58  ;;  %v6676_v34 = vmul.f32 %v5760_v23, %v5760_v23 }
 0x4fd   : > { %12404 = vmatmul.mubr.msk.f32.gmra.mxu1 %vm5762_vm3, %v5751_v24  ;;  %12547 = vmatmul.mubr.msk.f32.gmra.mxu0 %vm5762_vm3, %v6659_v59  ;;  %v6674_v59 = vmul.f32 %v5758_v28, %v5758_v28 }
 0x4fe   : > { %12406 = vmatprep.mubr.msk.f32.mxu1 %vm5762_vm3, %v5752_v0  ;;  %12549 = vmatprep.mubr.msk.f32.mxu0 %vm5762_vm3, %v6660_v31  ;;  %v17384_v48 = vpop.f32.mrf.mxu1  ;;  %v11575_v15 = vpop.f32.mrf.mxu0  ;;  %v5480_v58 = vadd.f32 %v11574_v29, %v5395_v6 }
 0x4ff   : > { %v11618_v31 = vadd.f32 %v17384_v48, %v17375_v45 }
 0x500   : > { %v11619_v1 = vpop.f32.mrf.mxu1  ;;  %v11576_v21 = vpop.f32.mrf.mxu0 }
 0x501   : > { %12407 = vmatmul.mubr.msk.f32.gmra.mxu1 %vm5762_vm3, %v5753_v11  ;;  %12550 = vmatmul.mubr.msk.f32.gmra.mxu0 %vm5762_vm3, %v6661_v3  ;;  %v11577_v18 = vadd.f32 %v11576_v21, %v11575_v15  ;;  %v5405_v3 = vadd.f32 %v11536_v56, %v11492_v46  ;;  %v5565_v11 = vadd.f32 %v11618_v31, %v5480_v58 }
 0x502   : > { %12409 = vmatprep.mubr.msk.f32.mxu1 %vm5762_vm3, %v5754_v25  ;;  %12552 = vmatprep.mubr.msk.f32.mxu0 %vm5762_vm3, %v6662_v60  ;;  %v11620_v35 = vpop.f32.mrf.mxu1  ;;  %v6677_v15 = vmul.f32 %v5761_v61, %v5761_v61 }
 0x503   : > { %v11578_v54 = vpop.f32.mrf.mxu0  ;;  %v5485_v49 = vadd.f32 %v11577_v18, %v5400_v55  ;;  %v11621_v24 = vadd.f32 %v11620_v35, %v11619_v1 }
 0x504   : > { %v11622_v27 = vpop.f32.mrf.mxu1 }
 0x505   : > { %12410 = vmatmul.mubr.msk.f32.gmra.mxu1 %vm5762_vm3, %v5755_v47  ;;  %12553 = vmatmul.mubr.msk.f32.gmra.mxu0 %vm5762_vm3, %v6663_v39  ;;  %v11579_v26 = vpop.f32.mrf.mxu0  ;;  %v5570_v48 = vadd.f32 %v11621_v24, %v5485_v49 }
 0x506   : > { %12412 = vmatprep.mubr.msk.f32.mxu1 %vm5762_vm3, %v5756_v51  ;;  %12555 = vmatprep.mubr.msk.f32.mxu0 %vm5762_vm3, %v6664_v7  ;;  %v11623_v40 = vpop.f32.mrf.mxu1  ;;  %v11580_v19 = vadd.f32 %v11579_v26, %v11578_v54 }
 0x507   : > { %v11581_v5 = vpop.f32.mrf.mxu0  ;;  %v11624_v60 = vadd.f32 %v11623_v40, %v11622_v27 }
 0x508   : > { %v11625_v42 = vpop.f32.mrf.mxu1  ;;  %v5490_v2 = vadd.f32 %v11580_v19, %v5405_v3 }
 0x509   : > { %12413 = vmatmul.mubr.msk.f32.gmra.mxu1 %vm5762_vm3, %v5757_v52  ;;  %12556 = vmatmul.mubr.msk.f32.gmra.mxu0 %vm5762_vm3, %v6665_v44  ;;  %v11582_v14 = vpop.f32.mrf.mxu0 }
 0x50a   : > { %12415 = vmatprep.mubr.msk.f32.mxu1 %vm5762_vm3, %v5758_v28  ;;  %12558 = vmatprep.mubr.msk.f32.mxu0 %vm5762_vm3, %v6666_v4  ;;  %v11626_v38 = vpop.f32.mrf.mxu1  ;;  %v11583_v36 = vadd.f32 %v11582_v14, %v11581_v5  ;;  %v5575_v44 = vadd.f32 %v11624_v60, %v5490_v2 }
 0x50b   : > { %v11627_v45 = vadd.f32 %v11626_v38, %v11625_v42 }
 0x50c   : > { %v5495_v25 = vadd.f32 %v11583_v36, %v5410_v50 }
 0x50d   : > { %12416 = vmatmul.mubr.msk.f32.gmra.mxu1 %vm5762_vm3, %v5759_v62  ;;  %12559 = vmatmul.mubr.msk.f32.gmra.mxu0 %vm5762_vm3, %v6667_v43 }
 0x50e   : > { %12418 = vmatprep.mubr.msk.f32.mxu1 %vm5762_vm3, %v5760_v23  ;;  %12561 = vmatprep.mubr.msk.f32.mxu0 %vm5762_vm3, %v6668_v8  ;;  %v5580_v21 = vadd.f32 %v11627_v45, %v5495_v25 }
 0x511   : > { %12419 = vmatmul.mubr.msk.f32.gmra.mxu1 %vm5762_vm3, %v5761_v61  ;;  %12562 = vmatmul.mubr.msk.f32.gmra.mxu0 %vm5762_vm3, %v6669_v37 }
 0x512   : > { %12564 = vmatprep.mubr.msk.f32.mxu0 %vm5762_vm3, %v6670_v9 }
 0x515   : > { %12565 = vmatmul.mubr.msk.f32.gmra.mxu0 %vm5762_vm3, %v6671_v57 }
 0x516   : > { %12567 = vmatprep.mubr.msk.f32.mxu0 %vm5762_vm3, %v6672_v13 }
 0x518   : > { %v12282_v0 = vpop.f32.mrf.mxu1 }
 0x519   : > { %12568 = vmatmul.mubr.msk.f32.gmra.mxu0 %vm5762_vm3, %v6673_v30  ;;  %v17475_v54 = vmul.f32 0.020408163, %v12282_v0 }
 0x51a   : > { %12570 = vmatprep.mubr.msk.f32.mxu0 %vm5762_vm3, %v6674_v59  ;;  %v6115_v17 = vpop.f32.mrf.mxu1 }
 0x51b   : > { %v12262_v12 = vpop.f32.mrf.mxu0  ;;  %v7684_v62 = vmul.f32 %v17475_v54, %v17475_v54  ;;  %v17485_v27 = vmul.f32 0.020408163, %v6115_v17 }
 0x51c   : > { %v17456_v47 = vadd.f32 %v12262_v12, %v5570_v48 }
 0x51d   : > { %v5649_v39 = vpop.f32.mrf.mxu0  ;;  %12571 = vmatmul.mubr.msk.f32.gmra.mxu0 %vm5762_vm3, %v6675_v41  ;;  %v12285_v51 = vpop.f32.mrf.mxu1  ;;  %v7683_v57 = vmul.f32 %v17485_v27, %v17485_v27 }
 0x51e   : > { %v17453_v7 = vadd.f32 %v5649_v39, %v5565_v11  ;;  %12573 = vmatprep.mubr.msk.f32.mxu0 %vm5762_vm3, %v6676_v34  ;;  %19827 = vst [vmem:[#allocation97_spill] sm:$0xff] %v17456_v47  ;;  %v17488_v23 = vmul.f32 0.020408163, %v12285_v51  ;;  %v10225_v13 = vmul.f32 %v17456_v47, %v17456_v47 }
 0x51f   : > { %v12265_v1 = vpop.f32.mrf.mxu0  ;;  %v6125_v28 = vpop.f32.mrf.mxu1 }
 0x520   : > { %19826 = vst [vmem:[#allocation96_spill] sm:$0xff] %v17453_v7  ;;  %12590 = vmatprep.mubr.msk.f32.mxu1 %vm5762_vm3, %v17453_v7  ;;  %v17467_v35 = vadd.f32 %v12265_v1, %v5580_v21  ;;  %v10224_v43 = vmul.f32 %v17453_v7, %v17453_v7  ;;  %v17493_v9 = vmul.f32 0.020408163, %v6125_v28  ;;  %v7686_v22 = vmul.f32 %v17488_v23, %v17488_v23 }
 0x521   : > { %v5659_v4 = vpop.f32.mrf.mxu0  ;;  %12591 = vmatmul.mubr.msk.f32.vlgmr.msra.gmra.mxu1 %vm5762_vm3, %v17456_v47  ;;  %12574 = vmatmul.mubr.msk.f32.gmra.mxu0 %vm5762_vm3, %v6677_v15  ;;  %v12288_v8 = vpop.f32.mrf.mxu1 }
 0x522   : > { %v17463_v52 = vadd.f32 %v5659_v4, %v5575_v44  ;;  %12597 = vmatpush3.msk.msra.mxu1 %vm6045_vm2, %v13580_v20  ;;  %19829 = vst [vmem:[#allocation99_spill] sm:$0xff] %v17467_v35  ;;  %v17503_v32 = vmul.f32 0.020408163, %v12288_v8  ;;  %v7685_v6 = vmul.f32 %v17493_v9, %v17493_v9  ;;  %v10227_v38 = vmul.f32 %v17467_v35, %v17467_v35 }
 0x523   : > { %12598 = vmatprep.subr.mxu1 %v13580_v20  ;;  %v6135_v40 = vpop.f32.mrf.mxu1 }
 0x524   : > { %19828 = vst [vmem:[#allocation98_spill] sm:$0xff] %v17463_v52  ;;  %12599 = vmatpush3.msra.mxu1 %v13580_v20  ;;  %12593 = vmatprep.mubr.msk.f32.mxu1 %vm5762_vm3, %v17463_v52  ;;  %v10226_v42 = vmul.f32 %v17463_v52, %v17463_v52  ;;  %v17511_v46 = vmul.f32 0.020408163, %v6135_v40  ;;  %v7688_v58 = vmul.f32 %v17503_v32, %v17503_v32 }
 0x525   : > { %12600 = vmatprep.subr.mxu1 %v13580_v20  ;;  %12594 = vmatmul.mubr.msk.f32.gmra.mxu1 %vm5762_vm3, %v17467_v35  ;;  %v12291_v14 = vpop.f32.mrf.mxu1 }
 0x526   : > { %12601 = vmatpush3.msra.mxu1 %v13580_v20  ;;  %12610 = vmatprep.mubr.msk.f32.mxu1 %vm5762_vm3, %v10224_v43  ;;  %v17522_v31 = vmul.f32 0.020408163, %v12291_v14  ;;  %v7687_v41 = vmul.f32 %v17511_v46, %v17511_v46  ;;  %v8156_v14 = vld [vmem:[%s13628_s24 + $0x18] sm:$0xff] }
 0x527   : > { %12602 = vmatprep.subr.mxu1 %v13580_v20  ;;  %v6145_v3 = vpop.f32.mrf.mxu1 }
 0x528   : > { %12603 = vmatpush3.msra.mxu1 %v13580_v20  ;;  %v7690_v11 = vmul.f32 %v17522_v31, %v17522_v31  ;;  %v17534_v25 = vmul.f32 0.020408163, %v6145_v3 }
 0x529   : > { %12604 = vmatprep.subr.mxu1 %v13580_v20  ;;  %v12437_v37 = vpop.f32.mrf.mxu0  ;;  %v12294_v15 = vpop.f32.mrf.mxu1 }
 0x52a   : > { %v7590_v26 = vmul.f32 0.020408163, %v12437_v37  ;;  %12605 = vmatpush3.msra.mxu1 %v13580_v20  ;;  %v7689_v44 = vmul.f32 %v17534_v25, %v17534_v25  ;;  %v17542_v21 = vmul.f32 0.020408163, %v12294_v15 }
 0x52b   : > { %12606 = vmatprep.subr.mxu1 %v13580_v20  ;;  %v7026_v61 = vpop.f32.mrf.mxu0 }
 0x52c   : > { %v7778_v10 = vsub.f32 %v7590_v26, %v7684_v62  ;;  %v7589_v5 = vmul.f32 0.020408163, %v7026_v61  ;;  %12607 = vmatpush3.msra.mxu1 %v13580_v20  ;;  %v6155_v62 = vpop.f32.mrf.mxu1  ;;  %v7692_v26 = vmul.f32 %v17542_v21, %v17542_v21 }
 0x52d   : > { %12608 = vmatprep.subr.mxu1 %v13580_v20  ;;  %v12440_v33 = vpop.f32.mrf.mxu0  ;;  %v17549_v61 = vmul.f32 0.020408163, %v6155_v62 }
 0x52e   : > { %v7872_v29 = vmax.f32 %v7778_v10, 0.0  ;;  %v7777_v18 = vsub.f32 %v7589_v5, %v7683_v57  ;;  %v7592_v30 = vmul.f32 0.020408163, %v12440_v33  ;;  %12609 = vmatpush3.msra.mxu1 %v13580_v20  ;;  %v12297_v33 = vpop.f32.mrf.mxu1 }
 0x52f   : > { %12611 = vmatmul.mubr.msk.f32.vlgmr.msra.gmra.mxu1 %vm5762_vm3, %v10225_v13  ;;  %v7036_v56 = vpop.f32.mrf.mxu0  ;;  %12616 = vmatprep.subr.msk.mxu1 %vm6045_vm2, %v13580_v20 }
 0x530   : > { %v7966_v59 = vadd.f32 1e-05, %v7872_v29  ;;  %v7871_v55 = vmax.f32 %v7777_v18, 0.0  ;;  %v7780_v53 = vsub.f32 %v7592_v30, %v7686_v22  ;;  %v7591_v63 = vmul.f32 0.020408163, %v7036_v56  ;;  %12613 = vmatprep.mubr.msk.f32.mxu1 %vm5762_vm3, %v10226_v42  ;;  %12617 = vmatpush3.msk.msra.mxu1 %vm6045_vm2, %v13580_v20  ;;  %v8154_v22 = vld [vmem:[%s13628_s24 + $0x8] sm:$0xff] }
 0x531   : > { %v12443_v19 = vpop.f32.mrf.mxu0  ;;  %12618 = vmatprep.subr.mxu1 %v13580_v20 }
 0x532   : > { %13177 = vrsqrt.f32 %v7966_v59  ;;  %v7965_v49 = vadd.f32 1e-05, %v7871_v55  ;;  %v7874_v24 = vmax.f32 %v7780_v53, 0.0  ;;  %v7779_v36 = vsub.f32 %v7591_v63, %v7685_v6  ;;  %12619 = vmatpush3.msra.mxu1 %v13580_v20  ;;  %v6165_v53 = vpop.f32.mrf.mxu1 }
 0x533   : > { %v7594_v0 = vmul.f32 0.020408163, %v12443_v19  ;;  %12614 = vmatmul.mubr.msk.f32.gmra.mxu1 %vm5762_vm3, %v10227_v38  ;;  %v7046_v34 = vpop.f32.mrf.mxu0  ;;  %12620 = vmatprep.subr.mxu1 %v13580_v20  ;;  %v17554_v6 = vmul.f32 0.020408163, %v12297_v33  ;;  %v8153_v19 = vld [vmem:[%s13628_s24] sm:$0xff] }
 0x534   : > { %v7968_v50 = vadd.f32 1e-05, %v7874_v24  ;;  %v7873_v12 = vmax.f32 %v7779_v36, 0.0  ;;  %v7593_v17 = vmul.f32 0.020408163, %v7046_v34  ;;  %12621 = vmatpush3.msra.mxu1 %v13580_v20  ;;  %13179 = vrsqrt.f32 %v7965_v49  ;;  %v8157_v33 = vld [vmem:[%s13628_s24 + $0x20] sm:$0xff] }
 0x535   : > { %v7782_v2 = vsub.f32 %v7594_v0, %v7688_v58  ;;  %v12446_v60 = vpop.f32.mrf.mxu0  ;;  %12622 = vmatprep.subr.mxu1 %v13580_v20  ;;  %v17559_v49 = vmul.f32 0.020408163, %v6165_v53 }
 0x536   : > { %13181 = vrsqrt.f32 %v7968_v50  ;;  %12623 = vmatpush3.msra.mxu1 %v13580_v20  ;;  %v7967_v45 = vadd.f32 1e-05, %v7873_v12  ;;  %v7781_v39 = vsub.f32 %v7593_v17, %v7687_v41  ;;  %v7596_v1 = vmul.f32 0.020408163, %v12446_v60  ;;  %v12300_v50 = vpop.f32.mrf.mxu1  ;;  %v8155_v60 = vld [vmem:[%s13628_s24 + $0x10] sm:$0xff] }
 0x537   : > { %v7876_v48 = vmax.f32 %v7782_v2, 0.0  ;;  %v7056_v51 = vpop.f32.mrf.mxu0  ;;  %12624 = vmatprep.subr.mxu1 %v13580_v20  ;;  %v7694_v41 = vmul.f32 %v17554_v6, %v17554_v6 }
 0x538   : > { %12625 = vmatpush3.msra.mxu1 %v13580_v20  ;;  %v7595_v4 = vmul.f32 0.020408163, %v7056_v51  ;;  %13183 = vrsqrt.f32 %v7967_v45  ;;  %v7875_v43 = vmax.f32 %v7781_v39, 0.0  ;;  %v7784_v8 = vsub.f32 %v7596_v1, %v7690_v11  ;;  %v6175_v1 = vpop.f32.mrf.mxu1 }
 0x539   : > { %12626 = vmatprep.subr.mxu1 %v13580_v20  ;;  %v7970_v28 = vadd.f32 1e-05, %v7876_v48  ;;  %v12449_v37 = vpop.f32.mrf.mxu0  ;;  %v17566_v11 = vmul.f32 0.020408163, %v12300_v50  ;;  %v7693_v48 = vmul.f32 %v17559_v49, %v17559_v49 }
 0x53a   : > { %12627 = vmatpush3.msra.mxu1 %v13580_v20  ;;  %v7783_v40 = vsub.f32 %v7595_v4, %v7689_v44  ;;  %v7598_v57 = vmul.f32 0.020408163, %v12449_v37  ;;  %v7969_v5 = vadd.f32 1e-05, %v7875_v43  ;;  %v7878_v13 = vmax.f32 %v7784_v8, 0.0  ;;  %v8158_v43 = vld [vmem:[%s13628_s24 + $0x28] sm:$0xff] }
 0x53b   : > { %12628 = vmatprep.subr.mxu1 %v13580_v20  ;;  %13185 = vrsqrt.f32 %v7970_v28  ;;  %v7066_v42 = vpop.f32.mrf.mxu0  ;;  %v7696_v8 = vmul.f32 %v17566_v11, %v17566_v11  ;;  %v17576_v37 = vmul.f32 0.020408163, %v6175_v1 }
 0x53c   : > { %12629 = vmatpush3.msra.mxu1 %v13580_v20  ;;  %v7691_v20 = vmul.f32 %v17549_v61, %v17549_v61  ;;  %v7877_v30 = vmax.f32 %v7783_v40, 0.0  ;;  %v7786_v56 = vsub.f32 %v7598_v57, %v7692_v26  ;;  %13187 = vrsqrt.f32 %v7969_v5 }
 0x53d   : > { %v7972_v55 = vadd.f32 1e-05, %v7878_v13  ;;  %v7597_v63 = vmul.f32 0.020408163, %v7066_v42  ;;  %v12452_v38 = vpop.f32.mrf.mxu0 }
 0x53e   : > { %v7971_v36 = vadd.f32 1e-05, %v7877_v30  ;;  %v7880_v0 = vmax.f32 %v7786_v56, 0.0  ;;  %v7600_v3 = vmul.f32 0.020408163, %v12452_v38 }
 0x53f   : > { %v13178_v10 = vpop.eup %13177  ;;  %13189 = vrsqrt.f32 %v7972_v55  ;;  %v7785_v34 = vsub.f32 %v7597_v63, %v7691_v20  ;;  %v7076_v12 = vpop.f32.mrf.mxu0  ;;  %v8160_v63 = vld [vmem:[%s13628_s24 + $0x38] sm:$0xff] }
 0x540   : > { %v8248_v29 = vmul.f32 %v13178_v10, %v8154_v22  ;;  %13191 = vrsqrt.f32 %v7971_v36  ;;  %v7974_v45 = vadd.f32 1e-05, %v7880_v0  ;;  %v7788_v39 = vsub.f32 %v7600_v3, %v7694_v41  ;;  %v12303_v22 = vpop.f32.mrf.mxu1 }
 0x541   : > { %v13180_v18 = vpop.eup %13179  ;;  %v7879_v15 = vmax.f32 %v7785_v34, 0.0  ;;  %v7599_v51 = vmul.f32 0.020408163, %v7076_v12  ;;  %v12455_v44 = vpop.f32.mrf.mxu0  ;;  %v17580_v42 = vmul.f32 0.020408163, %v12303_v22  ;;  %v8159_v12 = vld [vmem:[%s13628_s24 + $0x30] sm:$0xff] }
 0x542   : > { %8912 = vperm.xlu1 %13093, %v8248_v29   ;;  %v8342_v58 = vmul.f32 %v8248_v29, %v17475_v54  ;;  %v8247_v17 = vmul.f32 %v13180_v18, %v8153_v19  ;;  %13193 = vrsqrt.f32 %v7974_v45  ;;  %v7882_v62 = vmax.f32 %v7788_v39, 0.0 }
 0x543   : > { %v13182_v59 = vpop.eup %13181  ;;  %v7602_v26 = vmul.f32 0.020408163, %v12455_v44  ;;  %v7973_v40 = vadd.f32 1e-05, %v7879_v15  ;;  %v7787_v57 = vsub.f32 %v7599_v51, %v7693_v48  ;;  %v7086_v10 = vpop.f32.mrf.mxu0  ;;  %v7695_v18 = vmul.f32 %v17576_v37, %v17576_v37  ;;  %v8162_v44 = vld [vmem:[%s13628_s24 + $0x48] sm:$0xff] }
 0x544   : > { %8531 = vrot.lane.b32.xlu0 %v8342_v58, %s13582_s13  ;;  %v8250_v24 = vmul.f32 %v13182_v59, %v8156_v14  ;;  %v7976_v29 = vadd.f32 1e-05, %v7882_v62  ;;  %v7601_v30 = vmul.f32 0.020408163, %v7086_v10  ;;  %v6185_v14 = vpop.f32.mrf.mxu1  ;;  %v7698_v38 = vmul.f32 %v17580_v42, %v17580_v42  ;;  %v8161_v10 = vld [vmem:[%s13628_s24 + $0x40] sm:$0xff] }
 0x545   : > { %v13184_v2 = vpop.eup %13183  ;;  %v7790_v20 = vsub.f32 %v7602_v26, %v7696_v8  ;;  %13195 = vrsqrt.f32 %v7973_v40  ;;  %v7881_v56 = vmax.f32 %v7787_v57, 0.0  ;;  %v12458_v59 = vpop.f32.mrf.mxu0  ;;  %v17590_v19 = vmul.f32 0.020408163, %v6185_v14 }
 0x546   : > { %v8344_v54 = vmul.f32 %v8250_v24, %v17488_v23  ;;  %v8341_v23 = vmul.f32 %v8247_v17, %v17485_v27  ;;  %v8249_v4 = vmul.f32 %v13184_v2, %v8155_v60  ;;  %13197 = vrsqrt.f32 %v7976_v29  ;;  %v12306_v0 = vpop.f32.mrf.mxu1 }
 0x547   : > { %v7884_v58 = vmax.f32 %v7790_v20, 0.0  ;;  %v7975_v41 = vadd.f32 1e-05, %v7881_v56  ;;  %v7604_v3 = vmul.f32 0.020408163, %v12458_v59  ;;  %v7697_v2 = vmul.f32 %v17590_v19, %v17590_v19  ;;  %v8164_v59 = vld [vmem:[%s13628_s24 + $0x58] sm:$0xff] }
 0x548   : > { %8907 = vperm.xlu0 %13094, %v8247_v17   ;;  %8535 = vrot.lane.b32.xlu1 %v8344_v54, %s13582_s13  ;;  %v13186_v28 = vpop.eup %13185  ;;  %v8343_v27 = vmul.f32 %v8249_v4, %v17493_v9  ;;  %v17594_v17 = vmul.f32 0.020408163, %v12306_v0  ;;  %v6195_v39 = vpop.f32.mrf.mxu1 }
 0x549   : > { %v8252_v5 = vmul.f32 %v13186_v28, %v8158_v43  ;;  %v13188_v13 = vpop.eup %13187  ;;  %v7978_v54 = vadd.f32 1e-05, %v7884_v58  ;;  %13199 = vrsqrt.f32 %v7975_v41  ;;  %v7792_v15 = vsub.f32 %v7604_v3, %v7698_v38  ;;  %v8163_v3 = vld [vmem:[%s13628_s24 + $0x50] sm:$0xff] }
 0x54a   : > { %v8251_v55 = vmul.f32 %v13188_v13, %v8157_v33  ;;  %v17604_v28 = vmul.f32 0.020408163, %v6195_v39  ;;  %v12309_v62 = vpop.f32.mrf.mxu1 }
 0x54b   : > { %v8346_v9 = vmul.f32 %v8252_v5, %v17503_v32  ;;  %v7096_v32 = vpop.f32.mrf.mxu0  ;;  %13201 = vrsqrt.f32 %v7978_v54  ;;  %v7886_v8 = vmax.f32 %v7792_v15, 0.0  ;;  %v8166_v15 = vld [vmem:[%s13628_s24 + $0x68] sm:$0xff] }
 0x54c   : > { %8529 = vrot.lane.b32.xlu0 %v8341_v23, %s13582_s13  ;;  %8917 = vperm.xlu1 %13093, %v8249_v4   ;;  %v13190_v53 = vpop.eup %13189  ;;  %v8345_v34 = vmul.f32 %v8251_v55, %v17511_v46  ;;  %v7603_v45 = vmul.f32 0.020408163, %v7096_v32  ;;  %v7700_v23 = vmul.f32 %v17594_v17, %v17594_v17  ;;  %v6205_v20 = vpop.f32.mrf.mxu1 }
 0x54d   : > { %v13192_v36 = vpop.eup %13191  ;;  %v8254_v50 = vmul.f32 %v13190_v53, %v8160_v63  ;;  %v12461_v1 = vpop.f32.mrf.mxu0  ;;  %v17618_v53 = vmul.f32 0.020408163, %v6205_v20 }
 0x54e   : > { %v8253_v51 = vmul.f32 %v13192_v36, %v8159_v12  ;;  %v7791_v43 = vsub.f32 %v7603_v45, %v7697_v2  ;;  %v7606_v26 = vmul.f32 0.020408163, %v12461_v1  ;;  %v12312_v58 = vpop.f32.mrf.mxu1 }
 0x54f   : > { %v13194_v48 = vpop.eup %13193  ;;  %v8348_v46 = vmul.f32 %v8254_v50, %v17522_v31  ;;  %v7106_v40 = vpop.f32.mrf.mxu0  ;;  %v17622_v32 = vmul.f32 0.020408163, %v12312_v58 }
 0x550   : > { %8922 = vperm.xlu0 %13094, %v8250_v24   ;;  %8533 = vrot.lane.b32.xlu1 %v8343_v27, %s13582_s13  ;;  %v7789_v24 = vsub.f32 %v7601_v30, %v7695_v18  ;;  %v8347_v31 = vmul.f32 %v8253_v51, %v17534_v25  ;;  %v8256_v57 = vmul.f32 %v13194_v48, %v8162_v44  ;;  %v17608_v27 = vmul.f32 0.020408163, %v12309_v62 }
 0x551   : > { %v7885_v13 = vmax.f32 %v7791_v43, 0.0  ;;  %v7605_v33 = vmul.f32 0.020408163, %v7106_v40  ;;  %v7980_v18 = vadd.f32 1e-05, %v7886_v8  ;;  %v7794_v30 = vsub.f32 %v7606_v26, %v7700_v23  ;;  %v12464_v25 = vpop.f32.mrf.mxu0  ;;  %v8165_v40 = vld [vmem:[%s13628_s24 + $0x60] sm:$0xff] }
 0x552   : > { %v7883_v60 = vmax.f32 %v7789_v24, 0.0  ;;  %v13196_v22 = vpop.eup %13195  ;;  %v8350_v56 = vmul.f32 %v8256_v57, %v17542_v21  ;;  %v7608_v38 = vmul.f32 0.020408163, %v12464_v25  ;;  %v7704_v1 = vmul.f32 %v17622_v32, %v17622_v32 }
 0x553   : > { %v13198_v29 = vpop.eup %13197  ;;  %v8255_v14 = vmul.f32 %v13196_v22, %v8161_v10  ;;  %v7888_v24 = vmax.f32 %v7794_v30, 0.0  ;;  %v7116_v36 = vpop.f32.mrf.mxu0  ;;  %v8168_v30 = vld [vmem:[%s13628_s24 + $0x78] sm:$0xff] }
 0x554   : > { %8932 = vperm.xlu0 %13094, %v8252_v5   ;;  %8539 = vrot.lane.b32.xlu1 %v8346_v9, %s13582_s13  ;;  %v7977_v4 = vadd.f32 1e-05, %v7883_v60  ;;  %v7699_v5 = vmul.f32 %v17604_v28, %v17604_v28  ;;  %v7702_v9 = vmul.f32 %v17608_v27, %v17608_v27  ;;  %v8258_v41 = vmul.f32 %v13198_v29, %v8164_v59  ;;  %v6215_v60 = vpop.f32.mrf.mxu1 }
 0x555   : > { %v8349_v21 = vmul.f32 %v8255_v14, %v17549_v61  ;;  %v7607_v54 = vmul.f32 0.020408163, %v7116_v36  ;;  %v7982_v45 = vadd.f32 1e-05, %v7888_v24  ;;  %v12467_v39 = vpop.f32.mrf.mxu0  ;;  %v8167_v36 = vld [vmem:[%s13628_s24 + $0x70] sm:$0xff] }
 0x556   : > { %13203 = vrsqrt.f32 %v7977_v4  ;;  %v7793_v63 = vsub.f32 %v7605_v33, %v7699_v5  ;;  %v13200_v0 = vpop.eup %13199  ;;  %v7796_v12 = vsub.f32 %v7608_v38, %v7702_v9  ;;  %v8352_v61 = vmul.f32 %v8258_v41, %v17554_v6  ;;  %v12315_v43 = vpop.f32.mrf.mxu1 }
 0x557   : > { %13205 = vrsqrt.f32 %v7980_v18  ;;  %v8257_v48 = vmul.f32 %v13200_v0, %v8163_v3  ;;  %v7610_v8 = vmul.f32 0.020408163, %v12467_v39  ;;  %v7126_v26 = vpop.f32.mrf.mxu0 }
 0x558   : > { %8927 = vperm.xlu1 %13093, %v8251_v55   ;;  %8537 = vrot.lane.b32.xlu0 %v8345_v34, %s13582_s13  ;;  %v7979_v55 = vadd.f32 1e-05, %v7885_v13  ;;  %v7701_v34 = vmul.f32 %v17618_v53, %v17618_v53  ;;  %v13202_v2 = vpop.eup %13201  ;;  %v7890_v44 = vmax.f32 %v7796_v12, 0.0  ;;  %v6225_v5 = vpop.f32.mrf.mxu1  ;;  %v7609_v33 = vmul.f32 0.020408163, %v7126_v26 }
 0x559   : > { %v8351_v6 = vmul.f32 %v8257_v48, %v17559_v49  ;;  %v8260_v62 = vmul.f32 %v13202_v2, %v8166_v15  ;;  %v7798_v13 = vsub.f32 %v7610_v8, %v7704_v1  ;;  %v12470_v29 = vpop.f32.mrf.mxu0  ;;  %v17643_v25 = vmul.f32 0.020408163, %v6225_v5  ;;  %v8169_v8 = vld [vmem:[%s13628_s24 + $0x80] sm:$0xff] }
 0x55a   : > { %13207 = vrsqrt.f32 %v7979_v55  ;;  %v7795_v23 = vsub.f32 %v7607_v54, %v7701_v34  ;;  %v7984_v22 = vadd.f32 1e-05, %v7890_v44  ;;  %v7612_v59 = vmul.f32 0.020408163, %v12470_v29  ;;  %v12318_v9 = vpop.f32.mrf.mxu1  ;;  %v8172_v29 = vld [vmem:[%s13628_s24 + $0x98] sm:$0xff] }
 0x55b   : > { %13209 = vrsqrt.f32 %v7982_v45  ;;  %v8354_v49 = vmul.f32 %v8260_v62, %v17566_v11  ;;  %v7892_v55 = vmax.f32 %v7798_v13, 0.0  ;;  %v7136_v38 = vpop.f32.mrf.mxu0  ;;  %v8170_v45 = vld [vmem:[%s13628_s24 + $0x88] sm:$0xff] }
 0x55c   : > { %8942 = vperm.xlu0 %13094, %v8254_v50   ;;  %8543 = vrot.lane.b32.xlu1 %v8348_v46, %s13582_s13  ;;  %v7887_v50 = vmax.f32 %v7793_v63, 0.0  ;;  %v17632_v46 = vmul.f32 0.020408163, %v6215_v60  ;;  %v7889_v10 = vmax.f32 %v7795_v23, 0.0  ;;  %v7611_v3 = vmul.f32 0.020408163, %v7136_v38  ;;  %v6235_v34 = vpop.f32.mrf.mxu1 }
 0x55d   : > { %v12473_v60 = vpop.f32.mrf.mxu0  ;;  %v8171_v38 = vld [vmem:[%s13628_s24 + $0x90] sm:$0xff] }
 0x55e   : > { %v7614_v1 = vmul.f32 0.020408163, %v12473_v60  ;;  %v12321_v44 = vpop.f32.mrf.mxu1 }
 0x560   : > { %8937 = vperm.xlu1 %13093, %v8253_v51   ;;  %8541 = vrot.lane.b32.xlu0 %v8347_v31, %s13582_s13  ;;  %v7981_v51 = vadd.f32 1e-05, %v7887_v50  ;;  %v17636_v31 = vmul.f32 0.020408163, %v12315_v43  ;;  %v7986_v50 = vadd.f32 1e-05, %v7892_v55  ;;  %v7146_v43 = vpop.f32.mrf.mxu0 }
 0x561   : > { %v7613_v5 = vmul.f32 0.020408163, %v7146_v43 }
 0x562   : > { %13211 = vrsqrt.f32 %v7981_v51 }
 0x563   : > { %v13204_v4 = vpop.eup %13203  ;;  %13213 = vrsqrt.f32 %v7984_v22 }
 0x564   : > { %8952 = vperm.xlu0 %13094, %v8256_v57   ;;  %8547 = vrot.lane.b32.xlu1 %v8350_v56, %s13582_s13  ;;  %v7703_v57 = vmul.f32 %v17632_v46, %v17632_v46  ;;  %v8259_v18 = vmul.f32 %v13204_v4, %v8165_v40  ;;  %v13206_v20 = vpop.eup %13205  ;;  %v7706_v56 = vmul.f32 %v17636_v31, %v17636_v31 }
 0x565   : > { %v8262_v58 = vmul.f32 %v13206_v20, %v8168_v30 }
 0x566   : > { %v7797_v63 = vsub.f32 %v7609_v33, %v7703_v57  ;;  %v8353_v11 = vmul.f32 %v8259_v18, %v17576_v37  ;;  %v7800_v0 = vsub.f32 %v7612_v59, %v7706_v56 }
 0x567   : > { %v13208_v24 = vpop.eup %13207  ;;  %v8356_v37 = vmul.f32 %v8262_v58, %v17580_v42 }
 0x568   : > { %8947 = vperm.xlu1 %13093, %v8255_v14   ;;  %8545 = vrot.lane.b32.xlu0 %v8349_v21, %s13582_s13  ;;  %v7983_v14 = vadd.f32 1e-05, %v7889_v10  ;;  %v7705_v21 = vmul.f32 %v17643_v25, %v17643_v25  ;;  %v7891_v12 = vmax.f32 %v7797_v63, 0.0  ;;  %v8261_v54 = vmul.f32 %v13208_v24, %v8167_v36  ;;  %v13210_v2 = vpop.eup %13209  ;;  %v6245_v10 = vpop.f32.mrf.mxu1 }
 0x569   : > { %v7894_v39 = vmax.f32 %v7800_v0, 0.0  ;;  %v8264_v4 = vmul.f32 %v13210_v2, %v8170_v45 }
 0x56a   : > { %13215 = vrsqrt.f32 %v7983_v14  ;;  %v7799_v15 = vsub.f32 %v7611_v3, %v7705_v21  ;;  %v7985_v42 = vadd.f32 1e-05, %v7891_v12  ;;  %v8355_v23 = vmul.f32 %v8261_v54, %v17590_v19  ;;  %v12476_v19 = vpop.f32.mrf.mxu0  ;;  %v12324_v14 = vpop.f32.mrf.mxu1 }
 0x56b   : > { %13217 = vrsqrt.f32 %v7986_v50  ;;  %v7988_v26 = vadd.f32 1e-05, %v7894_v39  ;;  %v8358_v13 = vmul.f32 %v8264_v4, %v17594_v17 }
 0x56c   : > { %8962 = vperm.xlu0 %13094, %v8258_v41   ;;  %8551 = vrot.lane.b32.xlu1 %v8352_v61, %s13582_s13  ;;  %v17653_v41 = vmul.f32 0.020408163, %v12318_v9  ;;  %v17657_v61 = vmul.f32 0.020408163, %v6235_v34  ;;  %v7893_v40 = vmax.f32 %v7799_v15, 0.0  ;;  %13219 = vrsqrt.f32 %v7985_v42  ;;  %v7156_v55 = vpop.f32.mrf.mxu0  ;;  %v6255_v21 = vpop.f32.mrf.mxu1  ;;  %v8173_v42 = vld [vmem:[%s13628_s24 + $0xa0] sm:$0xff] }
 0x56d   : > { %13221 = vrsqrt.f32 %v7988_v26  ;;  %v7616_v9 = vmul.f32 0.020408163, %v12476_v19  ;;  %v7615_v36 = vmul.f32 0.020408163, %v7156_v55 }
 0x56e   : > { %v7987_v20 = vadd.f32 1e-05, %v7893_v40  ;;  %v12479_v34 = vpop.f32.mrf.mxu0 }
 0x56f   : > { %v13212_v51 = vpop.eup %13211  ;;  %v7618_v45 = vmul.f32 0.020408163, %v12479_v34  ;;  %v8178_v34 = vld [vmem:[%s13628_s24 + $0xc8] sm:$0xff] }
 0x570   : > { %8957 = vperm.xlu1 %13093, %v8257_v48   ;;  %8549 = vrot.lane.b32.xlu0 %v8351_v6, %s13582_s13  ;;  %v7708_v48 = vmul.f32 %v17653_v41, %v17653_v41  ;;  %v7707_v6 = vmul.f32 %v17657_v61, %v17657_v61  ;;  %v13214_v22 = vpop.eup %13213  ;;  %v8263_v33 = vmul.f32 %v13212_v51, %v8169_v8  ;;  %13223 = vrsqrt.f32 %v7987_v20 }
 0x571   : > { %v8266_v63 = vmul.f32 %v13214_v22, %v8172_v29 }
 0x572   : > { %v7802_v57 = vsub.f32 %v7614_v1, %v7708_v48  ;;  %v7801_v59 = vsub.f32 %v7613_v5, %v7707_v6  ;;  %v8357_v17 = vmul.f32 %v8263_v33, %v17604_v28  ;;  %v12327_v48 = vpop.f32.mrf.mxu1  ;;  %v7166_v1 = vpop.f32.mrf.mxu0  ;;  %v8176_v5 = vld [vmem:[%s13628_s24 + $0xb8] sm:$0xff] }
 0x573   : > { %v8360_v28 = vmul.f32 %v8266_v63, %v17608_v27  ;;  %v7617_v6 = vmul.f32 0.020408163, %v7166_v1  ;;  %v8177_v1 = vld [vmem:[%s13628_s24 + $0xc0] sm:$0xff] }
 0x574   : > { %8972 = vperm.xlu0 %13094, %v8260_v62   ;;  %8555 = vrot.lane.b32.xlu1 %v8354_v49, %s13582_s13  ;;  %v17667_v62 = vmul.f32 0.020408163, %v12321_v44  ;;  %v17671_v49 = vmul.f32 0.020408163, %v6245_v10  ;;  %v7896_v30 = vmax.f32 %v7802_v57, 0.0  ;;  %v7895_v0 = vmax.f32 %v7801_v59, 0.0  ;;  %v6265_v40 = vpop.f32.mrf.mxu1  ;;  %v12482_v10 = vpop.f32.mrf.mxu0 }
 0x575   : > { %v17699_v19 = vmul.f32 0.020408163, %v6265_v40 }
 0x576   : > { %v7990_v24 = vadd.f32 1e-05, %v7896_v30  ;;  %v7989_v39 = vadd.f32 1e-05, %v7895_v0  ;;  %v12330_v30 = vpop.f32.mrf.mxu1  ;;  %v7176_v59 = vpop.f32.mrf.mxu0 }
 0x577   : > { %v13216_v56 = vpop.eup %13215  ;;  %v7713_v55 = vmul.f32 %v17699_v19, %v17699_v19 }
 0x578   : > { %8967 = vperm.xlu1 %13093, %v8259_v18   ;;  %8553 = vrot.lane.b32.xlu0 %v8353_v11, %s13582_s13  ;;  %v7710_v18 = vmul.f32 %v17667_v62, %v17667_v62  ;;  %v7709_v11 = vmul.f32 %v17671_v49, %v17671_v49  ;;  %v8265_v50 = vmul.f32 %v13216_v56, %v8171_v38  ;;  %v13218_v12 = vpop.eup %13217  ;;  %13225 = vrsqrt.f32 %v7990_v24  ;;  %v6275_v24 = vpop.f32.mrf.mxu1 }
 0x579   : > { %v13220_v44 = vpop.eup %13219  ;;  %13227 = vrsqrt.f32 %v7989_v39  ;;  %v7620_v56 = vmul.f32 0.020408163, %v12482_v10 }
 0x57a   : > { %v7804_v3 = vsub.f32 %v7616_v9, %v7710_v18  ;;  %v7803_v60 = vsub.f32 %v7615_v36, %v7709_v11  ;;  %v8359_v27 = vmul.f32 %v8265_v50, %v17618_v53  ;;  %v13222_v26 = vpop.eup %13221  ;;  %v8267_v22 = vmul.f32 %v13220_v44, %v8173_v42  ;;  %v8175_v9 = vld [vmem:[%s13628_s24 + $0xb0] sm:$0xff] }
 0x57c   : > { %8982 = vperm.xlu0 %13094, %v8262_v58   ;;  %8559 = vrot.lane.b32.xlu1 %v8356_v37, %s13582_s13  ;;  %v17681_v58 = vmul.f32 0.020408163, %v12324_v14  ;;  %v8174_v37 = vld [vmem:[%s13628_s24 + $0xa8] sm:$0xff]  ;;  %v7898_v15 = vmax.f32 %v7804_v3, 0.0  ;;  %v7897_v43 = vmax.f32 %v7803_v60, 0.0  ;;  %v8270_v14 = vmul.f32 %v13222_v26, %v8176_v5 }
 0x57d   : > { %v8268_v51 = vmul.f32 %v13218_v12, %v8174_v37  ;;  %v13224_v20 = vpop.eup %13223 }
 0x57e   : > { %v7712_v2 = vmul.f32 %v17681_v58, %v17681_v58  ;;  %v7992_v57 = vadd.f32 1e-05, %v7898_v15  ;;  %v8364_v0 = vmul.f32 %v8270_v14, %v17636_v31  ;;  %v8269_v3 = vmul.f32 %v13224_v20, %v8175_v9 }
 0x57f   : > { %v8362_v53 = vmul.f32 %v8268_v51, %v17622_v32  ;;  %v8361_v32 = vmul.f32 %v8267_v22, %v17632_v46  ;;  %v12485_v46 = vpop.f32.mrf.mxu0 }
 0x580   : > { %8977 = vperm.xlu1 %13093, %v8261_v54   ;;  %8557 = vrot.lane.b32.xlu0 %v8355_v23, %s13582_s13  ;;  %v17685_v54 = vmul.f32 0.020408163, %v6255_v21  ;;  %v17692_v23 = vmul.f32 0.020408163, %v12327_v48  ;;  %v7806_v8 = vsub.f32 %v7618_v45, %v7712_v2  ;;  %13229 = vrsqrt.f32 %v7992_v57  ;;  %v12333_v2 = vpop.f32.mrf.mxu1  ;;  %v8180_v57 = vld [vmem:[%s13628_s24 + $0xd8] sm:$0xff] }
 0x581   : > { %v7619_v21 = vmul.f32 0.020408163, %v7176_v59  ;;  %v7622_v37 = vmul.f32 0.020408163, %v12485_v46  ;;  %v7186_v48 = vpop.f32.mrf.mxu0  ;;  %v8363_v31 = vmul.f32 %v8269_v3, %v17643_v25 }
 0x582   : > { %v7900_v29 = vmax.f32 %v7806_v8, 0.0  ;;  %v7621_v42 = vmul.f32 0.020408163, %v7186_v48  ;;  %v8181_v48 = vld [vmem:[%s13628_s24 + $0xe0] sm:$0xff] }
 0x583   : > { %v7807_v45 = vsub.f32 %v7619_v21, %v7713_v55  ;;  %v12488_v40 = vpop.f32.mrf.mxu0  ;;  %v8182_v21 = vld [vmem:[%s13628_s24 + $0xe8] sm:$0xff] }
 0x584   : > { %8992 = vperm.xlu0 %13094, %v8264_v4   ;;  %8563 = vrot.lane.b32.xlu1 %v8358_v13, %s13582_s13  ;;  %v7711_v4 = vmul.f32 %v17685_v54, %v17685_v54  ;;  %v7714_v13 = vmul.f32 %v17692_v23, %v17692_v23 }
 0x585   : > { %v13226_v11 = vpop.eup %13225  ;;  %v7901_v8 = vmax.f32 %v7807_v45, 0.0 }
 0x586   : > { %v7805_v18 = vsub.f32 %v7617_v6, %v7711_v4  ;;  %v7808_v36 = vsub.f32 %v7620_v56, %v7714_v13  ;;  %v8272_v39 = vmul.f32 %v13226_v11, %v8178_v34  ;;  %v13228_v15 = vpop.eup %13227  ;;  %v6285_v4 = vpop.f32.mrf.mxu1  ;;  %v7624_v13 = vmul.f32 0.020408163, %v12488_v40  ;;  %v8179_v56 = vld [vmem:[%s13628_s24 + $0xd0] sm:$0xff] }
 0x587   : > { %v8271_v6 = vmul.f32 %v13228_v15, %v8177_v1 }
 0x588   : > { %8987 = vperm.xlu1 %13093, %v8263_v33   ;;  %8561 = vrot.lane.b32.xlu0 %v8357_v17, %s13582_s13  ;;  %v7991_v33 = vadd.f32 1e-05, %v7897_v43  ;;  %v17709_v17 = vmul.f32 0.020408163, %v12330_v30  ;;  %v7899_v38 = vmax.f32 %v7805_v18, 0.0  ;;  %v7902_v60 = vmax.f32 %v7808_v36, 0.0  ;;  %v7196_v30 = vpop.f32.mrf.mxu0 }
 0x589   : > { %v8366_v25 = vmul.f32 %v8272_v39, %v17653_v41  ;;  %v7995_v41 = vadd.f32 1e-05, %v7901_v8  ;;  %v8365_v18 = vmul.f32 %v8271_v6, %v17657_v61  ;;  %v7623_v11 = vmul.f32 0.020408163, %v7196_v30 }
 0x58a   : > { %13231 = vrsqrt.f32 %v7991_v33  ;;  %v7993_v12 = vadd.f32 1e-05, %v7899_v38  ;;  %v7996_v43 = vadd.f32 1e-05, %v7902_v60  ;;  %v12491_v61 = vpop.f32.mrf.mxu0 }
 0x58c   : > { %9002 = vperm.xlu0 %13094, %v8266_v63   ;;  %8567 = vrot.lane.b32.xlu1 %v8360_v28, %s13582_s13  ;;  %v7994_v63 = vadd.f32 1e-05, %v7900_v29  ;;  %v17713_v28 = vmul.f32 0.020408163, %v6275_v24  ;;  %v12336_v29 = vpop.f32.mrf.mxu1  ;;  %v7206_v60 = vpop.f32.mrf.mxu0 }
 0x58d   : > { %v13230_v26 = vpop.eup %13229  ;;  %v7625_v1 = vmul.f32 0.020408163, %v7206_v60 }
 0x58e   : > { %13233 = vrsqrt.f32 %v7994_v63  ;;  %v8274_v20 = vmul.f32 %v13230_v26, %v8180_v57  ;;  %v6295_v38 = vpop.f32.mrf.mxu1 }
 0x58f   : > { %13235 = vrsqrt.f32 %v7993_v12  ;;  %v17741_v46 = vmul.f32 0.020408163, %v6295_v38 }
 0x590   : > { %8997 = vperm.xlu1 %13093, %v8265_v50   ;;  %8565 = vrot.lane.b32.xlu0 %v8359_v27, %s13582_s13  ;;  %v7716_v50 = vmul.f32 %v17709_v17, %v17709_v17  ;;  %v7715_v27 = vmul.f32 %v17713_v28, %v17713_v28  ;;  %13237 = vrsqrt.f32 %v7996_v43  ;;  %v8368_v24 = vmul.f32 %v8274_v20, %v17667_v62  ;;  %v12339_v12 = vpop.f32.mrf.mxu1 }
 0x591   : > { %13239 = vrsqrt.f32 %v7995_v41  ;;  %v8183_v41 = vld [vmem:[%s13628_s24 + $0xf0] sm:$0xff] }
 0x592   : > { %v7810_v44 = vsub.f32 %v7622_v37, %v7716_v50  ;;  %v7809_v5 = vsub.f32 %v7621_v42, %v7715_v27  ;;  %v6305_v27 = vpop.f32.mrf.mxu1 }
 0x594   : > { %9012 = vperm.xlu0 %13094, %v8268_v51   ;;  %8571 = vrot.lane.b32.xlu1 %v8362_v53, %s13582_s13  ;;  %v17723_v51 = vmul.f32 0.020408163, %v12333_v2  ;;  %v17727_v53 = vmul.f32 0.020408163, %v6285_v4  ;;  %v7904_v10 = vmax.f32 %v7810_v44, 0.0  ;;  %v7903_v9 = vmax.f32 %v7809_v5, 0.0  ;;  %v12494_v4 = vpop.f32.mrf.mxu0 }
 0x595   : > { %v7626_v2 = vmul.f32 0.020408163, %v12491_v61  ;;  %v7628_v57 = vmul.f32 0.020408163, %v12494_v4 }
 0x596   : > { %v7998_v59 = vadd.f32 1e-05, %v7904_v10 }
 0x597   : > { %v13232_v33 = vpop.eup %13231 }
 0x598   : > { %9007 = vperm.xlu1 %13093, %v8267_v22   ;;  %8569 = vrot.lane.b32.xlu0 %v8361_v32, %s13582_s13  ;;  %v7718_v22 = vmul.f32 %v17723_v51, %v17723_v51  ;;  %v7717_v32 = vmul.f32 %v17727_v53, %v17727_v53  ;;  %v8273_v36 = vmul.f32 %v13232_v33, %v8179_v56  ;;  %13241 = vrsqrt.f32 %v7998_v59 }
 0x59a   : > { %v7812_v55 = vsub.f32 %v7624_v13, %v7718_v22  ;;  %v7811_v37 = vsub.f32 %v7623_v11, %v7717_v32  ;;  %v8367_v62 = vmul.f32 %v8273_v36, %v17671_v49  ;;  %v12342_v22 = vpop.f32.mrf.mxu1  ;;  %v7216_v13 = vpop.f32.mrf.mxu0  ;;  %v8186_v11 = vld [vmem:[%s13628_s24 + $0x108] sm:$0xff] }
 0x59b   : > { %v13234_v63 = vpop.eup %13233  ;;  %v7627_v32 = vmul.f32 0.020408163, %v7216_v13 }
 0x59c   : > { %9022 = vperm.xlu0 %13094, %v8270_v14   ;;  %8575 = vrot.lane.b32.xlu1 %v8364_v0, %s13582_s13  ;;  %v17737_v14 = vmul.f32 0.020408163, %v12336_v29  ;;  %v7906_v34 = vmax.f32 %v7812_v55, 0.0  ;;  %v13236_v50 = vpop.eup %13235  ;;  %v8276_v45 = vmul.f32 %v13234_v63, %v8182_v21  ;;  %v7905_v44 = vmax.f32 %v7811_v37, 0.0  ;;  %v12497_v38 = vpop.f32.mrf.mxu0 }
 0x59d   : > { %v8275_v43 = vmul.f32 %v13236_v50, %v8181_v48  ;;  %v13238_v8 = vpop.eup %13237 }
 0x59e   : > { %v7720_v0 = vmul.f32 %v17737_v14, %v17737_v14  ;;  %v8000_v15 = vadd.f32 1e-05, %v7906_v34  ;;  %v8370_v49 = vmul.f32 %v8276_v45, %v17681_v58  ;;  %v7999_v10 = vadd.f32 1e-05, %v7905_v44  ;;  %v13240_v29 = vpop.eup %13239 }
 0x59f   : > { %v8369_v58 = vmul.f32 %v8275_v43, %v17685_v54  ;;  %v8277_v63 = vmul.f32 %v13240_v29, %v8183_v41 }
 0x5a0   : > { %9017 = vperm.xlu1 %13093, %v8269_v3   ;;  %8573 = vrot.lane.b32.xlu0 %v8363_v31, %s13582_s13  ;;  %v7997_v3 = vadd.f32 1e-05, %v7903_v9  ;;  %v7719_v31 = vmul.f32 %v17741_v46, %v17741_v46  ;;  %v7814_v42 = vsub.f32 %v7626_v2, %v7720_v0  ;;  %v6315_v9 = vpop.f32.mrf.mxu1  ;;  %v7226_v2 = vpop.f32.mrf.mxu0 }
 0x5a1   : > { %v17769_v61 = vmul.f32 0.020408163, %v6315_v9  ;;  %v7629_v44 = vmul.f32 0.020408163, %v7226_v2 }
 0x5a2   : > { %13243 = vrsqrt.f32 %v7997_v3  ;;  %v7813_v40 = vsub.f32 %v7625_v1, %v7719_v31  ;;  %v7908_v5 = vmax.f32 %v7814_v42, 0.0  ;;  %v12345_v50 = vpop.f32.mrf.mxu1  ;;  %v12500_v42 = vpop.f32.mrf.mxu0 }
 0x5a3   : > { %13245 = vrsqrt.f32 %v8000_v15  ;;  %v17783_v48 = vmul.f32 0.020408163, %v12345_v50 }
 0x5a4   : > { %9032 = vperm.xlu0 %13094, %v8272_v39   ;;  %8579 = vrot.lane.b32.xlu1 %v8366_v25, %s13582_s13  ;;  %v17751_v39 = vmul.f32 0.020408163, %v12339_v12  ;;  %v8184_v25 = vld [vmem:[%s13628_s24 + $0xf8] sm:$0xff]  ;;  %v7907_v30 = vmax.f32 %v7813_v40, 0.0  ;;  %13247 = vrsqrt.f32 %v7999_v10  ;;  %v8002_v55 = vadd.f32 1e-05, %v7908_v5  ;;  %v7236_v13 = vpop.f32.mrf.mxu0 }
 0x5a5   : > { %v8278_v33 = vmul.f32 %v13238_v8, %v8184_v25  ;;  %v13242_v59 = vpop.eup %13241  ;;  %v8371_v12 = vmul.f32 %v8277_v63, %v17699_v19  ;;  %v8188_v25 = vld [vmem:[%s13628_s24 + $0x118] sm:$0xff]  ;;  %v7726_v40 = vmul.f32 %v17783_v48, %v17783_v48  ;;  %v7631_v9 = vmul.f32 0.020408163, %v7236_v13 }
 0x5a6   : > { %v7722_v26 = vmul.f32 %v17751_v39, %v17751_v39  ;;  %13249 = vrsqrt.f32 %v8002_v55  ;;  %v8280_v37 = vmul.f32 %v13242_v59, %v8186_v11 }
 0x5a7   : > { %v8372_v54 = vmul.f32 %v8278_v33, %v17692_v23  ;;  %v7630_v23 = vmul.f32 0.020408163, %v12497_v38 }
 0x5a8   : > { %9027 = vperm.xlu1 %13093, %v8271_v6   ;;  %8577 = vrot.lane.b32.xlu0 %v8365_v18, %s13582_s13  ;;  %v17755_v6 = vmul.f32 0.020408163, %v6305_v27  ;;  %v7816_v56 = vsub.f32 %v7628_v57, %v7722_v26  ;;  %v6325_v27 = vpop.f32.mrf.mxu1  ;;  %v8374_v4 = vmul.f32 %v8280_v37, %v17709_v17 }
 0x5a9   : > { %v17791_v26 = vmul.f32 0.020408163, %v6325_v27 }
 0x5aa   : > { %v7721_v18 = vmul.f32 %v17755_v6, %v17755_v6  ;;  %v7910_v21 = vmax.f32 %v7816_v56, 0.0  ;;  %v12348_v10 = vpop.f32.mrf.mxu1 }
 0x5ab   : > { %v7725_v56 = vmul.f32 %v17791_v26, %v17791_v26 }
 0x5ac   : > { %9042 = vperm.xlu0 %13094, %v8274_v20   ;;  %8583 = vrot.lane.b32.xlu1 %v8368_v24, %s13582_s13  ;;  %v17765_v20 = vmul.f32 0.020408163, %v12342_v22  ;;  %v7815_v0 = vsub.f32 %v7627_v32, %v7721_v18  ;;  %v8004_v31 = vadd.f32 1e-05, %v7910_v21  ;;  %v7632_v22 = vmul.f32 0.020408163, %v12500_v42  ;;  %v6335_v55 = vpop.f32.mrf.mxu1 }
 0x5ad   : > { %v17805_v32 = vmul.f32 0.020408163, %v12348_v10 }
 0x5ae   : > { %v7724_v24 = vmul.f32 %v17765_v20, %v17765_v20  ;;  %v7909_v15 = vmax.f32 %v7815_v0, 0.0  ;;  %v7820_v59 = vsub.f32 %v7632_v22, %v7726_v40  ;;  %v8190_v0 = vld [vmem:[%s13628_s24 + $0x128] sm:$0xff] }
 0x5af   : > { %v13244_v34 = vpop.eup %13243  ;;  %v7728_v50 = vmul.f32 %v17805_v32, %v17805_v32 }
 0x5b0   : > { %9037 = vperm.xlu1 %13093, %v8273_v36   ;;  %8581 = vrot.lane.b32.xlu0 %v8367_v62, %s13582_s13  ;;  %v8001_v36 = vadd.f32 1e-05, %v7907_v30  ;;  %v8185_v62 = vld [vmem:[%s13628_s24 + $0x100] sm:$0xff]  ;;  %v13246_v1 = vpop.eup %13245  ;;  %v7818_v19 = vsub.f32 %v7630_v23, %v7724_v24  ;;  %v8003_v57 = vadd.f32 1e-05, %v7909_v15  ;;  %v8187_v30 = vld [vmem:[%s13628_s24 + $0x110] sm:$0xff] }
 0x5b1   : > { %v13248_v29 = vpop.eup %13247  ;;  %v7914_v23 = vmax.f32 %v7820_v59, 0.0 }
 0x5b2   : > { %13251 = vrsqrt.f32 %v8001_v36  ;;  %v7912_v17 = vmax.f32 %v7818_v19, 0.0  ;;  %v8281_v11 = vmul.f32 %v13248_v29, %v8187_v30  ;;  %v8189_v19 = vld [vmem:[%s13628_s24 + $0x120] sm:$0xff] }
 0x5b3   : > { %13253 = vrsqrt.f32 %v8004_v31  ;;  %v13250_v24 = vpop.eup %13249 }
 0x5b4   : > { %9052 = vperm.xlu0 %13094, %v8276_v45   ;;  %8587 = vrot.lane.b32.xlu1 %v8370_v49, %s13582_s13  ;;  %v7723_v45 = vmul.f32 %v17769_v61, %v17769_v61  ;;  %v8279_v49 = vmul.f32 %v13244_v34, %v8185_v62  ;;  %13255 = vrsqrt.f32 %v8003_v57  ;;  %v17813_v34 = vmul.f32 0.020408163, %v6335_v55  ;;  %v12351_v62 = vpop.f32.mrf.mxu1 }
 0x5b5   : > { %v8375_v31 = vmul.f32 %v8281_v11, %v17727_v53  ;;  %v8284_v15 = vmul.f32 %v13250_v24, %v8190_v0  ;;  %v17826_v42 = vmul.f32 0.020408163, %v12351_v62 }
 0x5b6   : > { %v17777_v60 = vpop.permute.xlu0 %8531  ;;  %v7817_v5 = vsub.f32 %v7629_v44, %v7723_v45  ;;  %v7727_v44 = vmul.f32 %v17813_v34, %v17813_v34  ;;  %v6345_v57 = vpop.f32.mrf.mxu1 }
 0x5b7   : > { %v8378_v10 = vmul.f32 %v8284_v15, %v17737_v14  ;;  %v7730_v29 = vmul.f32 %v17826_v42, %v17826_v42  ;;  %v17841_v30 = vmul.f32 0.020408163, %v6345_v57  ;;  %v10438_v14 = vld [vmem:[%s19576_s4 + $0x8] sm:$0xff] }
 0x5b8   : > { %9047 = vperm.xlu1 %13093, %v8275_v43   ;;  %8585 = vrot.lane.b32.xlu0 %v8369_v58, %s13582_s13  ;;  %v8373_v58 = vmul.f32 %v8279_v49, %v17713_v28  ;;  %v12503_v28 = vpop.f32.mrf.mxu0  ;;  %v10539_v0 = vmul.f32 %v10438_v14, %v10438_v14 }
 0x5bc   : > { %9062 = vperm.xlu0 %13094, %v8278_v33   ;;  %8591 = vrot.lane.b32.xlu1 %v8372_v54, %s13582_s13  ;;  %v8282_v33 = vmul.f32 %v13246_v1, %v8188_v25  ;;  %v8006_v54 = vadd.f32 1e-05, %v7912_v17 }
 0x5bd   : > { %v17774_v3 = vpop.permute.xlu1 %8912 }
 0x5be   : > { %v8376_v38 = vmul.f32 %v8282_v33, %v17723_v51  ;;  %v7246_v51 = vpop.f32.mrf.mxu0  ;;  %13257 = vrsqrt.f32 %v8006_v54  ;;  %v12354_v54 = vpop.f32.mrf.mxu1 }
 0x5bf   : > { %v13252_v2 = vpop.eup %13251 }
 0x5c0   : > { %9057 = vperm.xlu1 %13093, %v8277_v63   ;;  %8589 = vrot.lane.b32.xlu0 %v8371_v12, %s13582_s13  ;;  %v7911_v63 = vmax.f32 %v7817_v5, 0.0  ;;  %v7819_v12 = vsub.f32 %v7631_v9, %v7725_v56  ;;  %v13254_v53 = vpop.eup %13253  ;;  %v12506_v22 = vpop.f32.mrf.mxu0  ;;  %v8283_v17 = vmul.f32 %v13252_v2, %v8189_v19  ;;  %v10437_v5 = vld [vmem:[%s19576_s4] sm:$0xff]  ;;  %v17857_v2 = vmul.f32 0.020408163, %v12354_v54 }
 0x5c1   : > { %v17786_v43 = vpop.permute.xlu1 %8535  ;;  %12630 = vmatprep.mubr.msk.f32.mxu1 %vm5762_vm3, %v10437_v5  ;;  %v13256_v55 = vpop.eup %13255  ;;  %v10538_v24 = vmul.f32 %v10437_v5, %v10437_v5 }
 0x5c2   : > { %v8005_v45 = vadd.f32 1e-05, %v7911_v63  ;;  %v7913_v25 = vmax.f32 %v7819_v12, 0.0  ;;  %12631 = vmatmul.mubr.msk.f32.vlgmr.msra.gmra.mxu1 %vm5762_vm3, %v10438_v14  ;;  %v7256_v63 = vpop.f32.mrf.mxu0  ;;  %v8191_v12 = vld [vmem:[%s13628_s24 + $0x130] sm:$0xff] }
 0x5c3   : > { %v17788_v8 = vpop.permute.xlu0 %8907  ;;  %12650 = vmatprep.mubr.msk.f32.mxu0 %vm5762_vm3, %v10538_v24 }
 0x5c4   : > { %9072 = vperm.xlu0 %13094, %v8280_v37   ;;  %8595 = vrot.lane.b32.xlu1 %v8374_v4, %s13582_s13  ;;  %v7634_v37 = vmul.f32 0.020408163, %v12503_v28  ;;  %v7633_v4 = vmul.f32 0.020408163, %v7246_v51  ;;  %13259 = vrsqrt.f32 %v8005_v45  ;;  %v8007_v59 = vadd.f32 1e-05, %v7913_v25  ;;  %v6355_v45 = vpop.f32.mrf.mxu1 }
 0x5c5   : > { %v7636_v28 = vmul.f32 0.020408163, %v12506_v22  ;;  %v7729_v51 = vmul.f32 %v17841_v30, %v17841_v30  ;;  %12651 = vmatmul.mubr.msk.f32.vlgmr.msra.gmra.mxu0 %vm5762_vm3, %v10539_v0  ;;  %v7732_v22 = vmul.f32 %v17857_v2, %v17857_v2 }
 0x5c6   : > { %v7822_v40 = vsub.f32 %v7634_v37, %v7728_v50  ;;  %v7821_v56 = vsub.f32 %v7633_v4, %v7727_v44  ;;  %v8285_v44 = vmul.f32 %v13256_v55, %v8191_v12 }
 0x5c7   : > { %v17797_v41 = vpop.permute.xlu0 %8529  ;;  %v17799_v18 = vpop.permute.xlu1 %8917  ;;  %v7824_v62 = vsub.f32 %v7636_v28, %v7730_v29  ;;  %v8193_v28 = vld [vmem:[%s13628_s24 + $0x140] sm:$0xff] }
 0x5c8   : > { %9067 = vperm.xlu1 %13093, %v8279_v49   ;;  %8593 = vrot.lane.b32.xlu0 %v8373_v58, %s13582_s13  ;;  %v8008_v49 = vadd.f32 1e-05, %v7914_v23  ;;  %v7916_v9 = vmax.f32 %v7822_v40, 0.0  ;;  %v7915_v37 = vmax.f32 %v7821_v56, 0.0  ;;  %v8194_v40 = vld [vmem:[%s13628_s24 + $0x148] sm:$0xff]  ;;  %v8379_v29 = vmul.f32 %v8285_v44, %v17755_v6  ;;  %v10439_v6 = vld [vmem:[%s19576_s4 + $0x10] sm:$0xff] }
 0x5c9   : > { %12633 = vmatprep.mubr.msk.f32.mxu1 %vm5762_vm3, %v10439_v6  ;;  %v10540_v0 = vmul.f32 %v10439_v6, %v10439_v6 }
 0x5ca   : > { %13261 = vrsqrt.f32 %v8008_v49  ;;  %v8009_v57 = vadd.f32 1e-05, %v7915_v37 }
 0x5cb   : > { %v17808_v36 = vpop.permute.xlu0 %8922  ;;  %v17810_v21 = vpop.permute.xlu1 %8533  ;;  %13263 = vrsqrt.f32 %v8007_v59  ;;  %12653 = vmatprep.mubr.msk.f32.mxu0 %vm5762_vm3, %v10540_v0 }
 0x5cc   : > { %9082 = vperm.xlu0 %13094, %v8282_v33   ;;  %8599 = vrot.lane.b32.xlu1 %v8376_v38, %s13582_s13  ;;  %v8192_v33 = vld [vmem:[%s13628_s24 + $0x138] sm:$0xff]  ;;  %v8377_v38 = vmul.f32 %v8283_v17, %v17741_v46  ;;  %v7635_v46 = vmul.f32 0.020408163, %v7256_v63  ;;  %v13258_v4 = vpop.eup %13257 }
 0x5cd   : > { %v8288_v56 = vmul.f32 %v13258_v4, %v8194_v40  ;;  %v10440_v63 = vld [vmem:[%s19576_s4 + $0x18] sm:$0xff] }
 0x5ce   : > { %12634 = vmatmul.mubr.msk.f32.gmra.mxu1 %vm5762_vm3, %v10440_v63 }
 0x5cf   : > { %v17819_v1 = vpop.permute.xlu0 %8932  ;;  %v17821_v27 = vpop.permute.xlu1 %8539 }
 0x5d0   : > { %9077 = vperm.xlu1 %13093, %v8281_v11   ;;  %8597 = vrot.lane.b32.xlu0 %v8375_v31, %s13582_s13  ;;  %v8286_v11 = vmul.f32 %v13254_v53, %v8192_v33  ;;  %v8010_v31 = vadd.f32 1e-05, %v7916_v9  ;;  %v17867_v53 = vmul.f32 0.020408163, %v6355_v45 }
 0x5d1   : > { %v13260_v14 = vpop.eup %13259 }
 0x5d2   : > { %v8380_v19 = vmul.f32 %v8286_v11, %v17751_v39  ;;  %v7918_v39 = vmax.f32 %v7824_v62, 0.0  ;;  %13265 = vrsqrt.f32 %v8010_v31  ;;  %v7731_v55 = vmul.f32 %v17867_v53, %v17867_v53 }
 0x5d3   : > { %v17833_v13 = vpop.permute.xlu1 %8927  ;;  %v17835_v58 = vpop.permute.xlu0 %8537  ;;  %13267 = vrsqrt.f32 %v8009_v57  ;;  %v8287_v45 = vmul.f32 %v13260_v14, %v8193_v28  ;;  %v10541_v31 = vmul.f32 %v10440_v63, %v10440_v63  ;;  %v8195_v28 = vld [vmem:[%s13628_s24 + $0x150] sm:$0xff] }
 0x5d4   : > { %9092 = vperm.xlu0 %13094, %v8284_v15   ;;  %8603 = vrot.lane.b32.xlu1 %v8378_v10, %s13582_s13  ;;  %v12509_v15 = vpop.f32.mrf.mxu0  ;;  %v7823_v10 = vsub.f32 %v7635_v46, %v7729_v51  ;;  %v8382_v46 = vmul.f32 %v8288_v56, %v17765_v20 }
 0x5d5   : > { %v7638_v5 = vmul.f32 0.020408163, %v12509_v15  ;;  %12654 = vmatmul.mubr.msk.f32.gmra.mxu0 %vm5762_vm3, %v10541_v31 }
 0x5d6   : > { %v7266_v33 = vpop.f32.mrf.mxu0 }
 0x5d7   : > { %v17849_v50 = vpop.permute.xlu0 %8942  ;;  %v17851_v23 = vpop.permute.xlu1 %8543  ;;  %v7637_v24 = vmul.f32 0.020408163, %v7266_v33  ;;  %v7826_v51 = vsub.f32 %v7638_v5, %v7732_v22  ;;  %v8381_v5 = vmul.f32 %v8287_v45, %v17769_v61 }
 0x5d8   : > { %9087 = vperm.xlu1 %13093, %v8283_v17   ;;  %8601 = vrot.lane.b32.xlu0 %v8377_v38, %s13582_s13  ;;  %v12357_v17 = vpop.f32.mrf.mxu1  ;;  %v8012_v38 = vadd.f32 1e-05, %v7918_v39  ;;  %v13262_v12 = vpop.eup %13261 }
 0x5d9   : > { %v17880_v54 = vmul.f32 0.020408163, %v12357_v17  ;;  %v12512_v62 = vpop.f32.mrf.mxu0  ;;  %v7825_v40 = vsub.f32 %v7637_v24, %v7731_v55 }
 0x5da   : > { %v6365_v37 = vpop.f32.mrf.mxu1  ;;  %13269 = vrsqrt.f32 %v8012_v38  ;;  %v7640_v57 = vmul.f32 0.020408163, %v12512_v62 }
 0x5db   : > { %v17862_v49 = vpop.permute.xlu1 %8937  ;;  %v17864_v25 = vpop.permute.xlu0 %8541  ;;  %v17898_v4 = vmul.f32 0.020408163, %v6365_v37  ;;  %v7734_v20 = vmul.f32 %v17880_v54, %v17880_v54  ;;  %v7919_v63 = vmax.f32 %v7825_v40, 0.0 }
 0x5dc   : > { %9102 = vperm.xlu0 %13094, %v8286_v11   ;;  %8607 = vrot.lane.b32.xlu1 %v8380_v19, %s13582_s13  ;;  %v7917_v11 = vmax.f32 %v7823_v10, 0.0  ;;  %v12360_v22 = vpop.f32.mrf.mxu1  ;;  %v7920_v10 = vmax.f32 %v7826_v51, 0.0  ;;  %v7276_v17 = vpop.f32.mrf.mxu0 }
 0x5dd   : > { %v7733_v6 = vmul.f32 %v17898_v4, %v17898_v4  ;;  %v17913_v55 = vmul.f32 0.020408163, %v12360_v22  ;;  %v7828_v38 = vsub.f32 %v7640_v57, %v7734_v20  ;;  %v8013_v40 = vadd.f32 1e-05, %v7919_v63 }
 0x5de   : > { %v8011_v39 = vadd.f32 1e-05, %v7917_v11  ;;  %v7639_v11 = vmul.f32 0.020408163, %v7276_v17  ;;  %v6375_v61 = vpop.f32.mrf.mxu1  ;;  %v8014_v24 = vadd.f32 1e-05, %v7920_v10  ;;  %v12515_v0 = vpop.f32.mrf.mxu0 }
 0x5df   : > { %v17873_v59 = vpop.permute.xlu0 %8952  ;;  %v17875_v9 = vpop.permute.xlu1 %8547  ;;  %v17921_v31 = vmul.f32 0.020408163, %v6375_v61  ;;  %v7736_v20 = vmul.f32 %v17913_v55, %v17913_v55  ;;  %v7922_v57 = vmax.f32 %v7828_v38, 0.0 }
 0x5e0   : > { %19830 = vst [vmem:[#allocation100_spill] sm:$0xff] %v17873_v59  ;;  %9097 = vperm.xlu1 %13093, %v8285_v44   ;;  %8605 = vrot.lane.b32.xlu0 %v8379_v29, %s13582_s13  ;;  %v8196_v44 = vld [vmem:[%s13628_s24 + $0x158] sm:$0xff]  ;;  %v13264_v29 = vpop.eup %13263  ;;  %13271 = vrsqrt.f32 %v8011_v39  ;;  %v12363_v22 = vpop.f32.mrf.mxu1  ;;  %v7642_v39 = vmul.f32 0.020408163, %v12515_v0 }
 0x5e1   : > { %v8290_v33 = vmul.f32 %v13262_v12, %v8196_v44  ;;  %v8289_v37 = vmul.f32 %v13264_v29, %v8195_v28  ;;  %v13266_v51 = vpop.eup %13265  ;;  %13273 = vrsqrt.f32 %v8014_v24  ;;  %v7286_v10 = vpop.f32.mrf.mxu0  ;;  %v7735_v61 = vmul.f32 %v17921_v31, %v17921_v31  ;;  %v8212_v59 = vld [vmem:[%s13628_s24 + $0x1d8] sm:$0xff] }
 0x5e2   : > { %v13268_v44 = vpop.eup %13267  ;;  %13275 = vrsqrt.f32 %v8013_v40  ;;  %v8016_v63 = vadd.f32 1e-05, %v7922_v57  ;;  %v7830_v24 = vsub.f32 %v7642_v39, %v7736_v20  ;;  %v7641_v0 = vmul.f32 0.020408163, %v7286_v10 }
 0x5e3   : > { %v17892_v15 = vpop.permute.xlu1 %8947  ;;  %v17894_v19 = vpop.permute.xlu0 %8545  ;;  %v8384_v12 = vmul.f32 %v8290_v33, %v17783_v48  ;;  %v7827_v48 = vsub.f32 %v7639_v11, %v7733_v6  ;;  %v8383_v17 = vmul.f32 %v8289_v37, %v17791_v26  ;;  %v17935_v6 = vmul.f32 0.020408163, %v12363_v22 }
 0x5e4   : > { %19831 = vst [vmem:[#allocation101_spill] sm:$0xff] %v17892_v15  ;;  %9112 = vperm.xlu0 %13094, %v8288_v56   ;;  %8611 = vrot.lane.b32.xlu1 %v8382_v46, %s13582_s13  ;;  %v6385_v26 = vpop.f32.mrf.mxu1  ;;  %13277 = vrsqrt.f32 %v8016_v63 }
 0x5e5   : > { %v7921_v38 = vmax.f32 %v7827_v48, 0.0  ;;  %v17943_v35 = vmul.f32 0.020408163, %v6385_v26  ;;  %v7738_v40 = vmul.f32 %v17935_v6, %v17935_v6 }
 0x5e6   : > { %v12366_v48 = vpop.f32.mrf.mxu1 }
 0x5e7   : > { %v17905_v56 = vpop.permute.xlu0 %8962  ;;  %v17907_v14 = vpop.permute.xlu1 %8551  ;;  %v8015_v20 = vadd.f32 1e-05, %v7921_v38  ;;  %v17957_v63 = vmul.f32 0.020408163, %v12366_v48 }
 0x5e8   : > { %19832 = vst [vmem:[#allocation102_spill] sm:$0xff] %v17905_v56  ;;  %9107 = vperm.xlu1 %13093, %v8287_v45   ;;  %8609 = vrot.lane.b32.xlu0 %v8381_v5, %s13582_s13  ;;  %v8198_v45 = vld [vmem:[%s13628_s24 + $0x168] sm:$0xff]  ;;  %v13270_v11 = vpop.eup %13269 }
 0x5e9   : > { %v8292_v5 = vmul.f32 %v13266_v51, %v8198_v45  ;;  %13279 = vrsqrt.f32 %v8015_v20 }
 0x5eb   : > { %v17916_v62 = vpop.permute.xlu1 %8957  ;;  %v17918_v46 = vpop.permute.xlu0 %8549  ;;  %v8386_v51 = vmul.f32 %v8292_v5, %v17805_v32  ;;  %v7924_v32 = vmax.f32 %v7830_v24, 0.0 }
 0x5ec   : > { %19833 = vst [vmem:[#allocation103_spill] sm:$0xff] %v17916_v62  ;;  %9122 = vperm.xlu0 %13094, %v8290_v33   ;;  %8615 = vrot.lane.b32.xlu1 %v8384_v12, %s13582_s13  ;;  %v8197_v33 = vld [vmem:[%s13628_s24 + $0x160] sm:$0xff]  ;;  %v12518_v12 = vpop.f32.mrf.mxu0  ;;  %v8210_v62 = vld [vmem:[%s13628_s24 + $0x1c8] sm:$0xff] }
 0x5ed   : > { %v8291_v45 = vmul.f32 %v13268_v44, %v8197_v33  ;;  %v7644_v57 = vmul.f32 0.020408163, %v12518_v12  ;;  %v7829_v44 = vsub.f32 %v7641_v0, %v7735_v61 }
 0x5ee   : > { %v7296_v22 = vpop.f32.mrf.mxu0 }
 0x5ef   : > { %v17927_v29 = vpop.permute.xlu0 %8972  ;;  %v17929_v28 = vpop.permute.xlu1 %8555  ;;  %v8385_v39 = vmul.f32 %v8291_v45, %v17813_v34  ;;  %v7832_v61 = vsub.f32 %v7644_v57, %v7738_v40  ;;  %v7643_v38 = vmul.f32 0.020408163, %v7296_v22  ;;  %v7923_v24 = vmax.f32 %v7829_v44, 0.0 }
 0x5f0   : > { %19834 = vst [vmem:[#allocation104_spill] sm:$0xff] %v17927_v29  ;;  %9117 = vperm.xlu1 %13093, %v8289_v37   ;;  %8613 = vrot.lane.b32.xlu0 %v8383_v17, %s13582_s13  ;;  %v8200_v37 = vld [vmem:[%s13628_s24 + $0x178] sm:$0xff]  ;;  %v13272_v17 = vpop.eup %13271  ;;  %v6395_v34 = vpop.f32.mrf.mxu1  ;;  %v7740_v40 = vmul.f32 %v17957_v63, %v17957_v63 }
 0x5f1   : > { %v8294_v10 = vmul.f32 %v13270_v11, %v8200_v37  ;;  %v8018_v11 = vadd.f32 1e-05, %v7924_v32  ;;  %v12521_v0 = vpop.f32.mrf.mxu0  ;;  %v13274_v7 = vpop.eup %13273  ;;  %v7926_v20 = vmax.f32 %v7832_v61, 0.0  ;;  %v8017_v32 = vadd.f32 1e-05, %v7923_v24  ;;  %v8204_v29 = vld [vmem:[%s13628_s24 + $0x198] sm:$0xff] }
 0x5f2   : > { %v7646_v48 = vmul.f32 0.020408163, %v12521_v0 }
 0x5f3   : > { %v17938_v16 = vpop.permute.xlu1 %8967  ;;  %v17940_v52 = vpop.permute.xlu0 %8553  ;;  %v8388_v12 = vmul.f32 %v8294_v10, %v17826_v42  ;;  %13281 = vrsqrt.f32 %v8018_v11  ;;  %v8020_v61 = vadd.f32 1e-05, %v7926_v20 }
 0x5f4   : > { %19835 = vst [vmem:[#allocation105_spill] sm:$0xff] %v17938_v16  ;;  %9132 = vperm.xlu0 %13094, %v8292_v5   ;;  %8619 = vrot.lane.b32.xlu1 %v8386_v51, %s13582_s13  ;;  %v8199_v5 = vld [vmem:[%s13628_s24 + $0x170] sm:$0xff]  ;;  %v7737_v51 = vmul.f32 %v17943_v35, %v17943_v35  ;;  %v13276_v42 = vpop.eup %13275  ;;  %v7306_v44 = vpop.f32.mrf.mxu0  ;;  %v7834_v11 = vsub.f32 %v7646_v48, %v7740_v40  ;;  %13283 = vrsqrt.f32 %v8017_v32 }
 0x5f5   : > { %v8293_v37 = vmul.f32 %v13272_v17, %v8199_v5  ;;  %13285 = vrsqrt.f32 %v8020_v61 }
 0x5f6   : > { %v7831_v57 = vsub.f32 %v7643_v38, %v7737_v51  ;;  %v7928_v40 = vmax.f32 %v7834_v11, 0.0  ;;  %v12524_v20 = vpop.f32.mrf.mxu0 }
 0x5f7   : > { %v17949_v33 = vpop.permute.xlu0 %8982  ;;  %v17951_v26 = vpop.permute.xlu1 %8559  ;;  %v8387_v22 = vmul.f32 %v8293_v37, %v17841_v30 }
 0x5f8   : > { %19836 = vst [vmem:[#allocation106_spill] sm:$0xff] %v17949_v33  ;;  %9127 = vperm.xlu1 %13093, %v8291_v45   ;;  %8617 = vrot.lane.b32.xlu0 %v8385_v39, %s13582_s13  ;;  %v8202_v45 = vld [vmem:[%s13628_s24 + $0x188] sm:$0xff]  ;;  %v17965_v39 = vmul.f32 0.020408163, %v6395_v34  ;;  %v7925_v38 = vmax.f32 %v7831_v57, 0.0  ;;  %v13278_v30 = vpop.eup %13277 }
 0x5f9   : > { %v8296_v17 = vmul.f32 %v13274_v7, %v8202_v45  ;;  %v7645_v7 = vmul.f32 0.020408163, %v7306_v44  ;;  %v13280_v57 = vpop.eup %13279  ;;  %v8298_v32 = vmul.f32 %v13278_v30, %v8204_v29 }
 0x5fb   : > { %v17960_v47 = vpop.permute.xlu1 %8977  ;;  %v17962_v33 = vpop.permute.xlu0 %8557  ;;  %v8390_v24 = vmul.f32 %v8296_v17, %v17857_v2  ;;  %v7648_v2 = vmul.f32 0.020408163, %v12524_v20 }
 0x5fc   : > { %19837 = vst [vmem:[#allocation107_spill] sm:$0xff] %v17960_v47  ;;  %9142 = vperm.xlu0 %13094, %v8294_v10   ;;  %8623 = vrot.lane.b32.xlu1 %v8388_v12, %s13582_s13  ;;  %v8201_v10 = vld [vmem:[%s13628_s24 + $0x180] sm:$0xff]  ;;  %v7739_v12 = vmul.f32 %v17965_v39, %v17965_v39  ;;  %v12369_v47 = vpop.f32.mrf.mxu1 }
 0x5fd   : > { %v17979_v51 = vmul.f32 0.020408163, %v12369_v47  ;;  %v8295_v0 = vmul.f32 %v13276_v42, %v8201_v10 }
 0x5fe   : > { %v7833_v48 = vsub.f32 %v7645_v7, %v7739_v12  ;;  %v6405_v10 = vpop.f32.mrf.mxu1  ;;  %v7316_v7 = vpop.f32.mrf.mxu0 }
 0x5ff   : > { %v17971_v5 = vpop.permute.xlu0 %8992  ;;  %v17973_v34 = vpop.permute.xlu1 %8563  ;;  %v7742_v47 = vmul.f32 %v17979_v51, %v17979_v51  ;;  %v8389_v42 = vmul.f32 %v8295_v0, %v17867_v53  ;;  %v17997_v61 = vmul.f32 0.020408163, %v6405_v10  ;;  %v8392_v53 = vmul.f32 %v8298_v32, %v17880_v54 }
 0x600   : > { %19838 = vst [vmem:[#allocation108_spill] sm:$0xff] %v17971_v5  ;;  %9137 = vperm.xlu1 %13093, %v8293_v37   ;;  %8621 = vrot.lane.b32.xlu0 %v8387_v22, %s13582_s13  ;;  %v8019_v37 = vadd.f32 1e-05, %v7925_v38  ;;  %v8022_v38 = vadd.f32 1e-05, %v7928_v40  ;;  %v7927_v11 = vmax.f32 %v7833_v48, 0.0  ;;  %v13282_v30 = vpop.eup %13281 }
 0x601   : > { %v7836_v12 = vsub.f32 %v7648_v2, %v7742_v47  ;;  %v12372_v47 = vpop.f32.mrf.mxu1  ;;  %v13284_v2 = vpop.eup %13283 }
 0x602   : > { %13287 = vrsqrt.f32 %v8019_v37  ;;  %v7647_v37 = vmul.f32 0.020408163, %v7316_v7  ;;  %v8021_v40 = vadd.f32 1e-05, %v7927_v11  ;;  %v13286_v7 = vpop.eup %13285 }
 0x603   : > { %v17982_v45 = vpop.permute.xlu1 %8987  ;;  %v17984_v5 = vpop.permute.xlu0 %8561  ;;  %13289 = vrsqrt.f32 %v8022_v38  ;;  %v7930_v48 = vmax.f32 %v7836_v12, 0.0 }
 0x604   : > { %19839 = vst [vmem:[#allocation109_spill] sm:$0xff] %v17982_v45  ;;  %9152 = vperm.xlu0 %13094, %v8296_v17   ;;  %8627 = vrot.lane.b32.xlu1 %v8390_v24, %s13582_s13  ;;  %v8203_v17 = vld [vmem:[%s13628_s24 + $0x190] sm:$0xff]  ;;  %v6415_v11 = vpop.f32.mrf.mxu1  ;;  %13291 = vrsqrt.f32 %v8021_v40 }
 0x605   : > { %v8297_v29 = vmul.f32 %v13280_v57, %v8203_v17  ;;  %v8024_v12 = vadd.f32 1e-05, %v7930_v48 }
 0x606   : > { %v12375_v40 = vpop.f32.mrf.mxu1 }
 0x607   : > { %v17991_v44 = vpop.permute.xlu0 %9002  ;;  %v17993_v22 = vpop.permute.xlu1 %8567  ;;  %v8391_v54 = vmul.f32 %v8297_v29, %v17898_v4  ;;  %13293 = vrsqrt.f32 %v8024_v12  ;;  %v18037_v12 = vmul.f32 0.020408163, %v12375_v40 }
 0x608   : > { %19840 = vst [vmem:[#allocation110_spill] sm:$0xff] %v17991_v44  ;;  %9147 = vperm.xlu1 %13093, %v8295_v0   ;;  %8625 = vrot.lane.b32.xlu0 %v8389_v42, %s13582_s13  ;;  %v8206_v44 = vld [vmem:[%s13628_s24 + $0x1a8] sm:$0xff]  ;;  %v7741_v0 = vmul.f32 %v17997_v61, %v17997_v61  ;;  %v18009_v42 = vmul.f32 0.020408163, %v12372_v47  ;;  %v18020_v47 = vmul.f32 0.020408163, %v6415_v11 }
 0x609   : > { %v8300_v57 = vmul.f32 %v13282_v30, %v8206_v44  ;;  %v7746_v40 = vmul.f32 %v18037_v12, %v18037_v12 }
 0x60a   : > { %v7835_v38 = vsub.f32 %v7647_v37, %v7741_v0  ;;  %v7744_v30 = vmul.f32 %v18009_v42, %v18009_v42 }
 0x60b   : > { %v18000_v24 = vpop.permute.xlu1 %8997  ;;  %v18002_v20 = vpop.permute.xlu0 %8565  ;;  %v8394_v4 = vmul.f32 %v8300_v57, %v17913_v55 }
 0x60c   : > { %19841 = vst [vmem:[#allocation111_spill] sm:$0xff] %v18000_v24  ;;  %9162 = vperm.xlu0 %13094, %v8298_v32   ;;  %8631 = vrot.lane.b32.xlu1 %v8392_v53, %s13582_s13  ;;  %v8205_v32 = vld [vmem:[%s13628_s24 + $0x1a0] sm:$0xff]  ;;  %v12527_v53 = vpop.f32.mrf.mxu0  ;;  %v7929_v55 = vmax.f32 %v7835_v38, 0.0 }
 0x60d   : > { %v8299_v44 = vmul.f32 %v13284_v2, %v8205_v32  ;;  %v7743_v2 = vmul.f32 %v18020_v47, %v18020_v47 }
 0x60e   : > { %v7326_v0 = vpop.f32.mrf.mxu0 }
 0x60f   : > { %v18011_v17 = vpop.permute.xlu0 %9012  ;;  %v18013_v10 = vpop.permute.xlu1 %8571  ;;  %v8393_v48 = vmul.f32 %v8299_v44, %v17921_v31 }
 0x610   : > { %19842 = vst [vmem:[#allocation112_spill] sm:$0xff] %v18011_v17  ;;  %9157 = vperm.xlu1 %13093, %v8297_v29   ;;  %8629 = vrot.lane.b32.xlu0 %v8391_v54, %s13582_s13  ;;  %v7650_v17 = vmul.f32 0.020408163, %v12527_v53  ;;  %v8208_v29 = vld [vmem:[%s13628_s24 + $0x1b8] sm:$0xff]  ;;  %v13288_v37 = vpop.eup %13287  ;;  %v7649_v53 = vmul.f32 0.020408163, %v7326_v0  ;;  %v12530_v16 = vpop.f32.mrf.mxu0 }
 0x611   : > { %v8302_v54 = vmul.f32 %v13286_v7, %v8208_v29  ;;  %v13290_v38 = vpop.eup %13289  ;;  %v6425_v31 = vpop.f32.mrf.mxu1  ;;  %v8023_v7 = vadd.f32 1e-05, %v7929_v55 }
 0x612   : > { %v7838_v32 = vsub.f32 %v7650_v17, %v7744_v30  ;;  %v18040_v17 = vmul.f32 0.020408163, %v6425_v31  ;;  %v7837_v0 = vsub.f32 %v7649_v53, %v7743_v2  ;;  %v8304_v55 = vmul.f32 %v13290_v38, %v8210_v62 }
 0x613   : > { %v18022_v24 = vpop.permute.xlu1 %9007  ;;  %v18024_v45 = vpop.permute.xlu0 %8569  ;;  %13295 = vrsqrt.f32 %v8023_v7 }
 0x614   : > { %19843 = vst [vmem:[#allocation113_spill] sm:$0xff] %v18022_v24  ;;  %9172 = vperm.xlu0 %13094, %v8300_v57   ;;  %8635 = vrot.lane.b32.xlu1 %v8394_v4, %s13582_s13  ;;  %v8207_v57 = vld [vmem:[%s13628_s24 + $0x1b0] sm:$0xff]  ;;  %v8396_v4 = vmul.f32 %v8302_v54, %v17935_v6  ;;  %v7932_v30 = vmax.f32 %v7838_v32, 0.0  ;;  %v7652_v6 = vmul.f32 0.020408163, %v12530_v16  ;;  %v7745_v2 = vmul.f32 %v18040_v17, %v18040_v17  ;;  %v12378_v16 = vpop.f32.mrf.mxu1 }
 0x615   : > { %v8301_v29 = vmul.f32 %v13288_v37, %v8207_v57  ;;  %v7931_v53 = vmax.f32 %v7837_v0, 0.0 }
 0x616   : > { %v8026_v32 = vadd.f32 1e-05, %v7932_v30  ;;  %v7840_v7 = vsub.f32 %v7652_v6, %v7746_v40 }
 0x617   : > { %v18031_v11 = vpop.permute.xlu0 %9022  ;;  %v18033_v24 = vpop.permute.xlu1 %8575  ;;  %v8395_v37 = vmul.f32 %v8301_v29, %v17943_v35  ;;  %v8398_v35 = vmul.f32 %v8304_v55, %v17957_v63  ;;  %v8025_v30 = vadd.f32 1e-05, %v7931_v53 }
 0x618   : > { %19844 = vst [vmem:[#allocation114_spill] sm:$0xff] %v18031_v11  ;;  %9167 = vperm.xlu1 %13093, %v8299_v44   ;;  %8633 = vrot.lane.b32.xlu0 %v8393_v48, %s13582_s13  ;;  %v7336_v44 = vpop.f32.mrf.mxu0  ;;  %v13292_v48 = vpop.eup %13291  ;;  %13297 = vrsqrt.f32 %v8026_v32  ;;  %v7934_v40 = vmax.f32 %v7840_v7, 0.0 }
 0x619   : > { %v7651_v57 = vmul.f32 0.020408163, %v7336_v44  ;;  %v13294_v38 = vpop.eup %13293  ;;  %13299 = vrsqrt.f32 %v8025_v30 }
 0x61a   : > { %v8306_v6 = vmul.f32 %v13294_v38, %v8212_v59 }
 0x61b   : > { %v18042_v11 = vpop.permute.xlu1 %9017  ;;  %v18044_v56 = vpop.permute.xlu0 %8573  ;;  %v7839_v0 = vsub.f32 %v7651_v57, %v7745_v2 }
 0x61c   : > { %19845 = vst [vmem:[#allocation115_spill] sm:$0xff] %v18042_v11  ;;  %9182 = vperm.xlu0 %13094, %v8302_v54   ;;  %8639 = vrot.lane.b32.xlu1 %v8396_v4, %s13582_s13  ;;  %v8209_v4 = vld [vmem:[%s13628_s24 + $0x1c0] sm:$0xff]  ;;  %v18060_v11 = vmul.f32 0.020408163, %v12378_v16  ;;  %v8400_v59 = vmul.f32 %v8306_v6, %v17979_v51  ;;  %v13381_v51 = vld [vmem:[%s13628_s24 + $0x8] sm:$0xff] }
 0x61d   : > { %v8303_v62 = vmul.f32 %v13292_v48, %v8209_v4  ;;  %v7933_v2 = vmax.f32 %v7839_v0, 0.0  ;;  %v8211_v0 = vld [vmem:[%s13628_s24 + $0x1d0] sm:$0xff] }
 0x61e   : > { %v7748_v48 = vmul.f32 %v18060_v11, %v18060_v11 }
 0x61f   : > { %v18053_v31 = vpop.permute.xlu0 %9032  ;;  %v18055_v54 = vpop.permute.xlu1 %8579  ;;  %v8397_v63 = vmul.f32 %v8303_v62, %v17965_v39  ;;  %v8028_v39 = vadd.f32 1e-05, %v7934_v40  ;;  %v8027_v7 = vadd.f32 1e-05, %v7933_v2 }
 0x620   : > { %19846 = vst [vmem:[#allocation116_spill] sm:$0xff] %v18053_v31  ;;  %9177 = vperm.xlu1 %13093, %v8301_v29   ;;  %8637 = vrot.lane.b32.xlu0 %v8395_v37, %s13582_s13  ;;  %v12533_v29 = vpop.f32.mrf.mxu0  ;;  %v6435_v37 = vpop.f32.mrf.mxu1 }
 0x621   : > { %v7654_v32 = vmul.f32 0.020408163, %v12533_v29  ;;  %v13296_v16 = vpop.eup %13295  ;;  %13301 = vrsqrt.f32 %v8028_v39  ;;  %v8214_v39 = vld [vmem:[%s13628_s24 + $0x1e8] sm:$0xff] }
 0x622   : > { %v7346_v4 = vpop.f32.mrf.mxu0  ;;  %v8305_v40 = vmul.f32 %v13296_v16, %v8211_v0  ;;  %13303 = vrsqrt.f32 %v8027_v7  ;;  %v13382_v16 = vld [vmem:[%s13628_s24] sm:$0xff] }
 0x623   : > { %v18062_v44 = vpop.permute.xlu1 %9027  ;;  %v18064_v31 = vpop.permute.xlu0 %8577 }
 0x624   : > { %19847 = vst [vmem:[#allocation117_spill] sm:$0xff] %v18062_v44  ;;  %9192 = vperm.xlu0 %13094, %v8304_v55   ;;  %8643 = vrot.lane.b32.xlu1 %v8398_v35, %s13582_s13  ;;  %v18075_v55 = vmul.f32 0.020408163, %v6435_v37  ;;  %v7842_v35 = vsub.f32 %v7654_v32, %v7748_v48  ;;  %v7653_v37 = vmul.f32 0.020408163, %v7346_v4  ;;  %v19594_v4 = vmov 1  }
 0x626   : > { %v7747_v29 = vmul.f32 %v18075_v55, %v18075_v55  ;;  %v7936_v48 = vmax.f32 %v7842_v35, 0.0 }
 0x627   : > { %v18071_v53 = vpop.permute.xlu0 %9042  ;;  %v18073_v57 = vpop.permute.xlu1 %8583 }
 0x628   : > { %19848 = vst [vmem:[#allocation118_spill] sm:$0xff] %v18071_v53  ;;  %9187 = vperm.xlu1 %13093, %v8303_v62   ;;  %8641 = vrot.lane.b32.xlu0 %v8397_v63, %s13582_s13  ;;  %v12381_v62 = vpop.f32.mrf.mxu1  ;;  %v8812_v63 = vsub.f32 %v13381_v51, %v17777_v60  ;;  %v13298_v53 = vpop.eup %13297  ;;  %v8811_v60 = vsub.f32 %v13382_v16, %v17797_v41  ;;  %v8030_v7 = vadd.f32 1e-05, %v7936_v48  ;;  %v19854_v48 = vmov 0  }
 0x629   : > { %v8308_v51 = vmul.f32 %v13298_v53, %v8214_v39 }
 0x62a   : > { %13305 = vrsqrt.f32 %v8030_v7 }
 0x62b   : > { %v18079_v38 = vpop.permute.xlu1 %9037  ;;  %v18081_v30 = vpop.permute.xlu0 %8581 }
 0x62c   : > { %19849 = vst [vmem:[#allocation119_spill] sm:$0xff] %v18079_v38  ;;  %9202 = vperm.xlu0 %13094, %v8306_v6   ;;  %8647 = vrot.lane.b32.xlu1 %v8400_v59, %s13582_s13  ;;  %v18093_v38 = vmul.f32 0.020408163, %v12381_v62  ;;  %v7841_v6 = vsub.f32 %v7653_v37, %v7747_v29  ;;  %v12536_v59 = vpop.f32.mrf.mxu0  ;;  %v8399_v62 = vmul.f32 %v8305_v40, %v17997_v61  ;;  %v13300_v29 = vpop.eup %13299 }
 0x62d   : > { %v7656_v44 = vmul.f32 0.020408163, %v12536_v59 }
 0x62e   : > { %v7750_v37 = vmul.f32 %v18093_v38, %v18093_v38  ;;  %v7356_v41 = vpop.f32.mrf.mxu0 }
 0x62f   : > { %v18089_v2 = vpop.permute.xlu0 %9052  ;;  %v18091_v32 = vpop.permute.xlu1 %8587  ;;  %v7655_v16 = vmul.f32 0.020408163, %v7356_v41 }
 0x630   : > { %19850 = vst [vmem:[#allocation120_spill] sm:$0xff] %v18089_v2  ;;  %19851 = vst [vmem:[#allocation121_spill] sm:$0xff] %v18091_v32  ;;  %13095 = vset.pattern.permute.xlu0 %v19594_v4  ;;  %9197 = vperm.xlu1 %13093, %v8305_v40   ;;  %v6445_v4 = vpop.f32.mrf.mxu1  ;;  %v7935_v2 = vmax.f32 %v7841_v6, 0.0  ;;  %v8213_v32 = vld [vmem:[%s13628_s24 + $0x1e0] sm:$0xff]  ;;  %v8402_v40 = vmul.f32 %v8308_v51, %v18009_v42  ;;  %v7844_v59 = vsub.f32 %v7656_v44, %v7750_v37  ;;  %v8215_v37 = vld [vmem:[%s13628_s24 + $0x1f0] sm:$0xff] }
 0x631   : > { %9476 = vperm.xlu0 %13095, %v8812_v63   ;;  %v19853_v63 = vmov 1   ;;  %v18108_v15 = vmul.f32 0.020408163, %v6445_v4  ;;  %v8307_v6 = vmul.f32 %v13300_v29, %v8213_v32  ;;  %v8216_v29 = vld [vmem:[%s13628_s24 + $0x1f8] sm:$0xff] }
 0x632   : > { %v8029_v39 = vadd.f32 1e-05, %v7935_v2  ;;  %v12384_v32 = vpop.f32.mrf.mxu1  ;;  %v7938_v44 = vmax.f32 %v7844_v59, 0.0 }
 0x633   : > { %v18099_v35 = vpop.permute.xlu1 %9047  ;;  %v18101_v0 = vpop.permute.xlu0 %8585  ;;  %v7749_v4 = vmul.f32 %v18108_v15, %v18108_v15  ;;  %v8401_v42 = vmul.f32 %v8307_v6, %v18020_v47  ;;  %v18128_v41 = vmul.f32 0.020408163, %v12384_v32 }
 0x634   : > { %19852 = vst [vmem:[#allocation122_spill] sm:$0xff] %v18099_v35  ;;  %13097 = vset.pattern.permute.xlu1 %v19853_v63  ;;  %13307 = vrsqrt.f32 %v8029_v39  ;;  %v8032_v59 = vadd.f32 1e-05, %v7938_v44  ;;  %v13384_v44 = vld [vmem:[%s13628_s24 + $0x10] sm:$0xff] }
 0x635   : > { %9471 = vperm.xlu1 %13097, %v8811_v60   ;;  %8645 = vrot.lane.b32.xlu0 %v8399_v62, %s13582_s13  ;;  %v13302_v60 = vpop.eup %13301  ;;  %v7752_v32 = vmul.f32 %v18128_v41, %v18128_v41 }
 0x636   : > { %13096 = vset.pattern.permute.xlu0 %v19854_v48  ;;  %v13304_v2 = vpop.eup %13303  ;;  %v8310_v35 = vmul.f32 %v13302_v60, %v8216_v29  ;;  %v8813_v29 = vsub.f32 %v13384_v44, %v17810_v21  ;;  %13309 = vrsqrt.f32 %v8032_v59 }
 0x637   : > { %v18112_v61 = vpop.permute.xlu0 %9062  ;;  %v18114_v53 = vpop.permute.xlu1 %8591  ;;  %v8309_v47 = vmul.f32 %v13304_v2, %v8215_v37  ;;  %v8218_v37 = vld [vmem:[%s13628_s24 + $0x208] sm:$0xff] }
 0x638   : > { %19855 = vst [vmem:[#allocation123_spill] sm:$0xff] %v18112_v61  ;;  %19856 = vst [vmem:[#allocation124_spill] sm:$0xff] %v18114_v53  ;;  %v13383_v53 = vld [vmem:[%s13628_s24 + $0x18] sm:$0xff]  ;;  %v8404_v21 = vmul.f32 %v8310_v35, %v18037_v12 }
 0x639   : > { %9212 = vperm.xlu0 %13096, %v8308_v51   ;;  %8651 = vrot.lane.b32.xlu1 %v8402_v40, %s13582_s13  ;;  %v7843_v51 = vsub.f32 %v7655_v16, %v7749_v4  ;;  %v12539_v40 = vpop.f32.mrf.mxu0  ;;  %v8814_v39 = vsub.f32 %v13383_v53, %v17786_v43  ;;  %v6455_v4 = vpop.f32.mrf.mxu1  ;;  %v8403_v43 = vmul.f32 %v8309_v47, %v18040_v17 }
 0x63a   : > { %13098 = vset.pattern.permute.xlu1 %v19854_v48  ;;  %v7658_v16 = vmul.f32 0.020408163, %v12539_v40  ;;  %v13306_v53 = vpop.eup %13305 }
 0x63b   : > { %v18121_v7 = vpop.permute.xlu1 %9057  ;;  %v18123_v62 = vpop.permute.xlu0 %8589 }
 0x63c   : > { %19857 = vst [vmem:[#allocation125_spill] sm:$0xff] %v18121_v7  ;;  %v7846_v40 = vsub.f32 %v7658_v16, %v7752_v32  ;;  %v12387_v44 = vpop.f32.mrf.mxu1  ;;  %v8217_v32 = vld [vmem:[%s13628_s24 + $0x200] sm:$0xff] }
 0x63d   : > { %9207 = vperm.xlu1 %13098, %v8307_v6   ;;  %8649 = vrot.lane.b32.xlu0 %v8401_v42, %s13582_s13  ;;  %v7937_v6 = vmax.f32 %v7843_v51, 0.0  ;;  %v18140_v42 = vmul.f32 0.020408163, %v6455_v4  ;;  %v18159_v16 = vmul.f32 0.020408163, %v12387_v44 }
 0x63f   : > { %v18131_v61 = vpop.permute.xlu0 %9072  ;;  %v18133_v7 = vpop.permute.xlu1 %8595  ;;  %v8031_v51 = vadd.f32 1e-05, %v7937_v6  ;;  %v7940_v6 = vmax.f32 %v7846_v40, 0.0  ;;  %v7754_v40 = vmul.f32 %v18159_v16, %v18159_v16 }
 0x640   : > { %19858 = vst [vmem:[#allocation126_spill] sm:$0xff] %v18131_v61  ;;  %19859 = vst [vmem:[#allocation127_spill] sm:$0xff] %v18133_v7  ;;  %v7366_v61 = vpop.f32.mrf.mxu0  ;;  %v8312_v7 = vmul.f32 %v13306_v53, %v8218_v37  ;;  %v13385_v53 = vld [vmem:[%s13628_s24 + $0x20] sm:$0xff] }
 0x641   : > { %13099 = vset.pattern.permute.xlu1 %v19853_v63  ;;  %9222 = vperm.xlu0 %13096, %v8310_v35   ;;  %v7657_v4 = vmul.f32 0.020408163, %v7366_v61  ;;  %v13308_v59 = vpop.eup %13307  ;;  %13311 = vrsqrt.f32 %v8031_v51  ;;  %v8815_v12 = vsub.f32 %v13385_v53, %v17835_v58  ;;  %v8034_v51 = vadd.f32 1e-05, %v7940_v6 }
 0x642   : > { %9486 = vperm.xlu1 %13099, %v8814_v39   ;;  %v7751_v39 = vmul.f32 %v18140_v42, %v18140_v42  ;;  %v12542_v35 = vpop.f32.mrf.mxu0  ;;  %v8311_v37 = vmul.f32 %v13308_v59, %v8217_v32  ;;  %v13386_v32 = vld [vmem:[%s13628_s24 + $0x28] sm:$0xff] }
 0x643   : > { %v18142_v60 = vpop.permute.xlu1 %9067  ;;  %v18144_v2 = vpop.permute.xlu0 %8593  ;;  %13313 = vrsqrt.f32 %v8034_v51  ;;  %v8406_v51 = vmul.f32 %v8312_v7, %v18060_v11 }
 0x644   : > { %19860 = vst [vmem:[#allocation128_spill] sm:$0xff] %v18142_v60  ;;  %v7376_v53 = vpop.f32.mrf.mxu0  ;;  %v8405_v59 = vmul.f32 %v8311_v37, %v18075_v55  ;;  %v13310_v6 = vpop.eup %13309 }
 0x645   : > { %8653 = vrot.lane.b32.xlu0 %v8403_v43, %s13582_s13  ;;  %v7845_v43 = vsub.f32 %v7657_v4, %v7751_v39  ;;  %v6465_v39 = vpop.f32.mrf.mxu1 }
 0x646   : > { %9481 = vperm.xlu1 %13099, %v8813_v29   ;;  %v18172_v44 = vmul.f32 0.020408163, %v6465_v39 }
 0x647   : > { %v18153_v60 = vpop.permute.xlu0 %9082  ;;  %v18155_v17 = vpop.permute.xlu1 %8599  ;;  %v7939_v4 = vmax.f32 %v7845_v43, 0.0 }
 0x648   : > { %19861 = vst [vmem:[#allocation129_spill] sm:$0xff] %v18153_v60  ;;  %19862 = vst [vmem:[#allocation130_spill] sm:$0xff] %v18155_v17  ;;  %v8220_v17 = vld [vmem:[%s13628_s24 + $0x218] sm:$0xff]  ;;  %v12390_v39 = vpop.f32.mrf.mxu1 }
 0x649   : > { %9232 = vperm.xlu0 %13096, %v8312_v7   ;;  %v12545_v7 = vpop.f32.mrf.mxu0 }
 0x64a   : > { %8655 = vrot.lane.b32.xlu1 %v8404_v21, %s13582_s13  ;;  %v7660_v21 = vmul.f32 0.020408163, %v12542_v35 }
 0x64b   : > { %v18162_v61 = vpop.permute.xlu1 %9077  ;;  %v18164_v29 = vpop.permute.xlu0 %8597  ;;  %13100 = vset.pattern.permute.xlu1 %v19854_v48 }
 0x64c   : > { %19863 = vst [vmem:[#allocation131_spill] sm:$0xff] %v18162_v61  ;;  %19864 = vst [vmem:[#allocation132_spill] sm:$0xff] %v18164_v29  ;;  %v8816_v61 = vsub.f32 %v13386_v32, %v17821_v27  ;;  %v8033_v29 = vadd.f32 1e-05, %v7939_v4  ;;  %v7848_v43 = vsub.f32 %v7660_v21, %v7754_v40  ;;  %v8314_v27 = vmul.f32 %v13310_v6, %v8220_v17  ;;  %v8219_v21 = vld [vmem:[%s13628_s24 + $0x210] sm:$0xff] }
 0x64d   : > { %13102 = vset.pattern.permute.xlu0 %v19853_v63  ;;  %v13387_v17 = vld [vmem:[%s13628_s24 + $0x30] sm:$0xff] }
 0x64e   : > { %9217 = vperm.xlu1 %13100, %v8309_v47   ;;  %9491 = vperm.xlu0 %13102, %v8815_v12   ;;  %v7753_v47 = vmul.f32 %v18172_v44, %v18172_v44  ;;  %v7659_v12 = vmul.f32 0.020408163, %v7376_v53  ;;  %v13312_v40 = vpop.eup %13311  ;;  %13315 = vrsqrt.f32 %v8033_v29  ;;  %v7942_v4 = vmax.f32 %v7848_v43, 0.0  ;;  %v6475_v29 = vpop.f32.mrf.mxu1 }
 0x64f   : > { %v18174_v60 = vpop.permute.xlu0 %9092  ;;  %v18176_v58 = vpop.permute.xlu1 %8603  ;;  %v8817_v11 = vsub.f32 %v13387_v17, %v17864_v25  ;;  %v18210_v25 = vmul.f32 0.020408163, %v6475_v29  ;;  %v8408_v29 = vmul.f32 %v8314_v27, %v18093_v38 }
 0x650   : > { %19865 = vst [vmem:[#allocation133_spill] sm:$0xff] %v18174_v60  ;;  %v7847_v53 = vsub.f32 %v7659_v12, %v7753_v47  ;;  %v8036_v6 = vadd.f32 1e-05, %v7942_v4  ;;  %v7662_v12 = vmul.f32 0.020408163, %v12545_v7  ;;  %v7386_v17 = vpop.f32.mrf.mxu0  ;;  %v13314_v4 = vpop.eup %13313 }
 0x652   : > { %13101 = vset.pattern.permute.xlu1 %v19853_v63  ;;  %8657 = vrot.lane.b32.xlu0 %v8405_v59, %s13582_s13  ;;  %v18193_v59 = vmul.f32 0.020408163, %v12390_v39  ;;  %v7941_v47 = vmax.f32 %v7847_v53, 0.0  ;;  %13317 = vrsqrt.f32 %v8036_v6  ;;  %v12548_v38 = vpop.f32.mrf.mxu0 }
 0x653   : > { %v18186_v35 = vpop.permute.xlu1 %9087  ;;  %v18188_v55 = vpop.permute.xlu0 %8601  ;;  %9496 = vperm.xlu1 %13101, %v8816_v61   ;;  %13105 = vset.pattern.permute.xlu0 %v19854_v48  ;;  %v8313_v61 = vmul.f32 %v13312_v40, %v8219_v21  ;;  %v13388_v21 = vld [vmem:[%s13628_s24 + $0x38] sm:$0xff] }
 0x654   : > { %19866 = vst [vmem:[#allocation134_spill] sm:$0xff] %v18186_v35  ;;  %v7756_v43 = vmul.f32 %v18193_v59, %v18193_v59  ;;  %v8222_v35 = vld [vmem:[%s13628_s24 + $0x228] sm:$0xff] }
 0x655   : > { %v8407_v40 = vmul.f32 %v8313_v61, %v18108_v15  ;;  %v7755_v15 = vmul.f32 %v18210_v25, %v18210_v25 }
 0x656   : > { %9242 = vperm.xlu0 %13105, %v8314_v27   ;;  %v7850_v53 = vsub.f32 %v7662_v12, %v7756_v43 }
 0x657   : > { %v18195_v32 = vpop.permute.xlu0 %9102  ;;  %v18197_v60 = vpop.permute.xlu1 %8607  ;;  %8659 = vrot.lane.b32.xlu1 %v8406_v51, %s13582_s13 }
 0x658   : > { %19867 = vst [vmem:[#allocation135_spill] sm:$0xff] %v18195_v32  ;;  %19868 = vst [vmem:[#allocation136_spill] sm:$0xff] %v18197_v60  ;;  %13103 = vset.pattern.permute.xlu1 %v19854_v48  ;;  %v8818_v32 = vsub.f32 %v13388_v21, %v17851_v23  ;;  %v8035_v60 = vadd.f32 1e-05, %v7941_v47  ;;  %v8316_v23 = vmul.f32 %v13314_v4, %v8222_v35  ;;  %v7944_v43 = vmax.f32 %v7850_v53, 0.0  ;;  %v13389_v35 = vld [vmem:[%s13628_s24 + $0x40] sm:$0xff] }
 0x65a   : > { %13106 = vset.pattern.permute.xlu0 %v19853_v63  ;;  %13319 = vrsqrt.f32 %v8035_v60  ;;  %v8038_v27 = vadd.f32 1e-05, %v7944_v43 }
 0x65b   : > { %v18206_v39 = vpop.permute.xlu1 %9097  ;;  %v18208_v51 = vpop.permute.xlu0 %8605  ;;  %9227 = vperm.xlu1 %13103, %v8311_v37   ;;  %9501 = vperm.xlu0 %13106, %v8817_v11   ;;  %v7661_v37 = vmul.f32 0.020408163, %v7386_v17 }
 0x65c   : > { %19869 = vst [vmem:[#allocation137_spill] sm:$0xff] %v18206_v39  ;;  %v12393_v11 = vpop.f32.mrf.mxu1  ;;  %v13316_v6 = vpop.eup %13315  ;;  %13321 = vrsqrt.f32 %v8038_v27  ;;  %v8410_v27 = vmul.f32 %v8316_v23, %v18128_v41 }
 0x65d   : > { %v18231_v21 = vmul.f32 0.020408163, %v12393_v11  ;;  %v7849_v17 = vsub.f32 %v7661_v37, %v7755_v15 }
 0x65e   : > { %v6485_v37 = vpop.f32.mrf.mxu1 }
 0x65f   : > { %v18216_v7 = vpop.permute.xlu0 %9112  ;;  %v18218_v39 = vpop.permute.xlu1 %8611  ;;  %13104 = vset.pattern.permute.xlu1 %v19853_v63  ;;  %8661 = vrot.lane.b32.xlu0 %v8407_v40, %s13582_s13  ;;  %v8221_v40 = vld [vmem:[%s13628_s24 + $0x220] sm:$0xff]  ;;  %v7758_v15 = vmul.f32 %v18231_v21, %v18231_v21  ;;  %v7943_v11 = vmax.f32 %v7849_v17, 0.0 }
 0x660   : > { %19870 = vst [vmem:[#allocation138_spill] sm:$0xff] %v18216_v7  ;;  %19871 = vst [vmem:[#allocation139_spill] sm:$0xff] %v18218_v39  ;;  %9506 = vperm.xlu1 %13104, %v8818_v32   ;;  %13109 = vset.pattern.permute.xlu0 %v19854_v48  ;;  %v8819_v32 = vsub.f32 %v13389_v35, %v17894_v19  ;;  %v8315_v60 = vmul.f32 %v13316_v6, %v8221_v40  ;;  %v18244_v19 = vmul.f32 0.020408163, %v6485_v37  ;;  %v7396_v35 = vpop.f32.mrf.mxu0  ;;  %v13318_v43 = vpop.eup %13317  ;;  %v13390_v40 = vld [vmem:[%s13628_s24 + $0x48] sm:$0xff] }
 0x661   : > { %v8037_v39 = vadd.f32 1e-05, %v7943_v11  ;;  %v12396_v37 = vpop.f32.mrf.mxu1 }
 0x662   : > { %v8409_v6 = vmul.f32 %v8315_v60, %v18140_v42  ;;  %v7757_v42 = vmul.f32 %v18244_v19, %v18244_v19 }
 0x663   : > { %v18226_v47 = vpop.permute.xlu1 %9107  ;;  %v18228_v12 = vpop.permute.xlu0 %8609  ;;  %9252 = vperm.xlu0 %13109, %v8316_v23   ;;  %13323 = vrsqrt.f32 %v8037_v39 }
 0x664   : > { %19872 = vst [vmem:[#allocation140_spill] sm:$0xff] %v18226_v47  ;;  %8663 = vrot.lane.b32.xlu1 %v8408_v29, %s13582_s13  ;;  %v7664_v29 = vmul.f32 0.020408163, %v12548_v38 }
 0x665   : > { %13107 = vset.pattern.permute.xlu1 %v19854_v48 }
 0x666   : > { %v7852_v17 = vsub.f32 %v7664_v29, %v7758_v15  ;;  %v8223_v29 = vld [vmem:[%s13628_s24 + $0x230] sm:$0xff] }
 0x667   : > { %v18237_v4 = vpop.permute.xlu0 %9122  ;;  %v18239_v53 = vpop.permute.xlu1 %8615  ;;  %13110 = vset.pattern.permute.xlu0 %v19853_v63 }
 0x668   : > { %19873 = vst [vmem:[#allocation141_spill] sm:$0xff] %v18237_v4  ;;  %19874 = vst [vmem:[#allocation142_spill] sm:$0xff] %v18239_v53  ;;  %9237 = vperm.xlu1 %13107, %v8313_v61   ;;  %9511 = vperm.xlu0 %13110, %v8819_v32   ;;  %v8820_v4 = vsub.f32 %v13390_v40, %v17875_v9  ;;  %v8224_v53 = vld [vmem:[%s13628_s24 + $0x238] sm:$0xff]  ;;  %v7663_v61 = vmul.f32 0.020408163, %v7396_v35  ;;  %v13320_v15 = vpop.eup %13319  ;;  %v7946_v11 = vmax.f32 %v7852_v17, 0.0 }
 0x669   : > { %v8318_v9 = vmul.f32 %v13318_v43, %v8224_v53  ;;  %v13391_v53 = vld [vmem:[%s13628_s24 + $0x50] sm:$0xff]  ;;  %v8317_v39 = vmul.f32 %v13320_v15, %v8223_v29  ;;  %v13392_v29 = vld [vmem:[%s13628_s24 + $0x58] sm:$0xff] }
 0x66a   : > { %v7851_v35 = vsub.f32 %v7663_v61, %v7757_v42  ;;  %v8821_v43 = vsub.f32 %v13391_v53, %v17918_v46  ;;  %v8040_v23 = vadd.f32 1e-05, %v7946_v11  ;;  %v6495_v42 = vpop.f32.mrf.mxu1  ;;  %v13322_v11 = vpop.eup %13321 }
 0x66b   : > { %v18249_v7 = vpop.permute.xlu1 %9117  ;;  %v18251_v47 = vpop.permute.xlu0 %8613  ;;  %v8411_v15 = vmul.f32 %v8317_v39, %v18172_v44 }
 0x66c   : > { %19875 = vst [vmem:[#allocation143_spill] sm:$0xff] %v18249_v7  ;;  %13108 = vset.pattern.permute.xlu1 %v19853_v63  ;;  %8665 = vrot.lane.b32.xlu0 %v8409_v6, %s13582_s13  ;;  %v18265_v6 = vmul.f32 0.020408163, %v12396_v37  ;;  %v7945_v61 = vmax.f32 %v7851_v35, 0.0  ;;  %v18278_v37 = vmul.f32 0.020408163, %v6495_v42  ;;  %13325 = vrsqrt.f32 %v8040_v23  ;;  %v12399_v42 = vpop.f32.mrf.mxu1 }
 0x66d   : > { %9516 = vperm.xlu1 %13108, %v8820_v4   ;;  %13113 = vset.pattern.permute.xlu0 %v19854_v48  ;;  %v12551_v4 = vpop.f32.mrf.mxu0  ;;  %v8226_v7 = vld [vmem:[%s13628_s24 + $0x248] sm:$0xff]  ;;  %v8412_v23 = vmul.f32 %v8318_v9, %v18159_v16 }
 0x66e   : > { %v7760_v17 = vmul.f32 %v18265_v6, %v18265_v6 }
 0x66f   : > { %v18259_v32 = vpop.permute.xlu0 %9132  ;;  %v18261_v38 = vpop.permute.xlu1 %8619 }
 0x670   : > { %19876 = vst [vmem:[#allocation144_spill] sm:$0xff] %v18259_v32  ;;  %19877 = vst [vmem:[#allocation145_spill] sm:$0xff] %v18261_v38  ;;  %9262 = vperm.xlu0 %13113, %v8318_v9   ;;  %v7406_v46 = vpop.f32.mrf.mxu0  ;;  %v8039_v38 = vadd.f32 1e-05, %v7945_v61 }
 0x671   : > { %8667 = vrot.lane.b32.xlu1 %v8410_v27, %s13582_s13  ;;  %v7666_v27 = vmul.f32 0.020408163, %v12551_v4  ;;  %v7665_v4 = vmul.f32 0.020408163, %v7406_v46 }
 0x672   : > { %13111 = vset.pattern.permute.xlu1 %v19854_v48  ;;  %13327 = vrsqrt.f32 %v8039_v38  ;;  %v12554_v9 = vpop.f32.mrf.mxu0 }
 0x673   : > { %v18271_v40 = vpop.permute.xlu1 %9127  ;;  %v18273_v41 = vpop.permute.xlu0 %8617  ;;  %v7854_v35 = vsub.f32 %v7666_v27, %v7760_v17  ;;  %v8225_v27 = vld [vmem:[%s13628_s24 + $0x240] sm:$0xff] }
 0x674   : > { %19878 = vst [vmem:[#allocation146_spill] sm:$0xff] %v18271_v40  ;;  %13114 = vset.pattern.permute.xlu0 %v19853_v63  ;;  %v8822_v40 = vsub.f32 %v13392_v29, %v17907_v14  ;;  %v13324_v17 = vpop.eup %13323 }
 0x675   : > { %9247 = vperm.xlu1 %13111, %v8315_v60   ;;  %9521 = vperm.xlu0 %13114, %v8821_v43   ;;  %v7759_v60 = vmul.f32 %v18278_v37, %v18278_v37  ;;  %v8320_v43 = vmul.f32 %v13322_v11, %v8226_v7  ;;  %v7948_v61 = vmax.f32 %v7854_v35, 0.0  ;;  %v13393_v7 = vld [vmem:[%s13628_s24 + $0x60] sm:$0xff]  ;;  %v8319_v38 = vmul.f32 %v13324_v17, %v8225_v27  ;;  %v13394_v27 = vld [vmem:[%s13628_s24 + $0x68] sm:$0xff] }
 0x676   : > { %v8823_v16 = vsub.f32 %v13393_v7, %v17940_v52  ;;  %v7416_v7 = vpop.f32.mrf.mxu0 }
 0x677   : > { %v18280_v53 = vpop.permute.xlu0 %9142  ;;  %v18282_v32 = vpop.permute.xlu1 %8623  ;;  %v7853_v46 = vsub.f32 %v7665_v4, %v7759_v60  ;;  %v8042_v11 = vadd.f32 1e-05, %v7948_v61  ;;  %v8413_v17 = vmul.f32 %v8319_v38, %v18210_v25 }
 0x678   : > { %19879 = vst [vmem:[#allocation147_spill] sm:$0xff] %v18280_v53  ;;  %v6505_v60 = vpop.f32.mrf.mxu1  ;;  %v8824_v53 = vsub.f32 %v13394_v27, %v17929_v28 }
 0x679   : > { %13112 = vset.pattern.permute.xlu1 %v19853_v63  ;;  %8669 = vrot.lane.b32.xlu0 %v8411_v15, %s13582_s13  ;;  %v18299_v15 = vmul.f32 0.020408163, %v12399_v42  ;;  %v7947_v4 = vmax.f32 %v7853_v46, 0.0  ;;  %v18312_v42 = vmul.f32 0.020408163, %v6505_v60  ;;  %v13326_v61 = vpop.eup %13325  ;;  %13329 = vrsqrt.f32 %v8042_v11 }
 0x67a   : > { %9526 = vperm.xlu1 %13112, %v8822_v40   ;;  %13117 = vset.pattern.permute.xlu0 %v19854_v48  ;;  %v8414_v11 = vmul.f32 %v8320_v43, %v18193_v59  ;;  %v12402_v60 = vpop.f32.mrf.mxu1 }
 0x67b   : > { %v18293_v44 = vpop.permute.xlu1 %9137  ;;  %v18295_v14 = vpop.permute.xlu0 %8621  ;;  %v7762_v35 = vmul.f32 %v18299_v15, %v18299_v15 }
 0x67c   : > { %19880 = vst [vmem:[#allocation148_spill] sm:$0xff] %v18293_v44  ;;  %v8228_v44 = vld [vmem:[%s13628_s24 + $0x258] sm:$0xff] }
 0x67d   : > { %9272 = vperm.xlu0 %13117, %v8320_v43   ;;  %v8322_v28 = vmul.f32 %v13326_v61, %v8228_v44  ;;  %v12557_v44 = vpop.f32.mrf.mxu0 }
 0x67e   : > { %8671 = vrot.lane.b32.xlu1 %v8412_v23, %s13582_s13  ;;  %v7668_v23 = vmul.f32 0.020408163, %v12554_v9 }
 0x67f   : > { %v18302_v40 = vpop.permute.xlu0 %9152  ;;  %v18304_v29 = vpop.permute.xlu1 %8627  ;;  %13115 = vset.pattern.permute.xlu1 %v19854_v48 }
 0x680   : > { %19881 = vst [vmem:[#allocation149_spill] sm:$0xff] %v18302_v40  ;;  %19882 = vst [vmem:[#allocation150_spill] sm:$0xff] %v18304_v29  ;;  %v8041_v29 = vadd.f32 1e-05, %v7947_v4  ;;  %v7856_v46 = vsub.f32 %v7668_v23, %v7762_v35  ;;  %v13328_v35 = vpop.eup %13327  ;;  %v8227_v23 = vld [vmem:[%s13628_s24 + $0x250] sm:$0xff] }
 0x681   : > { %13118 = vset.pattern.permute.xlu0 %v19853_v63  ;;  %v8321_v43 = vmul.f32 %v13328_v35, %v8227_v23  ;;  %v13396_v23 = vld [vmem:[%s13628_s24 + $0x78] sm:$0xff] }
 0x682   : > { %9257 = vperm.xlu1 %13115, %v8317_v39   ;;  %9531 = vperm.xlu0 %13118, %v8823_v16   ;;  %v7761_v39 = vmul.f32 %v18312_v42, %v18312_v42  ;;  %v7667_v16 = vmul.f32 0.020408163, %v7416_v7  ;;  %13331 = vrsqrt.f32 %v8041_v29  ;;  %v7950_v4 = vmax.f32 %v7856_v46, 0.0  ;;  %v6515_v29 = vpop.f32.mrf.mxu1 }
 0x683   : > { %v18314_v40 = vpop.permute.xlu1 %9147  ;;  %v18316_v52 = vpop.permute.xlu0 %8625  ;;  %v8415_v35 = vmul.f32 %v8321_v43, %v18244_v19 }
 0x684   : > { %19883 = vst [vmem:[#allocation151_spill] sm:$0xff] %v18314_v40  ;;  %v7855_v7 = vsub.f32 %v7667_v16, %v7761_v39  ;;  %v8044_v61 = vadd.f32 1e-05, %v7950_v4  ;;  %v7670_v16 = vmul.f32 0.020408163, %v12557_v44  ;;  %v8230_v40 = vld [vmem:[%s13628_s24 + $0x268] sm:$0xff] }
 0x686   : > { %13116 = vset.pattern.permute.xlu1 %v19853_v63  ;;  %8673 = vrot.lane.b32.xlu0 %v8413_v17, %s13582_s13  ;;  %v18333_v17 = vmul.f32 0.020408163, %v12402_v60  ;;  %v7949_v39 = vmax.f32 %v7855_v7, 0.0  ;;  %v13330_v4 = vpop.eup %13329  ;;  %13333 = vrsqrt.f32 %v8044_v61 }
 0x687   : > { %v18326_v9 = vpop.permute.xlu0 %9162  ;;  %v18328_v25 = vpop.permute.xlu1 %8631  ;;  %9536 = vperm.xlu1 %13116, %v8824_v53   ;;  %13121 = vset.pattern.permute.xlu0 %v19854_v48  ;;  %v13395_v53 = vld [vmem:[%s13628_s24 + $0x70] sm:$0xff] }
 0x688   : > { %19884 = vst [vmem:[#allocation152_spill] sm:$0xff] %v18326_v9  ;;  %19885 = vst [vmem:[#allocation153_spill] sm:$0xff] %v18328_v25  ;;  %v8825_v59 = vsub.f32 %v13395_v53, %v17962_v33  ;;  %v7764_v46 = vmul.f32 %v18333_v17, %v18333_v17  ;;  %v18350_v33 = vmul.f32 0.020408163, %v6515_v29  ;;  %v7426_v53 = vpop.f32.mrf.mxu0  ;;  %v8043_v25 = vadd.f32 1e-05, %v7949_v39 }
 0x689   : > { %v8416_v29 = vmul.f32 %v8322_v28, %v18231_v21 }
 0x68a   : > { %9282 = vperm.xlu0 %13121, %v8322_v28   ;;  %v7858_v7 = vsub.f32 %v7670_v16, %v7764_v46  ;;  %v7763_v19 = vmul.f32 %v18350_v33, %v18350_v33  ;;  %13335 = vrsqrt.f32 %v8043_v25  ;;  %v12560_v21 = vpop.f32.mrf.mxu0 }
 0x68b   : > { %v18335_v27 = vpop.permute.xlu1 %9157  ;;  %v18337_v9 = vpop.permute.xlu0 %8629  ;;  %8675 = vrot.lane.b32.xlu1 %v8414_v11, %s13582_s13 }
 0x68c   : > { %19886 = vst [vmem:[#allocation154_spill] sm:$0xff] %v18335_v27  ;;  %13119 = vset.pattern.permute.xlu1 %v19854_v48  ;;  %v8826_v27 = vsub.f32 %v13396_v23, %v17951_v26  ;;  %v8324_v26 = vmul.f32 %v13330_v4, %v8230_v40  ;;  %v7952_v46 = vmax.f32 %v7858_v7, 0.0  ;;  %v13397_v40 = vld [vmem:[%s13628_s24 + $0x80] sm:$0xff] }
 0x68e   : > { %13122 = vset.pattern.permute.xlu0 %v19853_v63  ;;  %v8046_v28 = vadd.f32 1e-05, %v7952_v46 }
 0x68f   : > { %v18346_v60 = vpop.permute.xlu0 %9172  ;;  %v18348_v11 = vpop.permute.xlu1 %8635  ;;  %9267 = vperm.xlu1 %13119, %v8319_v38   ;;  %9541 = vperm.xlu0 %13122, %v8825_v59   ;;  %v7669_v38 = vmul.f32 0.020408163, %v7426_v53 }
 0x690   : > { %19887 = vst [vmem:[#allocation155_spill] sm:$0xff] %v18346_v60  ;;  %19888 = vst [vmem:[#allocation156_spill] sm:$0xff] %v18348_v11  ;;  %v12405_v59 = vpop.f32.mrf.mxu1  ;;  %v13332_v61 = vpop.eup %13331  ;;  %13337 = vrsqrt.f32 %v8046_v28  ;;  %v8418_v28 = vmul.f32 %v8324_v26, %v18265_v6 }
 0x691   : > { %v18371_v23 = vmul.f32 0.020408163, %v12405_v59  ;;  %v7857_v53 = vsub.f32 %v7669_v38, %v7763_v19 }
 0x692   : > { %v6525_v38 = vpop.f32.mrf.mxu1 }
 0x693   : > { %v18356_v44 = vpop.permute.xlu1 %9167  ;;  %v18358_v60 = vpop.permute.xlu0 %8633  ;;  %13120 = vset.pattern.permute.xlu1 %v19853_v63  ;;  %8677 = vrot.lane.b32.xlu0 %v8415_v35, %s13582_s13  ;;  %v8229_v35 = vld [vmem:[%s13628_s24 + $0x260] sm:$0xff]  ;;  %v7766_v19 = vmul.f32 %v18371_v23, %v18371_v23  ;;  %v7951_v59 = vmax.f32 %v7857_v53, 0.0 }
 0x694   : > { %19889 = vst [vmem:[#allocation157_spill] sm:$0xff] %v18356_v44  ;;  %9546 = vperm.xlu1 %13120, %v8826_v27   ;;  %13125 = vset.pattern.permute.xlu0 %v19854_v48  ;;  %v8827_v27 = vsub.f32 %v13397_v40, %v17984_v5  ;;  %v8323_v25 = vmul.f32 %v13332_v61, %v8229_v35  ;;  %v18384_v5 = vmul.f32 0.020408163, %v6525_v38  ;;  %v7436_v40 = vpop.f32.mrf.mxu0  ;;  %v13334_v46 = vpop.eup %13333  ;;  %v13398_v35 = vld [vmem:[%s13628_s24 + $0x88] sm:$0xff] }
 0x695   : > { %v8045_v11 = vadd.f32 1e-05, %v7951_v59  ;;  %v12408_v38 = vpop.f32.mrf.mxu1 }
 0x696   : > { %v8417_v61 = vmul.f32 %v8323_v25, %v18278_v37  ;;  %v7765_v37 = vmul.f32 %v18384_v5, %v18384_v5 }
 0x697   : > { %v18366_v39 = vpop.permute.xlu0 %9182  ;;  %v18368_v16 = vpop.permute.xlu1 %8639  ;;  %9292 = vperm.xlu0 %13125, %v8324_v26   ;;  %13339 = vrsqrt.f32 %v8045_v11 }
 0x698   : > { %19890 = vst [vmem:[#allocation158_spill] sm:$0xff] %v18366_v39  ;;  %19891 = vst [vmem:[#allocation159_spill] sm:$0xff] %v18368_v16  ;;  %8679 = vrot.lane.b32.xlu1 %v8416_v29, %s13582_s13  ;;  %v7672_v29 = vmul.f32 0.020408163, %v12560_v21  ;;  %v8828_v39 = vsub.f32 %v13398_v35, %v17973_v34  ;;  %v8232_v16 = vld [vmem:[%s13628_s24 + $0x278] sm:$0xff] }
 0x699   : > { %13123 = vset.pattern.permute.xlu1 %v19854_v48  ;;  %v8326_v34 = vmul.f32 %v13334_v46, %v8232_v16  ;;  %v13399_v16 = vld [vmem:[%s13628_s24 + $0x90] sm:$0xff] }
 0x69a   : > { %v7860_v53 = vsub.f32 %v7672_v29, %v7766_v19  ;;  %v13336_v19 = vpop.eup %13335  ;;  %v8231_v29 = vld [vmem:[%s13628_s24 + $0x270] sm:$0xff]  ;;  %v8829_v46 = vsub.f32 %v13399_v16, %v18002_v20  ;;  %v13400_v20 = vld [vmem:[%s19575_s3 + $0x338] sm:$0xff] }
 0x69b   : > { %v18377_v4 = vpop.permute.xlu1 %9177  ;;  %v18379_v7 = vpop.permute.xlu0 %8637  ;;  %13126 = vset.pattern.permute.xlu0 %v19853_v63  ;;  %v8325_v26 = vmul.f32 %v13336_v19, %v8231_v29  ;;  %v9376_v19 = vmul.f32 %v13400_v20, %v17774_v3 }
 0x69c   : > { %19892 = vst [vmem:[#allocation160_spill] sm:$0xff] %v18377_v4  ;;  %9277 = vperm.xlu1 %13123, %v8321_v43   ;;  %9551 = vperm.xlu0 %13126, %v8827_v27   ;;  %v7671_v43 = vmul.f32 0.020408163, %v7436_v40  ;;  %v7954_v59 = vmax.f32 %v7860_v53, 0.0 }
 0x69d   : > { %v8419_v16 = vmul.f32 %v8325_v26, %v18312_v42 }
 0x69e   : > { %v7859_v40 = vsub.f32 %v7671_v43, %v7765_v37  ;;  %v8048_v11 = vadd.f32 1e-05, %v7954_v59  ;;  %v6535_v37 = vpop.f32.mrf.mxu1 }
 0x69f   : > { %v18389_v4 = vpop.permute.xlu0 %9192  ;;  %v18391_v44 = vpop.permute.xlu1 %8643 }
 0x6a0   : > { %19893 = vst [vmem:[#allocation161_spill] sm:$0xff] %v18389_v4  ;;  %13124 = vset.pattern.permute.xlu1 %v19853_v63  ;;  %8681 = vrot.lane.b32.xlu0 %v8417_v61, %s13582_s13  ;;  %v18405_v61 = vmul.f32 0.020408163, %v12408_v38  ;;  %v7953_v43 = vmax.f32 %v7859_v40, 0.0  ;;  %v18418_v38 = vmul.f32 0.020408163, %v6535_v37  ;;  %13341 = vrsqrt.f32 %v8048_v11 }
 0x6a1   : > { %9556 = vperm.xlu1 %13124, %v8828_v39   ;;  %13129 = vset.pattern.permute.xlu0 %v19854_v48  ;;  %v12563_v39 = vpop.f32.mrf.mxu0  ;;  %v13401_v4 = vld [vmem:[%s13628_s24 + $0x98] sm:$0xff] }
 0x6a2   : > { %v7768_v53 = vmul.f32 %v18405_v61, %v18405_v61  ;;  %v8830_v40 = vsub.f32 %v13401_v4, %v17993_v22  ;;  %v7767_v3 = vmul.f32 %v18418_v38, %v18418_v38  ;;  %v13402_v22 = vld [vmem:[%s19575_s3 + $0x330] sm:$0xff] }
 0x6a3   : > { %v18399_v27 = vpop.permute.xlu1 %9187  ;;  %v18401_v21 = vpop.permute.xlu0 %8641  ;;  %v9375_v42 = vmul.f32 %v13402_v22, %v17788_v8 }
 0x6a4   : > { %19894 = vst [vmem:[#allocation162_spill] sm:$0xff] %v18399_v27  ;;  %9302 = vperm.xlu0 %13129, %v8326_v34   ;;  %v7446_v59 = vpop.f32.mrf.mxu0 }
 0x6a5   : > { %8683 = vrot.lane.b32.xlu1 %v8418_v28, %s13582_s13  ;;  %v7674_v28 = vmul.f32 0.020408163, %v12563_v39  ;;  %v8234_v39 = vld [vmem:[%s13628_s24 + $0x288] sm:$0xff]  ;;  %v7673_v20 = vmul.f32 0.020408163, %v7446_v59 }
 0x6a6   : > { %13127 = vset.pattern.permute.xlu1 %v19854_v48 }
 0x6a7   : > { %v18411_v35 = vpop.permute.xlu0 %9202  ;;  %v18413_v6 = vpop.permute.xlu1 %8647  ;;  %v7862_v37 = vsub.f32 %v7674_v28, %v7768_v53  ;;  %v7861_v8 = vsub.f32 %v7673_v20, %v7767_v3 }
 0x6a8   : > { %19895 = vst [vmem:[#allocation163_spill] sm:$0xff] %v18411_v35  ;;  %13130 = vset.pattern.permute.xlu0 %v19853_v63  ;;  %v13338_v35 = vpop.eup %13337 }
 0x6a9   : > { %9287 = vperm.xlu1 %13127, %v8323_v25   ;;  %9561 = vperm.xlu0 %13130, %v8829_v46   ;;  %v8047_v46 = vadd.f32 1e-05, %v7953_v43  ;;  %v8328_v4 = vmul.f32 %v13338_v35, %v8234_v39  ;;  %v8420_v43 = vmul.f32 %v8326_v34, %v18299_v15  ;;  %v13340_v28 = vpop.eup %13339  ;;  %v7956_v59 = vmax.f32 %v7862_v37, 0.0  ;;  %v13403_v35 = vld [vmem:[%s13628_s24 + $0xa0] sm:$0xff] }
 0x6aa   : > { %v8831_v15 = vsub.f32 %v13403_v35, %v18024_v45  ;;  %v7955_v22 = vmax.f32 %v7861_v8, 0.0  ;;  %v8236_v35 = vld [vmem:[%s13628_s24 + $0x298] sm:$0xff] }
 0x6ab   : > { %v18424_v29 = vpop.permute.xlu1 %9197  ;;  %13343 = vrsqrt.f32 %v8047_v46  ;;  %v8050_v37 = vadd.f32 1e-05, %v7956_v59 }
 0x6ac   : > { %19896 = vst [vmem:[#allocation164_spill] sm:$0xff] %v18424_v29  ;;  %v9477_v25 = vpop.permute.xlu0 %9476 }
 0x6ad   : > { %v9940_v27 = vadd.f32 %v9477_v25, %v9376_v19  ;;  %13128 = vset.pattern.permute.xlu1 %v19853_v63  ;;  %8685 = vrot.lane.b32.xlu0 %v8419_v16, %s13582_s13  ;;  %v12411_v19 = vpop.f32.mrf.mxu1  ;;  %v13342_v59 = vpop.eup %13341  ;;  %13345 = vrsqrt.f32 %v8050_v37 }
 0x6ae   : > { %9566 = vperm.xlu1 %13128, %v8830_v40   ;;  %13133 = vset.pattern.permute.xlu0 %v19854_v48  ;;  %v8233_v40 = vld [vmem:[%s13628_s24 + $0x280] sm:$0xff]  ;;  %v18445_v25 = vmul.f32 0.020408163, %v12411_v19  ;;  %v8330_v37 = vmul.f32 %v13342_v59, %v8236_v35 }
 0x6af   : > { %10034 = vst.msk [vmem:[%s13633_s27 + $0x8] sm:$0xff] %vm5762_vm3, %v9940_v27  ;;  %v12566_v27 = vpop.f32.mrf.mxu0  ;;  %v8327_v46 = vmul.f32 %v13340_v28, %v8233_v40  ;;  %v6545_v20 = vpop.f32.mrf.mxu1 }
 0x6b0   : > { %v9472_v11 = vpop.permute.xlu1 %9471  ;;  %v18441_v53 = vpop.permute.xlu0 %8645  ;;  %v7770_v3 = vmul.f32 %v18445_v25, %v18445_v25 }
 0x6b1   : > { %v9939_v16 = vadd.f32 %v9472_v11, %v9375_v42  ;;  %9312 = vperm.xlu0 %13133, %v8328_v4   ;;  %v7676_v42 = vmul.f32 0.020408163, %v12566_v27  ;;  %v18460_v11 = vmul.f32 0.020408163, %v6545_v20  ;;  %v7456_v45 = vpop.f32.mrf.mxu0  ;;  %v8421_v28 = vmul.f32 %v8327_v46, %v18350_v33 }
 0x6b2   : > { %8687 = vrot.lane.b32.xlu1 %v8420_v43, %s13582_s13  ;;  %v7675_v27 = vmul.f32 0.020408163, %v7456_v45  ;;  %v8422_v20 = vmul.f32 %v8328_v4, %v18333_v17  ;;  %v13407_v4 = vld [vmem:[%s13628_s24 + $0xb0] sm:$0xff] }
 0x6b3   : > { %10033 = vst.msk [vmem:[%s13633_s27] sm:$0xff] %vm5762_vm3, %v9939_v16  ;;  %13131 = vset.pattern.permute.xlu1 %v19854_v48  ;;  %v13404_v16 = vld [vmem:[%s13628_s24 + $0xa8] sm:$0xff]  ;;  %v7864_v8 = vsub.f32 %v7676_v42, %v7770_v3  ;;  %v12414_v42 = vpop.f32.mrf.mxu1  ;;  %v12569_v35 = vpop.f32.mrf.mxu0 }
 0x6b4   : > { %v18453_v34 = vpop.permute.xlu0 %9212  ;;  %v18455_v39 = vpop.permute.xlu1 %8651  ;;  %v8832_v40 = vsub.f32 %v13404_v16, %v18013_v10  ;;  %v13405_v10 = vld [vmem:[%s19575_s3 + $0x348] sm:$0xff]  ;;  %v8235_v16 = vld [vmem:[%s13628_s24 + $0x290] sm:$0xff] }
 0x6b5   : > { %19897 = vst [vmem:[#allocation165_spill] sm:$0xff] %v18453_v34  ;;  %13134 = vset.pattern.permute.xlu0 %v19853_v63  ;;  %v8049_v34 = vadd.f32 1e-05, %v7955_v22  ;;  %v9378_v33 = vmul.f32 %v13405_v10, %v17808_v36  ;;  %v7958_v45 = vmax.f32 %v7864_v8, 0.0  ;;  %v13406_v36 = vld [vmem:[%s19575_s3 + $0x340] sm:$0xff] }
 0x6b6   : > { %9297 = vperm.xlu1 %13131, %v8325_v26   ;;  %9571 = vperm.xlu0 %13134, %v8831_v15   ;;  %v7769_v26 = vmul.f32 %v18460_v11, %v18460_v11  ;;  %v9377_v59 = vmul.f32 %v13406_v36, %v17799_v18  ;;  %v13408_v36 = vld [vmem:[%s13628_s24 + $0xb8] sm:$0xff] }
 0x6b7   : > { %13347 = vrsqrt.f32 %v8049_v34  ;;  %v8833_v34 = vsub.f32 %v13407_v4, %v18044_v56 }
 0x6b8   : > { %v18462_v43 = vpop.permute.xlu1 %9207  ;;  %v18464_v19 = vpop.permute.xlu0 %8649 }
 0x6b9   : > { %19898 = vst [vmem:[#allocation166_spill] sm:$0xff] %v18462_v43  ;;  %v13344_v22 = vpop.eup %13343  ;;  %v7863_v43 = vsub.f32 %v7675_v27, %v7769_v26  ;;  %v8052_v27 = vadd.f32 1e-05, %v7958_v45 }
 0x6ba   : > { %13132 = vset.pattern.permute.xlu1 %v19853_v63  ;;  %8689 = vrot.lane.b32.xlu0 %v8421_v28, %s13582_s13  ;;  %v8329_v26 = vmul.f32 %v13344_v22, %v8235_v16  ;;  %v7466_v22 = vpop.f32.mrf.mxu0  ;;  %v13346_v16 = vpop.eup %13345 }
 0x6bb   : > { %9576 = vperm.xlu1 %13132, %v8832_v40   ;;  %13137 = vset.pattern.permute.xlu0 %v19854_v48  ;;  %v18483_v40 = vmul.f32 0.020408163, %v12414_v42  ;;  %13349 = vrsqrt.f32 %v8052_v27 }
 0x6bc   : > { %v18479_v15 = vpop.permute.xlu0 %9222 }
 0x6bd   : > { %19899 = vst [vmem:[#allocation167_spill] sm:$0xff] %v18479_v15  ;;  %v9487_v3 = vpop.permute.xlu1 %9486  ;;  %v7772_v18 = vmul.f32 %v18483_v40, %v18483_v40 }
 0x6be   : > { %v9942_v28 = vadd.f32 %v9487_v3, %v9378_v33  ;;  %9322 = vperm.xlu0 %13137, %v8330_v37   ;;  %v6555_v33 = vpop.f32.mrf.mxu1  ;;  %v7957_v3 = vmax.f32 %v7863_v43, 0.0  ;;  %v8238_v43 = vld [vmem:[%s13628_s24 + $0x2a8] sm:$0xff] }
 0x6bf   : > { %8691 = vrot.lane.b32.xlu1 %v8422_v20, %s13582_s13  ;;  %v7678_v20 = vmul.f32 0.020408163, %v12569_v35  ;;  %v18500_v42 = vmul.f32 0.020408163, %v6555_v33  ;;  %v8424_v33 = vmul.f32 %v8330_v37, %v18371_v23  ;;  %v13411_v37 = vld [vmem:[%s13628_s24 + $0xc0] sm:$0xff] }
 0x6c0   : > { %10036 = vst.msk [vmem:[%s13633_s27 + $0x18] sm:$0xff] %vm5762_vm3, %v9942_v28  ;;  %v18492_v17 = vpop.permute.xlu0 %8653  ;;  %13135 = vset.pattern.permute.xlu1 %v19854_v48  ;;  %v8423_v28 = vmul.f32 %v8329_v26, %v18384_v5  ;;  %v8051_v4 = vadd.f32 1e-05, %v7957_v3 }
 0x6c1   : > { %v9482_v8 = vpop.permute.xlu1 %9481  ;;  %v7771_v5 = vmul.f32 %v18500_v42, %v18500_v42 }
 0x6c2   : > { %v9941_v10 = vadd.f32 %v9482_v8, %v9377_v59  ;;  %13138 = vset.pattern.permute.xlu0 %v19853_v63  ;;  %v8834_v59 = vsub.f32 %v13408_v36, %v18033_v24  ;;  %v7677_v8 = vmul.f32 0.020408163, %v7466_v22  ;;  %13351 = vrsqrt.f32 %v8051_v4  ;;  %v12572_v4 = vpop.f32.mrf.mxu0 }
 0x6c3   : > { %9307 = vperm.xlu1 %13135, %v8327_v46   ;;  %9581 = vperm.xlu0 %13138, %v8833_v34   ;;  %v7866_v46 = vsub.f32 %v7678_v20, %v7772_v18  ;;  %v13409_v34 = vld [vmem:[%s19575_s3 + $0x350] sm:$0xff]  ;;  %v12417_v20 = vpop.f32.mrf.mxu1 }
 0x6c4   : > { %10035 = vst.msk [vmem:[%s13633_s27 + $0x10] sm:$0xff] %vm5762_vm3, %v9941_v10  ;;  %v18504_v56 = vpop.permute.xlu0 %9232  ;;  %v9379_v35 = vmul.f32 %v13409_v34, %v17833_v13  ;;  %v8332_v10 = vmul.f32 %v13346_v16, %v8238_v43  ;;  %v13348_v3 = vpop.eup %13347  ;;  %v18525_v36 = vmul.f32 0.020408163, %v12417_v20  ;;  %v7865_v22 = vsub.f32 %v7677_v8, %v7771_v5  ;;  %v13410_v16 = vld [vmem:[%s19575_s3 + $0x358] sm:$0xff] }
 0x6c5   : > { %19900 = vst [vmem:[#allocation168_spill] sm:$0xff] %v18504_v56  ;;  %v18506_v45 = vpop.permute.xlu1 %8655  ;;  %v7960_v13 = vmax.f32 %v7866_v46, 0.0  ;;  %v8835_v43 = vsub.f32 %v13411_v37, %v18064_v31 }
 0x6c6   : > { %v7774_v8 = vmul.f32 %v18525_v36, %v18525_v36 }
 0x6c7   : > { %13136 = vset.pattern.permute.xlu1 %v19853_v63  ;;  %8693 = vrot.lane.b32.xlu0 %v8423_v28, %s13582_s13  ;;  %v8237_v28 = vld [vmem:[%s13628_s24 + $0x2a0] sm:$0xff] }
 0x6c8   : > { %9586 = vperm.xlu1 %13136, %v8834_v59   ;;  %13141 = vset.pattern.permute.xlu0 %v19854_v48  ;;  %v9380_v59 = vmul.f32 %v13410_v16, %v17819_v1  ;;  %v8331_v34 = vmul.f32 %v13348_v3, %v8237_v28  ;;  %v6565_v1 = vpop.f32.mrf.mxu1  ;;  %v7476_v3 = vpop.f32.mrf.mxu0  ;;  %v13412_v16 = vld [vmem:[%s13628_s24 + $0xc8] sm:$0xff] }
 0x6c9   : > { %v18521_v24 = vpop.permute.xlu1 %9217  ;;  %v9492_v27 = vpop.permute.xlu0 %9491 }
 0x6ca   : > { %19901 = vst [vmem:[#allocation169_spill] sm:$0xff] %v18521_v24  ;;  %v9943_v18 = vadd.f32 %v9492_v27, %v9379_v35  ;;  %v8054_v35 = vadd.f32 1e-05, %v7960_v13  ;;  %v7959_v27 = vmax.f32 %v7865_v22, 0.0  ;;  %v8425_v13 = vmul.f32 %v8331_v34, %v18418_v38  ;;  %v13350_v28 = vpop.eup %13349  ;;  %v8240_v22 = vld [vmem:[%s13628_s24 + $0x2b8] sm:$0xff]  ;;  %v13413_v38 = vld [vmem:[%s19575_s3 + $0x360] sm:$0xff] }
 0x6cb   : > { %9332 = vperm.xlu0 %13141, %v8332_v10   ;;  %v19933_v24 = vld [vmem:[#allocation139_spill] sm:$0xff] }
 0x6cc   : > { %10037 = vst.msk [vmem:[%s13633_s27 + $0x20] sm:$0xff] %vm5762_vm3, %v9943_v18  ;;  %8695 = vrot.lane.b32.xlu1 %v8424_v33, %s13582_s13  ;;  %v7680_v18 = vmul.f32 0.020408163, %v12572_v4  ;;  %v18542_v33 = vmul.f32 0.020408163, %v6565_v1  ;;  %13353 = vrsqrt.f32 %v8054_v35  ;;  %v9381_v4 = vmul.f32 %v13413_v38, %v17862_v49 }
 0x6cd   : > { %v18534_v23 = vpop.permute.xlu0 %8657  ;;  %13139 = vset.pattern.permute.xlu1 %v19854_v48  ;;  %v8053_v37 = vadd.f32 1e-05, %v7959_v27  ;;  %v8426_v1 = vmul.f32 %v8332_v10, %v18405_v61  ;;  %v13415_v10 = vld [vmem:[%s13628_s24 + $0xd0] sm:$0xff] }
 0x6ce   : > { %v9497_v46 = vpop.permute.xlu1 %9496 }
 0x6cf   : > { %v9944_v5 = vadd.f32 %v9497_v46, %v9380_v59  ;;  %13142 = vset.pattern.permute.xlu0 %v19853_v63  ;;  %v8836_v59 = vsub.f32 %v13412_v16, %v18055_v54  ;;  %v7679_v46 = vmul.f32 0.020408163, %v7476_v3  ;;  %v13352_v27 = vpop.eup %13351  ;;  %13355 = vrsqrt.f32 %v8053_v37  ;;  %v8239_v16 = vld [vmem:[%s13628_s24 + $0x2b0] sm:$0xff]  ;;  %v12575_v37 = vpop.f32.mrf.mxu0 }
 0x6d0   : > { %9317 = vperm.xlu1 %13139, %v8329_v26   ;;  %9591 = vperm.xlu0 %13142, %v8835_v43   ;;  %v7868_v26 = vsub.f32 %v7680_v18, %v7774_v8  ;;  %v7773_v43 = vmul.f32 %v18542_v33, %v18542_v33  ;;  %v12420_v18 = vpop.f32.mrf.mxu1 }
 0x6d1   : > { %10038 = vst.msk [vmem:[%s13633_s27 + $0x28] sm:$0xff] %vm5762_vm3, %v9944_v5  ;;  %v18546_v31 = vpop.permute.xlu0 %9242  ;;  %v8334_v5 = vmul.f32 %v13350_v28, %v8240_v22  ;;  %v18567_v49 = vmul.f32 0.020408163, %v12420_v18  ;;  %v13414_v28 = vld [vmem:[%s19575_s3 + $0x368] sm:$0xff]  ;;  %v8837_v22 = vsub.f32 %v13415_v10, %v18081_v30 }
 0x6d2   : > { %19902 = vst [vmem:[#allocation170_spill] sm:$0xff] %v18546_v31  ;;  %v18548_v20 = vpop.permute.xlu1 %8659  ;;  %v7867_v3 = vsub.f32 %v7679_v46, %v7773_v43  ;;  %v8333_v43 = vmul.f32 %v13352_v27, %v8239_v16  ;;  %v7486_v27 = vpop.f32.mrf.mxu0 }
 0x6d3   : > { %v7776_v46 = vmul.f32 %v18567_v49, %v18567_v49 }
 0x6d4   : > { %13140 = vset.pattern.permute.xlu1 %v19853_v63  ;;  %8697 = vrot.lane.b32.xlu0 %v8425_v13, %s13582_s13  ;;  %v7962_v13 = vmax.f32 %v7868_v26, 0.0 }
 0x6d5   : > { %9596 = vperm.xlu1 %13140, %v8836_v59   ;;  %13145 = vset.pattern.permute.xlu0 %v19854_v48  ;;  %v9382_v59 = vmul.f32 %v13414_v28, %v17849_v50  ;;  %v6575_v50 = vpop.f32.mrf.mxu1  ;;  %v13416_v28 = vld [vmem:[%s13628_s24 + $0xd8] sm:$0xff] }
 0x6d6   : > { %v18563_v54 = vpop.permute.xlu1 %9227  ;;  %v9502_v35 = vpop.permute.xlu0 %9501  ;;  %v8056_v38 = vadd.f32 1e-05, %v7962_v13  ;;  %v8427_v13 = vmul.f32 %v8333_v43, %v18460_v11  ;;  %v13417_v11 = vld [vmem:[%s19575_s3 + $0x370] sm:$0xff] }
 0x6d7   : > { %19903 = vst [vmem:[#allocation171_spill] sm:$0xff] %v18563_v54  ;;  %v9945_v8 = vadd.f32 %v9502_v35, %v9381_v4  ;;  %v7961_v35 = vmax.f32 %v7867_v3, 0.0  ;;  %v8242_v3 = vld [vmem:[%s13628_s24 + $0x2c8] sm:$0xff]  ;;  %v12592_v10 = vpop.f32.mrf.mxu1 }
 0x6d8   : > { %9342 = vperm.xlu0 %13145, %v8334_v5   ;;  %13357 = vrsqrt.f32 %v8056_v38 }
 0x6d9   : > { %10039 = vst.msk [vmem:[%s13633_s27 + $0x30] sm:$0xff] %vm5762_vm3, %v9945_v8  ;;  %8699 = vrot.lane.b32.xlu1 %v8426_v1, %s13582_s13  ;;  %v7682_v8 = vmul.f32 0.020408163, %v12575_v37  ;;  %v18584_v1 = vmul.f32 0.020408163, %v6575_v50  ;;  %v13354_v16 = vpop.eup %13353 }
 0x6da   : > { %v18576_v61 = vpop.permute.xlu0 %8661  ;;  %13143 = vset.pattern.permute.xlu1 %v19854_v48  ;;  %v8336_v50 = vmul.f32 %v13354_v16, %v8242_v3  ;;  %v13418_v16 = vld [vmem:[%s19575_s3 + $0x378] sm:$0xff]  ;;  %v13419_v3 = vld [vmem:[%s13628_s24 + $0xe0] sm:$0xff] }
 0x6db   : > { %v9507_v26 = vpop.permute.xlu1 %9506  ;;  %v7775_v37 = vmul.f32 %v18584_v1, %v18584_v1 }
 0x6dc   : > { %v9946_v4 = vadd.f32 %v9507_v26, %v9382_v59  ;;  %13146 = vset.pattern.permute.xlu0 %v19853_v63  ;;  %v8838_v59 = vsub.f32 %v13416_v28, %v18073_v57  ;;  %v19905_v26 = vld [vmem:[#allocation101_spill] sm:$0xff]  ;;  %v7681_v57 = vmul.f32 0.020408163, %v7486_v27  ;;  %v18608_v28 = vpop.f32.mrf.mxu1 }
 0x6dd   : > { %9327 = vperm.xlu1 %13143, %v8331_v34   ;;  %9601 = vperm.xlu0 %13146, %v8837_v22   ;;  %v8055_v34 = vadd.f32 1e-05, %v7961_v35  ;;  %v7870_v22 = vsub.f32 %v7682_v8, %v7776_v46  ;;  %v8428_v8 = vmul.f32 %v8334_v5, %v18445_v25 }
 0x6de   : > { %10040 = vst.msk [vmem:[%s13633_s27 + $0x38] sm:$0xff] %vm5762_vm3, %v9946_v4  ;;  %v18588_v30 = vpop.permute.xlu0 %9252  ;;  %v9383_v4 = vmul.f32 %v13417_v11, %v19905_v26  ;;  %v18611_v11 = vld [vmem:[%s13628_s24 + $0x2c0] sm:$0xff]  ;;  %v7869_v27 = vsub.f32 %v7681_v57, %v7775_v37  ;;  %v18626_v26 = vpop.f32.mrf.mxu1 }
 0x6df   : > { %19904 = vst [vmem:[#allocation172_spill] sm:$0xff] %v18588_v30  ;;  %v18590_v18 = vpop.permute.xlu1 %8663  ;;  %13359 = vrsqrt.f32 %v8055_v34  ;;  %v7964_v30 = vmax.f32 %v7870_v22, 0.0  ;;  %v8839_v34 = vsub.f32 %v13419_v3, %v18101_v0  ;;  %v19909_v3 = vld [vmem:[#allocation121_spill] sm:$0xff] }
 0x6e1   : > { %13144 = vset.pattern.permute.xlu1 %v19853_v63  ;;  %8701 = vrot.lane.b32.xlu0 %v8427_v13, %s13582_s13  ;;  %v13356_v13 = vpop.eup %13355 }
 0x6e2   : > { %9606 = vperm.xlu1 %13144, %v8838_v59   ;;  %13149 = vset.pattern.permute.xlu0 %v19854_v48  ;;  %v19907_v59 = vld [vmem:[#allocation100_spill] sm:$0xff]  ;;  %v8335_v37 = vmul.f32 %v13356_v13, %v18611_v11  ;;  %v18636_v13 = vpop.f32.mrf.mxu1 }
 0x6e3   : > { %v18605_v38 = vpop.permute.xlu1 %9237  ;;  %v9512_v46 = vpop.permute.xlu0 %9511  ;;  %v9384_v25 = vmul.f32 %v13418_v16, %v19907_v59  ;;  %v13420_v59 = vld [vmem:[%s13628_s24 + $0xe8] sm:$0xff] }
 0x6e4   : > { %19906 = vst [vmem:[#allocation101_spill] sm:$0xff] %v18605_v38  ;;  %v9947_v35 = vadd.f32 %v9512_v46, %v9383_v4  ;;  %v8058_v4 = vadd.f32 1e-05, %v7964_v30  ;;  %v7963_v46 = vmax.f32 %v7869_v27, 0.0  ;;  %v8429_v0 = vmul.f32 %v8335_v37, %v18500_v42  ;;  %v19910_v42 = vld [vmem:[#allocation103_spill] sm:$0xff]  ;;  %v18704_v38 = vld [vmem:[%s13628_s24 + $0x2e0] sm:$0xff] }
 0x6e5   : > { %9352 = vperm.xlu0 %13149, %v8336_v50   ;;  %v13358_v16 = vpop.eup %13357  ;;  %v8840_v30 = vsub.f32 %v13420_v59, %v19909_v3  ;;  %v8430_v3 = vmul.f32 %v8336_v50, %v18483_v40 }
 0x6e6   : > { %10041 = vst.msk [vmem:[%s13633_s27 + $0x40] sm:$0xff] %vm5762_vm3, %v9947_v35  ;;  %8703 = vrot.lane.b32.xlu1 %v8428_v8, %s13582_s13  ;;  %13361 = vrsqrt.f32 %v8058_v4  ;;  %v8057_v27 = vadd.f32 1e-05, %v7963_v46  ;;  %v18650_v4 = vmul.f32 0.020408163, %v12592_v10 }
 0x6e7   : > { %v18620_v5 = vpop.permute.xlu0 %8665  ;;  %13147 = vset.pattern.permute.xlu1 %v19854_v48 }
 0x6e8   : > { %v9517_v22 = vpop.permute.xlu1 %9516  ;;  %13363 = vrsqrt.f32 %v8057_v27  ;;  %v10334_v10 = vmul.f32 %v18650_v4, %v18650_v4  ;;  %v13423_v27 = vld [vmem:[%s13628_s24 + $0xf0] sm:$0xff] }
 0x6e9   : > { %v9948_v57 = vadd.f32 %v9517_v22, %v9384_v25  ;;  %13150 = vset.pattern.permute.xlu0 %v19853_v63  ;;  %v18641_v25 = vld [vmem:[%s13628_s24 + $0x2d8] sm:$0xff]  ;;  %v12612_v22 = vpop.f32.mrf.mxu1 }
 0x6ea   : > { %9337 = vperm.xlu1 %13147, %v8333_v43   ;;  %9611 = vperm.xlu0 %13150, %v8839_v34   ;;  %v13421_v43 = vld [vmem:[%s19575_s3 + $0x380] sm:$0xff]  ;;  %v10330_v31 = vmul.f32 0.020408163, %v12612_v22 }
 0x6eb   : > { %10042 = vst.msk [vmem:[%s13633_s27 + $0x48] sm:$0xff] %vm5762_vm3, %v9948_v57  ;;  %v18631_v35 = vpop.permute.xlu0 %9262  ;;  %v9385_v34 = vmul.f32 %v13421_v43, %v19910_v42  ;;  %v18657_v43 = vld [vmem:[%s13628_s24 + $0x2d0] sm:$0xff]  ;;  %v8841_v42 = vsub.f32 %v13423_v27, %v18123_v62 }
 0x6ec   : > { %19908 = vst [vmem:[#allocation100_spill] sm:$0xff] %v18631_v35  ;;  %v18633_v8 = vpop.permute.xlu1 %8667  ;;  %v13360_v35 = vpop.eup %13359 }
 0x6ed   : > { %v8337_v22 = vmul.f32 %v13360_v35, %v18657_v43 }
 0x6ee   : > { %13148 = vset.pattern.permute.xlu1 %v19853_v63  ;;  %8705 = vrot.lane.b32.xlu0 %v8429_v0, %s13582_s13  ;;  %v8338_v0 = vmul.f32 %v13358_v16, %v18641_v25  ;;  %v13422_v16 = vld [vmem:[%s19575_s3 + $0x388] sm:$0xff] }
 0x6ef   : > { %9616 = vperm.xlu1 %13148, %v8840_v30   ;;  %13153 = vset.pattern.permute.xlu0 %v19854_v48  ;;  %v19912_v30 = vld [vmem:[#allocation102_spill] sm:$0xff]  ;;  %v8431_v27 = vmul.f32 %v8337_v22, %v18542_v33 }
 0x6f0   : > { %v18652_v57 = vpop.permute.xlu1 %9247  ;;  %v9522_v46 = vpop.permute.xlu0 %9521  ;;  %v9386_v40 = vmul.f32 %v13422_v16, %v19912_v30  ;;  %v18676_v16 = vmul.f32 0.020408163, %v18608_v28  ;;  %v13425_v33 = vld [vmem:[%s19575_s3 + $0x390] sm:$0xff] }
 0x6f1   : > { %19911 = vst [vmem:[#allocation121_spill] sm:$0xff] %v18652_v57  ;;  %v9949_v59 = vadd.f32 %v9522_v46, %v9385_v34  ;;  %v10338_v46 = vsub.f32 %v10330_v31, %v10334_v10  ;;  %v18688_v57 = vld [vmem:[%s13628_s24 + $0x2e8] sm:$0xff] }
 0x6f2   : > { %9362 = vperm.xlu0 %13153, %v8338_v0   ;;  %v10333_v28 = vmul.f32 %v18676_v16, %v18676_v16 }
 0x6f3   : > { %10043 = vst.msk [vmem:[%s13633_s27 + $0x50] sm:$0xff] %vm5762_vm3, %v9949_v59  ;;  %8707 = vrot.lane.b32.xlu1 %v8430_v3, %s13582_s13  ;;  %v10306_v3 = vpop.f32.mrf.mxu1  ;;  %v13362_v35 = vpop.eup %13361  ;;  %v10342_v31 = vmax.f32 %v10338_v46, 0.0 }
 0x6f4   : > { %v18668_v50 = vpop.permute.xlu0 %8669  ;;  %13151 = vset.pattern.permute.xlu1 %v19854_v48  ;;  %v10329_v10 = vmul.f32 0.020408163, %v10306_v3  ;;  %v8340_v3 = vmul.f32 %v13362_v35, %v18688_v57  ;;  %v13426_v35 = vld [vmem:[%s19575_s3 + $0x398] sm:$0xff] }
 0x6f5   : > { %v9527_v34 = vpop.permute.xlu1 %9526  ;;  %v13364_v15 = vpop.eup %13363 }
 0x6f6   : > { %v9950_v59 = vadd.f32 %v9527_v34, %v9386_v40  ;;  %13154 = vset.pattern.permute.xlu0 %v19853_v63  ;;  %v13424_v40 = vld [vmem:[%s13628_s24 + $0xf8] sm:$0xff]  ;;  %v19914_v34 = vld [vmem:[#allocation124_spill] sm:$0xff] }
 0x6f7   : > { %9347 = vperm.xlu1 %13151, %v8335_v37   ;;  %9621 = vperm.xlu0 %13154, %v8841_v42   ;;  %v8842_v56 = vsub.f32 %v13424_v40, %v19914_v34  ;;  %v19915_v37 = vld [vmem:[#allocation105_spill] sm:$0xff]  ;;  %v10346_v40 = vadd.f32 1e-05, %v10342_v31  ;;  %v19917_v31 = vld [vmem:[#allocation104_spill] sm:$0xff] }
 0x6f8   : > { %10044 = vst.msk [vmem:[%s13633_s27 + $0x58] sm:$0xff] %vm5762_vm3, %v9950_v59  ;;  %v18680_v30 = vpop.permute.xlu0 %9272  ;;  %v9387_v42 = vmul.f32 %v13425_v33, %v19915_v37  ;;  %v13427_v33 = vld [vmem:[%s13628_s24 + $0x100] sm:$0xff]  ;;  %v8339_v37 = vmul.f32 %v13364_v15, %v18704_v38  ;;  %v13428_v15 = vld [vmem:[%s13628_s24 + $0x108] sm:$0xff] }
 0x6f9   : > { %19913 = vst [vmem:[#allocation103_spill] sm:$0xff] %v18680_v30  ;;  %v18682_v62 = vpop.permute.xlu1 %8671  ;;  %v8432_v30 = vmul.f32 %v8338_v0, %v18525_v36  ;;  %13365 = vrsqrt.f32 %v10346_v40 }
 0x6fb   : > { %13152 = vset.pattern.permute.xlu1 %v19853_v63  ;;  %8709 = vrot.lane.b32.xlu0 %v8431_v27, %s13582_s13  ;;  %v10337_v27 = vsub.f32 %v10329_v10, %v10333_v28  ;;  %v9388_v10 = vmul.f32 %v13426_v35, %v19917_v31  ;;  %v12615_v28 = vpop.f32.mrf.mxu1  ;;  %v19919_v31 = vld [vmem:[#allocation127_spill] sm:$0xff] }
 0x6fc   : > { %9626 = vperm.xlu1 %13152, %v8842_v56   ;;  %13157 = vset.pattern.permute.xlu0 %v19854_v48  ;;  %v18710_v56 = vmul.f32 0.020408163, %v18626_v26 }
 0x6fd   : > { %v18699_v46 = vpop.permute.xlu1 %9257  ;;  %v9532_v59 = vpop.permute.xlu0 %9531  ;;  %v10341_v0 = vmax.f32 %v10337_v27, 0.0 }
 0x6fe   : > { %19916 = vst [vmem:[#allocation102_spill] sm:$0xff] %v18699_v46  ;;  %v9951_v34 = vadd.f32 %v9532_v59, %v9387_v42  ;;  %v10332_v59 = vmul.f32 0.020408163, %v12615_v28  ;;  %v10336_v40 = vmul.f32 %v18710_v56, %v18710_v56 }
 0x6ff   : > { %9372 = vperm.xlu0 %13157, %v8340_v3   ;;  %v10345_v27 = vadd.f32 1e-05, %v10341_v0 }
 0x700   : > { %10045 = vst.msk [vmem:[%s13633_s27 + $0x60] sm:$0xff] %vm5762_vm3, %v9951_v34  ;;  %8711 = vrot.lane.b32.xlu1 %v8432_v30, %s13582_s13  ;;  %v8843_v30 = vsub.f32 %v13427_v33, %v18144_v2  ;;  %v8433_v2 = vmul.f32 %v8339_v37, %v18584_v1  ;;  %v10340_v28 = vsub.f32 %v10332_v59, %v10336_v40  ;;  %v19920_v33 = vld [vmem:[#allocation107_spill] sm:$0xff]  ;;  %v19921_v1 = vld [vmem:[#allocation132_spill] sm:$0xff] }
 0x701   : > { %v18716_v36 = vpop.permute.xlu0 %8673  ;;  %13155 = vset.pattern.permute.xlu1 %v19854_v48  ;;  %13367 = vrsqrt.f32 %v10345_v27  ;;  %v13431_v27 = vld [vmem:[%s19575_s3 + $0x3a8] sm:$0xff] }
 0x702   : > { %v9537_v26 = vpop.permute.xlu1 %9536 }
 0x703   : > { %v9952_v42 = vadd.f32 %v9537_v26, %v9388_v10  ;;  %13158 = vset.pattern.permute.xlu0 %v19853_v63  ;;  %v8844_v10 = vsub.f32 %v13428_v15, %v19919_v31  ;;  %v8434_v15 = vmul.f32 %v8340_v3, %v18567_v49  ;;  %v19923_v31 = vld [vmem:[#allocation106_spill] sm:$0xff] }
 0x704   : > { %9357 = vperm.xlu1 %13155, %v8337_v22   ;;  %9631 = vperm.xlu0 %13158, %v8843_v30   ;;  %v13429_v22 = vld [vmem:[%s19575_s3 + $0x3a0] sm:$0xff]  ;;  %v13430_v30 = vld [vmem:[%s13628_s24 + $0x110] sm:$0xff] }
 0x705   : > { %10046 = vst.msk [vmem:[%s13633_s27 + $0x68] sm:$0xff] %vm5762_vm3, %v9952_v42  ;;  %v18725_v34 = vpop.permute.xlu0 %9282  ;;  %v9389_v0 = vmul.f32 %v13429_v22, %v19920_v33  ;;  %v8845_v26 = vsub.f32 %v13430_v30, %v19921_v1  ;;  %v13432_v22 = vld [vmem:[%s13628_s24 + $0x120] sm:$0xff]  ;;  %v10316_v1 = vpop.f32.mrf.mxu1 }
 0x706   : > { %19918 = vst [vmem:[#allocation124_spill] sm:$0xff] %v18725_v34  ;;  %v18729_v35 = vpop.permute.xlu1 %8675  ;;  %v8847_v33 = vsub.f32 %v13432_v22, %v18188_v55  ;;  %v13366_v49 = vpop.eup %13365 }
 0x707   : > { %v12652_v34 = vpop.f32.mrf.mxu0 }
 0x708   : > { %13156 = vset.pattern.permute.xlu1 %v19853_v63  ;;  %8713 = vrot.lane.b32.xlu0 %v8433_v2, %s13582_s13  ;;  %v10344_v2 = vmax.f32 %v10340_v28, 0.0  ;;  %v18758_v28 = vld [vmem:[%s13628_s24 + $0x2f8] sm:$0xff] }
 0x709   : > { %9636 = vperm.xlu1 %13156, %v8844_v10   ;;  %v9390_v10 = vmul.f32 %v13431_v27, %v19923_v31  ;;  %v10358_v27 = vmul.f32 %v13366_v49, %v18758_v28  ;;  %v10331_v31 = vmul.f32 0.020408163, %v10316_v1  ;;  %v13435_v49 = vld [vmem:[%s19575_s3 + $0x3b0] sm:$0xff] }
 0x70a   : > { %v18742_v42 = vpop.permute.xlu1 %9267  ;;  %v9542_v59 = vpop.permute.xlu0 %9541  ;;  %v10348_v30 = vadd.f32 1e-05, %v10344_v2  ;;  %v13434_v2 = vld [vmem:[%s13628_s24 + $0x118] sm:$0xff] }
 0x70b   : > { %19922 = vst [vmem:[#allocation105_spill] sm:$0xff] %v18742_v42  ;;  %v9953_v40 = vadd.f32 %v9542_v59, %v9389_v0  ;;  %v18761_v59 = vmul.f32 0.020408163, %v18636_v13  ;;  %v10362_v1 = vmul.f32 %v10358_v27, %v18650_v4 }
 0x70c   : > { %9641 = vperm.xlu0 %13158, %v8845_v26   ;;  %13369 = vrsqrt.f32 %v10348_v30 }
 0x70d   : > { %10047 = vst.msk [vmem:[%s13633_s27 + $0x70] sm:$0xff] %vm5762_vm3, %v9953_v40  ;;  %8715 = vrot.lane.b32.xlu1 %v8434_v15, %s13582_s13  ;;  %v13433_v40 = vld [vmem:[%s13628_s24 + $0x130] sm:$0xff] }
 0x70e   : > { %v18754_v0 = vpop.permute.xlu0 %8677  ;;  %13159 = vset.pattern.permute.xlu1 %v19854_v48  ;;  %v8849_v55 = vsub.f32 %v13433_v40, %v18208_v51  ;;  %v10335_v51 = vmul.f32 %v18761_v59, %v18761_v59 }
 0x70f   : > { %v9547_v3 = vpop.permute.xlu1 %9546 }
 0x710   : > { %v9954_v26 = vadd.f32 %v9547_v3, %v9390_v10  ;;  %9651 = vperm.xlu0 %13158, %v8847_v33   ;;  %v19925_v10 = vld [vmem:[#allocation130_spill] sm:$0xff]  ;;  %v12632_v33 = vpop.f32.mrf.mxu1  ;;  %v19926_v3 = vld [vmem:[#allocation109_spill] sm:$0xff]  ;;  %v10339_v40 = vsub.f32 %v10331_v31, %v10335_v51  ;;  %v19928_v51 = vld [vmem:[#allocation108_spill] sm:$0xff] }
 0x711   : > { %9367 = vperm.xlu1 %13159, %v8339_v37   ;;  %v8846_v13 = vsub.f32 %v13434_v2, %v19925_v10  ;;  %v18776_v37 = vmul.f32 0.020408163, %v12632_v33  ;;  %v9391_v30 = vmul.f32 %v13435_v49, %v19926_v3  ;;  %v18787_v10 = vld [vmem:[%s13628_s24 + $0x2f0] sm:$0xff]  ;;  %v13436_v33 = vld [vmem:[%s13628_s24 + $0x128] sm:$0xff]  ;;  %v10644_v49 = vmul.f32 0.020408163, %v12652_v34 }
 0x712   : > { %10048 = vst.msk [vmem:[%s13633_s27 + $0x78] sm:$0xff] %vm5762_vm3, %v9954_v26  ;;  %v18767_v15 = vpop.permute.xlu0 %9292  ;;  %v13368_v26 = vpop.eup %13367  ;;  %v10343_v31 = vmax.f32 %v10339_v40, 0.0  ;;  %v19929_v34 = vld [vmem:[#allocation136_spill] sm:$0xff] }
 0x713   : > { %19924 = vst [vmem:[#allocation104_spill] sm:$0xff] %v18767_v15  ;;  %v18770_v22 = vpop.permute.xlu1 %8679  ;;  %v8848_v15 = vsub.f32 %v13436_v33, %v18176_v58  ;;  %v10357_v4 = vmul.f32 %v13368_v26, %v18787_v10  ;;  %v13437_v58 = vld [vmem:[%s19575_s3 + $0x3b8] sm:$0xff]  ;;  %v10519_v46 = vpop.f32.mrf.mxu1 }
 0x714   : > { %9661 = vperm.xlu0 %13158, %v8849_v55   ;;  %v9392_v3 = vmul.f32 %v13437_v58, %v19928_v51  ;;  %v10347_v26 = vadd.f32 1e-05, %v10343_v31 }
 0x715   : > { %13160 = vset.pattern.permute.xlu1 %v19853_v63 }
 0x716   : > { %9646 = vperm.xlu1 %13160, %v8846_v13   ;;  %v10648_v13 = vmul.f32 %v18776_v37, %v18776_v37  ;;  %13371 = vrsqrt.f32 %v10347_v26  ;;  %v13441_v26 = vld [vmem:[%s13628_s24 + $0x148] sm:$0xff] }
 0x717   : > { %v18784_v55 = vpop.permute.xlu1 %9277  ;;  %v9552_v2 = vpop.permute.xlu0 %9551  ;;  %v8852_v29 = vsub.f32 %v13441_v26, %v19933_v24 }
 0x718   : > { %19927 = vst [vmem:[#allocation127_spill] sm:$0xff] %v18784_v55  ;;  %v9955_v42 = vadd.f32 %v9552_v2, %v9391_v30  ;;  %10371 = vrot.lane.b32.xlu0 %v10362_v1, %s13582_s13  ;;  %v13438_v1 = vld [vmem:[%s13628_s24 + $0x138] sm:$0xff]  ;;  %v13439_v55 = vld [vmem:[%s13628_s24 + $0x140] sm:$0xff] }
 0x719   : > { %13163 = vset.pattern.permute.xlu0 %v19854_v48  ;;  %v8850_v2 = vsub.f32 %v13438_v1, %v19929_v34  ;;  %v8851_v40 = vsub.f32 %v13439_v55, %v18228_v12  ;;  %v13370_v51 = vpop.eup %13369  ;;  %v12635_v34 = vpop.f32.mrf.mxu1  ;;  %v13440_v12 = vld [vmem:[%s19575_s3 + $0x3c0] sm:$0xff]  ;;  %v19931_v55 = vld [vmem:[#allocation111_spill] sm:$0xff] }
 0x71a   : > { %10049 = vst.msk [vmem:[%s13633_s27 + $0x80] sm:$0xff] %vm5762_vm3, %v9955_v42  ;;  %9656 = vperm.xlu1 %13160, %v8848_v15   ;;  %v10652_v42 = vsub.f32 %v10644_v49, %v10648_v13  ;;  %v18816_v13 = vld [vmem:[%s13628_s24 + $0x308] sm:$0xff]  ;;  %v18818_v49 = vmul.f32 0.020408163, %v12635_v34  ;;  %v9393_v31 = vmul.f32 %v13440_v12, %v19931_v55 }
 0x71b   : > { %v18802_v30 = vpop.permute.xlu0 %8681 }
 0x71c   : > { %v9557_v33 = vpop.permute.xlu1 %9556  ;;  %10387 = vperm.xlu0 %13163, %v10357_v4   ;;  %v10656_v1 = vmax.f32 %v10652_v42, 0.0  ;;  %v10650_v12 = vmul.f32 %v18818_v49, %v18818_v49 }
 0x71d   : > { %v9956_v15 = vadd.f32 %v9557_v33, %v9392_v3  ;;  %v10620_v3 = vpop.f32.mrf.mxu0 }
 0x71e   : > { %9666 = vperm.xlu1 %13160, %v8850_v2   ;;  %v18825_v2 = vmul.f32 0.020408163, %v10519_v46  ;;  %v13442_v46 = vld [vmem:[%s19575_s3 + $0x3c8] sm:$0xff] }
 0x71f   : > { %10050 = vst.msk [vmem:[%s13633_s27 + $0x88] sm:$0xff] %vm5762_vm3, %v9956_v15  ;;  %v18810_v54 = vpop.permute.xlu0 %9302  ;;  %v10360_v15 = vmul.f32 %v13370_v51, %v18816_v13  ;;  %v12655_v34 = vpop.f32.mrf.mxu0 }
 0x720   : > { %19930 = vst [vmem:[#allocation107_spill] sm:$0xff] %v18810_v54  ;;  %v18812_v58 = vpop.permute.xlu1 %8683  ;;  %13164 = vset.pattern.permute.xlu0 %v19853_v63  ;;  %v10646_v55 = vmul.f32 0.020408163, %v12655_v34  ;;  %v10647_v24 = vmul.f32 %v18825_v2, %v18825_v2 }
 0x721   : > { %9671 = vperm.xlu0 %13164, %v8851_v40   ;;  %v10660_v40 = vadd.f32 1e-05, %v10656_v1  ;;  %v10643_v1 = vmul.f32 0.020408163, %v10620_v3 }
 0x722   : > { %13161 = vset.pattern.permute.xlu1 %v19854_v48  ;;  %v10654_v34 = vsub.f32 %v10646_v55, %v10650_v12 }
 0x723   : > { %10392 = vperm.xlu1 %13161, %v10358_v27   ;;  %v19934_v27 = vld [vmem:[#allocation110_spill] sm:$0xff]  ;;  %13373 = vrsqrt.f32 %v10660_v40  ;;  %v13372_v55 = vpop.eup %13371 }
 0x724   : > { %v18827_v33 = vpop.permute.xlu1 %9287  ;;  %v9562_v42 = vpop.permute.xlu0 %9561  ;;  %v9394_v51 = vmul.f32 %v13442_v46, %v19934_v27  ;;  %v13443_v46 = vld [vmem:[%s13628_s24 + $0x150] sm:$0xff]  ;;  %v10651_v27 = vsub.f32 %v10643_v1, %v10647_v24  ;;  %v13446_v1 = vld [vmem:[%s13628_s24 + $0x160] sm:$0xff] }
 0x725   : > { %19932 = vst [vmem:[#allocation132_spill] sm:$0xff] %v18827_v33  ;;  %v9957_v54 = vadd.f32 %v9562_v42, %v9393_v31  ;;  %13165 = vset.pattern.permute.xlu0 %v19854_v48  ;;  %v10361_v33 = vmul.f32 %v10357_v4, %v18676_v16  ;;  %v8853_v3 = vsub.f32 %v13443_v46, %v18251_v47  ;;  %v19936_v40 = vld [vmem:[#allocation142_spill] sm:$0xff]  ;;  %v10658_v16 = vmax.f32 %v10654_v34, 0.0  ;;  %v10529_v4 = vpop.f32.mrf.mxu1 }
 0x726   : > { %10402 = vperm.xlu0 %13165, %v10360_v15   ;;  %v13445_v47 = vld [vmem:[%s19575_s3 + $0x3d0] sm:$0xff] }
 0x727   : > { %10051 = vst.msk [vmem:[%s13633_s27 + $0x90] sm:$0xff] %vm5762_vm3, %v9957_v54  ;;  %13162 = vset.pattern.permute.xlu1 %v19853_v63  ;;  %v10364_v54 = vmul.f32 %v10360_v15, %v18710_v56  ;;  %v13444_v15 = vld [vmem:[%s13628_s24 + $0x158] sm:$0xff] }
 0x728   : > { %v18844_v31 = vpop.permute.xlu0 %8685  ;;  %9676 = vperm.xlu1 %13162, %v8852_v29   ;;  %v8854_v12 = vsub.f32 %v13444_v15, %v19936_v40  ;;  %v10630_v15 = vpop.f32.mrf.mxu0 }
 0x729   : > { %v9567_v42 = vpop.permute.xlu1 %9566 }
 0x72a   : > { %v9958_v26 = vadd.f32 %v9567_v42, %v9394_v51  ;;  %10375 = vrot.lane.b32.xlu0 %v10364_v54, %s13582_s13  ;;  %v19937_v51 = vld [vmem:[#allocation113_spill] sm:$0xff]  ;;  %v10655_v54 = vmax.f32 %v10651_v27, 0.0  ;;  %v18868_v42 = vld [vmem:[%s13628_s24 + $0x300] sm:$0xff]  ;;  %v13448_v27 = vld [vmem:[%s19575_s3 + $0x3d8] sm:$0xff] }
 0x72b   : > { %13167 = vset.pattern.permute.xlu0 %v19853_v63  ;;  %v9395_v24 = vmul.f32 %v13445_v47, %v19937_v51  ;;  %v13447_v47 = vld [vmem:[%s13628_s24 + $0x170] sm:$0xff] }
 0x72c   : > { %10052 = vst.msk [vmem:[%s13633_s27 + $0x98] sm:$0xff] %vm5762_vm3, %v9958_v26  ;;  %10369 = vrot.lane.b32.xlu1 %v10361_v33, %s13582_s13  ;;  %v18855_v29 = vpop.permute.xlu0 %9312  ;;  %v8855_v33 = vsub.f32 %v13446_v1, %v18273_v41  ;;  %v18870_v26 = vmul.f32 0.020408163, %v10529_v4  ;;  %v8857_v51 = vsub.f32 %v13447_v47, %v18295_v14  ;;  %v10659_v41 = vadd.f32 1e-05, %v10655_v54 }
 0x72d   : > { %19935 = vst [vmem:[#allocation106_spill] sm:$0xff] %v18855_v29  ;;  %v18857_v56 = vpop.permute.xlu1 %8687  ;;  %v10359_v29 = vmul.f32 %v13372_v55, %v18868_v42  ;;  %v10645_v55 = vmul.f32 0.020408163, %v10630_v15 }
 0x72e   : > { %9681 = vperm.xlu0 %13167, %v8853_v3   ;;  %v10662_v3 = vadd.f32 1e-05, %v10658_v16  ;;  %v10649_v4 = vmul.f32 %v18870_v26, %v18870_v26 }
 0x730   : > { %9686 = vperm.xlu1 %13162, %v8854_v12   ;;  %v19938_v12 = vld [vmem:[#allocation112_spill] sm:$0xff]  ;;  %v13374_v14 = vpop.eup %13373  ;;  %13375 = vrsqrt.f32 %v10662_v3  ;;  %v13449_v3 = vld [vmem:[%s13628_s24 + $0x168] sm:$0xff] }
 0x731   : > { %v18872_v34 = vpop.permute.xlu1 %9297  ;;  %v9572_v46 = vpop.permute.xlu0 %9571  ;;  %v9396_v16 = vmul.f32 %v13448_v27, %v19938_v12  ;;  %13377 = vrsqrt.f32 %v10659_v41  ;;  %v19940_v41 = vld [vmem:[#allocation115_spill] sm:$0xff] }
 0x732   : > { %v9959_v40 = vadd.f32 %v9572_v46, %v9395_v24  ;;  %9691 = vperm.xlu0 %13167, %v8855_v33   ;;  %v18889_v33 = vld [vmem:[%s13628_s24 + $0x318] sm:$0xff]  ;;  %v10363_v46 = vmul.f32 %v10359_v29, %v18761_v59  ;;  %v19939_v59 = vld [vmem:[#allocation145_spill] sm:$0xff] }
 0x733   : > { %v10672_v47 = vmul.f32 %v13374_v14, %v18889_v33 }
 0x734   : > { %10053 = vst.msk [vmem:[%s13633_s27 + $0xa0] sm:$0xff] %vm5762_vm3, %v9959_v40  ;;  %13166 = vset.pattern.permute.xlu1 %v19854_v48  ;;  %v10653_v40 = vsub.f32 %v10645_v55, %v10649_v4 }
 0x735   : > { %v18886_v24 = vpop.permute.xlu0 %8689  ;;  %10397 = vperm.xlu1 %13166, %v10359_v29   ;;  %v8856_v29 = vsub.f32 %v13449_v3, %v19939_v59  ;;  %v10676_v4 = vmul.f32 %v10672_v47, %v18776_v37  ;;  %v13452_v3 = vld [vmem:[%s13628_s24 + $0x180] sm:$0xff]  ;;  %v13453_v37 = vld [vmem:[%s19575_s3 + $0x3e8] sm:$0xff] }
 0x736   : > { %v9577_v1 = vpop.permute.xlu1 %9576  ;;  %9701 = vperm.xlu0 %13167, %v8857_v51   ;;  %v13450_v51 = vld [vmem:[%s19575_s3 + $0x3e0] sm:$0xff]  ;;  %v8859_v59 = vsub.f32 %v13452_v3, %v18316_v52  ;;  %v18928_v52 = vld [vmem:[%s13628_s24 + $0x328] sm:$0xff] }
 0x737   : > { %v9960_v54 = vadd.f32 %v9577_v1, %v9396_v16  ;;  %v9397_v12 = vmul.f32 %v13450_v51, %v19940_v41  ;;  %v10657_v16 = vmax.f32 %v10653_v40, 0.0  ;;  %v13451_v1 = vld [vmem:[%s13628_s24 + $0x178] sm:$0xff]  ;;  %v13454_v41 = vld [vmem:[%s13628_s24 + $0x188] sm:$0xff] }
 0x739   : > { %10054 = vst.msk [vmem:[%s13633_s27 + $0xa8] sm:$0xff] %vm5762_vm3, %v9960_v54  ;;  %10373 = vrot.lane.b32.xlu1 %v10363_v46, %s13582_s13  ;;  %v18895_v15 = vpop.permute.xlu0 %9322  ;;  %v8858_v54 = vsub.f32 %v13451_v1, %v18282_v32  ;;  %v10661_v40 = vadd.f32 1e-05, %v10657_v16  ;;  %v19941_v32 = vld [vmem:[#allocation114_spill] sm:$0xff] }
 0x73a   : > { %v18898_v27 = vpop.permute.xlu1 %8691  ;;  %13169 = vset.pattern.permute.xlu0 %v19854_v48  ;;  %13168 = vset.pattern.permute.xlu1 %v19853_v63 }
 0x73b   : > { %10706 = vperm.xlu0 %13169, %v10672_v47   ;;  %v9398_v47 = vmul.f32 %v13453_v37, %v19941_v32  ;;  %13379 = vrsqrt.f32 %v10661_v40  ;;  %v13455_v40 = vld [vmem:[%s19575_s3 + $0x3f0] sm:$0xff]  ;;  %v19943_v32 = vld [vmem:[#allocation117_spill] sm:$0xff] }
 0x73d   : > { %9696 = vperm.xlu1 %13168, %v8856_v29   ;;  %v13376_v51 = vpop.eup %13375 }
 0x73e   : > { %v18909_v55 = vpop.permute.xlu1 %9307  ;;  %v9582_v14 = vpop.permute.xlu0 %9581  ;;  %v10674_v3 = vmul.f32 %v13376_v51, %v18928_v52 }
 0x73f   : > { %v9961_v46 = vadd.f32 %v9582_v14, %v9397_v12  ;;  %10685 = vrot.lane.b32.xlu0 %v10676_v4, %s13582_s13  ;;  %v19942_v12 = vld [vmem:[#allocation150_spill] sm:$0xff]  ;;  %v13378_v1 = vpop.eup %13377 }
 0x740   : > { %13171 = vset.pattern.permute.xlu0 %v19853_v63  ;;  %v8860_v4 = vsub.f32 %v13454_v41, %v19942_v12  ;;  %v10678_v51 = vmul.f32 %v10674_v3, %v18818_v49  ;;  %v13457_v49 = vld [vmem:[%s19575_s3 + $0x3f8] sm:$0xff] }
 0x741   : > { %10055 = vst.msk [vmem:[%s13633_s27 + $0xb0] sm:$0xff] %vm5762_vm3, %v9961_v46  ;;  %9706 = vperm.xlu1 %13168, %v8858_v54   ;;  %v18931_v54 = vld [vmem:[%s13628_s24 + $0x310] sm:$0xff] }
 0x742   : > { %v18923_v29 = vpop.permute.xlu0 %8693 }
 0x743   : > { %v9587_v14 = vpop.permute.xlu1 %9586  ;;  %9711 = vperm.xlu0 %13171, %v8859_v59   ;;  %v10671_v59 = vmul.f32 %v13378_v1, %v18931_v54 }
 0x744   : > { %v9962_v16 = vadd.f32 %v9587_v14, %v9398_v47  ;;  %v9399_v47 = vmul.f32 %v13455_v40, %v19943_v32 }
 0x745   : > { %9716 = vperm.xlu1 %13168, %v8860_v4   ;;  %v10675_v14 = vmul.f32 %v10671_v59, %v18825_v2  ;;  %v13458_v2 = vld [vmem:[%s13628_s24 + $0x198] sm:$0xff] }
 0x746   : > { %10056 = vst.msk [vmem:[%s13633_s27 + $0xb8] sm:$0xff] %vm5762_vm3, %v9962_v16  ;;  %v18935_v46 = vpop.permute.xlu0 %9332  ;;  %v13456_v16 = vld [vmem:[%s13628_s24 + $0x190] sm:$0xff] }
 0x747   : > { %v18938_v37 = vpop.permute.xlu1 %8695  ;;  %13172 = vset.pattern.permute.xlu0 %v19854_v48  ;;  %v8861_v1 = vsub.f32 %v13456_v16, %v18337_v9  ;;  %v18970_v16 = vld [vmem:[%s13628_s24 + $0x320] sm:$0xff] }
 0x748   : > { %10716 = vperm.xlu0 %13172, %v10674_v3   ;;  %v19944_v3 = vld [vmem:[#allocation116_spill] sm:$0xff] }
 0x749   : > { %13170 = vset.pattern.permute.xlu1 %v19854_v48  ;;  %v9400_v40 = vmul.f32 %v13457_v49, %v19944_v3 }
 0x74a   : > { %10701 = vperm.xlu1 %13170, %v10671_v59   ;;  %v19945_v59 = vld [vmem:[#allocation153_spill] sm:$0xff] }
 0x74b   : > { %v18948_v41 = vpop.permute.xlu1 %9317  ;;  %v9592_v12 = vpop.permute.xlu0 %9591  ;;  %v8862_v9 = vsub.f32 %v13458_v2, %v19945_v59  ;;  %v19946_v59 = vld [vmem:[#allocation119_spill] sm:$0xff] }
 0x74c   : > { %v9963_v4 = vadd.f32 %v9592_v12, %v9399_v47  ;;  %10689 = vrot.lane.b32.xlu0 %v10678_v51, %s13582_s13  ;;  %v13380_v12 = vpop.eup %13379 }
 0x74d   : > { %13175 = vset.pattern.permute.xlu0 %v19853_v63  ;;  %v10673_v2 = vmul.f32 %v13380_v12, %v18970_v16 }
 0x74e   : > { %10057 = vst.msk [vmem:[%s13633_s27 + $0xc0] sm:$0xff] %vm5762_vm3, %v9963_v4  ;;  %10683 = vrot.lane.b32.xlu1 %v10675_v14, %s13582_s13  ;;  %v13459_v4 = vld [vmem:[%s13628_s24 + $0x1a0] sm:$0xff] }
 0x74f   : > { %v18962_v32 = vpop.permute.xlu0 %8697  ;;  %13173 = vset.pattern.permute.xlu1 %v19853_v63  ;;  %v8863_v14 = vsub.f32 %v13459_v4, %v18358_v60  ;;  %v13461_v60 = vld [vmem:[%s19575_s3 + $0x400] sm:$0xff]  ;;  %v10677_v12 = vmul.f32 %v10673_v2, %v18870_v26  ;;  %v13464_v26 = vld [vmem:[%s13628_s24 + $0x1a8] sm:$0xff] }
 0x750   : > { %v9597_v47 = vpop.permute.xlu1 %9596  ;;  %9721 = vperm.xlu0 %13175, %v8861_v1   ;;  %v13460_v1 = vld [vmem:[%s13628_s24 + $0x1b0] sm:$0xff] }
 0x751   : > { %v9964_v51 = vadd.f32 %v9597_v47, %v9400_v40  ;;  %v8865_v40 = vsub.f32 %v13460_v1, %v18379_v7  ;;  %v13463_v7 = vld [vmem:[%s19575_s3 + $0x408] sm:$0xff]  ;;  %v19947_v1 = vld [vmem:[#allocation118_spill] sm:$0xff] }
 0x752   : > { %9726 = vperm.xlu1 %13173, %v8862_v9   ;;  %v9401_v9 = vmul.f32 %v13461_v60, %v19946_v59  ;;  %v9402_v60 = vmul.f32 %v13463_v7, %v19947_v1  ;;  %v13467_v1 = vld [vmem:[%s13628_s24 + $0x1e0] sm:$0xff] }
 0x753   : > { %10058 = vst.msk [vmem:[%s13633_s27 + $0xc8] sm:$0xff] %vm5762_vm3, %v9964_v51  ;;  %v18974_v49 = vpop.permute.xlu0 %9342 }
 0x754   : > { %v18976_v3 = vpop.permute.xlu1 %8699  ;;  %9731 = vperm.xlu0 %13175, %v8863_v14   ;;  %v13462_v14 = vld [vmem:[%s13628_s24 + $0x1c0] sm:$0xff] }
 0x756   : > { %13174 = vset.pattern.permute.xlu1 %v19854_v48  ;;  %v8867_v48 = vsub.f32 %v13462_v14, %v18401_v21  ;;  %v13466_v14 = vld [vmem:[%s13628_s24 + $0x1b8] sm:$0xff] }
 0x757   : > { %10711 = vperm.xlu1 %13174, %v10673_v2   ;;  %v19948_v2 = vld [vmem:[#allocation156_spill] sm:$0xff] }
 0x758   : > { %v18986_v47 = vpop.permute.xlu1 %9327  ;;  %v9602_v51 = vpop.permute.xlu0 %9601  ;;  %9741 = vperm.xlu0 %13175, %v8865_v40   ;;  %v8864_v21 = vsub.f32 %v13464_v26, %v19948_v2  ;;  %v8871_v26 = vsub.f32 %v13467_v1, %v18464_v19  ;;  %v13472_v1 = vld [vmem:[%s13628_s24 + $0x1d8] sm:$0xff] }
 0x759   : > { %v9965_v4 = vadd.f32 %v9602_v51, %v9401_v9  ;;  %v13465_v9 = vld [vmem:[%s13628_s24 + $0x1d0] sm:$0xff] }
 0x75a   : > { %v8869_v51 = vsub.f32 %v13465_v9, %v18441_v53  ;;  %v13468_v53 = vld [vmem:[%s19575_s3 + $0x410] sm:$0xff] }
 0x75b   : > { %10059 = vst.msk [vmem:[%s13633_s27 + $0xd0] sm:$0xff] %vm5762_vm3, %v9965_v4  ;;  %10687 = vrot.lane.b32.xlu1 %v10677_v12, %s13582_s13 }
 0x75c   : > { %v18998_v59 = vpop.permute.xlu0 %8701  ;;  %9751 = vperm.xlu0 %13175, %v8867_v48   ;;  %13176 = vset.pattern.permute.xlu1 %v19853_v63  ;;  %v19949_v48 = vld [vmem:[#allocation159_spill] sm:$0xff] }
 0x75d   : > { %v9607_v40 = vpop.permute.xlu1 %9606  ;;  %v8866_v7 = vsub.f32 %v13466_v14, %v19949_v48  ;;  %v13471_v48 = vld [vmem:[%s19575_s3 + $0x418] sm:$0xff] }
 0x75e   : > { %v9966_v4 = vadd.f32 %v9607_v40, %v9402_v60  ;;  %v19950_v60 = vld [vmem:[#allocation122_spill] sm:$0xff] }
 0x75f   : > { %9736 = vperm.xlu1 %13176, %v8864_v21   ;;  %v9403_v2 = vmul.f32 %v13468_v53, %v19950_v60  ;;  %v13469_v21 = vld [vmem:[%s13628_s24 + $0x1c8] sm:$0xff] }
 0x760   : > { %10060 = vst.msk [vmem:[%s13633_s27 + $0xd8] sm:$0xff] %vm5762_vm3, %v9966_v4  ;;  %9761 = vperm.xlu0 %13175, %v8869_v51   ;;  %v19007_v12 = vpop.permute.xlu0 %9352  ;;  %v8868_v40 = vsub.f32 %v13469_v21, %v18391_v44  ;;  %v13470_v4 = vld [vmem:[%s13628_s24 + $0x1f0] sm:$0xff] }
 0x761   : > { %v19011_v63 = vpop.permute.xlu1 %8703  ;;  %v8873_v14 = vsub.f32 %v13470_v4, %v18492_v17  ;;  %v13473_v17 = vld [vmem:[%s13628_s24 + $0x200] sm:$0xff] }
 0x762   : > { %v8875_v60 = vsub.f32 %v13473_v17, %v18534_v23  ;;  %v13476_v23 = vld [vmem:[%s19575_s3 + $0x420] sm:$0xff] }
 0x763   : > { %9746 = vperm.xlu1 %13176, %v8866_v7   ;;  %v19951_v7 = vld [vmem:[#allocation120_spill] sm:$0xff] }
 0x764   : > { %9771 = vperm.xlu0 %13175, %v8871_v26   ;;  %v9404_v44 = vmul.f32 %v13471_v48, %v19951_v7  ;;  %v8870_v26 = vsub.f32 %v13472_v1, %v18413_v6  ;;  %v19952_v48 = vld [vmem:[#allocation125_spill] sm:$0xff]  ;;  %v13477_v7 = vld [vmem:[%s13628_s24 + $0x1f8] sm:$0xff]  ;;  %v13478_v1 = vld [vmem:[%s13628_s24 + $0x220] sm:$0xff] }
 0x765   : > { %v19021_v9 = vpop.permute.xlu1 %9337  ;;  %v9612_v51 = vpop.permute.xlu0 %9611 }
 0x766   : > { %v9967_v19 = vadd.f32 %v9612_v51, %v9403_v2 }
 0x767   : > { %9756 = vperm.xlu1 %13176, %v8868_v40   ;;  %v13474_v40 = vld [vmem:[%s13628_s24 + $0x1e8] sm:$0xff] }
 0x768   : > { %10061 = vst.msk [vmem:[%s13633_s27 + $0xe0] sm:$0xff] %vm5762_vm3, %v9967_v19  ;;  %9781 = vperm.xlu0 %13175, %v8873_v14   ;;  %v8872_v51 = vsub.f32 %v13474_v40, %v18455_v39  ;;  %v13475_v14 = vld [vmem:[%s13628_s24 + $0x210] sm:$0xff]  ;;  %v9405_v39 = vmul.f32 %v13476_v23, %v19952_v48  ;;  %v19953_v40 = vld [vmem:[#allocation123_spill] sm:$0xff] }
 0x769   : > { %v19033_v53 = vpop.permute.xlu0 %8705  ;;  %v8877_v6 = vsub.f32 %v13475_v14, %v18576_v61 }
 0x76a   : > { %v9617_v2 = vpop.permute.xlu1 %9616 }
 0x76b   : > { %v9968_v21 = vadd.f32 %v9617_v2, %v9404_v44  ;;  %9766 = vperm.xlu1 %13176, %v8870_v26   ;;  %v8874_v44 = vsub.f32 %v13477_v7, %v18506_v45  ;;  %v8879_v26 = vsub.f32 %v13478_v1, %v18620_v5  ;;  %v13479_v2 = vld [vmem:[%s13628_s24 + $0x208] sm:$0xff]  ;;  %v13483_v7 = vld [vmem:[%s13628_s24 + $0x240] sm:$0xff] }
 0x76c   : > { %9791 = vperm.xlu0 %13175, %v8875_v60   ;;  %v13480_v45 = vld [vmem:[%s19575_s3 + $0x428] sm:$0xff] }
 0x76d   : > { %10062 = vst.msk [vmem:[%s13633_s27 + $0xe8] sm:$0xff] %vm5762_vm3, %v9968_v21  ;;  %v19041_v4 = vpop.permute.xlu0 %9362  ;;  %v8876_v21 = vsub.f32 %v13479_v2, %v18548_v20  ;;  %v9406_v5 = vmul.f32 %v13480_v45, %v19953_v40  ;;  %v13482_v20 = vld [vmem:[%s13628_s24 + $0x218] sm:$0xff]  ;;  %v13486_v2 = vld [vmem:[%s13628_s24 + $0x250] sm:$0xff] }
 0x76e   : > { %v19045_v19 = vpop.permute.xlu1 %8707 }
 0x76f   : > { %9776 = vperm.xlu1 %13176, %v8872_v51   ;;  %v13481_v51 = vld [vmem:[%s13628_s24 + $0x230] sm:$0xff] }
 0x770   : > { %9801 = vperm.xlu0 %13175, %v8877_v6   ;;  %v8881_v14 = vsub.f32 %v13481_v51, %v18668_v50  ;;  %v13484_v50 = vld [vmem:[%s13628_s24 + $0x228] sm:$0xff]  ;;  %v13487_v51 = vld [vmem:[%s13628_s24 + $0x238] sm:$0xff] }
 0x772   : > { %v19055_v17 = vpop.permute.xlu1 %9347  ;;  %v9622_v61 = vpop.permute.xlu0 %9621 }
 0x773   : > { %v9969_v60 = vadd.f32 %v9622_v61, %v9405_v39  ;;  %9786 = vperm.xlu1 %13176, %v8874_v44   ;;  %v8878_v39 = vsub.f32 %v13482_v20, %v18590_v18  ;;  %v8883_v44 = vsub.f32 %v13483_v7, %v18716_v36  ;;  %v8880_v61 = vsub.f32 %v13484_v50, %v18633_v8  ;;  %v13485_v18 = vld [vmem:[%s19575_s3 + $0x430] sm:$0xff] }
 0x774   : > { %9811 = vperm.xlu0 %13175, %v8879_v26   ;;  %v8882_v8 = vsub.f32 %v13487_v51, %v18682_v62  ;;  %v13494_v51 = vld [vmem:[%s19575_s3 + $0x450] sm:$0xff] }
 0x775   : > { %10063 = vst.msk [vmem:[%s13633_s27 + $0xf0] sm:$0xff] %vm5762_vm3, %v9969_v60  ;;  %v19954_v60 = vld [vmem:[#allocation128_spill] sm:$0xff] }
 0x776   : > { %v19067_v6 = vpop.permute.xlu0 %8709  ;;  %v9407_v36 = vmul.f32 %v13485_v18, %v19954_v60  ;;  %v13492_v60 = vld [vmem:[%s13628_s24 + $0x270] sm:$0xff] }
 0x777   : > { %v9627_v23 = vpop.permute.xlu1 %9626  ;;  %9796 = vperm.xlu1 %13176, %v8876_v21   ;;  %v8885_v21 = vsub.f32 %v13486_v2, %v18754_v0  ;;  %v13489_v0 = vld [vmem:[%s19575_s3 + $0x438] sm:$0xff] }
 0x778   : > { %v9970_v48 = vadd.f32 %v9627_v23, %v9406_v5  ;;  %9821 = vperm.xlu0 %13175, %v8881_v14   ;;  %v13488_v14 = vld [vmem:[%s13628_s24 + $0x260] sm:$0xff] }
 0x779   : > { %v8887_v23 = vsub.f32 %v13488_v14, %v18802_v30  ;;  %v13491_v30 = vld [vmem:[%s19575_s3 + $0x440] sm:$0xff] }
 0x77a   : > { %10064 = vst.msk [vmem:[%s13633_s27 + $0xf8] sm:$0xff] %vm5762_vm3, %v9970_v48  ;;  %v19075_v1 = vpop.permute.xlu0 %9372  ;;  %v19955_v48 = vld [vmem:[#allocation126_spill] sm:$0xff]  ;;  %v13495_v14 = vld [vmem:[%s13628_s24 + $0x280] sm:$0xff] }
 0x77b   : > { %v19077_v26 = vpop.permute.xlu1 %8711  ;;  %9806 = vperm.xlu1 %13176, %v8878_v39   ;;  %v9408_v20 = vmul.f32 %v13489_v0, %v19955_v48 }
 0x77c   : > { %9831 = vperm.xlu0 %13175, %v8883_v44   ;;  %v13490_v44 = vld [vmem:[%s13628_s24 + $0x248] sm:$0xff] }
 0x77d   : > { %v8884_v62 = vsub.f32 %v13490_v44, %v18729_v35  ;;  %v13493_v35 = vld [vmem:[%s13628_s24 + $0x258] sm:$0xff]  ;;  %v13497_v44 = vld [vmem:[%s19575_s3 + $0x460] sm:$0xff] }
 0x77f   : > { %v19087_v45 = vpop.permute.xlu1 %9357  ;;  %v9632_v40 = vpop.permute.xlu0 %9631  ;;  %9816 = vperm.xlu1 %13176, %v8880_v61   ;;  %v19956_v61 = vld [vmem:[#allocation131_spill] sm:$0xff] }
 0x780   : > { %v9971_v5 = vadd.f32 %v9632_v40, %v9407_v36  ;;  %9841 = vperm.xlu0 %13175, %v8885_v21   ;;  %v9409_v18 = vmul.f32 %v13491_v30, %v19956_v61  ;;  %v8889_v36 = vsub.f32 %v13492_v60, %v18844_v31 }
 0x782   : > { %10065 = vst.msk [vmem:[%s13633_s27 + $0x100] sm:$0xff] %vm5762_vm3, %v9971_v5  ;;  %v8886_v5 = vsub.f32 %v13493_v35, %v18770_v22  ;;  %v13496_v22 = vld [vmem:[%s13628_s24 + $0x268] sm:$0xff] }
 0x783   : > { %v19099_v39 = vpop.permute.xlu0 %8713  ;;  %9826 = vperm.xlu1 %13176, %v8882_v8   ;;  %v19957_v8 = vld [vmem:[#allocation134_spill] sm:$0xff] }
 0x784   : > { %v9637_v7 = vpop.permute.xlu1 %9636  ;;  %9851 = vperm.xlu0 %13175, %v8887_v23   ;;  %v9411_v31 = vmul.f32 %v13494_v51, %v19957_v8  ;;  %v8891_v23 = vsub.f32 %v13495_v14, %v18886_v24  ;;  %v19960_v14 = vld [vmem:[#allocation133_spill] sm:$0xff] }
 0x785   : > { %v9972_v50 = vadd.f32 %v9637_v7, %v9408_v20  ;;  %v8888_v7 = vsub.f32 %v13496_v22, %v18812_v58  ;;  %v19959_v58 = vld [vmem:[#allocation129_spill] sm:$0xff] }
 0x787   : > { %10066 = vst.msk [vmem:[%s13633_s27 + $0x108] sm:$0xff] %vm5762_vm3, %v9972_v50  ;;  %v9642_v2 = vpop.permute.xlu0 %9641  ;;  %9836 = vperm.xlu1 %13176, %v8884_v62   ;;  %v19958_v62 = vld [vmem:[#allocation137_spill] sm:$0xff]  ;;  %v13498_v50 = vld [vmem:[%s13628_s24 + $0x290] sm:$0xff] }
 0x788   : > { %v9973_v21 = vadd.f32 %v9642_v2, %v9409_v18  ;;  %v19111_v40 = vpop.permute.xlu1 %8715  ;;  %9861 = vperm.xlu0 %13175, %v8889_v36   ;;  %v9413_v24 = vmul.f32 %v13497_v44, %v19958_v62  ;;  %v8893_v30 = vsub.f32 %v13498_v50, %v18923_v29  ;;  %v13499_v18 = vld [vmem:[%s19575_s3 + $0x448] sm:$0xff]  ;;  %v13500_v2 = vld [vmem:[%s13628_s24 + $0x278] sm:$0xff]  ;;  %v13501_v29 = vld [vmem:[%s13628_s24 + $0x2a0] sm:$0xff] }
 0x789   : > { %v9410_v60 = vmul.f32 %v13499_v18, %v19959_v58  ;;  %v13505_v62 = vld [vmem:[%s19575_s3 + $0x468] sm:$0xff]  ;;  %v13507_v58 = vld [vmem:[%s19575_s3 + $0x470] sm:$0xff] }
 0x78a   : > { %10067 = vst.msk [vmem:[%s13633_s27 + $0x110] sm:$0xff] %vm5762_vm3, %v9973_v21  ;;  %v8890_v21 = vsub.f32 %v13500_v2, %v18857_v56  ;;  %v13503_v56 = vld [vmem:[%s13628_s24 + $0x288] sm:$0xff] }
 0x78b   : > { %v9652_v0 = vpop.permute.xlu0 %9651  ;;  %9846 = vperm.xlu1 %13176, %v8886_v5   ;;  %v8895_v5 = vsub.f32 %v13501_v29, %v18962_v32  ;;  %v13509_v29 = vld [vmem:[%s13628_s24 + $0x2b8] sm:$0xff] }
 0x78c   : > { %v9975_v48 = vadd.f32 %v9652_v0, %v9411_v31  ;;  %v19123_v20 = vpop.permute.xlu1 %9367  ;;  %9871 = vperm.xlu0 %13175, %v8891_v23   ;;  %v13502_v31 = vld [vmem:[%s19575_s3 + $0x458] sm:$0xff]  ;;  %v8892_v0 = vsub.f32 %v13503_v56, %v18898_v27  ;;  %v13511_v56 = vld [vmem:[%s13628_s24 + $0x2c8] sm:$0xff] }
 0x78d   : > { %v9412_v23 = vmul.f32 %v13502_v31, %v19960_v14  ;;  %v13506_v27 = vld [vmem:[%s13628_s24 + $0x298] sm:$0xff]  ;;  %v19963_v31 = vld [vmem:[#allocation138_spill] sm:$0xff] }
 0x78e   : > { %10069 = vst.msk [vmem:[%s13633_s27 + $0x120] sm:$0xff] %vm5762_vm3, %v9975_v48  ;;  %v13504_v48 = vld [vmem:[%s13628_s24 + $0x2b0] sm:$0xff] }
 0x78f   : > { %v9662_v61 = vpop.permute.xlu0 %9661  ;;  %9856 = vperm.xlu1 %13176, %v8888_v7   ;;  %v8897_v22 = vsub.f32 %v13504_v48, %v18998_v59 }
 0x790   : > { %v9977_v36 = vadd.f32 %v9662_v61, %v9413_v24  ;;  %9881 = vperm.xlu0 %13175, %v8893_v30   ;;  %v19961_v24 = vld [vmem:[#allocation135_spill] sm:$0xff]  ;;  %v8894_v30 = vsub.f32 %v13506_v27, %v18938_v37  ;;  %v8899_v61 = vsub.f32 %v18611_v11, %v19033_v53  ;;  %v8901_v11 = vsub.f32 %v18657_v43, %v19067_v6  ;;  %v13514_v27 = vld [vmem:[%s19575_s3 + $0x490] sm:$0xff] }
 0x791   : > { %v9647_v35 = vpop.permute.xlu1 %9646  ;;  %v9414_v50 = vmul.f32 %v13505_v62, %v19961_v24  ;;  %v8903_v43 = vsub.f32 %v18704_v38, %v19099_v39  ;;  %v19964_v38 = vld [vmem:[#allocation143_spill] sm:$0xff] }
 0x792   : > { %10071 = vst.msk [vmem:[%s13633_s27 + $0x130] sm:$0xff] %vm5762_vm3, %v9977_v36  ;;  %v9974_v51 = vadd.f32 %v9647_v35, %v9410_v60  ;;  %v19962_v60 = vld [vmem:[#allocation140_spill] sm:$0xff] }
 0x793   : > { %v10372_v8 = vpop.permute.xlu0 %10371  ;;  %9866 = vperm.xlu1 %13176, %v8890_v21   ;;  %v9415_v36 = vmul.f32 %v13507_v58, %v19962_v60  ;;  %v13508_v21 = vld [vmem:[%s13628_s24 + $0x2a8] sm:$0xff]  ;;  %v13515_v58 = vld [vmem:[%s19575_s3 + $0x4a0] sm:$0xff] }
 0x794   : > { %10068 = vst.msk [vmem:[%s13633_s27 + $0x118] sm:$0xff] %vm5762_vm3, %v9974_v51  ;;  %9891 = vperm.xlu0 %13175, %v8895_v5   ;;  %v8896_v37 = vsub.f32 %v13508_v21, %v18976_v3  ;;  %v8898_v5 = vsub.f32 %v13509_v29, %v19011_v63  ;;  %v13510_v3 = vld [vmem:[%s19575_s3 + $0x478] sm:$0xff]  ;;  %v10382_v63 = vsub.f32 %v18758_v28, %v10372_v8  ;;  %v13513_v28 = vld [vmem:[%s19575_s3 + $0x488] sm:$0xff]  ;;  %v19967_v60 = vld [vmem:[#allocation148_spill] sm:$0xff] }
 0x795   : > { %v9657_v32 = vpop.permute.xlu1 %9656  ;;  %v9416_v14 = vmul.f32 %v13510_v3, %v19963_v31  ;;  %v19965_v8 = vld [vmem:[#allocation141_spill] sm:$0xff]  ;;  %v13516_v29 = vld [vmem:[%s19575_s3 + $0x498] sm:$0xff] }
 0x796   : > { %v9976_v7 = vadd.f32 %v9657_v32, %v9412_v23  ;;  %v9418_v62 = vmul.f32 %v13513_v28, %v19965_v8 }
 0x797   : > { %v19155_v44 = vpop.permute.xlu0 %10387  ;;  %9876 = vperm.xlu1 %13176, %v8892_v0   ;;  %v8900_v0 = vsub.f32 %v13511_v56, %v19045_v19 }
 0x798   : > { %10070 = vst.msk [vmem:[%s13633_s27 + $0x128] sm:$0xff] %vm5762_vm3, %v9976_v7  ;;  %9901 = vperm.xlu0 %13175, %v8897_v22   ;;  %v13512_v22 = vld [vmem:[%s19575_s3 + $0x480] sm:$0xff]  ;;  %v8902_v7 = vsub.f32 %v18641_v25, %v19077_v26  ;;  %v8904_v26 = vsub.f32 %v18688_v57, %v19111_v40 }
 0x799   : > { %v9667_v59 = vpop.permute.xlu1 %9666  ;;  %v9417_v39 = vmul.f32 %v13512_v22, %v19964_v38  ;;  %v13519_v38 = vld [vmem:[%s19575_s3 + $0x4b8] sm:$0xff] }
 0x79a   : > { %v9978_v18 = vadd.f32 %v9667_v59, %v9414_v50 }
 0x79b   : > { %9886 = vperm.xlu1 %13176, %v8894_v30   ;;  %v19966_v30 = vld [vmem:[#allocation146_spill] sm:$0xff] }
 0x79c   : > { %10072 = vst.msk [vmem:[%s13633_s27 + $0x138] sm:$0xff] %vm5762_vm3, %v9978_v18  ;;  %v9672_v2 = vpop.permute.xlu0 %9671  ;;  %9911 = vperm.xlu0 %13175, %v8899_v61   ;;  %v9419_v59 = vmul.f32 %v13514_v27, %v19966_v30  ;;  %v13520_v30 = vld [vmem:[%s19575_s3 + $0x4c0] sm:$0xff] }
 0x79d   : > { %v9979_v35 = vadd.f32 %v9672_v2, %v9415_v36  ;;  %v9421_v36 = vmul.f32 %v13515_v58, %v19967_v60  ;;  %v19973_v58 = vld [vmem:[#allocation152_spill] sm:$0xff] }
 0x79e   : > { %v19177_v53 = vpop.permute.xlu1 %10392 }
 0x79f   : > { %10073 = vst.msk [vmem:[%s13633_s27 + $0x140] sm:$0xff] %vm5762_vm3, %v9979_v35  ;;  %9896 = vperm.xlu1 %13176, %v8896_v37  }
 0x7a0   : > { %9921 = vperm.xlu0 %13175, %v8901_v11  }
 0x7a1   : > { %v19183_v51 = vpop.permute.xlu0 %10402 }
 0x7a3   : > { %v9677_v6 = vpop.permute.xlu1 %9676  ;;  %9906 = vperm.xlu1 %13176, %v8898_v5   ;;  %v19968_v5 = vld [vmem:[#allocation144_spill] sm:$0xff] }
 0x7a4   : > { %v9980_v23 = vadd.f32 %v9677_v6, %v9416_v14  ;;  %9931 = vperm.xlu0 %13175, %v8903_v43   ;;  %v9420_v3 = vmul.f32 %v13516_v29, %v19968_v5  ;;  %v13517_v6 = vld [vmem:[%s19575_s3 + $0x4a8] sm:$0xff]  ;;  %v13523_v29 = vld [vmem:[%s19575_s3 + $0x4e0] sm:$0xff] }
 0x7a5   : > { %v10376_v32 = vpop.permute.xlu0 %10375  ;;  %v19975_v5 = vld [vmem:[#allocation160_spill] sm:$0xff] }
 0x7a6   : > { %10074 = vst.msk [vmem:[%s13633_s27 + $0x148] sm:$0xff] %vm5762_vm3, %v9980_v23  ;;  %v10384_v35 = vsub.f32 %v18816_v13, %v10376_v32  ;;  %v19969_v13 = vld [vmem:[#allocation147_spill] sm:$0xff] }
 0x7a7   : > { %v10370_v48 = vpop.permute.xlu1 %10369  ;;  %9916 = vperm.xlu1 %13176, %v8900_v0   ;;  %v9422_v23 = vmul.f32 %v13517_v6, %v19969_v13  ;;  %v13518_v0 = vld [vmem:[%s19575_s3 + $0x4b0] sm:$0xff]  ;;  %v19970_v32 = vld [vmem:[#allocation151_spill] sm:$0xff] }
 0x7a8   : > { %10416 = vperm.xlu0 %13175, %v10382_v63   ;;  %v10381_v21 = vsub.f32 %v18787_v10, %v10370_v48  ;;  %v19976_v6 = vld [vmem:[#allocation162_spill] sm:$0xff] }
 0x7a9   : > { %v9682_v19 = vpop.permute.xlu0 %9681 }
 0x7aa   : > { %v9981_v24 = vadd.f32 %v9682_v19, %v9417_v39  ;;  %v19971_v39 = vld [vmem:[#allocation149_spill] sm:$0xff] }
 0x7ab   : > { %v9687_v50 = vpop.permute.xlu1 %9686  ;;  %9926 = vperm.xlu1 %13176, %v8902_v7   ;;  %v9424_v7 = vmul.f32 %v13519_v38, %v19971_v39  ;;  %v19978_v38 = vld [vmem:[#allocation164_spill] sm:$0xff] }
 0x7ac   : > { %10075 = vst.msk [vmem:[%s13633_s27 + $0x150] sm:$0xff] %vm5762_vm3, %v9981_v24  ;;  %v9982_v25 = vadd.f32 %v9687_v50, %v9418_v62 }
 0x7ad   : > { %v9692_v61 = vpop.permute.xlu0 %9691 }
 0x7ae   : > { %10076 = vst.msk [vmem:[%s13633_s27 + $0x158] sm:$0xff] %vm5762_vm3, %v9982_v25  ;;  %v9983_v18 = vadd.f32 %v9692_v61, %v9419_v59  ;;  %v19972_v59 = vld [vmem:[#allocation154_spill] sm:$0xff] }
 0x7af   : > { %9936 = vperm.xlu1 %13176, %v8904_v26   ;;  %v9425_v25 = vmul.f32 %v13520_v30, %v19972_v59  ;;  %v19980_v30 = vld [vmem:[#allocation166_spill] sm:$0xff] }
 0x7b0   : > { %10077 = vst.msk [vmem:[%s13633_s27 + $0x160] sm:$0xff] %vm5762_vm3, %v9983_v18  ;;  %v19222_v2 = vpop.permute.xlu1 %10397  ;;  %v13521_v18 = vld [vmem:[%s19575_s3 + $0x4c8] sm:$0xff] }
 0x7b1   : > { %v9702_v37 = vpop.permute.xlu0 %9701  ;;  %v9426_v60 = vmul.f32 %v13521_v18, %v19973_v58  ;;  %v13529_v58 = vld [vmem:[%s19575_s3 + $0x4f8] sm:$0xff] }
 0x7b2   : > { %v9985_v57 = vadd.f32 %v9702_v37, %v9421_v36  ;;  %v19974_v37 = vld [vmem:[#allocation157_spill] sm:$0xff] }
 0x7b3   : > { %10411 = vperm.xlu1 %13176, %v10381_v21   ;;  %v13522_v21 = vld [vmem:[%s19575_s3 + $0x4d0] sm:$0xff] }
 0x7b4   : > { %10079 = vst.msk [vmem:[%s13633_s27 + $0x170] sm:$0xff] %vm5762_vm3, %v9985_v57  ;;  %v10374_v40 = vpop.permute.xlu1 %10373  ;;  %v9427_v57 = vmul.f32 %v13522_v21, %v19974_v37  ;;  %v19982_v21 = vld [vmem:[#allocation169_spill] sm:$0xff] }
 0x7b5   : > { %v10383_v10 = vsub.f32 %v18868_v42, %v10374_v40  ;;  %v9423_v42 = vmul.f32 %v13518_v0, %v19970_v32 }
 0x7b6   : > { %v19228_v11 = vpop.permute.xlu0 %10706 }
 0x7b7   : > { %10426 = vperm.xlu1 %13176, %v10384_v35  }
 0x7b8   : > { %v9697_v31 = vpop.permute.xlu1 %9696 }
 0x7b9   : > { %v9984_v14 = vadd.f32 %v9697_v31, %v9420_v3  ;;  %v9429_v3 = vmul.f32 %v13523_v29, %v19975_v5  ;;  %v13531_v29 = vld [vmem:[%s19575_s3 + $0x508] sm:$0xff]  ;;  %v19983_v5 = vld [vmem:[#allocation163_spill] sm:$0xff] }
 0x7ba   : > { %v10686_v43 = vpop.permute.xlu0 %10685 }
 0x7bb   : > { %10078 = vst.msk [vmem:[%s13633_s27 + $0x168] sm:$0xff] %vm5762_vm3, %v9984_v14  ;;  %10421 = vperm.xlu1 %13176, %v10383_v10   ;;  %v10696_v63 = vsub.f32 %v18889_v33, %v10686_v43  ;;  %v13524_v43 = vld [vmem:[%s19575_s3 + $0x4f0] sm:$0xff] }
 0x7bc   : > { %v9707_v56 = vpop.permute.xlu1 %9706  ;;  %v9431_v13 = vmul.f32 %v13524_v43, %v19976_v6 }
 0x7bd   : > { %v9986_v48 = vadd.f32 %v9707_v56, %v9422_v23 }
 0x7be   : > { %v9712_v22 = vpop.permute.xlu0 %9711 }
 0x7bf   : > { %10080 = vst.msk [vmem:[%s13633_s27 + $0x178] sm:$0xff] %vm5762_vm3, %v9986_v48  ;;  %v9987_v19 = vadd.f32 %v9712_v22, %v9423_v42  ;;  %10730 = vperm.xlu1 %13176, %v10696_v63   ;;  %v13525_v42 = vld [vmem:[%s19575_s3 + $0x4d8] sm:$0xff]  ;;  %v13526_v22 = vld [vmem:[%s19575_s3 + $0x500] sm:$0xff] }
 0x7c0   : > { %v9717_v28 = vpop.permute.xlu1 %9716  ;;  %v19977_v63 = vld [vmem:[#allocation155_spill] sm:$0xff]  ;;  %v9433_v39 = vmul.f32 %v13526_v22, %v19978_v38 }
 0x7c1   : > { %10081 = vst.msk [vmem:[%s13633_s27 + $0x180] sm:$0xff] %vm5762_vm3, %v9987_v19  ;;  %v9988_v8 = vadd.f32 %v9717_v28, %v9424_v7  ;;  %v9428_v48 = vmul.f32 %v13525_v42, %v19977_v63  ;;  %v13534_v63 = vld [vmem:[%s19575_s3 + $0x540] sm:$0xff] }
 0x7c3   : > { %10082 = vst.msk [vmem:[%s13633_s27 + $0x188] sm:$0xff] %vm5762_vm3, %v9988_v8  ;;  %v19256_v62 = vpop.permute.xlu0 %10716  ;;  %v13527_v8 = vld [vmem:[%s19575_s3 + $0x4e8] sm:$0xff] }
 0x7c5   : > { %v19258_v33 = vpop.permute.xlu1 %10701 }
 0x7c7   : > { %v10690_v24 = vpop.permute.xlu0 %10689 }
 0x7c8   : > { %v10698_v50 = vsub.f32 %v18928_v52, %v10690_v24  ;;  %v19979_v24 = vld [vmem:[#allocation158_spill] sm:$0xff] }
 0x7c9   : > { %v10684_v27 = vpop.permute.xlu1 %10683 }
 0x7ca   : > { %v10695_v26 = vsub.f32 %v18931_v54, %v10684_v27  ;;  %10740 = vperm.xlu1 %13176, %v10698_v50   ;;  %v9430_v50 = vmul.f32 %v13527_v8, %v19979_v24  ;;  %v13528_v27 = vld [vmem:[%s19575_s3 + $0x510] sm:$0xff] }
 0x7cb   : > { %v9722_v61 = vpop.permute.xlu0 %9721  ;;  %v9435_v59 = vmul.f32 %v13528_v27, %v19980_v30  ;;  %v13536_v24 = vld [vmem:[%s19575_s3 + $0x550] sm:$0xff] }
 0x7cc   : > { %v9989_v52 = vadd.f32 %v9722_v61, %v9425_v25  ;;  %10725 = vperm.xlu0 %13175, %v10695_v26  }
 0x7cd   : > { %v9727_v36 = vpop.permute.xlu1 %9726 }
 0x7ce   : > { %10083 = vst.msk [vmem:[%s13633_s27 + $0x190] sm:$0xff] %vm5762_vm3, %v9989_v52  ;;  %v9990_v54 = vadd.f32 %v9727_v36, %v9426_v60  ;;  %v19981_v60 = vld [vmem:[#allocation161_spill] sm:$0xff]  ;;  %v13530_v36 = vld [vmem:[%s19575_s3 + $0x520] sm:$0xff] }
 0x7cf   : > { %v9732_v40 = vpop.permute.xlu0 %9731  ;;  %v9432_v52 = vmul.f32 %v13529_v58, %v19981_v60  ;;  %v9437_v37 = vmul.f32 %v13530_v36, %v19982_v21  ;;  %v13538_v60 = vld [vmem:[%s19575_s3 + $0x560] sm:$0xff] }
 0x7d0   : > { %10084 = vst.msk [vmem:[%s13633_s27 + $0x198] sm:$0xff] %vm5762_vm3, %v9990_v54  ;;  %v9991_v35 = vadd.f32 %v9732_v40, %v9427_v57 }
 0x7d2   : > { %10085 = vst.msk [vmem:[%s13633_s27 + $0x1a0] sm:$0xff] %vm5762_vm3, %v9991_v35  ;;  %v19284_v31 = vpop.permute.xlu1 %10711 }
 0x7d3   : > { %v9742_v10 = vpop.permute.xlu0 %9741 }
 0x7d4   : > { %v9993_v14 = vadd.f32 %v9742_v10, %v9429_v3  ;;  %v9434_v3 = vmul.f32 %v13531_v29, %v19983_v5  ;;  %v13532_v10 = vld [vmem:[%s19575_s3 + $0x530] sm:$0xff] }
 0x7d5   : > { %v13540_v5 = vld [vmem:[%s19575_s3 + $0x570] sm:$0xff] }
 0x7d6   : > { %10087 = vst.msk [vmem:[%s13633_s27 + $0x1b0] sm:$0xff] %vm5762_vm3, %v9993_v14  ;;  %v10688_v23 = vpop.permute.xlu1 %10687  ;;  %v19984_v14 = vld [vmem:[#allocation171_spill] sm:$0xff] }
 0x7d7   : > { %v10697_v56 = vsub.f32 %v18970_v16, %v10688_v23  ;;  %v9752_v0 = vpop.permute.xlu0 %9751  ;;  %v9439_v43 = vmul.f32 %v13532_v10, %v19984_v14 }
 0x7d8   : > { %v9995_v32 = vadd.f32 %v9752_v0, %v9431_v13  ;;  %v13533_v0 = vld [vmem:[%s19575_s3 + $0x518] sm:$0xff] }
 0x7d9   : > { %10735 = vperm.xlu0 %13175, %v10697_v56  }
 0x7da   : > { %10089 = vst.msk [vmem:[%s13633_s27 + $0x1c0] sm:$0xff] %vm5762_vm3, %v9995_v32  ;;  %v9737_v7 = vpop.permute.xlu1 %9736  ;;  %v19985_v32 = vld [vmem:[#allocation165_spill] sm:$0xff] }
 0x7db   : > { %v9992_v16 = vadd.f32 %v9737_v7, %v9428_v48  ;;  %v9762_v19 = vpop.permute.xlu0 %9761  ;;  %v9436_v42 = vmul.f32 %v13533_v0, %v19985_v32  ;;  %v19986_v48 = vld [vmem:[#allocation101_spill] sm:$0xff]  ;;  %v13542_v32 = vld [vmem:[%s19575_s3 + $0x580] sm:$0xff] }
 0x7dc   : > { %v9997_v28 = vadd.f32 %v9762_v19, %v9433_v39  ;;  %v9441_v22 = vmul.f32 %v13534_v63, %v19986_v48  ;;  %v13535_v19 = vld [vmem:[%s19575_s3 + $0x528] sm:$0xff] }
 0x7dd   : > { %10086 = vst.msk [vmem:[%s13633_s27 + $0x1a8] sm:$0xff] %vm5762_vm3, %v9992_v16 }
 0x7de   : > { %10091 = vst.msk [vmem:[%s13633_s27 + $0x1d0] sm:$0xff] %vm5762_vm3, %v9997_v28  ;;  %v9747_v25 = vpop.permute.xlu1 %9746  ;;  %v19987_v28 = vld [vmem:[#allocation167_spill] sm:$0xff] }
 0x7df   : > { %v9994_v26 = vadd.f32 %v9747_v25, %v9430_v50  ;;  %v9772_v61 = vpop.permute.xlu0 %9771  ;;  %v9438_v8 = vmul.f32 %v13535_v19, %v19987_v28  ;;  %v19988_v50 = vld [vmem:[#allocation121_spill] sm:$0xff]  ;;  %v13544_v28 = vld [vmem:[%s19575_s3 + $0x590] sm:$0xff] }
 0x7e0   : > { %v9999_v18 = vadd.f32 %v9772_v61, %v9435_v59  ;;  %v9443_v27 = vmul.f32 %v13536_v24, %v19988_v50  ;;  %v13537_v61 = vld [vmem:[%s19575_s3 + $0x538] sm:$0xff] }
 0x7e1   : > { %10088 = vst.msk [vmem:[%s13633_s27 + $0x1b8] sm:$0xff] %vm5762_vm3, %v9994_v26 }
 0x7e2   : > { %10093 = vst.msk [vmem:[%s13633_s27 + $0x1e0] sm:$0xff] %vm5762_vm3, %v9999_v18  ;;  %v9757_v57 = vpop.permute.xlu1 %9756  ;;  %v19989_v18 = vld [vmem:[#allocation168_spill] sm:$0xff] }
 0x7e3   : > { %v9996_v54 = vadd.f32 %v9757_v57, %v9432_v52  ;;  %v9782_v40 = vpop.permute.xlu0 %9781  ;;  %v9440_v58 = vmul.f32 %v13537_v61, %v19989_v18  ;;  %v19990_v52 = vld [vmem:[#allocation102_spill] sm:$0xff]  ;;  %v13546_v18 = vld [vmem:[%s19575_s3 + $0x5a0] sm:$0xff] }
 0x7e4   : > { %v10001_v35 = vadd.f32 %v9782_v40, %v9437_v37  ;;  %v9445_v36 = vmul.f32 %v13538_v60, %v19990_v52  ;;  %v13539_v40 = vld [vmem:[%s19575_s3 + $0x548] sm:$0xff] }
 0x7e5   : > { %10090 = vst.msk [vmem:[%s13633_s27 + $0x1c8] sm:$0xff] %vm5762_vm3, %v9996_v54 }
 0x7e6   : > { %10095 = vst.msk [vmem:[%s13633_s27 + $0x1f0] sm:$0xff] %vm5762_vm3, %v10001_v35  ;;  %v9767_v6 = vpop.permute.xlu1 %9766  ;;  %v19991_v35 = vld [vmem:[#allocation170_spill] sm:$0xff] }
 0x7e7   : > { %v9998_v13 = vadd.f32 %v9767_v6, %v9434_v3  ;;  %v9792_v23 = vpop.permute.xlu0 %9791  ;;  %v9442_v29 = vmul.f32 %v13539_v40, %v19991_v35  ;;  %v19992_v3 = vld [vmem:[#allocation105_spill] sm:$0xff] }
 0x7e8   : > { %v10003_v56 = vadd.f32 %v9792_v23, %v9439_v43  ;;  %v9447_v10 = vmul.f32 %v13540_v5, %v19992_v3  ;;  %v13541_v23 = vld [vmem:[%s19575_s3 + $0x558] sm:$0xff] }
 0x7e9   : > { %10092 = vst.msk [vmem:[%s13633_s27 + $0x1d8] sm:$0xff] %vm5762_vm3, %v9998_v13 }
 0x7ea   : > { %10097 = vst.msk [vmem:[%s13633_s27 + $0x200] sm:$0xff] %vm5762_vm3, %v10003_v56  ;;  %v9777_v38 = vpop.permute.xlu1 %9776  ;;  %v19993_v56 = vld [vmem:[#allocation172_spill] sm:$0xff] }
 0x7eb   : > { %v10000_v39 = vadd.f32 %v9777_v38, %v9436_v42  ;;  %v9802_v7 = vpop.permute.xlu0 %9801  ;;  %v9444_v0 = vmul.f32 %v13541_v23, %v19993_v56  ;;  %v19994_v42 = vld [vmem:[#allocation127_spill] sm:$0xff] }
 0x7ec   : > { %v10005_v16 = vadd.f32 %v9802_v7, %v9441_v22  ;;  %v9449_v63 = vmul.f32 %v13542_v32, %v19994_v42  ;;  %v13543_v7 = vld [vmem:[%s19575_s3 + $0x568] sm:$0xff]  ;;  %v20000_v42 = vld [vmem:[#allocation107_spill] sm:$0xff] }
 0x7ed   : > { %10094 = vst.msk [vmem:[%s13633_s27 + $0x1e8] sm:$0xff] %vm5762_vm3, %v10000_v39  ;;  %v13551_v32 = vld [vmem:[%s19575_s3 + $0x5a8] sm:$0xff] }
 0x7ee   : > { %10099 = vst.msk [vmem:[%s13633_s27 + $0x210] sm:$0xff] %vm5762_vm3, %v10005_v16  ;;  %v9787_v30 = vpop.permute.xlu1 %9786  ;;  %v19995_v16 = vld [vmem:[#allocation100_spill] sm:$0xff] }
 0x7ef   : > { %v10002_v59 = vadd.f32 %v9787_v30, %v9438_v8  ;;  %v9812_v25 = vpop.permute.xlu0 %9811  ;;  %v9446_v19 = vmul.f32 %v13543_v7, %v19995_v16  ;;  %v19996_v8 = vld [vmem:[#allocation132_spill] sm:$0xff]  ;;  %v13553_v16 = vld [vmem:[%s19575_s3 + $0x5b8] sm:$0xff] }
 0x7f0   : > { %v10007_v26 = vadd.f32 %v9812_v25, %v9443_v27  ;;  %v9451_v24 = vmul.f32 %v13544_v28, %v19996_v8  ;;  %v13545_v25 = vld [vmem:[%s19575_s3 + $0x578] sm:$0xff] }
 0x7f1   : > { %10096 = vst.msk [vmem:[%s13633_s27 + $0x1f8] sm:$0xff] %vm5762_vm3, %v10002_v59 }
 0x7f2   : > { %10101 = vst.msk [vmem:[%s13633_s27 + $0x220] sm:$0xff] %vm5762_vm3, %v10007_v26  ;;  %v9797_v21 = vpop.permute.xlu1 %9796  ;;  %v19997_v26 = vld [vmem:[#allocation103_spill] sm:$0xff] }
 0x7f3   : > { %v10004_v37 = vadd.f32 %v9797_v21, %v9440_v58  ;;  %v9822_v57 = vpop.permute.xlu0 %9821  ;;  %v9448_v61 = vmul.f32 %v13545_v25, %v19997_v26  ;;  %v9453_v58 = vmul.f32 %v13546_v18, %v18872_v34  ;;  %v13548_v34 = vld [vmem:[%s19575_s3 + $0x5b0] sm:$0xff] }
 0x7f4   : > { %v10009_v54 = vadd.f32 %v9822_v57, %v9445_v36  ;;  %v19998_v57 = vld [vmem:[#allocation124_spill] sm:$0xff]  ;;  %v9455_v40 = vmul.f32 %v13548_v34, %v18909_v55 }
 0x7f5   : > { %10098 = vst.msk [vmem:[%s13633_s27 + $0x208] sm:$0xff] %vm5762_vm3, %v10004_v37  ;;  %v13547_v37 = vld [vmem:[%s19575_s3 + $0x588] sm:$0xff]  ;;  %v13550_v55 = vld [vmem:[%s19575_s3 + $0x5c0] sm:$0xff] }
 0x7f6   : > { %10103 = vst.msk [vmem:[%s13633_s27 + $0x230] sm:$0xff] %vm5762_vm3, %v10009_v54  ;;  %v9807_v14 = vpop.permute.xlu1 %9806  ;;  %v9450_v54 = vmul.f32 %v13547_v37, %v19998_v57 }
 0x7f7   : > { %v10006_v43 = vadd.f32 %v9807_v14, %v9442_v29  ;;  %v9832_v6 = vpop.permute.xlu0 %9831  ;;  %v19999_v14 = vld [vmem:[#allocation104_spill] sm:$0xff] }
 0x7f8   : > { %v10011_v13 = vadd.f32 %v9832_v6, %v9447_v10  ;;  %v13549_v10 = vld [vmem:[%s19575_s3 + $0x598] sm:$0xff]  ;;  %v9457_v6 = vmul.f32 %v13550_v55, %v18948_v41  ;;  %v13552_v41 = vld [vmem:[%s19575_s3 + $0x5d0] sm:$0xff] }
 0x7f9   : > { %10100 = vst.msk [vmem:[%s13633_s27 + $0x218] sm:$0xff] %vm5762_vm3, %v10006_v43  ;;  %v9452_v43 = vmul.f32 %v13549_v10, %v19999_v14  ;;  %v20002_v14 = vld [vmem:[#allocation97_spill] sm:$0xff] }
 0x7fa   : > { %10105 = vst.msk [vmem:[%s13633_s27 + $0x240] sm:$0xff] %vm5762_vm3, %v10011_v13  ;;  %v9817_v48 = vpop.permute.xlu1 %9816 }
 0x7fb   : > { %v10008_v22 = vadd.f32 %v9817_v48, %v9444_v0  ;;  %v9842_v38 = vpop.permute.xlu0 %9841  ;;  %v9459_v48 = vmul.f32 %v13552_v41, %v18986_v47  ;;  %v13554_v47 = vld [vmem:[%s19575_s3 + $0x5e0] sm:$0xff] }
 0x7fc   : > { %v10013_v39 = vadd.f32 %v9842_v38, %v9449_v63  ;;  %v9454_v63 = vmul.f32 %v13551_v32, %v20000_v42  ;;  %v9461_v8 = vmul.f32 %v13554_v47, %v19021_v9  ;;  %v13556_v9 = vld [vmem:[%s19575_s3 + $0x5f0] sm:$0xff]  ;;  %v20003_v41 = vld [vmem:[#allocation96_spill] sm:$0xff]  ;;  %v13564_v47 = vld [vmem:[%s19576_s4 + $0x8] sm:$0xff] }
 0x7fd   : > { %10102 = vst.msk [vmem:[%s13633_s27 + $0x228] sm:$0xff] %vm5762_vm3, %v10008_v22  ;;  %v9463_v26 = vmul.f32 %v13556_v9, %v19055_v17  ;;  %v13558_v17 = vld [vmem:[%s19575_s3 + $0x600] sm:$0xff] }
 0x7fe   : > { %10107 = vst.msk [vmem:[%s13633_s27 + $0x250] sm:$0xff] %vm5762_vm3, %v10013_v39  ;;  %v9827_v50 = vpop.permute.xlu1 %9826 }
 0x7ff   : > { %v10010_v27 = vadd.f32 %v9827_v50, %v9446_v19  ;;  %v9852_v30 = vpop.permute.xlu0 %9851  ;;  %v20001_v19 = vld [vmem:[#allocation106_spill] sm:$0xff] }
 0x800   : > { %v10015_v59 = vadd.f32 %v9852_v30, %v9451_v24  ;;  %v9456_v28 = vmul.f32 %v13553_v16, %v20001_v19  ;;  %v20005_v16 = vld [vmem:[#allocation98_spill] sm:$0xff] }
 0x801   : > { %10104 = vst.msk [vmem:[%s13633_s27 + $0x238] sm:$0xff] %vm5762_vm3, %v10010_v27  ;;  %v10407_v19 = vmul.f32 %v19222_v2, %v20005_v16  ;;  %v13565_v2 = vld [vmem:[%s19576_s4 + $0x18] sm:$0xff] }
 0x802   : > { %10109 = vst.msk [vmem:[%s13633_s27 + $0x260] sm:$0xff] %vm5762_vm3, %v10015_v59  ;;  %v9837_v60 = vpop.permute.xlu1 %9836  ;;  %v13555_v59 = vld [vmem:[%s19575_s3 + $0x5c8] sm:$0xff] }
 0x803   : > { %v10012_v52 = vadd.f32 %v9837_v60, %v9448_v61  ;;  %v9862_v36 = vpop.permute.xlu0 %9861  ;;  %v9458_v25 = vmul.f32 %v13555_v59, %v18895_v15  ;;  %v13557_v15 = vld [vmem:[%s19575_s3 + $0x5d8] sm:$0xff] }
 0x804   : > { %v10017_v21 = vadd.f32 %v9862_v36, %v9453_v58  ;;  %v9465_v36 = vmul.f32 %v13558_v17, %v19087_v45  ;;  %v13560_v45 = vld [vmem:[%s19575_s3 + $0x610] sm:$0xff] }
 0x805   : > { %10106 = vst.msk [vmem:[%s13633_s27 + $0x248] sm:$0xff] %vm5762_vm3, %v10012_v52  ;;  %v9460_v52 = vmul.f32 %v13557_v15, %v18935_v46  ;;  %v13559_v46 = vld [vmem:[%s19575_s3 + $0x5e8] sm:$0xff] }
 0x806   : > { %10111 = vst.msk [vmem:[%s13633_s27 + $0x270] sm:$0xff] %vm5762_vm3, %v10017_v21  ;;  %v9847_v35 = vpop.permute.xlu1 %9846  ;;  %v9462_v34 = vmul.f32 %v13559_v46, %v18974_v49  ;;  %v13561_v49 = vld [vmem:[%s19575_s3 + $0x5f8] sm:$0xff] }
 0x807   : > { %v10014_v29 = vadd.f32 %v9847_v35, %v9450_v54  ;;  %v9872_v5 = vpop.permute.xlu0 %9871  ;;  %v9464_v10 = vmul.f32 %v13561_v49, %v19007_v12 }
 0x808   : > { %v10019_v3 = vadd.f32 %v9872_v5, %v9455_v40  ;;  %v9467_v40 = vmul.f32 %v13560_v45, %v19123_v20  ;;  %v10406_v20 = vmul.f32 %v19177_v53, %v20002_v14 }
 0x809   : > { %10108 = vst.msk [vmem:[%s13633_s27 + $0x258] sm:$0xff] %vm5762_vm3, %v10014_v29 }
 0x80a   : > { %10113 = vst.msk [vmem:[%s13633_s27 + $0x280] sm:$0xff] %vm5762_vm3, %v10019_v3  ;;  %v9857_v13 = vpop.permute.xlu1 %9856 }
 0x80b   : > { %v10016_v23 = vadd.f32 %v9857_v13, %v9452_v43  ;;  %v9882_v56 = vpop.permute.xlu0 %9881 }
 0x80c   : > { %v10021_v0 = vadd.f32 %v9882_v56, %v9457_v6 }
 0x80d   : > { %10110 = vst.msk [vmem:[%s13633_s27 + $0x268] sm:$0xff] %vm5762_vm3, %v10016_v23  ;;  %v13562_v23 = vld [vmem:[%s19575_s3 + $0x608] sm:$0xff] }
 0x80e   : > { %10115 = vst.msk [vmem:[%s13633_s27 + $0x290] sm:$0xff] %vm5762_vm3, %v10021_v0  ;;  %v9867_v22 = vpop.permute.xlu1 %9866  ;;  %v9466_v12 = vmul.f32 %v13562_v23, %v19041_v4  ;;  %v13563_v0 = vld [vmem:[%s19575_s3 + $0x618] sm:$0xff]  ;;  %v10405_v4 = vmul.f32 %v19155_v44, %v20003_v41 }
 0x80f   : > { %v10018_v38 = vadd.f32 %v9867_v22, %v9454_v63  ;;  %v9892_v39 = vpop.permute.xlu0 %9891  ;;  %v9468_v32 = vmul.f32 %v13563_v0, %v19075_v1 }
 0x810   : > { %v10023_v7 = vadd.f32 %v9892_v39, %v9459_v48 }
 0x811   : > { %10112 = vst.msk [vmem:[%s13633_s27 + $0x278] sm:$0xff] %vm5762_vm3, %v10018_v38  ;;  %v20004_v38 = vld [vmem:[#allocation99_spill] sm:$0xff] }
 0x812   : > { %10117 = vst.msk [vmem:[%s13633_s27 + $0x2a0] sm:$0xff] %vm5762_vm3, %v10023_v7  ;;  %v9877_v24 = vpop.permute.xlu1 %9876  ;;  %v10408_v39 = vmul.f32 %v19183_v51, %v20004_v38 }
 0x813   : > { %v10020_v50 = vadd.f32 %v9877_v24, %v9456_v28  ;;  %v9902_v27 = vpop.permute.xlu0 %9901 }
 0x814   : > { %v10025_v30 = vadd.f32 %v9902_v27, %v9461_v8  ;;  %v10720_v8 = vmul.f32 %v13564_v47, %v19228_v11 }
 0x815   : > { %10114 = vst.msk [vmem:[%s13633_s27 + $0x288] sm:$0xff] %vm5762_vm3, %v10020_v50  ;;  %v10722_v50 = vmul.f32 %v13565_v2, %v19256_v62 }
 0x816   : > { %10119 = vst.msk [vmem:[%s13633_s27 + $0x2b0] sm:$0xff] %vm5762_vm3, %v10025_v30  ;;  %v9887_v61 = vpop.permute.xlu1 %9886  ;;  %v13566_v30 = vld [vmem:[%s19576_s4] sm:$0xff] }
 0x817   : > { %v10022_v18 = vadd.f32 %v9887_v61, %v9458_v25  ;;  %v9912_v58 = vpop.permute.xlu0 %9911  ;;  %v10719_v11 = vmul.f32 %v13566_v30, %v19258_v33 }
 0x818   : > { %v10027_v60 = vadd.f32 %v9912_v58, %v9463_v26  ;;  %v13567_v26 = vld [vmem:[%s19576_s4 + $0x10] sm:$0xff] }
 0x819   : > { %10116 = vst.msk [vmem:[%s13633_s27 + $0x298] sm:$0xff] %vm5762_vm3, %v10022_v18  ;;  %v10721_v62 = vmul.f32 %v13567_v26, %v19284_v31 }
 0x81a   : > { %10121 = vst.msk [vmem:[%s13633_s27 + $0x2c0] sm:$0xff] %vm5762_vm3, %v10027_v60  ;;  %v9897_v21 = vpop.permute.xlu1 %9896 }
 0x81b   : > { %v10024_v37 = vadd.f32 %v9897_v21, %v9460_v52  ;;  %v9922_v57 = vpop.permute.xlu0 %9921 }
 0x81c   : > { %v10029_v54 = vadd.f32 %v9922_v57, %v9465_v36 }
 0x81d   : > { %10118 = vst.msk [vmem:[%s13633_s27 + $0x2a8] sm:$0xff] %vm5762_vm3, %v10024_v37 }
 0x81e   : > { %10123 = vst.msk [vmem:[%s13633_s27 + $0x2d0] sm:$0xff] %vm5762_vm3, %v10029_v54  ;;  %v9907_v35 = vpop.permute.xlu1 %9906 }
 0x81f   : > { %v10026_v29 = vadd.f32 %v9907_v35, %v9462_v34  ;;  %v9932_v5 = vpop.permute.xlu0 %9931 }
 0x820   : > { %v10031_v3 = vadd.f32 %v9932_v5, %v9467_v40 }
 0x821   : > { %10120 = vst.msk [vmem:[%s13633_s27 + $0x2b8] sm:$0xff] %vm5762_vm3, %v10026_v29 }
 0x822   : > { %10125 = vst.msk [vmem:[%s13633_s27 + $0x2e0] sm:$0xff] %vm5762_vm3, %v10031_v3  ;;  %v9917_v43 = vpop.permute.xlu1 %9916 }
 0x823   : > { %v10028_v55 = vadd.f32 %v9917_v43, %v9464_v10  ;;  %v10417_v6 = vpop.permute.xlu0 %10416 }
 0x824   : > { %v10430_v13 = vadd.f32 %v10417_v6, %v10406_v20 }
 0x825   : > { %10122 = vst.msk [vmem:[%s13633_s27 + $0x2c8] sm:$0xff] %vm5762_vm3, %v10028_v55 }
 0x826   : > { %10434 = vst.msk [vmem:[%s13633_s27 + $0x2f8] sm:$0xff] %vm5762_vm3, %v10430_v13  ;;  %v9927_v56 = vpop.permute.xlu1 %9926 }
 0x827   : > { %v10030_v53 = vadd.f32 %v9927_v56, %v9466_v12 }
 0x829   : > { %10124 = vst.msk [vmem:[%s13633_s27 + $0x2d8] sm:$0xff] %vm5762_vm3, %v10030_v53 }
 0x82a   : > { %v9937_v42 = vpop.permute.xlu1 %9936 }
 0x82b   : > { %v10032_v63 = vadd.f32 %v9937_v42, %v9468_v32 }
 0x82d   : > { %10126 = vst.msk [vmem:[%s13633_s27 + $0x2e8] sm:$0xff] %vm5762_vm3, %v10032_v63 }
 0x82e   : > { %v10412_v48 = vpop.permute.xlu1 %10411 }
 0x82f   : > { %v10429_v22 = vadd.f32 %v10412_v48, %v10405_v4 }
 0x831   : > { %10433 = vst.msk [vmem:[%s13633_s27 + $0x2f0] sm:$0xff] %vm5762_vm3, %v10429_v22 }
 0x832   : > { %v10427_v7 = vpop.permute.xlu1 %10426 }
 0x833   : > { %v10432_v1 = vadd.f32 %v10427_v7, %v10408_v39 }
 0x835   : > { %10436 = vst.msk [vmem:[%s13633_s27 + $0x308] sm:$0xff] %vm5762_vm3, %v10432_v1 }
 0x836   : > { %v10422_v28 = vpop.permute.xlu1 %10421 }
 0x837   : > { %v10431_v44 = vadd.f32 %v10422_v28, %v10407_v19 }
 0x839   : > { %10435 = vst.msk [vmem:[%s13633_s27 + $0x300] sm:$0xff] %vm5762_vm3, %v10431_v44 }
 0x83a   : > { %v10731_v51 = vpop.permute.xlu1 %10730 }
 0x83b   : > { %v10744_v24 = vadd.f32 %v10731_v51, %v10720_v8 }
 0x83d   : > { %10748 = vst.msk [vmem:[%s13633_s27 + $0x318] sm:$0xff] %vm5762_vm3, %v10744_v24 }
 0x845   : > { %v10741_v27 = vpop.permute.xlu1 %10740 }
 0x846   : > { %v10746_v59 = vadd.f32 %v10741_v27, %v10722_v50 }
 0x847   : > { %v10726_v25 = vpop.permute.xlu0 %10725 }
 0x848   : > { %10750 = vst.msk [vmem:[%s13633_s27 + $0x328] sm:$0xff] %vm5762_vm3, %v10746_v59  ;;  %v10743_v9 = vadd.f32 %v10726_v25, %v10719_v11 }
 0x84a   : > { %10747 = vst.msk [vmem:[%s13633_s27 + $0x310] sm:$0xff] %vm5762_vm3, %v10743_v9 }
 0x854   : > { %v10736_v61 = vpop.permute.xlu0 %10735 }
 0x855   : > { %v10745_v18 = vadd.f32 %v10736_v61, %v10721_v62 }
 0x857   : > { %10749 = vst.msk [vmem:[%s13633_s27 + $0x320] sm:$0xff] %vm5762_vm3, %v10745_v18 }
 0x858 PF: > { %s15_s18 = sadd.s32 1, %s13574_s18  }
 0x859   : > { %p12_p6 = scmp.ge.s32.totalorder %s15_s18, 4  }
 0x85b   :  { %14 = sbr.rel (!%p12_p6) target bundleno = 1 (0x1), region = 78 }

</bundles_post_ra>
